<compile_context>
chip_gen: v7x
topology: tpu7x:2x2x1
jax: 0.10.0
libtpu: 0.0.40
codegen_flags: <defaults>
</compile_context>

<pallas_src>
import jax
import jax.numpy as jnp
from jax.experimental import pallas as pl
from jax.experimental.pallas import tpu as pltpu


# Row indices inside the packed f32 "rows" slab (broadcast rows / biases).
R_LE1_W, R_LE1_B, R_SE1_B, R_PH, R_LE2_B, R_SE2_B = 0, 1, 2, 3, 4, 5
R_SB1, R_SB2, R_SB3, R_SB4 = 6, 7, 8, 9
R_LB1, R_LB2, R_LB3, R_LB4, R_COMB_B = 10, 11, 12, 13, 14
N_ROWS = 16


def masked_q_phi_x_kernel(xexp_ref, mexp_ref, m16_ref,
                          rows_ref, w_pf_ref, w_sc_ref, w_sm_ref,
                          out_ref, xemb_s):
    f32, bf16 = jnp.float32, jnp.bfloat16
    tb, DH = xexp_ref.shape            # DH = d_in * d_hid
    DE = mexp_ref.shape[1]             # DE = d_in * d_emb
    d_in = m16_ref.shape[1] // 2
    d_hid = DH // d_in
    d_emb = DE // d_in

    # Static, tile-aligned row offsets inside the packed weight slabs.
    o_comb = 0
    o_lw1 = o_comb + DE
    o_lw2 = o_lw1 + d_emb
    o_lw3 = o_lw2 + d_hid
    o_lw4 = o_lw3 + d_hid
    o_sw4 = o_lw4 + d_hid              # w_sm layout
    o_w1a = 0
    o_w1b = o_w1a + DE
    o_w2 = o_w1b + DE
    o_w3 = o_w2 + DH
    o_se1 = o_w3 + DH                  # w_sc layout

    def row(k, w):                     # one broadcast row from the f32 rows slab
        return rows_ref[k:k + 1, :w]

    def mm(a, w):                      # bf16 MXU matmul, f32 accumulation
        return jnp.dot(a.astype(bf16), w, preferred_element_type=f32)

    def relu(v):
        return jnp.maximum(v, 0.0)

    # ---- Phase 1: per-feature loc embedding (block-diag) + mask + combine ----
    # Linear(1, d_hid) per feature == lane-dense VPU FMA on the pre-expanded x.
    h = relu(xexp_ref[...] * row(R_LE1_W, DH) + row(R_LE1_B, DH))      # (TB, DH)
    emb = mm(h, w_pf_ref[0:DH, :]) + row(R_LE2_B, DE)                  # (TB, DE)
    ph = row(R_PH, DE)
    # masked_fill(m==0,0) + placeholder*(1-m)  ==  ph + m*(emb-ph) for 0/1 m
    x_emb = ph + mexp_ref[...] * (emb - ph)                            # (TB, DE)
    xemb_s[...] = x_emb                                                # one full-width store

    # combine_loc: Linear(d_in,1) across features == x_emb @ (comb_w ⊗ I_emb)
    x_comb = mm(x_emb, w_sm_ref[o_comb:o_comb + DE, :])[:, :d_emb] \
        + row(R_COMB_B, d_emb)                                         # (TB, d_emb)

    # ---- Phase 2: loc_net (small dense matmuls) -------------------------------
    a = relu(mm(x_comb, w_sm_ref[o_lw1:o_lw1 + d_emb, :]) + row(R_LB1, d_hid))
    a = relu(mm(a, w_sm_ref[o_lw2:o_lw2 + d_hid, :]) + row(R_LB2, d_hid))
    a = relu(mm(a, w_sm_ref[o_lw3:o_lw3 + d_hid, :]) + row(R_LB3, d_hid))
    # lw4 is zero-padded beyond d_out, so loc16 cols [d_in, 2*d_in) are exactly 0
    loc16 = mm(a, w_sm_ref[o_lw4:o_lw4 + d_hid, :])[:, :2 * d_in] + row(R_LB4, 2 * d_in)
    loc = loc16[:, :d_in]                                              # (TB, d_in)

    # ---- Phase 3: shapley embedding + shared-weight scale_net (block-diag) ---
    # se1 (1->d_hid per feature) folded into a (d_in, DH) block-diag matmul;
    # loc.detach() is a forward no-op.
    hs = relu(mm(loc, w_sc_ref[o_se1:o_se1 + d_in, :]) + row(R_SE1_B, DH))
    shap = mm(hs, w_pf_ref[DH:2 * DH, :]) + row(R_SE2_B, DE)           # (TB, DE)
    xe = xemb_s[...]                                                   # one full-width load
    # concat([shap, xe]) @ sw1  ==  shap @ kron(I,sw1[:d_emb]) + xe @ kron(I,sw1[d_emb:])
    g = relu(mm(shap, w_sc_ref[o_w1a:o_w1a + DE, :])
             + mm(xe, w_sc_ref[o_w1b:o_w1b + DE, :]) + row(R_SB1, DH))
    g = relu(mm(g, w_sc_ref[o_w2:o_w2 + DH, :]) + row(R_SB2, DH))
    g = relu(mm(g, w_sc_ref[o_w3:o_w3 + DH, :]) + row(R_SB3, DH))
    # final d_hid->1 projection for all features at once, placed into cols
    # [d_in, 2*d_in) by the pre-shifted kron(I, sw4) weights.
    s16 = mm(g, w_sm_ref[o_sw4:o_sw4 + DH, :])[:, :2 * d_in] + row(R_SB4, 2 * d_in)
    sp16 = jnp.maximum(s16, 0.0) + jnp.log1p(jnp.exp(-jnp.abs(s16))) + 1e-5

    # ---- single lane-dense output store ---------------------------------------
    col = jax.lax.broadcasted_iota(jnp.int32, (tb, 2 * d_in), 1)
    out_ref[...] = jnp.where(col < d_in, loc16 * m16_ref[...], sp16)


def _default_batch_tile(B):
    # v7x has 2 TensorCores/chip -> split the batch into two "parallel" grid
    # steps (one per core).  Single-TC v5e/v6e: a multi-step grid is a purely
    # sequential loop, so use a grid of 1 and save the per-step overhead.
    kind = jax.devices()[0].device_kind.lower()
    two_tc = ("v7" in kind) or ("7x" in kind)
    if two_tc and B % 2 == 0 and (B // 2) % 8 == 0:
        return B // 2
    return B


def masked_q_phi_x(x, m, kparams, batch_tile=None):
    B, d_in = x.shape
    rows, w_pf, w_sc, w_sm = (kparams["rows"], kparams["w_pf"],
                              kparams["w_sc"], kparams["w_sm"])
    DH = w_pf.shape[0] // 2            # d_in * d_hid
    DE = w_pf.shape[1]                 # d_in * d_emb
    d_hid = DH // d_in
    d_emb = DE // d_in

    if batch_tile is None:
        batch_tile = _default_batch_tile(B)
    assert B % batch_tile == 0 and batch_tile % 8 == 0

    # Lane-dense expanded inputs (cheap XLA repeats outside the kernel).
    x_exp = jnp.repeat(x, d_hid, axis=1)                   # (B, DH)
    m_exp = jnp.repeat(m, d_emb, axis=1)                   # (B, DE)
    m16 = jnp.concatenate([m, jnp.ones_like(m)], axis=1)   # (B, 2*d_in)

    def data_spec(w):
        return pl.BlockSpec((batch_tile, w), lambda i: (i, 0))

    def const_spec(p):
        return pl.BlockSpec(p.shape, lambda i: (0, 0))     # whole slab, every step

    out = pl.pallas_call(
        masked_q_phi_x_kernel,
        grid=(B // batch_tile,),
        in_specs=[data_spec(DH), data_spec(DE), data_spec(2 * d_in),
                  const_spec(rows), const_spec(w_pf),
                  const_spec(w_sc), const_spec(w_sm)],
        out_specs=pl.BlockSpec((batch_tile, 2 * d_in), lambda i: (i, 0)),
        out_shape=jax.ShapeDtypeStruct((B, 2 * d_in), jnp.float32),
        scratch_shapes=[pltpu.VMEM((batch_tile, DE), jnp.float32)],   # x_emb stage
        compiler_params=pltpu.CompilerParams(
            dimension_semantics=("parallel",),
            # footprint is ~6-8 MiB at batch_tile=512; 16 MiB leaves 2x headroom
            # while staying well under v7x's 64 MiB/TC.
            vmem_limit_bytes=16 * 1024 * 1024,
        ),
    )(x_exp, m_exp, m16, rows, w_pf, w_sc, w_sm)
    return out[:, :d_in], out[:, d_in:]


# ---------------------------------------------------------------------------
# Deterministic parameter construction (synthetic weights, no checkpoint).
# ---------------------------------------------------------------------------
def init_raw_params(key, d_in, d_hid, d_emb, d_out):
    ks = iter(jax.random.split(key, 40))

    def nrm(shape, scale=0.1):
        return scale * jax.random.normal(next(ks), shape, jnp.float32)

    p = {}
    p["placeholder"] = jax.random.normal(next(ks), (d_in, d_emb), jnp.float32)
    # masked embedding nets: per-feature 1 -> d_hid -> d_emb  (n_layers - 2 == 2)
    p["le1_w"] = nrm((d_in, d_hid)); p["le1_b"] = nrm((d_in, d_hid))
    p["le2_w"] = nrm((d_in, d_hid, d_emb)); p["le2_b"] = nrm((d_in, d_emb))
    p["se1_w"] = nrm((d_in, d_hid)); p["se1_b"] = nrm((d_in, d_hid))
    p["se2_w"] = nrm((d_in, d_hid, d_emb)); p["se2_b"] = nrm((d_in, d_emb))
    # combine_loc: Linear(d_in, 1)
    p["comb_w"] = nrm((d_in,)); p["comb_b"] = nrm(())
    # loc_net: d_emb -> d_hid -> d_hid -> d_hid -> d_out  (n_layers = 4)
    p["lw1"] = nrm((d_emb, d_hid)); p["lb1"] = nrm((d_hid,))
    p["lw2"] = nrm((d_hid, d_hid)); p["lb2"] = nrm((d_hid,))
    p["lw3"] = nrm((d_hid, d_hid)); p["lb3"] = nrm((d_hid,))
    p["lw4"] = nrm((d_hid, d_out)); p["lb4"] = nrm((d_out,))
    # scale_net (shared across features): 2*d_emb -> d_hid -> d_hid -> d_hid -> 1
    p["sw1"] = nrm((2 * d_emb, d_hid)); p["sb1"] = nrm((d_hid,))
    p["sw2"] = nrm((d_hid, d_hid)); p["sb2"] = nrm((d_hid,))
    p["sw3"] = nrm((d_hid, d_hid)); p["sb3"] = nrm((d_hid,))
    p["sw4"] = nrm((d_hid, 1)); p["sb4"] = nrm(())
    return p


def build_kernel_params(p):
    """Pack parameters into 4 kernel slabs: rows (f32), w_pf / w_sc / w_sm (bf16).

    Per-feature nets are realised as block-diagonal kron(I_d_in, W) matrices so
    the kernel runs one full-width matmul per layer instead of d_in small ones.
    """
    d_in, d_emb = p["placeholder"].shape
    d_hid = p["le1_w"].shape[1]
    DH, DE = d_in * d_hid, d_in * d_emb
    eye_i = jnp.eye(d_in, dtype=jnp.float32)
    bf = lambda a: jnp.asarray(a, jnp.bfloat16)

    def bdiag3(w):      # (d_in, k, n) -> block-diagonal (d_in*k, d_in*n)
        d, k, n = w.shape
        return (eye_i[:, None, :, None] * w[:, :, None, :]).reshape(d * k, d * n)

    # --- w_pf: per-feature d_hid -> d_emb embedding weights (loc; shapley) ---
    w_pf = bf(jnp.concatenate([bdiag3(p["le2_w"]), bdiag3(p["se2_w"])], axis=0))

    # --- w_sc: scale-net weights kron'd with I_d_in + se1 block-diag rows ----
    se1k = (eye_i[:, :, None] * p["se1_w"][None, :, :]).reshape(d_in, DH)
    se1k = jnp.pad(se1k, ((0, (-d_in) % 16), (0, 0)))       # bf16 sublane-tile pad
    w_sc = bf(jnp.concatenate([
        jnp.kron(eye_i, p["sw1"][:d_emb, :]),                # applied to shap slab
        jnp.kron(eye_i, p["sw1"][d_emb:, :]),                # applied to x_emb slab
        jnp.kron(eye_i, p["sw2"]),
        jnp.kron(eye_i, p["sw3"]),
        se1k,
    ], axis=0))                                              # (2*DE + 2*DH + 16, DH)

    # --- w_sm: small dense weights, columns zero-padded to a common width ----
    NC = max(d_hid, d_emb, 2 * d_in)
    padc = lambda w: jnp.pad(w, ((0, 0), (0, NC - w.shape[1])))
    combk = jnp.kron(p["comb_w"].reshape(d_in, 1), jnp.eye(d_emb))       # (DE, d_emb)
    # final d_hid->1 projection, pre-shifted into columns [d_in, 2*d_in)
    sw4k = jnp.concatenate(
        [jnp.zeros((DH, d_in)), jnp.kron(eye_i, p["sw4"])], axis=1)      # (DH, 2*d_in)
    w_sm = bf(jnp.concatenate([
        padc(combk), padc(p["lw1"]), padc(p["lw2"]),
        padc(p["lw3"]), padc(p["lw4"]), padc(sw4k)], axis=0))            # (496, NC)

    # --- rows: all broadcast rows / biases in one tiny f32 slab --------------
    def rowpad(v):
        v = jnp.asarray(v, jnp.float32).reshape(1, -1)
        return jnp.pad(v, ((0, 0), (0, DH - v.shape[1])))

    rows = jnp.concatenate([
        rowpad(p["le1_w"]),                                  # R_LE1_W
        rowpad(p["le1_b"]),                                  # R_LE1_B
        rowpad(p["se1_b"]),                                  # R_SE1_B
        rowpad(p["placeholder"]),                            # R_PH
        rowpad(p["le2_b"]),                                  # R_LE2_B
        rowpad(p["se2_b"]),                                  # R_SE2_B
        rowpad(jnp.tile(p["sb1"], d_in)),                    # R_SB1
        rowpad(jnp.tile(p["sb2"], d_in)),                    # R_SB2
        rowpad(jnp.tile(p["sb3"], d_in)),                    # R_SB3
        rowpad(jnp.concatenate([jnp.zeros((d_in,)),
                                jnp.full((d_in,), p["sb4"])])),  # R_SB4 (shifted)
        rowpad(p["lb1"]), rowpad(p["lb2"]),
        rowpad(p["lb3"]), rowpad(p["lb4"]),                  # R_LB1..R_LB4
        rowpad(jnp.full((d_emb,), p["comb_b"])),             # R_COMB_B
        jnp.zeros((N_ROWS - 15, DH), jnp.float32),           # pad to N_ROWS
    ], axis=0)

    return dict(rows=rows, w_pf=w_pf, w_sc=w_sc, w_sm=w_sm)


# Pure-JAX reference (per-feature 3-D formulation) used only for verification.
def reference_forward(x, m, p):
    relu = lambda v: jnp.maximum(v, 0.0)
    h = relu(x[:, :, None] * p["le1_w"][None] + p["le1_b"][None])
    emb = jnp.einsum("bif,ife->bie", h, p["le2_w"]) + p["le2_b"][None]
    m3 = m[:, :, None]
    x_emb = jnp.where(m3 == 0.0, 0.0, emb) + p["placeholder"][None] * (1.0 - m3)
    x_comb = jnp.einsum("bie,i->be", x_emb, p["comb_w"]) + p["comb_b"]
    a = relu(x_comb @ p["lw1"] + p["lb1"])
    a = relu(a @ p["lw2"] + p["lb2"])
    a = relu(a @ p["lw3"] + p["lb3"])
    loc = a @ p["lw4"] + p["lb4"]
    hs = relu(loc[:, :, None] * p["se1_w"][None] + p["se1_b"][None])
    shap = jnp.einsum("bif,ife->bie", hs, p["se2_w"]) + p["se2_b"][None]
    z = jnp.concatenate([shap, x_emb], axis=-1)
    g = relu(jnp.einsum("bie,eh->bih", z, p["sw1"]) + p["sb1"])
    g = relu(jnp.einsum("bih,hk->bik", g, p["sw2"]) + p["sb2"])
    g = relu(jnp.einsum("bih,hk->bik", g, p["sw3"]) + p["sb3"])
    s = jnp.einsum("bih,ho->bio", g, p["sw4"])[..., 0] + p["sb4"]
    scale = jax.nn.softplus(s) + 1e-5
    return loc * m, scale


if __name__ == "__main__":
    d_in, d_hid, d_emb, n_layers = 8, 32, 16, 4
    d_out = d_in              # required for shape consistency of the PyTorch forward
    B = 512

    key = jax.random.PRNGKey(0)
    kx, km, kp = jax.random.split(key, 3)
    x = jax.random.normal(kx, (B, d_in), jnp.float32)
    m = jax.random.bernoulli(km, 0.5, (B, d_in)).astype(jnp.float32)

    raw = init_raw_params(kp, d_in, d_hid, d_emb, d_out)
    # bf16-rounded weights are treated as the model weights so the f32
    # reference and the bf16 kernel share identical parameter values (kernel
    # error is then only bf16 activation rounding inside the matmuls).
    raw = jax.tree_util.tree_map(
        lambda a: a.astype(jnp.bfloat16).astype(jnp.float32), raw)
    kparams = build_kernel_params(raw)

    loc, scale = masked_q_phi_x(x, m, kparams)
    jax.block_until_ready((loc, scale))

    ref_loc, ref_scale = reference_forward(x, m, raw)
    assert loc.shape == (B, d_in) and scale.shape == (B, d_in)
    assert jnp.allclose(loc, ref_loc, atol=2e-2, rtol=2e-2), \
        float(jnp.max(jnp.abs(loc - ref_loc)))
    assert jnp.allclose(scale, ref_scale, atol=2e-2, rtol=2e-2), \
        float(jnp.max(jnp.abs(scale - ref_scale)))
    print("KERNEL_OK")
</pallas_src>

<mosaic_0001>
module attributes {stable_mosaic.version = 11 : i64} {
  func.func @masked_q_phi_x_kernel(%arg0: i32, %arg1: memref<512x256xf32, #tpu.memory_space<vmem>>, %arg2: memref<512x128xf32, #tpu.memory_space<vmem>>, %arg3: memref<512x16xf32, #tpu.memory_space<vmem>>, %arg4: memref<16x256xf32, #tpu.memory_space<vmem>>, %arg5: memref<512x128xbf16, #tpu.memory_space<vmem>>, %arg6: memref<784x256xbf16, #tpu.memory_space<vmem>>, %arg7: memref<496x32xbf16, #tpu.memory_space<vmem>>, %arg8: memref<512x16xf32, #tpu.memory_space<vmem>>, %arg9: memref<512x128xf32, #tpu.memory_space<vmem>>) attributes {dimension_semantics = [#tpu.dimension_semantics<parallel>], iteration_bounds = array<i64: 1>, scalar_prefetch = 0 : i64, scratch_operands = 1 : i64, tpu.core_type = #tpu.core_type<tc>, window_params = [{transform_indices = @transform_0, window_bounds = array<i64: 512, 256>}, {transform_indices = @transform_1, window_bounds = array<i64: 512, 128>}, {transform_indices = @transform_2, window_bounds = array<i64: 512, 16>}, {pipeline_mode = #tpu.pipeline_mode<synchronous>, transform_indices = @transform_3, window_bounds = array<i64: 16, 256>}, {pipeline_mode = #tpu.pipeline_mode<synchronous>, transform_indices = @transform_4, window_bounds = array<i64: 512, 128>}, {pipeline_mode = #tpu.pipeline_mode<synchronous>, transform_indices = @transform_5, window_bounds = array<i64: 784, 256>}, {pipeline_mode = #tpu.pipeline_mode<synchronous>, transform_indices = @transform_6, window_bounds = array<i64: 496, 32>}, {transform_indices = @transform_7, window_bounds = array<i64: 512, 16>}]} {
    %c0 = arith.constant 0 : index
    %c0_0 = arith.constant 0 : index
    %0 = vector.load %arg1[%c0, %c0_0] : memref<512x256xf32, #tpu.memory_space<vmem>>, vector<512x256xf32>
    %c0_1 = arith.constant 0 : index
    %c0_2 = arith.constant 0 : index
    %1 = vector.load %arg4[%c0_1, %c0_2] : memref<16x256xf32, #tpu.memory_space<vmem>>, vector<1x256xf32>
    %2 = vector.broadcast %1 : vector<1x256xf32> to vector<512x256xf32>
    %3 = arith.mulf %0, %2 : vector<512x256xf32>
    %c1 = arith.constant 1 : index
    %c0_3 = arith.constant 0 : index
    %4 = vector.load %arg4[%c1, %c0_3] : memref<16x256xf32, #tpu.memory_space<vmem>>, vector<1x256xf32>
    %5 = vector.broadcast %4 : vector<1x256xf32> to vector<512x256xf32>
    %6 = arith.addf %3, %5 : vector<512x256xf32>
    %cst = arith.constant 0.000000e+00 : f32
    %7 = vector.broadcast %cst : f32 to vector<512x256xf32>
    %8 = arith.maximumf %6, %7 : vector<512x256xf32>
    %c0_4 = arith.constant 0 : index
    %c0_5 = arith.constant 0 : index
    %9 = vector.load %arg5[%c0_4, %c0_5] : memref<512x128xbf16, #tpu.memory_space<vmem>>, vector<256x128xbf16>
    %10 = arith.truncf %8 : vector<512x256xf32> to vector<512x256xbf16>
    %cst_6 = arith.constant dense<0.000000e+00> : vector<512x128xf32>
    %11 = tpu.matmul %10, %9, %cst_6 {dimension_numbers = #tpu.dot_dimension_numbers<[1], [0], [0], [1], [0, 0, 1, 1], [], []>} : vector<512x256xbf16>, vector<256x128xbf16>, vector<512x128xf32> -> vector<512x128xf32>
    %c4 = arith.constant 4 : index
    %c0_7 = arith.constant 0 : index
    %12 = vector.load %arg4[%c4, %c0_7] : memref<16x256xf32, #tpu.memory_space<vmem>>, vector<1x128xf32>
    %13 = vector.broadcast %12 : vector<1x128xf32> to vector<512x128xf32>
    %14 = arith.addf %11, %13 : vector<512x128xf32>
    %c3 = arith.constant 3 : index
    %c0_8 = arith.constant 0 : index
    %15 = vector.load %arg4[%c3, %c0_8] : memref<16x256xf32, #tpu.memory_space<vmem>>, vector<1x128xf32>
    %c0_9 = arith.constant 0 : index
    %c0_10 = arith.constant 0 : index
    %16 = vector.load %arg2[%c0_9, %c0_10] : memref<512x128xf32, #tpu.memory_space<vmem>>, vector<512x128xf32>
    %17 = vector.broadcast %15 : vector<1x128xf32> to vector<512x128xf32>
    %18 = arith.subf %14, %17 : vector<512x128xf32>
    %19 = arith.mulf %16, %18 : vector<512x128xf32>
    %20 = vector.broadcast %15 : vector<1x128xf32> to vector<512x128xf32>
    %21 = arith.addf %20, %19 : vector<512x128xf32>
    %c0_11 = arith.constant 0 : index
    %c0_12 = arith.constant 0 : index
    %22 = vector.load %arg9[%c0_11, %c0_12] : memref<512x128xf32, #tpu.memory_space<vmem>>, vector<512x128xf32>
    tpu.vector_store %arg9[%c0_11, %c0_12], %21 {strides = array<i32>} : memref<512x128xf32, #tpu.memory_space<vmem>>, vector<512x128xf32>,
    %c0_13 = arith.constant 0 : index
    %c0_14 = arith.constant 0 : index
    %23 = vector.load %arg7[%c0_13, %c0_14] : memref<496x32xbf16, #tpu.memory_space<vmem>>, vector<128x32xbf16>
    %24 = arith.truncf %21 : vector<512x128xf32> to vector<512x128xbf16>
    %cst_15 = arith.constant dense<0.000000e+00> : vector<512x32xf32>
    %25 = tpu.matmul %24, %23, %cst_15 {dimension_numbers = #tpu.dot_dimension_numbers<[1], [0], [0], [1], [0, 0, 1, 1], [], []>} : vector<512x128xbf16>, vector<128x32xbf16>, vector<512x32xf32> -> vector<512x32xf32>
    %26 = vector.extract_strided_slice %25 {offsets = [0, 0], sizes = [512, 16], strides = [1, 1]} : vector<512x32xf32> to vector<512x16xf32>
    %c14 = arith.constant 14 : index
    %c0_16 = arith.constant 0 : index
    %27 = vector.load %arg4[%c14, %c0_16] : memref<16x256xf32, #tpu.memory_space<vmem>>, vector<1x16xf32>
    %28 = vector.broadcast %27 : vector<1x16xf32> to vector<512x16xf32>
    %29 = arith.addf %26, %28 : vector<512x16xf32>
    %c128 = arith.constant 128 : index
    %c0_17 = arith.constant 0 : index
    %30 = vector.load %arg7[%c128, %c0_17] : memref<496x32xbf16, #tpu.memory_space<vmem>>, vector<16x32xbf16>
    %31 = arith.truncf %29 : vector<512x16xf32> to vector<512x16xbf16>
    %cst_18 = arith.constant dense<0.000000e+00> : vector<512x32xf32>
    %32 = tpu.matmul %31, %30, %cst_18 {dimension_numbers = #tpu.dot_dimension_numbers<[1], [0], [0], [1], [0, 0, 1, 1], [], []>} : vector<512x16xbf16>, vector<16x32xbf16>, vector<512x32xf32> -> vector<512x32xf32>
    %c10 = arith.constant 10 : index
    %c0_19 = arith.constant 0 : index
    %33 = vector.load %arg4[%c10, %c0_19] : memref<16x256xf32, #tpu.memory_space<vmem>>, vector<1x32xf32>
    %34 = vector.broadcast %33 : vector<1x32xf32> to vector<512x32xf32>
    %35 = arith.addf %32, %34 : vector<512x32xf32>
    %cst_20 = arith.constant 0.000000e+00 : f32
    %36 = vector.broadcast %cst_20 : f32 to vector<512x32xf32>
    %37 = arith.maximumf %35, %36 : vector<512x32xf32>
    %c144 = arith.constant 144 : index
    %c0_21 = arith.constant 0 : index
    %38 = vector.load %arg7[%c144, %c0_21] : memref<496x32xbf16, #tpu.memory_space<vmem>>, vector<32x32xbf16>
    %39 = arith.truncf %37 : vector<512x32xf32> to vector<512x32xbf16>
    %cst_22 = arith.constant dense<0.000000e+00> : vector<512x32xf32>
    %40 = tpu.matmul %39, %38, %cst_22 {dimension_numbers = #tpu.dot_dimension_numbers<[1], [0], [0], [1], [0, 0, 1, 1], [], []>} : vector<512x32xbf16>, vector<32x32xbf16>, vector<512x32xf32> -> vector<512x32xf32>
    %c11 = arith.constant 11 : index
    %c0_23 = arith.constant 0 : index
    %41 = vector.load %arg4[%c11, %c0_23] : memref<16x256xf32, #tpu.memory_space<vmem>>, vector<1x32xf32>
    %42 = vector.broadcast %41 : vector<1x32xf32> to vector<512x32xf32>
    %43 = arith.addf %40, %42 : vector<512x32xf32>
    %cst_24 = arith.constant 0.000000e+00 : f32
    %44 = vector.broadcast %cst_24 : f32 to vector<512x32xf32>
    %45 = arith.maximumf %43, %44 : vector<512x32xf32>
    %c176 = arith.constant 176 : index
    %c0_25 = arith.constant 0 : index
    %46 = vector.load %arg7[%c176, %c0_25] : memref<496x32xbf16, #tpu.memory_space<vmem>>, vector<32x32xbf16>
    %47 = arith.truncf %45 : vector<512x32xf32> to vector<512x32xbf16>
    %cst_26 = arith.constant dense<0.000000e+00> : vector<512x32xf32>
    %48 = tpu.matmul %47, %46, %cst_26 {dimension_numbers = #tpu.dot_dimension_numbers<[1], [0], [0], [1], [0, 0, 1, 1], [], []>} : vector<512x32xbf16>, vector<32x32xbf16>, vector<512x32xf32> -> vector<512x32xf32>
    %c12 = arith.constant 12 : index
    %c0_27 = arith.constant 0 : index
    %49 = vector.load %arg4[%c12, %c0_27] : memref<16x256xf32, #tpu.memory_space<vmem>>, vector<1x32xf32>
    %50 = vector.broadcast %49 : vector<1x32xf32> to vector<512x32xf32>
    %51 = arith.addf %48, %50 : vector<512x32xf32>
    %cst_28 = arith.constant 0.000000e+00 : f32
    %52 = vector.broadcast %cst_28 : f32 to vector<512x32xf32>
    %53 = arith.maximumf %51, %52 : vector<512x32xf32>
    %c208 = arith.constant 208 : index
    %c0_29 = arith.constant 0 : index
    %54 = vector.load %arg7[%c208, %c0_29] : memref<496x32xbf16, #tpu.memory_space<vmem>>, vector<32x32xbf16>
    %55 = arith.truncf %53 : vector<512x32xf32> to vector<512x32xbf16>
    %cst_30 = arith.constant dense<0.000000e+00> : vector<512x32xf32>
    %56 = tpu.matmul %55, %54, %cst_30 {dimension_numbers = #tpu.dot_dimension_numbers<[1], [0], [0], [1], [0, 0, 1, 1], [], []>} : vector<512x32xbf16>, vector<32x32xbf16>, vector<512x32xf32> -> vector<512x32xf32>
    %57 = vector.extract_strided_slice %56 {offsets = [0, 0], sizes = [512, 16], strides = [1, 1]} : vector<512x32xf32> to vector<512x16xf32>
    %c13 = arith.constant 13 : index
    %c0_31 = arith.constant 0 : index
    %58 = vector.load %arg4[%c13, %c0_31] : memref<16x256xf32, #tpu.memory_space<vmem>>, vector<1x16xf32>
    %59 = vector.broadcast %58 : vector<1x16xf32> to vector<512x16xf32>
    %60 = arith.addf %57, %59 : vector<512x16xf32>
    %61 = vector.extract_strided_slice %60 {offsets = [0, 0], sizes = [512, 8], strides = [1, 1]} : vector<512x16xf32> to vector<512x8xf32>
    %c768 = arith.constant 768 : index
    %c0_32 = arith.constant 0 : index
    %62 = vector.load %arg6[%c768, %c0_32] : memref<784x256xbf16, #tpu.memory_space<vmem>>, vector<8x256xbf16>
    %63 = arith.truncf %61 : vector<512x8xf32> to vector<512x8xbf16>
    %cst_33 = arith.constant dense<0.000000e+00> : vector<512x256xf32>
    %64 = tpu.matmul %63, %62, %cst_33 {dimension_numbers = #tpu.dot_dimension_numbers<[1], [0], [0], [1], [0, 0, 1, 1], [], []>} : vector<512x8xbf16>, vector<8x256xbf16>, vector<512x256xf32> -> vector<512x256xf32>
    %c2 = arith.constant 2 : index
    %c0_34 = arith.constant 0 : index
    %65 = vector.load %arg4[%c2, %c0_34] : memref<16x256xf32, #tpu.memory_space<vmem>>, vector<1x256xf32>
    %66 = vector.broadcast %65 : vector<1x256xf32> to vector<512x256xf32>
    %67 = arith.addf %64, %66 : vector<512x256xf32>
    %cst_35 = arith.constant 0.000000e+00 : f32
    %68 = vector.broadcast %cst_35 : f32 to vector<512x256xf32>
    %69 = arith.maximumf %67, %68 : vector<512x256xf32>
    %c256 = arith.constant 256 : index
    %c0_36 = arith.constant 0 : index
    %70 = vector.load %arg5[%c256, %c0_36] : memref<512x128xbf16, #tpu.memory_space<vmem>>, vector<256x128xbf16>
    %71 = arith.truncf %69 : vector<512x256xf32> to vector<512x256xbf16>
    %cst_37 = arith.constant dense<0.000000e+00> : vector<512x128xf32>
    %72 = tpu.matmul %71, %70, %cst_37 {dimension_numbers = #tpu.dot_dimension_numbers<[1], [0], [0], [1], [0, 0, 1, 1], [], []>} : vector<512x256xbf16>, vector<256x128xbf16>, vector<512x128xf32> -> vector<512x128xf32>
    %c5 = arith.constant 5 : index
    %c0_38 = arith.constant 0 : index
    %73 = vector.load %arg4[%c5, %c0_38] : memref<16x256xf32, #tpu.memory_space<vmem>>, vector<1x128xf32>
    %74 = vector.broadcast %73 : vector<1x128xf32> to vector<512x128xf32>
    %75 = arith.addf %72, %74 : vector<512x128xf32>
    %c0_39 = arith.constant 0 : index
    %c0_40 = arith.constant 0 : index
    %76 = vector.load %arg9[%c0_39, %c0_40] : memref<512x128xf32, #tpu.memory_space<vmem>>, vector<512x128xf32>
    %c0_41 = arith.constant 0 : index
    %c0_42 = arith.constant 0 : index
    %77 = vector.load %arg6[%c0_41, %c0_42] : memref<784x256xbf16, #tpu.memory_space<vmem>>, vector<128x256xbf16>
    %78 = arith.truncf %75 : vector<512x128xf32> to vector<512x128xbf16>
    %cst_43 = arith.constant dense<0.000000e+00> : vector<512x256xf32>
    %79 = tpu.matmul %78, %77, %cst_43 {dimension_numbers = #tpu.dot_dimension_numbers<[1], [0], [0], [1], [0, 0, 1, 1], [], []>} : vector<512x128xbf16>, vector<128x256xbf16>, vector<512x256xf32> -> vector<512x256xf32>
    %c128_44 = arith.constant 128 : index
    %c0_45 = arith.constant 0 : index
    %80 = vector.load %arg6[%c128_44, %c0_45] : memref<784x256xbf16, #tpu.memory_space<vmem>>, vector<128x256xbf16>
    %81 = arith.truncf %76 : vector<512x128xf32> to vector<512x128xbf16>
    %cst_46 = arith.constant dense<0.000000e+00> : vector<512x256xf32>
    %82 = tpu.matmul %81, %80, %cst_46 {dimension_numbers = #tpu.dot_dimension_numbers<[1], [0], [0], [1], [0, 0, 1, 1], [], []>} : vector<512x128xbf16>, vector<128x256xbf16>, vector<512x256xf32> -> vector<512x256xf32>
    %83 = arith.addf %79, %82 : vector<512x256xf32>
    %c6 = arith.constant 6 : index
    %c0_47 = arith.constant 0 : index
    %84 = vector.load %arg4[%c6, %c0_47] : memref<16x256xf32, #tpu.memory_space<vmem>>, vector<1x256xf32>
    %85 = vector.broadcast %84 : vector<1x256xf32> to vector<512x256xf32>
    %86 = arith.addf %83, %85 : vector<512x256xf32>
    %cst_48 = arith.constant 0.000000e+00 : f32
    %87 = vector.broadcast %cst_48 : f32 to vector<512x256xf32>
    %88 = arith.maximumf %86, %87 : vector<512x256xf32>
    %c256_49 = arith.constant 256 : index
    %c0_50 = arith.constant 0 : index
    %89 = vector.load %arg6[%c256_49, %c0_50] : memref<784x256xbf16, #tpu.memory_space<vmem>>, vector<256x256xbf16>
    %90 = arith.truncf %88 : vector<512x256xf32> to vector<512x256xbf16>
    %cst_51 = arith.constant dense<0.000000e+00> : vector<512x256xf32>
    %91 = tpu.matmul %90, %89, %cst_51 {dimension_numbers = #tpu.dot_dimension_numbers<[1], [0], [0], [1], [0, 0, 1, 1], [], []>} : vector<512x256xbf16>, vector<256x256xbf16>, vector<512x256xf32> -> vector<512x256xf32>
    %c7 = arith.constant 7 : index
    %c0_52 = arith.constant 0 : index
    %92 = vector.load %arg4[%c7, %c0_52] : memref<16x256xf32, #tpu.memory_space<vmem>>, vector<1x256xf32>
    %93 = vector.broadcast %92 : vector<1x256xf32> to vector<512x256xf32>
    %94 = arith.addf %91, %93 : vector<512x256xf32>
    %cst_53 = arith.constant 0.000000e+00 : f32
    %95 = vector.broadcast %cst_53 : f32 to vector<512x256xf32>
    %96 = arith.maximumf %94, %95 : vector<512x256xf32>
    %c512 = arith.constant 512 : index
    %c0_54 = arith.constant 0 : index
    %97 = vector.load %arg6[%c512, %c0_54] : memref<784x256xbf16, #tpu.memory_space<vmem>>, vector<256x256xbf16>
    %98 = arith.truncf %96 : vector<512x256xf32> to vector<512x256xbf16>
    %cst_55 = arith.constant dense<0.000000e+00> : vector<512x256xf32>
    %99 = tpu.matmul %98, %97, %cst_55 {dimension_numbers = #tpu.dot_dimension_numbers<[1], [0], [0], [1], [0, 0, 1, 1], [], []>} : vector<512x256xbf16>, vector<256x256xbf16>, vector<512x256xf32> -> vector<512x256xf32>
    %c8 = arith.constant 8 : index
    %c0_56 = arith.constant 0 : index
    %100 = vector.load %arg4[%c8, %c0_56] : memref<16x256xf32, #tpu.memory_space<vmem>>, vector<1x256xf32>
    %101 = vector.broadcast %100 : vector<1x256xf32> to vector<512x256xf32>
    %102 = arith.addf %99, %101 : vector<512x256xf32>
    %cst_57 = arith.constant 0.000000e+00 : f32
    %103 = vector.broadcast %cst_57 : f32 to vector<512x256xf32>
    %104 = arith.maximumf %102, %103 : vector<512x256xf32>
    %c240 = arith.constant 240 : index
    %c0_58 = arith.constant 0 : index
    %105 = vector.load %arg7[%c240, %c0_58] : memref<496x32xbf16, #tpu.memory_space<vmem>>, vector<256x32xbf16>
    %106 = arith.truncf %104 : vector<512x256xf32> to vector<512x256xbf16>
    %cst_59 = arith.constant dense<0.000000e+00> : vector<512x32xf32>
    %107 = tpu.matmul %106, %105, %cst_59 {dimension_numbers = #tpu.dot_dimension_numbers<[1], [0], [0], [1], [0, 0, 1, 1], [], []>} : vector<512x256xbf16>, vector<256x32xbf16>, vector<512x32xf32> -> vector<512x32xf32>
    %108 = vector.extract_strided_slice %107 {offsets = [0, 0], sizes = [512, 16], strides = [1, 1]} : vector<512x32xf32> to vector<512x16xf32>
    %c9 = arith.constant 9 : index
    %c0_60 = arith.constant 0 : index
    %109 = vector.load %arg4[%c9, %c0_60] : memref<16x256xf32, #tpu.memory_space<vmem>>, vector<1x16xf32>
    %110 = vector.broadcast %109 : vector<1x16xf32> to vector<512x16xf32>
    %111 = arith.addf %108, %110 : vector<512x16xf32>
    %cst_61 = arith.constant 0.000000e+00 : f32
    %112 = vector.broadcast %cst_61 : f32 to vector<512x16xf32>
    %113 = arith.maximumf %111, %112 : vector<512x16xf32>
    %114 = math.absf %111 : vector<512x16xf32>
    %cst_62 = arith.constant 0.000000e+00 : f32
    %115 = vector.broadcast %cst_62 : f32 to vector<512x16xf32>
    %116 = arith.subf %115, %114 : vector<512x16xf32>
    %117 = math.exp %116 : vector<512x16xf32>
    %118 = math.log1p %117 : vector<512x16xf32>
    %119 = arith.addf %113, %118 : vector<512x16xf32>
    %cst_63 = arith.constant 9.99999974E-6 : f32
    %120 = vector.broadcast %cst_63 : f32 to vector<512x16xf32>
    %121 = arith.addf %119, %120 : vector<512x16xf32>
    %122 = tpu.iota {dimensions = array<i32: 1>} : vector<512x16xi32>
    %c8_i32 = arith.constant 8 : i32
    %123 = vector.broadcast %c8_i32 : i32 to vector<512x16xi32>
    %124 = arith.cmpi slt, %122, %123 : vector<512x16xi32>
    %c0_64 = arith.constant 0 : index
    %c0_65 = arith.constant 0 : index
    %125 = vector.load %arg3[%c0_64, %c0_65] : memref<512x16xf32, #tpu.memory_space<vmem>>, vector<512x16xf32>
    %126 = arith.mulf %60, %125 : vector<512x16xf32>
    %127 = arith.select %124, %126, %121 : vector<512x16xi1>, vector<512x16xf32>
    %c0_66 = arith.constant 0 : index
    %c0_67 = arith.constant 0 : index
    %128 = vector.load %arg8[%c0_66, %c0_67] : memref<512x16xf32, #tpu.memory_space<vmem>>, vector<512x16xf32>
    tpu.vector_store %arg8[%c0_66, %c0_67], %127 {strides = array<i32>} : memref<512x16xf32, #tpu.memory_space<vmem>>, vector<512x16xf32>,
    return
  }
  func.func @transform_0(%arg0: i32) -> (i32, i32) {
    %c0_i32 = arith.constant 0 : i32
    %c0_i32_0 = arith.constant 0 : i32
    return %arg0, %c0_i32 : i32, i32
  }
  func.func @transform_1(%arg0: i32) -> (i32, i32) {
    %c0_i32 = arith.constant 0 : i32
    %c0_i32_0 = arith.constant 0 : i32
    return %arg0, %c0_i32 : i32, i32
  }
  func.func @transform_2(%arg0: i32) -> (i32, i32) {
    %c0_i32 = arith.constant 0 : i32
    %c0_i32_0 = arith.constant 0 : i32
    return %arg0, %c0_i32 : i32, i32
  }
  func.func @transform_3(%arg0: i32) -> (i32, i32) {
    %c0_i32 = arith.constant 0 : i32
    %c0_i32_0 = arith.constant 0 : i32
    %c0_i32_1 = arith.constant 0 : i32
    return %c0_i32, %c0_i32_0 : i32, i32
  }
  func.func @transform_4(%arg0: i32) -> (i32, i32) {
    %c0_i32 = arith.constant 0 : i32
    %c0_i32_0 = arith.constant 0 : i32
    %c0_i32_1 = arith.constant 0 : i32
    return %c0_i32, %c0_i32_0 : i32, i32
  }
  func.func @transform_5(%arg0: i32) -> (i32, i32) {
    %c0_i32 = arith.constant 0 : i32
    %c0_i32_0 = arith.constant 0 : i32
    %c0_i32_1 = arith.constant 0 : i32
    return %c0_i32, %c0_i32_0 : i32, i32
  }
  func.func @transform_6(%arg0: i32) -> (i32, i32) {
    %c0_i32 = arith.constant 0 : i32
    %c0_i32_0 = arith.constant 0 : i32
    %c0_i32_1 = arith.constant 0 : i32
    return %c0_i32, %c0_i32_0 : i32, i32
  }
  func.func @transform_7(%arg0: i32) -> (i32, i32) {
    %c0_i32 = arith.constant 0 : i32
    %c0_i32_0 = arith.constant 0 : i32
    return %arg0, %c0_i32 : i32, i32
  }
}

</mosaic_0001>

<bundles_post_ra>
// kernel: tpu_custom_call.1
= control target key start
LH: loop header
LB: loop body
LE: loop exit
PB: predicated region body
PF: predicated region fallthrough
CT: control target
= control target key end

     0   :  { %12 = vsyncpa [#allocation4], 0  ;;  %s16046_s0 = inlined_call_operand.hbm [shape: f32[512,256], index: 0, kind: input, shape index: {}]   ;;  %s16047_s1 = inlined_call_operand.hbm [shape: f32[512,128], index: 1, kind: input, shape index: {}]   ;;  %s16048_s2 = inlined_call_operand.vmem [shape: f32[512,16], index: 2, kind: input, shape index: {}]   ;;  %s16049_s3 = inlined_call_operand.vmem [shape: f32[16,256], index: 3, kind: input, shape index: {}]   ;;  %s16050_s4 = inlined_call_operand.hbm [shape: bf16[512,128], index: 4, kind: input, shape index: {}]   ;;  %s16051_s5 = inlined_call_operand.vmem [shape: bf16[784,256], index: 5, kind: input, shape index: {}]   ;;  %s16052_s6 = inlined_call_operand.vmem [shape: bf16[496,32], index: 6, kind: input, shape index: {}]   ;;  %s16053_s7 = inlined_call_operand.vmem [shape: f32[512,16], index: 7, kind: output, shape index: {}]  }
   0x1   :  { %13 = vsyncpa [#allocation6], 0  ;;  %s11125_s24 = smov [#allocation5]   ;;  %s11055_s28 = scalar_lea.hbm %s16047_s1, 8192 }
   0x2   :  { %s31_s25 = sshll.u32 %s11125_s24, 4  ;;  %p11056_p0 = scmp.ne.s32.totalorder %s16047_s1, %s11055_s28  ;;  %s32_s25 = int_to_ptr.vmem [resolvable:$true] %s31_s25 }
   0x3   :  { %p11059_p1 = scmp.lt.u32.totalorder %s11055_s28, %s16047_s1 }
   0x5   :  { %p11061_p2 = pnand %p11059_p1, %p11056_p0 }
   0x7   :  { %11064 = shalt.err (!%p11061_p2)
}
   0x8   :  { %s11065_s10 = scalar_lea.vmem %s32_s25, 8192  ;;  %p11070_p4 = scmp.lt.s32.totalorder %s32_s25, %s32_s25 }
   0x9   :  { %p11066_p3 = scmp.ne.s32.totalorder %s32_s25, %s11065_s10  ;;  %p11071_p5 = scmp.lt.s32.totalorder %s11065_s10, %s11065_s10 }
   0xb   :  { %p11072_p6 = por %p11071_p5, %p11070_p4 }
   0xd   :  { %p11073_p7 = pnand %p11072_p6, %p11066_p3 }
   0xf   :  { %11076 = shalt.err (!%p11073_p7)
}
  0x10   :  { %s11126_s11 = smov 128   ;;  %s11127_s12 = smov 8  }
  0x11   :  { %37 = dma.hbm_to_vmem [thread:$0]  %s16047_s1, 8192, %s32_s25, [#allocation6], %s11126_s11, %s11126_s11, %s11127_s12  }
  0x12   :  { %s11128_s15 = smov [#allocation3]   ;;  %s11077_s19 = scalar_lea.hbm %s16046_s0, 16384 }
  0x13   :  { %s19_s16 = sshll.u32 %s11128_s15, 4  ;;  %p11078_p8 = scmp.ne.s32.totalorder %s16046_s0, %s11077_s19  ;;  %s20_s16 = int_to_ptr.vmem [resolvable:$true] %s19_s16 }
  0x14   :  { %p11081_p9 = scmp.lt.u32.totalorder %s11077_s19, %s16046_s0 }
  0x16   :  { %p11083_p10 = pnand %p11081_p9, %p11078_p8 }
  0x18   :  { %11086 = shalt.err (!%p11083_p10)
}
  0x19   :  { %s11087_s24 = scalar_lea.vmem %s20_s16, 16384  ;;  %p11092_p12 = scmp.lt.s32.totalorder %s20_s16, %s20_s16 }
  0x1a   :  { %p11088_p11 = scmp.ne.s32.totalorder %s20_s16, %s11087_s24  ;;  %p11093_p13 = scmp.lt.s32.totalorder %s11087_s24, %s11087_s24 }
  0x1c   :  { %p11094_p0 = por %p11093_p13, %p11092_p12 }
  0x1e   :  { %p11095_p1 = pnand %p11094_p0, %p11088_p11 }
  0x20   :  { %11098 = shalt.err (!%p11095_p1)
}
  0x21   :  { %s11129_s1 = smov 256   ;;  %s11130_s25 = smov 16  }
  0x22   :  { %25 = dma.hbm_to_vmem [thread:$0]  %s16046_s0, 16384, %s20_s16, [#allocation4], %s11129_s1, %s11129_s1, %s11130_s25  }
  0x23   :  { %s11131_s28 = smov [#allocation7]   ;;  %s11099_s9 = scalar_lea.hbm %s16050_s4, 4096 }
  0x24   :  { %s47_s29 = sshll.u32 %s11131_s28, 4  ;;  %p11100_p2 = scmp.ne.s32.totalorder %s16050_s4, %s11099_s9  ;;  %s48_s29 = int_to_ptr.vmem [resolvable:$true] %s47_s29 }
  0x25   :  { %p11103_p3 = scmp.lt.u32.totalorder %s11099_s9, %s16050_s4 }
  0x27   :  { %p11105_p4 = pnand %p11103_p3, %p11100_p2 }
  0x29   :  { %11108 = shalt.err (!%p11105_p4)
}
  0x2a   :  { %s11109_s14 = scalar_lea.vmem %s48_s29, 4096  ;;  %p11114_p6 = scmp.lt.s32.totalorder %s48_s29, %s48_s29 }
  0x2b   :  { %p11110_p5 = scmp.ne.s32.totalorder %s48_s29, %s11109_s14  ;;  %p11115_p7 = scmp.lt.s32.totalorder %s11109_s14, %s11109_s14 }
  0x2d   :  { %p11116_p8 = por %p11115_p7, %p11114_p6 }
  0x2f   :  { %p11117_p9 = pnand %p11116_p8, %p11110_p5 }
  0x31   :  { %11120 = shalt.err (!%p11117_p9)
}
  0x32   :  { %s11132_s0 = smov 64   ;;  %s11133_s15 = smov 4  }
  0x33   :  { %53 = dma.hbm_to_vmem [thread:$0]  %s16050_s4, 4096, %s48_s29, [#allocation6], %s11132_s0, %s11132_s0, %s11133_s15  }
  0x34   :  { %11121 = dma.done.wait [#allocation4], 16384  }
  0x35   :  { %11122 = vsyncadd [#allocation4], 4294950912 }
  0x36   :  { %11123 = dma.done.wait [#allocation6], 12288  }
  0x37   :  { %11124 = vsyncadd [#allocation6], 4294955008  ;;  %v16099_v0 = vmov 0   ;;  %v10586_v1 = vld [vmem:[#allocation7] sm:$0xff]   ;;  %v10587_v2 = vld [vmem:[#allocation7 + $0x8] sm:$0xff]   ;;  %v16054_v3 = vlaneseq  ;;  %vm1899_vm0 = vcmask 130048  }
  0x38   :  { %798 = vmatprep.subr.bf16.mxu0 %v16099_v0  ;;  %v10588_v4 = vld [vmem:[#allocation7 + $0x10] sm:$0xff]   ;;  %v10589_v6 = vld [vmem:[#allocation7 + $0x18] sm:$0xff]   ;;  %v10590_v8 = vld [vmem:[#allocation7 + $0x20] sm:$0xff]   ;;  %vm2398_vm1 = vcmask 261120   ;;  %vm3992_vm2 = vcmask 1043456   ;;  %vm3895_vm3 = vcmask 64512  }
  0x39   :  { %799 = vmatpush1.bf16.msra.mxu0 %v10586_v1  ;;  %v199_v5 = vshrl.u32 %v16054_v3, 7  ;;  %v69_v9 = vld [vmem:[#allocation3 + $0x8] sm:$0xff]  ;;  %v71_v10 = vld [vmem:[#allocation3 + $0x18] sm:$0xff]  ;;  %v10592_v20 = vld [vmem:[#allocation7 + $0x30] sm:$0xff]  }
  0x3a   :  { %800 = vmatprep.subr.bf16.mxu0 %v16099_v0  ;;  %v196_v11 = vld [vmem:[%s16049_s3] ss:$8 sm:$0x3]  ;;  %v9592_v13 = vld [vmem:[%s16049_s3 + $0x1] ss:$8 sm:$0x3] }
  0x3b   :  { %v11216_v7 = vsub.s32 1, %v199_v5  ;;  %v10591_v14 = vld [vmem:[#allocation7 + $0x28] sm:$0xff]   ;;  %v10593_v24 = vld [vmem:[#allocation7 + $0x38] sm:$0xff]   ;;  %v10594_v25 = vld [vmem:[#allocation7 + $0x40] sm:$0xff]   ;;  %v11241_v28 = vsub.s32 0, %v199_v5 }
  0x3c   :  { %v10595_v26 = vld [vmem:[#allocation7 + $0x48] sm:$0xff]   ;;  %v10596_v27 = vld [vmem:[#allocation7 + $0x50] sm:$0xff]   ;;  %v10597_v29 = vld [vmem:[#allocation7 + $0x58] sm:$0xff]  }
  0x3d   :  { %801 = vmatpush1.bf16.msra.mxu0 %v10587_v2  ;;  %v11223_v12 = vrot.slane %v196_v11, %v11216_v7  ;;  %v11229_v15 = vrot.slane %v9592_v13, %v11216_v7  ;;  %v10598_v30 = vld [vmem:[#allocation7 + $0x60] sm:$0xff]   ;;  %v11245_v31 = vrot.slane %v196_v11, %v11241_v28  ;;  %v70_v33 = vld [vmem:[#allocation3 + $0x10] sm:$0xff]  ;;  %v73_v34 = vld [vmem:[#allocation3 + $0x28] sm:$0xff]  ;;  %v11249_v37 = vrot.slane %v9592_v13, %v11241_v28 }
  0x3e   :  { %802 = vmatprep.subr.bf16.mxu0 %v16099_v0  ;;  %v68_v32 = vld [vmem:[#allocation3] sm:$0xff]  ;;  %v75_v35 = vld [vmem:[#allocation3 + $0x38] sm:$0xff]  ;;  %v10599_v36 = vld [vmem:[#allocation7 + $0x68] sm:$0xff]  }
  0x3f   :  { %v209_v16 = vmul.f32 %v11223_v12, %v69_v9  ;;  %v211_v17 = vmul.f32 %v11223_v12, %v71_v10  ;;  %v208_v38 = vmul.f32 %v11245_v31, %v68_v32  ;;  %v210_v39 = vmul.f32 %v11245_v31, %v70_v33  ;;  %v10600_v42 = vld [vmem:[#allocation7 + $0x70] sm:$0xff]   ;;  %v72_v44 = vld [vmem:[#allocation3 + $0x20] sm:$0xff]  ;;  %v77_v49 = vld [vmem:[#allocation3 + $0x48] sm:$0xff] }
  0x40   :  { %v213_v40 = vmul.f32 %v11223_v12, %v73_v34  ;;  %v215_v41 = vmul.f32 %v11223_v12, %v75_v35  ;;  %v74_v45 = vld [vmem:[#allocation3 + $0x30] sm:$0xff]  ;;  %v79_v50 = vld [vmem:[#allocation3 + $0x58] sm:$0xff]  ;;  %v212_v54 = vmul.f32 %v11245_v31, %v72_v44  ;;  %v217_v58 = vmul.f32 %v11223_v12, %v77_v49  ;;  %v76_v60 = vld [vmem:[#allocation3 + $0x40] sm:$0xff] }
  0x41   :  { %803 = vmatpush1.bf16.msra.mxu0 %v10588_v4  ;;  %v350_v18 = vadd.f32 %v11229_v15, %v209_v16  ;;  %v352_v19 = vadd.f32 %v11229_v15, %v211_v17  ;;  %v349_v43 = vadd.f32 %v11249_v37, %v208_v38  ;;  %v351_v46 = vadd.f32 %v11249_v37, %v210_v39  ;;  %v10601_v51 = vld [vmem:[#allocation7 + $0x78] sm:$0xff]   ;;  %v78_v61 = vld [vmem:[#allocation3 + $0x50] sm:$0xff] }
  0x42   :  { %804 = vmatprep.subr.bf16.mxu0 %v16099_v0  ;;  %v354_v47 = vadd.f32 %v11229_v15, %v213_v40  ;;  %v356_v48 = vadd.f32 %v11229_v15, %v215_v41  ;;  %v214_v55 = vmul.f32 %v11245_v31, %v74_v45  ;;  %v219_v59 = vmul.f32 %v11223_v12, %v79_v50  ;;  %v84_v40 = vld [vmem:[#allocation3 + $0x80] sm:$0xff]  ;;  %v86_v41 = vld [vmem:[#allocation3 + $0x90] sm:$0xff]  ;;  %v91_v49 = vld [vmem:[#allocation3 + $0xb8] sm:$0xff] }
  0x43   :  { %v478_v21 = vmax.f32 %v350_v18, 0.0  ;;  %v480_v22 = vmax.f32 %v352_v19, 0.0  ;;  %v477_v52 = vmax.f32 %v349_v43, 0.0  ;;  %v479_v53 = vmax.f32 %v351_v46, 0.0  ;;  %v80_v19 = vld [vmem:[#allocation3 + $0x60] sm:$0xff] }
  0x44   :  { %v482_v56 = vmax.f32 %v354_v47, 0.0  ;;  %v484_v57 = vmax.f32 %v356_v48, 0.0  ;;  %v353_v63 = vadd.f32 %v11249_v37, %v212_v54  ;;  %v355_v1 = vadd.f32 %v11249_v37, %v214_v55  ;;  %v89_v48 = vld [vmem:[#allocation3 + $0xa8] sm:$0xff] }
  0x45   :  { %805 = vmatpush1.bf16.msra.mxu0 %v10589_v6  ;;  %v638_v23 = vpack.c.bf16 %v480_v22, %v478_v21  ;;  %v637_v62 = vpack.c.bf16 %v479_v53, %v477_v52  ;;  %v358_v4 = vadd.f32 %v11229_v15, %v217_v58  ;;  %v360_v5 = vadd.f32 %v11229_v15, %v219_v59  ;;  %v81_v6 = vld [vmem:[#allocation3 + $0x68] sm:$0xff]  ;;  %v88_v58 = vld [vmem:[#allocation3 + $0xa0] sm:$0xff]  ;;  %v90_v59 = vld [vmem:[#allocation3 + $0xb0] sm:$0xff] }
  0x46   :  { %806 = vmatprep.subr.bf16.mxu0 %v16099_v0  ;;  %v640_v2 = vpack.c.bf16 %v484_v57, %v482_v56  ;;  %v481_v9 = vmax.f32 %v353_v63, 0.0  ;;  %v483_v10 = vmax.f32 %v355_v1, 0.0  ;;  %v216_v11 = vmul.f32 %v11245_v31, %v76_v60 }
  0x47   :  { %830 = vmatprep.mubr.bf16.mxu0 %v638_v23  ;;  %v218_v13 = vmul.f32 %v11245_v31, %v78_v61  ;;  %v488_v16 = vmax.f32 %v360_v5, 0.0  ;;  %v221_v17 = vmul.f32 %v11223_v12, %v81_v6  ;;  %v82_v23 = vld [vmem:[#allocation3 + $0x70] sm:$0xff]  ;;  %v220_v33 = vmul.f32 %v11245_v31, %v80_v19  ;;  %v95_v5 = vld [vmem:[#allocation3 + $0xd8] sm:$0xff]  ;;  %v97_v19 = vld [vmem:[#allocation3 + $0xe8] sm:$0xff] }
  0x48   :  { %v357_v21 = vadd.f32 %v11249_v37, %v216_v11  ;;  %v222_v34 = vmul.f32 %v11245_v31, %v82_v23  ;;  %v224_v52 = vmul.f32 %v11245_v31, %v84_v40  ;;  %v226_v53 = vmul.f32 %v11245_v31, %v86_v41  ;;  %v101_v40 = vld [vmem:[#allocation3 + $0x108] sm:$0xff]  ;;  %v103_v41 = vld [vmem:[#allocation3 + $0x118] sm:$0xff] }
  0x49   :  { %807 = vmatpush1.bf16.msra.mxu0 %v10590_v8  ;;  %v83_v8 = vld [vmem:[#allocation3 + $0x78] sm:$0xff]  ;;  %v359_v22 = vadd.f32 %v11249_v37, %v218_v13  ;;  %v361_v43 = vadd.f32 %v11249_v37, %v220_v33  ;;  %v229_v56 = vmul.f32 %v11223_v12, %v89_v48  ;;  %v231_v57 = vmul.f32 %v11223_v12, %v91_v49 }
  0x4a   :  { %808 = vmatprep.subr.bf16.mxu0 %v16099_v0  ;;  %v223_v18 = vmul.f32 %v11223_v12, %v83_v8  ;;  %v363_v44 = vadd.f32 %v11249_v37, %v222_v34  ;;  %v365_v61 = vadd.f32 %v11249_v37, %v224_v52  ;;  %v237_v33 = vmul.f32 %v11223_v12, %v97_v19 }
  0x4b   :  { %v487_v32 = vmax.f32 %v359_v22, 0.0  ;;  %v489_v50 = vmax.f32 %v361_v43, 0.0  ;;  %v370_v1 = vadd.f32 %v11229_v15, %v229_v56  ;;  %v241_v52 = vmul.f32 %v11223_v12, %v101_v40 }
  0x4c   :  { %v493_v6 = vmax.f32 %v365_v61, 0.0 }
  0x4d   :  { %809 = vmatpush1.bf16.msra.mxu0 %v10591_v14  ;;  %v486_v14 = vmax.f32 %v358_v4, 0.0  ;;  %v93_v4 = vld [vmem:[#allocation3 + $0xc8] sm:$0xff]  ;;  %v498_v11 = vmax.f32 %v370_v1, 0.0 }
  0x4e   :  { %810 = vmatprep.subr.bf16.mxu0 %v16099_v0  ;;  %v105_v1 = vld [vmem:[#allocation3 + $0x128] sm:$0xff] }
  0x51   :  { %811 = vmatpush1.bf16.msra.mxu0 %v10592_v20  ;;  %v639_v20 = vpack.c.bf16 %v483_v10, %v481_v9  ;;  %v228_v9 = vmul.f32 %v11245_v31, %v88_v58  ;;  %v230_v10 = vmul.f32 %v11245_v31, %v90_v59  ;;  %v382_v58 = vadd.f32 %v11229_v15, %v241_v52 }
  0x52   :  { %812 = vmatprep.subr.bf16.mxu0 %v16099_v0 }
  0x53   :  { %v369_v22 = vadd.f32 %v11249_v37, %v228_v9  ;;  %v371_v23 = vadd.f32 %v11249_v37, %v230_v10 }
  0x55   :  { %813 = vmatpush1.bf16.msra.mxu0 %v10593_v24  ;;  %v642_v24 = vpack.c.bf16 %v488_v16, %v486_v14  ;;  %v233_v14 = vmul.f32 %v11223_v12, %v93_v4  ;;  %v235_v16 = vmul.f32 %v11223_v12, %v95_v5 }
  0x56   :  { %814 = vmatprep.subr.bf16.mxu0 %v16099_v0 }
  0x59   :  { %815 = vmatpush1.bf16.msra.mxu0 %v10594_v25  ;;  %v362_v25 = vadd.f32 %v11229_v15, %v221_v17  ;;  %v92_v17 = vld [vmem:[#allocation3 + $0xc0] sm:$0xff] }
  0x5a   :  { %816 = vmatprep.subr.bf16.mxu0 %v16099_v0 }
  0x5b   :  { %v490_v35 = vmax.f32 %v362_v25, 0.0  ;;  %v374_v25 = vadd.f32 %v11229_v15, %v233_v14 }
  0x5d   :  { %817 = vmatpush1.bf16.msra.mxu0 %v10595_v26  ;;  %v364_v26 = vadd.f32 %v11229_v15, %v223_v18  ;;  %v94_v18 = vld [vmem:[#allocation3 + $0xd0] sm:$0xff] }
  0x5e   :  { %818 = vmatprep.subr.bf16.mxu0 %v16099_v0 }
  0x61   :  { %819 = vmatpush1.bf16.msra.mxu0 %v10596_v27  ;;  %v85_v27 = vld [vmem:[#allocation3 + $0x88] sm:$0xff] }
  0x62   :  { %820 = vmatprep.subr.bf16.mxu0 %v16099_v0  ;;  %v225_v38 = vmul.f32 %v11223_v12, %v85_v27  ;;  %v232_v27 = vmul.f32 %v11245_v31, %v92_v17 }
  0x64   :  { %v366_v46 = vadd.f32 %v11229_v15, %v225_v38  ;;  %v96_v38 = vld [vmem:[#allocation3 + $0xe0] sm:$0xff] }
  0x65   :  { %821 = vmatpush1.bf16.msra.mxu0 %v10597_v29  ;;  %v87_v29 = vld [vmem:[#allocation3 + $0x98] sm:$0xff]  ;;  %v236_v48 = vmul.f32 %v11245_v31, %v96_v38 }
  0x66   :  { %822 = vmatprep.subr.bf16.mxu0 %v16099_v0  ;;  %v227_v39 = vmul.f32 %v11223_v12, %v87_v29  ;;  %v494_v54 = vmax.f32 %v366_v46, 0.0  ;;  %v234_v29 = vmul.f32 %v11245_v31, %v94_v18 }
  0x67   :  { %v377_v56 = vadd.f32 %v11249_v37, %v236_v48 }
  0x68   :  { %v368_v47 = vadd.f32 %v11229_v15, %v227_v39  ;;  %v98_v39 = vld [vmem:[#allocation3 + $0xf0] sm:$0xff]  ;;  %v375_v43 = vadd.f32 %v11249_v37, %v234_v29 }
  0x69   :  { %823 = vmatpush1.bf16.msra.mxu0 %v10598_v30  ;;  %v485_v30 = vmax.f32 %v357_v21, 0.0  ;;  %v238_v49 = vmul.f32 %v11245_v31, %v98_v39  ;;  %v505_v4 = vmax.f32 %v377_v56, 0.0 }
  0x6a   :  { %824 = vmatprep.subr.bf16.mxu0 %v16099_v0  ;;  %v496_v55 = vmax.f32 %v368_v47, 0.0 }
  0x6c   :  { %v646_v63 = vpack.c.bf16 %v496_v55, %v494_v54 }
  0x6d   :  { %825 = vmatpush1.bf16.msra.mxu0 %v10599_v36  ;;  %v492_v36 = vmax.f32 %v364_v26, 0.0  ;;  %v376_v26 = vadd.f32 %v11229_v15, %v235_v16 }
  0x6e   :  { %826 = vmatprep.subr.bf16.mxu0 %v16099_v0 }
  0x6f   :  { %v644_v45 = vpack.c.bf16 %v492_v36, %v490_v35  ;;  %v502_v35 = vmax.f32 %v374_v25, 0.0  ;;  %v504_v36 = vmax.f32 %v376_v26, 0.0 }
  0x71   :  { %827 = vmatpush1.bf16.msra.mxu0 %v10600_v42  ;;  %v641_v42 = vpack.c.bf16 %v487_v32, %v485_v30  ;;  %v497_v30 = vmax.f32 %v369_v22, 0.0  ;;  %v499_v32 = vmax.f32 %v371_v23, 0.0  ;;  %v650_v47 = vpack.c.bf16 %v504_v36, %v502_v35  ;;  %v106_v22 = vld [vmem:[#allocation3 + $0x130] sm:$0xff]  ;;  %v109_v23 = vld [vmem:[#allocation3 + $0x148] sm:$0xff] }
  0x72   :  { %828 = vmatprep.subr.bf16.mxu0 %v16099_v0  ;;  %v246_v29 = vmul.f32 %v11245_v31, %v106_v22  ;;  %v118_v22 = vld [vmem:[#allocation3 + $0x190] sm:$0xff] }
  0x74   :  { %v387_v38 = vadd.f32 %v11249_v37, %v246_v29 }
  0x75   :  { %829 = vmatpush1.bf16.msra.mxu0 %v10601_v51  ;;  %v491_v51 = vmax.f32 %v363_v44, 0.0  ;;  %v647_v44 = vpack.c.bf16 %v499_v32, %v497_v30 }
  0x77   :  { %v643_v60 = vpack.c.bf16 %v491_v51, %v489_v50  ;;  %v503_v51 = vmax.f32 %v375_v43, 0.0  ;;  %v110_v43 = vld [vmem:[#allocation3 + $0x150] sm:$0xff] }
  0x78   :  { %831 = vmatmul.mubr.bf16.vlgmr.msra.gmra.mrb[0].mxu0 %v637_v62  ;;  %v367_v62 = vadd.f32 %v11249_v37, %v226_v53  ;;  %v243_v53 = vmul.f32 %v11223_v12, %v103_v41 }
  0x79   :  { %838 = vmatprep.mubr.bf16.mxu0 %v640_v2  ;;  %v372_v2 = vadd.f32 %v11229_v15, %v231_v57  ;;  %v379_v57 = vadd.f32 %v11249_v37, %v238_v49  ;;  %v250_v49 = vmul.f32 %v11245_v31, %v110_v43 }
  0x7a   :  { %v495_v8 = vmax.f32 %v367_v62, 0.0  ;;  %v384_v59 = vadd.f32 %v11229_v15, %v243_v53  ;;  %v102_v62 = vld [vmem:[#allocation3 + $0x110] sm:$0xff] }
  0x7b   :  { %v500_v13 = vmax.f32 %v372_v2, 0.0  ;;  %v107_v2 = vld [vmem:[#allocation3 + $0x138] sm:$0xff]  ;;  %v507_v5 = vmax.f32 %v379_v57, 0.0  ;;  %v242_v10 = vmul.f32 %v11245_v31, %v102_v62  ;;  %v391_v56 = vadd.f32 %v11249_v37, %v250_v49  ;;  %v117_v62 = vld [vmem:[#allocation3 + $0x188] sm:$0xff] }
  0x7c   :  { %v645_v21 = vpack.c.bf16 %v495_v8, %v493_v6  ;;  %v510_v6 = vmax.f32 %v382_v58, 0.0  ;;  %v512_v8 = vmax.f32 %v384_v59, 0.0 }
  0x7d   :  { %v651_v14 = vpack.c.bf16 %v507_v5, %v505_v4  ;;  %v383_v17 = vadd.f32 %v11249_v37, %v242_v10  ;;  %v519_v4 = vmax.f32 %v391_v56, 0.0 }
  0x7e   :  { %v654_v18 = vpack.c.bf16 %v512_v8, %v510_v6  ;;  %v10603_v8 = vld [vmem:[%s16052_s6 + $0x8] sm:$0xff]  }
  0x7f   :  { %v511_v26 = vmax.f32 %v383_v17, 0.0 }
  0x80   :  { %839 = vmatmul.mubr.bf16.gmra.mrb[4].mxu0 %v639_v20  ;;  %v99_v20 = vld [vmem:[#allocation3 + $0xf8] sm:$0xff] }
  0x81   :  { %846 = vmatprep.mubr.bf16.mxu0 %v642_v24  ;;  %v648_v24 = vpack.c.bf16 %v500_v13, %v498_v11  ;;  %v239_v34 = vmul.f32 %v11223_v12, %v99_v20  ;;  %v245_v11 = vmul.f32 %v11223_v12, %v105_v1  ;;  %v247_v13 = vmul.f32 %v11223_v12, %v107_v2  ;;  %v10602_v1 = vld [vmem:[%s16052_s6] sm:$0xff]  }
  0x82   :  { %10094 = vmatprep.subr.bf16.mxu1 %v10602_v1 }
  0x83   :  { %v380_v46 = vadd.f32 %v11229_v15, %v239_v34  ;;  %v386_v19 = vadd.f32 %v11229_v15, %v245_v11  ;;  %v388_v20 = vadd.f32 %v11229_v15, %v247_v13  ;;  %v257_v11 = vmul.f32 %v11223_v12, %v117_v62  ;;  %10095 = vmatpush3.bf16.msra.mxu1 %v10602_v1  ;;  %v124_v1 = vld [vmem:[#allocation3 + $0x1c0] sm:$0xff] }
  0x84   :  { %10096 = vmatprep.subr.bf16.mxu1 %v10603_v8 }
  0x85   :  { %v508_v55 = vmax.f32 %v380_v46, 0.0  ;;  %v514_v30 = vmax.f32 %v386_v19, 0.0  ;;  %v516_v32 = vmax.f32 %v388_v20, 0.0  ;;  %v398_v19 = vadd.f32 %v11229_v15, %v257_v11 }
  0x87   :  { %v656_v39 = vpack.c.bf16 %v516_v32, %v514_v30  ;;  %10097 = vmatpush3.bf16.msra.mxu1 %v10603_v8  ;;  %v258_v30 = vmul.f32 %v11245_v31, %v118_v22  ;;  %v526_v32 = vmax.f32 %v398_v19, 0.0 }
  0x88   :  { %847 = vmatmul.mubr.bf16.gmra.mrb[8].mxu0 %v641_v42  ;;  %v373_v42 = vadd.f32 %v11249_v37, %v232_v27 }
  0x89   :  { %854 = vmatprep.mubr.bf16.mxu0 %v644_v45  ;;  %v378_v45 = vadd.f32 %v11229_v15, %v237_v33  ;;  %v249_v33 = vmul.f32 %v11223_v12, %v109_v23  ;;  %v121_v23 = vld [vmem:[#allocation3 + $0x1a8] sm:$0xff] }
  0x8a   :  { %v501_v50 = vmax.f32 %v373_v42, 0.0  ;;  %v108_v42 = vld [vmem:[#allocation3 + $0x140] sm:$0xff] }
  0x8b   :  { %v506_v54 = vmax.f32 %v378_v45, 0.0  ;;  %v390_v40 = vadd.f32 %v11229_v15, %v249_v33  ;;  %v115_v45 = vld [vmem:[#allocation3 + $0x178] sm:$0xff]  ;;  %v248_v48 = vmul.f32 %v11245_v31, %v108_v42 }
  0x8c   :  { %v649_v61 = vpack.c.bf16 %v503_v51, %v501_v50  ;;  %v255_v53 = vmul.f32 %v11223_v12, %v115_v45  ;;  %v122_v45 = vld [vmem:[#allocation3 + $0x1b0] sm:$0xff] }
  0x8d   :  { %v518_v50 = vmax.f32 %v390_v40, 0.0  ;;  %v399_v40 = vadd.f32 %v11249_v37, %v258_v30 }
  0x8e   :  { %v396_v59 = vadd.f32 %v11229_v15, %v255_v53 }
  0x90   :  { %855 = vmatmul.mubr.bf16.gmra.mrb[12].mxu0 %v643_v60  ;;  %v100_v60 = vld [vmem:[#allocation3 + $0x100] sm:$0xff]  ;;  %v524_v10 = vmax.f32 %v396_v59, 0.0 }
  0x91   :  { %862 = vmatprep.mubr.bf16.mxu0 %v646_v63  ;;  %v652_v63 = vpack.c.bf16 %v508_v55, %v506_v54  ;;  %v240_v9 = vmul.f32 %v11245_v31, %v100_v60  ;;  %v389_v55 = vadd.f32 %v11249_v37, %v248_v48  ;;  %v112_v60 = vld [vmem:[#allocation3 + $0x160] sm:$0xff] }
  0x92   :  { %v252_v5 = vmul.f32 %v11245_v31, %v112_v60  ;;  %v10606_v48 = vld [vmem:[%s16052_s6 + $0x20] sm:$0xff]  }
  0x93   :  { %v381_v16 = vadd.f32 %v11249_v37, %v240_v9  ;;  %v517_v2 = vmax.f32 %v389_v55, 0.0 }
  0x95   :  { %v509_v25 = vmax.f32 %v381_v16, 0.0  ;;  %v393_v16 = vadd.f32 %v11249_v37, %v252_v5  ;;  %v131_v5 = vld [vmem:[#allocation3 + $0x1f8] sm:$0xff] }
  0x97   :  { %v653_v35 = vpack.c.bf16 %v511_v26, %v509_v25  ;;  %v10604_v25 = vld [vmem:[%s16052_s6 + $0x10] sm:$0xff]   ;;  %v521_v26 = vmax.f32 %v393_v16, 0.0 }
  0x98   :  { %863 = vmatmul.mubr.bf16.gmra.mrb[16].mxu0 %v645_v21  ;;  %v104_v21 = vld [vmem:[#allocation3 + $0x120] sm:$0xff]  ;;  %10098 = vmatprep.subr.bf16.mxu1 %v10604_v25 }
  0x99   :  { %870 = vmatprep.mubr.bf16.mxu0 %v648_v24  ;;  %v111_v24 = vld [vmem:[#allocation3 + $0x158] sm:$0xff]  ;;  %v244_v27 = vmul.f32 %v11245_v31, %v104_v21  ;;  %v116_v21 = vld [vmem:[#allocation3 + $0x180] sm:$0xff]  ;;  %10099 = vmatpush3.bf16.msra.mxu1 %v10604_v25 }
  0x9a   :  { %v251_v34 = vmul.f32 %v11223_v12, %v111_v24  ;;  %v123_v24 = vld [vmem:[#allocation3 + $0x1b8] sm:$0xff]  ;;  %v256_v29 = vmul.f32 %v11245_v31, %v116_v21  ;;  %v128_v25 = vld [vmem:[#allocation3 + $0x1e0] sm:$0xff] }
  0x9b   :  { %v385_v36 = vadd.f32 %v11249_v37, %v244_v27 }
  0x9c   :  { %v392_v41 = vadd.f32 %v11229_v15, %v251_v34  ;;  %v261_v34 = vmul.f32 %v11223_v12, %v121_v23 }
  0x9d   :  { %v513_v46 = vmax.f32 %v385_v36, 0.0  ;;  %v10605_v36 = vld [vmem:[%s16052_s6 + $0x18] sm:$0xff]  }
  0x9e   :  { %v520_v51 = vmax.f32 %v392_v41, 0.0  ;;  %10100 = vmatprep.subr.bf16.mxu1 %v10605_v36  ;;  %v402_v42 = vadd.f32 %v11229_v15, %v261_v34 }
  0x9f   :  { %10101 = vmatpush3.bf16.msra.mxu1 %v10605_v36 }
  0xa0   :  { %871 = vmatmul.mubr.bf16.gmra.mrb[20].mxu0 %v647_v44  ;;  %v113_v44 = vld [vmem:[#allocation3 + $0x168] sm:$0xff]  ;;  %v658_v57 = vpack.c.bf16 %v520_v51, %v518_v50  ;;  %v527_v50 = vmax.f32 %v399_v40, 0.0  ;;  %10102 = vmatprep.subr.bf16.mxu1 %v10606_v48  ;;  %v530_v53 = vmax.f32 %v402_v42, 0.0 }
  0xa1   :  { %878 = vmatprep.mubr.bf16.mxu0 %v650_v47  ;;  %v515_v47 = vmax.f32 %v387_v38, 0.0  ;;  %v253_v52 = vmul.f32 %v11223_v12, %v113_v44  ;;  %v120_v44 = vld [vmem:[#allocation3 + $0x1a0] sm:$0xff] }
  0xa2   :  { %v260_v51 = vmul.f32 %v11245_v31, %v120_v44 }
  0xa3   :  { %v655_v54 = vpack.c.bf16 %v515_v47, %v513_v46  ;;  %v394_v58 = vadd.f32 %v11229_v15, %v253_v52  ;;  %v125_v46 = vld [vmem:[#allocation3 + $0x1c8] sm:$0xff]  ;;  %v127_v47 = vld [vmem:[#allocation3 + $0x1d8] sm:$0xff]  ;;  %v262_v52 = vmul.f32 %v11245_v31, %v122_v45  ;;  %10103 = vmatpush3.bf16.msra.mxu1 %v10606_v48 }
  0xa4   :  { %v265_v55 = vmul.f32 %v11223_v12, %v125_v46  ;;  %v267_v56 = vmul.f32 %v11223_v12, %v127_v47  ;;  %v401_v59 = vadd.f32 %v11249_v37, %v260_v51  ;;  %v132_v46 = vld [vmem:[#allocation3 + $0x200] sm:$0xff]  ;;  %v134_v47 = vld [vmem:[#allocation3 + $0x210] sm:$0xff]  ;;  %v137_v48 = vld [vmem:[#allocation3 + $0x228] sm:$0xff] }
  0xa5   :  { %v522_v9 = vmax.f32 %v394_v58, 0.0  ;;  %v403_v60 = vadd.f32 %v11249_v37, %v262_v52  ;;  %v272_v52 = vmul.f32 %v11245_v31, %v132_v46  ;;  %v149_v46 = vld [vmem:[#allocation3 + $0x288] sm:$0xff] }
  0xa6   :  { %v406_v62 = vadd.f32 %v11229_v15, %v265_v55  ;;  %v529_v8 = vmax.f32 %v401_v59, 0.0 }
  0xa7   :  { %v413_v59 = vadd.f32 %v11249_v37, %v272_v52 }
  0xa8   :  { %879 = vmatmul.mubr.bf16.gmra.mrb[24].mxu0 %v649_v61  ;;  %v114_v61 = vld [vmem:[#allocation3 + $0x170] sm:$0xff] }
  0xa9   :  { %886 = vmatprep.mubr.bf16.mxu0 %v652_v63  ;;  %v119_v63 = vld [vmem:[#allocation3 + $0x198] sm:$0xff]  ;;  %v254_v6 = vmul.f32 %v11245_v31, %v114_v61 }
  0xaa   :  { %v259_v13 = vmul.f32 %v11223_v12, %v119_v63  ;;  %v408_v63 = vadd.f32 %v11229_v15, %v267_v56  ;;  %v277_v56 = vmul.f32 %v11223_v12, %v137_v48 }
  0xab   :  { %v395_v17 = vadd.f32 %v11249_v37, %v254_v6  ;;  %v10608_v6 = vld [vmem:[%s16052_s6 + $0x30] sm:$0xff]  }
  0xac   :  { %v400_v20 = vadd.f32 %v11229_v15, %v259_v13  ;;  %v534_v13 = vmax.f32 %v406_v62, 0.0  ;;  %v418_v62 = vadd.f32 %v11229_v15, %v277_v56 }
  0xad   :  { %v523_v27 = vmax.f32 %v395_v17, 0.0  ;;  %v271_v17 = vmul.f32 %v11223_v12, %v131_v5  ;;  %v143_v5 = vld [vmem:[#allocation3 + $0x258] sm:$0xff] }
  0xae   :  { %v528_v33 = vmax.f32 %v400_v20, 0.0 }
  0xaf   :  { %v659_v38 = vpack.c.bf16 %v523_v27, %v521_v26  ;;  %v130_v26 = vld [vmem:[#allocation3 + $0x1f0] sm:$0xff]  ;;  %v133_v27 = vld [vmem:[#allocation3 + $0x208] sm:$0xff] }
  0xb0   :  { %887 = vmatmul.mubr.bf16.gmra.mrb[28].mxu0 %v651_v14  ;;  %v657_v14 = vpack.c.bf16 %v519_v4, %v517_v2  ;;  %v662_v41 = vpack.c.bf16 %v528_v33, %v526_v32  ;;  %v126_v2 = vld [vmem:[#allocation3 + $0x1d0] sm:$0xff]  ;;  %v129_v4 = vld [vmem:[#allocation3 + $0x1e8] sm:$0xff]  ;;  %v268_v33 = vmul.f32 %v11245_v31, %v128_v25  ;;  %v270_v34 = vmul.f32 %v11245_v31, %v130_v26  ;;  %v147_v26 = vld [vmem:[#allocation3 + $0x278] sm:$0xff] }
  0xb1   :  { %894 = vmatprep.mubr.bf16.mxu0 %v654_v18  ;;  %v660_v18 = vpack.c.bf16 %v524_v10, %v522_v9  ;;  %v531_v9 = vmax.f32 %v403_v60, 0.0  ;;  %v264_v10 = vmul.f32 %v11245_v31, %v124_v1  ;;  %v266_v11 = vmul.f32 %v11245_v31, %v126_v2  ;;  %v136_v1 = vld [vmem:[#allocation3 + $0x220] sm:$0xff]  ;;  %v138_v2 = vld [vmem:[#allocation3 + $0x230] sm:$0xff]  ;;  %v145_v25 = vld [vmem:[#allocation3 + $0x268] sm:$0xff] }
  0xb2   :  { %v269_v16 = vmul.f32 %v11223_v12, %v129_v4  ;;  %v411_v42 = vadd.f32 %v11249_v37, %v270_v34  ;;  %v141_v4 = vld [vmem:[#allocation3 + $0x248] sm:$0xff] }
  0xb3   :  { %v663_v19 = vpack.c.bf16 %v531_v9, %v529_v8  ;;  %v405_v20 = vadd.f32 %v11249_v37, %v264_v10  ;;  %v407_v21 = vadd.f32 %v11249_v37, %v266_v11  ;;  %v276_v9 = vmul.f32 %v11245_v31, %v136_v1  ;;  %v153_v1 = vld [vmem:[#allocation3 + $0x2a8] sm:$0xff] }
  0xb4   :  { %v410_v23 = vadd.f32 %v11229_v15, %v269_v16  ;;  %v539_v51 = vmax.f32 %v411_v42, 0.0  ;;  %v278_v10 = vmul.f32 %v11245_v31, %v138_v2  ;;  %v546_v11 = vmax.f32 %v418_v62, 0.0  ;;  %v148_v62 = vld [vmem:[#allocation3 + $0x280] sm:$0xff]  ;;  %v155_v2 = vld [vmem:[#allocation3 + $0x2b8] sm:$0xff] }
  0xb5   :  { %v533_v30 = vmax.f32 %v405_v20, 0.0  ;;  %v535_v32 = vmax.f32 %v407_v21, 0.0  ;;  %v283_v16 = vmul.f32 %v11223_v12, %v143_v5 }
  0xb7   :  { %v665_v40 = vpack.c.bf16 %v535_v32, %v533_v30 }
  0xb8   :  { %895 = vmatmul.mubr.bf16.gmra.mrb[32].mxu0 %v653_v35  ;;  %v263_v35 = vmul.f32 %v11223_v12, %v123_v24  ;;  %v412_v24 = vadd.f32 %v11229_v15, %v271_v17 }
  0xb9   :  { %902 = vmatprep.mubr.bf16.mxu0 %v656_v39  ;;  %v397_v39 = vadd.f32 %v11249_v37, %v256_v29  ;;  %v135_v29 = vld [vmem:[#allocation3 + $0x218] sm:$0xff] }
  0xba   :  { %v404_v43 = vadd.f32 %v11229_v15, %v263_v35  ;;  %v538_v35 = vmax.f32 %v410_v23, 0.0  ;;  %v540_v36 = vmax.f32 %v412_v24, 0.0  ;;  %v140_v23 = vld [vmem:[#allocation3 + $0x240] sm:$0xff]  ;;  %v142_v24 = vld [vmem:[#allocation3 + $0x250] sm:$0xff] }
  0xbb   :  { %v525_v49 = vmax.f32 %v397_v39, 0.0  ;;  %v275_v39 = vmul.f32 %v11223_v12, %v135_v29  ;;  %v280_v30 = vmul.f32 %v11245_v31, %v140_v23  ;;  %v282_v32 = vmul.f32 %v11245_v31, %v142_v24  ;;  %v157_v23 = vld [vmem:[#allocation3 + $0x2c8] sm:$0xff]  ;;  %v159_v24 = vld [vmem:[#allocation3 + $0x2d8] sm:$0xff] }
  0xbd   :  { %v661_v58 = vpack.c.bf16 %v527_v50, %v525_v49  ;;  %v416_v45 = vadd.f32 %v11229_v15, %v275_v39  ;;  %v139_v49 = vld [vmem:[#allocation3 + $0x238] sm:$0xff]  ;;  %v421_v39 = vadd.f32 %v11249_v37, %v280_v30 }
  0xbf   :  { %v544_v55 = vmax.f32 %v416_v45, 0.0  ;;  %v146_v45 = vld [vmem:[#allocation3 + $0x270] sm:$0xff]  ;;  %v549_v48 = vmax.f32 %v421_v39, 0.0 }
  0xc0   :  { %903 = vmatmul.mubr.bf16.gmra.mrb[36].mxu0 %v655_v54  ;;  %v532_v54 = vmax.f32 %v404_v43, 0.0  ;;  %v668_v43 = vpack.c.bf16 %v540_v36, %v538_v35  ;;  %v285_v35 = vmul.f32 %v11223_v12, %v145_v25  ;;  %v287_v36 = vmul.f32 %v11223_v12, %v147_v26 }
  0xc1   :  { %910 = vmatprep.mubr.bf16.mxu0 %v658_v57  ;;  %v10607_v57 = vld [vmem:[%s16052_s6 + $0x28] sm:$0xff]  }
  0xc2   :  { %10104 = vmatprep.subr.bf16.mxu1 %v10607_v57  ;;  %v664_v61 = vpack.c.bf16 %v532_v54, %v530_v53  ;;  %v274_v53 = vmul.f32 %v11245_v31, %v134_v47  ;;  %v426_v42 = vadd.f32 %v11229_v15, %v285_v35  ;;  %v151_v47 = vld [vmem:[#allocation3 + $0x298] sm:$0xff] }
  0xc3   :  { %10105 = vmatpush3.bf16.msra.mxu1 %v10607_v57  ;;  %v279_v57 = vmul.f32 %v11223_v12, %v139_v49 }
  0xc4   :  { %10106 = vmatprep.subr.bf16.mxu1 %v10608_v6  ;;  %v415_v60 = vadd.f32 %v11249_v37, %v274_v53  ;;  %v554_v52 = vmax.f32 %v426_v42, 0.0  ;;  %v156_v42 = vld [vmem:[#allocation3 + $0x2c0] sm:$0xff] }
  0xc6   :  { %v543_v8 = vmax.f32 %v415_v60, 0.0 }
  0xc7   :  { %10107 = vmatpush3.bf16.msra.mxu1 %v10608_v6  ;;  %v541_v6 = vmax.f32 %v413_v59, 0.0 }
  0xc8   :  { %911 = vmatmul.mubr.bf16.gmra.mrb[40].mxu0 %v657_v14  ;;  %v536_v14 = vmax.f32 %v408_v63, 0.0  ;;  %v420_v63 = vadd.f32 %v11229_v15, %v279_v57 }
  0xc9   :  { %918 = vmatprep.mubr.bf16.mxu0 %v660_v18  ;;  %v10609_v18 = vld [vmem:[%s16052_s6 + $0x38] sm:$0xff]   ;;  %v669_v17 = vpack.c.bf16 %v543_v8, %v541_v6  ;;  %v288_v6 = vmul.f32 %v11245_v31, %v148_v62  ;;  %v165_v62 = vld [vmem:[#allocation3 + $0x308] sm:$0xff] }
  0xca   :  { %10108 = vmatprep.subr.bf16.mxu1 %v10609_v18  ;;  %v666_v22 = vpack.c.bf16 %v536_v14, %v534_v13  ;;  %v548_v13 = vmax.f32 %v420_v63, 0.0  ;;  %v281_v14 = vmul.f32 %v11223_v12, %v141_v4  ;;  %v150_v63 = vld [vmem:[#allocation3 + $0x290] sm:$0xff] }
  0xcb   :  { %10109 = vmatpush3.bf16.msra.mxu1 %v10609_v18  ;;  %v417_v18 = vadd.f32 %v11249_v37, %v276_v9  ;;  %v290_v8 = vmul.f32 %v11245_v31, %v150_v63  ;;  %v167_v63 = vld [vmem:[#allocation3 + $0x318] sm:$0xff] }
  0xcc   :  { %v672_v20 = vpack.c.bf16 %v548_v13, %v546_v11  ;;  %v422_v21 = vadd.f32 %v11229_v15, %v281_v14  ;;  %v293_v11 = vmul.f32 %v11223_v12, %v153_v1  ;;  %v295_v13 = vmul.f32 %v11223_v12, %v155_v2 }
  0xd0   :  { %919 = vmatmul.mubr.bf16.gmra.mrb[44].mxu0 %v659_v38  ;;  %v273_v38 = vmul.f32 %v11223_v12, %v133_v27  ;;  %v545_v27 = vmax.f32 %v417_v18, 0.0 }
  0xd1   :  { %926 = vmatprep.mubr.bf16.mxu0 %v662_v41  ;;  %v409_v41 = vadd.f32 %v11249_v37, %v268_v33  ;;  %v550_v33 = vmax.f32 %v422_v21, 0.0  ;;  %v152_v21 = vld [vmem:[#allocation3 + $0x2a0] sm:$0xff] }
  0xd2   :  { %v414_v44 = vadd.f32 %v11229_v15, %v273_v38 }
  0xd3   :  { %v537_v50 = vmax.f32 %v409_v41, 0.0 }
  0xd4   :  { %v542_v54 = vmax.f32 %v414_v44, 0.0  ;;  %v144_v44 = vld [vmem:[#allocation3 + $0x260] sm:$0xff] }
  0xd8   :  { %927 = vmatmul.mubr.bf16.gmra.mrb[48].mxu0 %v661_v58  ;;  %v667_v58 = vpack.c.bf16 %v539_v51, %v537_v50  ;;  %v284_v50 = vmul.f32 %v11245_v31, %v144_v44  ;;  %v286_v51 = vmul.f32 %v11245_v31, %v146_v45  ;;  %v161_v44 = vld [vmem:[#allocation3 + $0x2e8] sm:$0xff]  ;;  %v163_v45 = vld [vmem:[#allocation3 + $0x2f8] sm:$0xff] }
  0xd9   :  { %934 = vmatprep.mubr.bf16.mxu0 %v664_v61  ;;  %v670_v61 = vpack.c.bf16 %v544_v55, %v542_v54  ;;  %v289_v54 = vmul.f32 %v11223_v12, %v149_v46  ;;  %v291_v55 = vmul.f32 %v11223_v12, %v151_v47 }
  0xda   :  { %v425_v57 = vadd.f32 %v11249_v37, %v284_v50 }
  0xdb   :  { %v430_v60 = vadd.f32 %v11229_v15, %v289_v54 }
  0xdc   :  { %v553_v4 = vmax.f32 %v425_v57, 0.0 }
  0xdd   :  { %v558_v9 = vmax.f32 %v430_v60, 0.0  ;;  %v160_v60 = vld [vmem:[#allocation3 + $0x2e0] sm:$0xff] }
  0xe0   :  { %935 = vmatmul.mubr.bf16.gmra.mrb[52].mxu0 %v663_v19  ;;  %v419_v19 = vadd.f32 %v11249_v37, %v278_v10 }
  0xe1   :  { %942 = vmatprep.mubr.bf16.mxu0 %v666_v22  ;;  %v424_v22 = vadd.f32 %v11229_v15, %v283_v16  ;;  %v429_v16 = vadd.f32 %v11249_v37, %v288_v6 }
  0xe2   :  { %v547_v29 = vmax.f32 %v419_v19, 0.0  ;;  %v434_v19 = vadd.f32 %v11229_v15, %v293_v11 }
  0xe3   :  { %v552_v34 = vmax.f32 %v424_v22, 0.0  ;;  %v154_v22 = vld [vmem:[#allocation3 + $0x2b0] sm:$0xff]  ;;  %v557_v25 = vmax.f32 %v429_v16, 0.0 }
  0xe4   :  { %v671_v38 = vpack.c.bf16 %v547_v29, %v545_v27  ;;  %v292_v27 = vmul.f32 %v11245_v31, %v152_v21  ;;  %v294_v29 = vmul.f32 %v11245_v31, %v154_v22  ;;  %v562_v30 = vmax.f32 %v434_v19, 0.0  ;;  %v164_v19 = vld [vmem:[#allocation3 + $0x300] sm:$0xff]  ;;  %v169_v21 = vld [vmem:[#allocation3 + $0x328] sm:$0xff]  ;;  %v171_v22 = vld [vmem:[#allocation3 + $0x338] sm:$0xff] }
  0xe5   :  { %v674_v41 = vpack.c.bf16 %v552_v34, %v550_v33  ;;  %v297_v33 = vmul.f32 %v11223_v12, %v157_v23  ;;  %v299_v34 = vmul.f32 %v11223_v12, %v159_v24 }
  0xe8   :  { %943 = vmatmul.mubr.bf16.gmra.mrb[56].mxu0 %v665_v40  ;;  %v423_v40 = vadd.f32 %v11249_v37, %v282_v32 }
  0xe9   :  { %950 = vmatprep.mubr.bf16.mxu0 %v668_v43  ;;  %v428_v43 = vadd.f32 %v11229_v15, %v287_v36  ;;  %v433_v36 = vadd.f32 %v11249_v37, %v292_v27 }
  0xea   :  { %v551_v49 = vmax.f32 %v423_v40, 0.0  ;;  %v438_v40 = vadd.f32 %v11229_v15, %v297_v33 }
  0xeb   :  { %v556_v53 = vmax.f32 %v428_v43, 0.0  ;;  %v158_v43 = vld [vmem:[#allocation3 + $0x2d0] sm:$0xff]  ;;  %v561_v46 = vmax.f32 %v433_v36, 0.0 }
  0xec   :  { %v673_v56 = vpack.c.bf16 %v551_v49, %v549_v48  ;;  %v296_v48 = vmul.f32 %v11245_v31, %v156_v42  ;;  %v298_v49 = vmul.f32 %v11245_v31, %v158_v43  ;;  %v566_v50 = vmax.f32 %v438_v40, 0.0  ;;  %v168_v40 = vld [vmem:[#allocation3 + $0x320] sm:$0xff]  ;;  %v173_v42 = vld [vmem:[#allocation3 + $0x348] sm:$0xff]  ;;  %v175_v43 = vld [vmem:[#allocation3 + $0x358] sm:$0xff] }
  0xed   :  { %v676_v59 = vpack.c.bf16 %v556_v53, %v554_v52  ;;  %v301_v52 = vmul.f32 %v11223_v12, %v161_v44  ;;  %v303_v53 = vmul.f32 %v11223_v12, %v163_v45 }
  0xf0   :  { %951 = vmatmul.mubr.bf16.gmra.mrb[60].mxu0 %v667_v58  ;;  %v427_v58 = vadd.f32 %v11249_v37, %v286_v51 }
  0xf1   :  { %958 = vmatprep.mubr.bf16.mxu0 %v670_v61  ;;  %v432_v61 = vadd.f32 %v11229_v15, %v291_v55  ;;  %v437_v55 = vadd.f32 %v11249_v37, %v296_v48 }
  0xf2   :  { %v555_v5 = vmax.f32 %v427_v58, 0.0  ;;  %v442_v58 = vadd.f32 %v11229_v15, %v301_v52 }
  0xf3   :  { %v560_v10 = vmax.f32 %v432_v61, 0.0  ;;  %v162_v61 = vld [vmem:[#allocation3 + $0x2f0] sm:$0xff]  ;;  %v565_v1 = vmax.f32 %v437_v55, 0.0 }
  0xf4   :  { %v675_v14 = vpack.c.bf16 %v555_v5, %v553_v4  ;;  %v300_v4 = vmul.f32 %v11245_v31, %v160_v60  ;;  %v302_v5 = vmul.f32 %v11245_v31, %v162_v61  ;;  %v570_v6 = vmax.f32 %v442_v58, 0.0  ;;  %v172_v58 = vld [vmem:[#allocation3 + $0x340] sm:$0xff]  ;;  %v177_v60 = vld [vmem:[#allocation3 + $0x368] sm:$0xff]  ;;  %v179_v61 = vld [vmem:[#allocation3 + $0x378] sm:$0xff] }
  0xf5   :  { %v678_v18 = vpack.c.bf16 %v560_v10, %v558_v9  ;;  %v305_v9 = vmul.f32 %v11223_v12, %v165_v62  ;;  %v307_v10 = vmul.f32 %v11223_v12, %v167_v63 }
  0xf8   :  { %959 = vmatmul.mubr.bf16.gmra.mrb[64].mxu0 %v669_v17  ;;  %v431_v17 = vadd.f32 %v11249_v37, %v290_v8 }
  0xf9   :  { %966 = vmatprep.mubr.bf16.mxu0 %v672_v20  ;;  %v436_v20 = vadd.f32 %v11229_v15, %v295_v13  ;;  %v441_v13 = vadd.f32 %v11249_v37, %v300_v4 }
  0xfa   :  { %v559_v26 = vmax.f32 %v431_v17, 0.0  ;;  %v446_v17 = vadd.f32 %v11229_v15, %v305_v9 }
  0xfb   :  { %v564_v32 = vmax.f32 %v436_v20, 0.0  ;;  %v166_v20 = vld [vmem:[#allocation3 + $0x310] sm:$0xff]  ;;  %v569_v23 = vmax.f32 %v441_v13, 0.0 }
  0xfc   :  { %v677_v35 = vpack.c.bf16 %v559_v26, %v557_v25  ;;  %v304_v25 = vmul.f32 %v11245_v31, %v164_v19  ;;  %v306_v26 = vmul.f32 %v11245_v31, %v166_v20  ;;  %v574_v27 = vmax.f32 %v446_v17, 0.0  ;;  %v176_v17 = vld [vmem:[#allocation3 + $0x360] sm:$0xff]  ;;  %v181_v19 = vld [vmem:[#allocation3 + $0x388] sm:$0xff]  ;;  %v183_v20 = vld [vmem:[#allocation3 + $0x398] sm:$0xff] }
  0xfd   :  { %v680_v39 = vpack.c.bf16 %v564_v32, %v562_v30  ;;  %v309_v30 = vmul.f32 %v11223_v12, %v169_v21  ;;  %v311_v32 = vmul.f32 %v11223_v12, %v171_v22 }
 0x100   :  { %967 = vmatmul.mubr.bf16.gmra.mrb[68].mxu0 %v671_v38  ;;  %v435_v38 = vadd.f32 %v11249_v37, %v294_v29 }
 0x101   :  { %974 = vmatprep.mubr.bf16.mxu0 %v674_v41  ;;  %v440_v41 = vadd.f32 %v11229_v15, %v299_v34  ;;  %v445_v34 = vadd.f32 %v11249_v37, %v304_v25 }
 0x102   :  { %v563_v47 = vmax.f32 %v435_v38, 0.0  ;;  %v450_v38 = vadd.f32 %v11229_v15, %v309_v30 }
 0x103   :  { %v568_v51 = vmax.f32 %v440_v41, 0.0  ;;  %v170_v41 = vld [vmem:[#allocation3 + $0x330] sm:$0xff]  ;;  %v573_v44 = vmax.f32 %v445_v34, 0.0  ;;  %v180_v34 = vld [vmem:[#allocation3 + $0x380] sm:$0xff] }
 0x104   :  { %v679_v54 = vpack.c.bf16 %v563_v47, %v561_v46  ;;  %v308_v46 = vmul.f32 %v11245_v31, %v168_v40  ;;  %v310_v47 = vmul.f32 %v11245_v31, %v170_v41  ;;  %v578_v48 = vmax.f32 %v450_v38, 0.0  ;;  %v185_v40 = vld [vmem:[#allocation3 + $0x3a8] sm:$0xff]  ;;  %v187_v41 = vld [vmem:[#allocation3 + $0x3b8] sm:$0xff] }
 0x105   :  { %v682_v57 = vpack.c.bf16 %v568_v51, %v566_v50  ;;  %v313_v50 = vmul.f32 %v11223_v12, %v173_v42  ;;  %v315_v51 = vmul.f32 %v11223_v12, %v175_v43  ;;  %v320_v42 = vmul.f32 %v11245_v31, %v180_v34  ;;  %v190_v34 = vld [vmem:[#allocation3 + $0x3d0] sm:$0xff] }
 0x108   :  { %975 = vmatmul.mubr.bf16.gmra.mrb[72].mxu0 %v673_v56  ;;  %v439_v56 = vadd.f32 %v11249_v37, %v298_v49 }
 0x109   :  { %982 = vmatprep.mubr.bf16.mxu0 %v676_v59  ;;  %v444_v59 = vadd.f32 %v11229_v15, %v303_v53  ;;  %v449_v53 = vadd.f32 %v11249_v37, %v308_v46  ;;  %v11507_v46 = vld [vmem:[%s16049_s3 + $0x4] ss:$0 sm:$0xff] }
 0x10a   :  { %v567_v2 = vmax.f32 %v439_v56, 0.0  ;;  %v454_v56 = vadd.f32 %v11229_v15, %v313_v50  ;;  %v327_v50 = vmul.f32 %v11223_v12, %v187_v41 }
 0x10b   :  { %v572_v8 = vmax.f32 %v444_v59, 0.0  ;;  %v174_v59 = vld [vmem:[#allocation3 + $0x350] sm:$0xff]  ;;  %v577_v62 = vmax.f32 %v449_v53, 0.0  ;;  %v461_v53 = vadd.f32 %v11249_v37, %v320_v42 }
 0x10c   :  { %v681_v11 = vpack.c.bf16 %v567_v2, %v565_v1  ;;  %v312_v1 = vmul.f32 %v11245_v31, %v172_v58  ;;  %v314_v2 = vmul.f32 %v11245_v31, %v174_v59  ;;  %v582_v4 = vmax.f32 %v454_v56, 0.0  ;;  %v184_v58 = vld [vmem:[#allocation3 + $0x3a0] sm:$0xff] }
 0x10d   :  { %v684_v16 = vpack.c.bf16 %v572_v8, %v570_v6  ;;  %v317_v6 = vmul.f32 %v11223_v12, %v177_v60  ;;  %v319_v8 = vmul.f32 %v11223_v12, %v179_v61  ;;  %v1088_v61 = vld [vmem:[#allocation5] sm:$0xff] }
 0x110   :  { %983 = vmatmul.mubr.bf16.gmra.mrb[76].mxu0 %v675_v14  ;;  %v443_v14 = vadd.f32 %v11249_v37, %v302_v5 }
 0x111   :  { %990 = vmatprep.mubr.bf16.mxu0 %v678_v18  ;;  %v448_v18 = vadd.f32 %v11229_v15, %v307_v10  ;;  %v453_v10 = vadd.f32 %v11249_v37, %v312_v1  ;;  %v186_v1 = vld [vmem:[#allocation3 + $0x3b0] sm:$0xff] }
 0x112   :  { %v571_v24 = vmax.f32 %v443_v14, 0.0  ;;  %v458_v14 = vadd.f32 %v11229_v15, %v317_v6  ;;  %v189_v6 = vld [vmem:[#allocation3 + $0x3c8] sm:$0xff] }
 0x113   :  { %v576_v29 = vmax.f32 %v448_v18, 0.0  ;;  %v178_v18 = vld [vmem:[#allocation3 + $0x370] sm:$0xff]  ;;  %v581_v21 = vmax.f32 %v453_v10, 0.0 }
 0x114   :  { %v683_v33 = vpack.c.bf16 %v571_v24, %v569_v23  ;;  %v316_v23 = vmul.f32 %v11245_v31, %v176_v17  ;;  %v318_v24 = vmul.f32 %v11245_v31, %v178_v18  ;;  %v586_v25 = vmax.f32 %v458_v14, 0.0 }
 0x115   :  { %v686_v36 = vpack.c.bf16 %v576_v29, %v574_v27  ;;  %v321_v27 = vmul.f32 %v11223_v12, %v181_v19  ;;  %v323_v29 = vmul.f32 %v11223_v12, %v183_v20  ;;  %v326_v17 = vmul.f32 %v11245_v31, %v186_v1 }
 0x116   :  { %v329_v20 = vmul.f32 %v11223_v12, %v189_v6 }
 0x117   :  { %v462_v38 = vadd.f32 %v11229_v15, %v321_v27 }
 0x118   :  { %991 = vmatmul.mubr.bf16.gmra.mrb[80].mxu0 %v677_v35  ;;  %v447_v35 = vadd.f32 %v11249_v37, %v306_v26 }
 0x119   :  { %998 = vmatprep.mubr.bf16.mxu0 %v680_v39  ;;  %v452_v39 = vadd.f32 %v11229_v15, %v311_v32  ;;  %v457_v32 = vadd.f32 %v11249_v37, %v316_v23 }
 0x11a   :  { %v575_v45 = vmax.f32 %v447_v35, 0.0  ;;  %v182_v35 = vld [vmem:[#allocation3 + $0x390] sm:$0xff] }
 0x11b   :  { %v580_v49 = vmax.f32 %v452_v39, 0.0  ;;  %v464_v39 = vadd.f32 %v11229_v15, %v323_v29  ;;  %v322_v43 = vmul.f32 %v11245_v31, %v182_v35  ;;  %v1090_v35 = vld [vmem:[#allocation5 + $0x10] sm:$0xff] }
 0x11c   :  { %v685_v52 = vpack.c.bf16 %v575_v45, %v573_v44  ;;  %v585_v44 = vmax.f32 %v457_v32, 0.0  ;;  %v467_v32 = vadd.f32 %v11249_v37, %v326_v17 }
 0x11d   :  { %v688_v55 = vpack.c.bf16 %v580_v49, %v578_v48  ;;  %v592_v48 = vmax.f32 %v464_v39, 0.0  ;;  %v325_v49 = vmul.f32 %v11223_v12, %v185_v40  ;;  %v470_v39 = vadd.f32 %v11229_v15, %v329_v20 }
 0x120   :  { %999 = vmatmul.mubr.bf16.gmra.mrb[84].mxu0 %v679_v54  ;;  %v451_v54 = vadd.f32 %v11249_v37, %v310_v47  ;;  %v590_v47 = vmax.f32 %v462_v38, 0.0 }
 0x121   :  { %1006 = vmatprep.mubr.bf16.mxu0 %v682_v57  ;;  %v456_v57 = vadd.f32 %v11229_v15, %v315_v51 }
 0x122   :  { %v579_v63 = vmax.f32 %v451_v54, 0.0  ;;  %v463_v54 = vadd.f32 %v11249_v37, %v322_v43  ;;  %v694_v60 = vpack.c.bf16 %v592_v48, %v590_v47  ;;  %v195_v47 = vld [vmem:[#allocation3 + $0x3f8] sm:$0xff] }
 0x123   :  { %v584_v5 = vmax.f32 %v456_v57, 0.0  ;;  %v1091_v48 = vld [vmem:[#allocation5 + $0x18] sm:$0xff] }
 0x124   :  { %v687_v9 = vpack.c.bf16 %v579_v63, %v577_v62  ;;  %v466_v62 = vadd.f32 %v11229_v15, %v325_v49  ;;  %v468_v63 = vadd.f32 %v11229_v15, %v327_v50  ;;  %v591_v10 = vmax.f32 %v463_v54, 0.0 }
 0x125   :  { %v690_v13 = vpack.c.bf16 %v584_v5, %v582_v4  ;;  %v330_v50 = vmul.f32 %v11245_v31, %v190_v34 }
 0x126   :  { %v594_v18 = vmax.f32 %v466_v62, 0.0  ;;  %v596_v19 = vmax.f32 %v468_v63, 0.0 }
 0x127   :  { %v471_v1 = vadd.f32 %v11249_v37, %v330_v50 }
 0x128   :  { %1007 = vmatmul.mubr.bf16.gmra.mrb[88].mxu0 %v681_v11  ;;  %v455_v11 = vadd.f32 %v11249_v37, %v314_v2  ;;  %v696_v38 = vpack.c.bf16 %v596_v19, %v594_v18 }
 0x129   :  { %1014 = vmatprep.mubr.bf16.mxu0 %v684_v16  ;;  %v460_v16 = vadd.f32 %v11229_v15, %v319_v8  ;;  %v191_v8 = vld [vmem:[#allocation3 + $0x3d8] sm:$0xff] }
 0x12a   :  { %v583_v22 = vmax.f32 %v455_v11, 0.0  ;;  %v1089_v11 = vld [vmem:[#allocation5 + $0x8] sm:$0xff] }
 0x12b   :  { %v588_v26 = vmax.f32 %v460_v16, 0.0 }
 0x12c   :  { %v689_v30 = vpack.c.bf16 %v583_v22, %v581_v21  ;;  %v331_v21 = vmul.f32 %v11223_v12, %v191_v8 }
 0x12e   :  { %v472_v40 = vadd.f32 %v11229_v15, %v331_v21  ;;  %v1093_v21 = vld [vmem:[#allocation5 + $0x28] sm:$0xff] }
 0x130   :  { %1015 = vmatmul.mubr.bf16.gmra.mrb[92].mxu0 %v683_v33  ;;  %v459_v33 = vadd.f32 %v11249_v37, %v318_v24 }
 0x131   :  { %1022 = vmatprep.mubr.bf16.mxu0 %v686_v36  ;;  %v692_v36 = vpack.c.bf16 %v588_v26, %v586_v25 }
 0x132   :  { %v587_v45 = vmax.f32 %v459_v33, 0.0  ;;  %v188_v33 = vld [vmem:[#allocation3 + $0x3c0] sm:$0xff] }
 0x133   :  { %v328_v49 = vmul.f32 %v11245_v31, %v188_v33 }
 0x134   :  { %v691_v57 = vpack.c.bf16 %v587_v45, %v585_v44  ;;  %v193_v45 = vld [vmem:[#allocation3 + $0x3e8] sm:$0xff] }
 0x135   :  { %v469_v63 = vadd.f32 %v11249_v37, %v328_v49  ;;  %v1095_v49 = vld [vmem:[#allocation5 + $0x38] sm:$0xff] }
 0x138   :  { %1023 = vmatmul.mubr.bf16.gmra.mrb[96].mxu0 %v685_v52  ;;  %v11514_v52 = vld [vmem:[%s16049_s3 + $0x3] ss:$0 sm:$0xff] }
 0x139   :  { %1030 = vmatprep.mubr.bf16.mxu0 %v688_v55 }
 0x140   :  { %1031 = vmatmul.mubr.bf16.gmra.mrb[100].mxu0 %v687_v9  ;;  %v589_v9 = vmax.f32 %v461_v53, 0.0 }
 0x141   :  { %1038 = vmatprep.mubr.bf16.mxu0 %v690_v13  ;;  %v324_v13 = vmul.f32 %v11245_v31, %v184_v58  ;;  %v600_v58 = vmax.f32 %v472_v40, 0.0 }
 0x142   :  { %v693_v24 = vpack.c.bf16 %v591_v10, %v589_v9  ;;  %v192_v9 = vld [vmem:[#allocation3 + $0x3e0] sm:$0xff] }
 0x143   :  { %v465_v25 = vadd.f32 %v11249_v37, %v324_v13  ;;  %v1092_v10 = vld [vmem:[#allocation5 + $0x20] sm:$0xff] }
 0x145   :  { %v593_v54 = vmax.f32 %v465_v25, 0.0 }
 0x148   :  { %1039 = vmatmul.mubr.bf16.gmra.mrb[104].mxu0 %v689_v30 }
 0x149   :  { %1046 = vmatprep.mubr.bf16.mxu0 %v692_v36 }
 0x14b   :  { %v832_v51 = vpop.f32.mrb[0].mxu0 }
 0x14c   :  { %v833_v55 = vadd.f32 %v832_v51, %v11507_v46  ;;  %v834_v56 = vpop.f32.mrb[1].mxu0 }
 0x14d   :  { %v835_v59 = vpop.f32.mrb[2].mxu0  ;;  %v10610_v56 = vld [vmem:[%s16052_s6 + $0x40] sm:$0xff]  }
 0x14e   :  { %v1152_v2 = vsub.f32 %v833_v55, %v11514_v52  ;;  %v836_v4 = vadd.f32 %v835_v59, %v11507_v46  ;;  %v837_v5 = vpop.f32.mrb[3].mxu0  ;;  %v595_v55 = vmax.f32 %v467_v32, 0.0  ;;  %v333_v59 = vmul.f32 %v11223_v12, %v193_v45  ;;  %10174 = vmatprep.subr.bf16.mxu1 %v10610_v56 }
 0x150   :  { %v1153_v14 = vsub.f32 %v836_v4, %v11514_v52  ;;  %1047 = vmatmul.mubr.bf16.gmra.mrb[108].mxu0 %v691_v57  ;;  %v1216_v16 = vmul.f32 %v1152_v2, %v1088_v61  ;;  %v598_v57 = vmax.f32 %v470_v39, 0.0  ;;  %v695_v5 = vpack.c.bf16 %v595_v55, %v593_v54 }
 0x151   :  { %1054 = vmatprep.mubr.bf16.mxu0 %v694_v60  ;;  %v335_v60 = vmul.f32 %v11223_v12, %v195_v47  ;;  %v474_v12 = vadd.f32 %v11229_v15, %v333_v59 }
 0x152   :  { %v1217_v22 = vmul.f32 %v1153_v14, %v1089_v11  ;;  %v1280_v29 = vadd.f32 %v1216_v16, %v11514_v52  ;;  %v698_v13 = vpack.c.bf16 %v600_v58, %v598_v57  ;;  %v194_v16 = vld [vmem:[#allocation3 + $0x3f0] sm:$0xff] }
 0x153   :  { %v840_v23 = vpop.f32.mrb[4].mxu0  ;;  %v476_v14 = vadd.f32 %v11229_v15, %v335_v60  ;;  %v334_v15 = vmul.f32 %v11245_v31, %v194_v16  ;;  %v1098_v16 = vld [vmem:[#allocation5 + $0x50] sm:$0xff] }
 0x154   :  { %v841_v26 = vadd.f32 %v840_v23, %v11507_v46  ;;  %v842_v27 = vpop.f32.mrb[5].mxu0  ;;  %v1281_v30 = vadd.f32 %v1217_v22, %v11514_v52  ;;  %v597_v22 = vmax.f32 %v469_v63, 0.0  ;;  %v599_v23 = vmax.f32 %v471_v1, 0.0 }
 0x155   :  { %v843_v36 = vpop.f32.mrb[6].mxu0  ;;  %v602_v27 = vmax.f32 %v474_v12, 0.0  ;;  %v475_v40 = vadd.f32 %v11249_v37, %v334_v15 }
 0x156   :  { %v1154_v41 = vsub.f32 %v841_v26, %v11514_v52  ;;  %v844_v42 = vadd.f32 %v843_v36, %v11507_v46  ;;  %v845_v43 = vpop.f32.mrb[7].mxu0  ;;  %v11537_v44 = vpack.c.bf16 %v1281_v30, %v1280_v29  ;;  %v604_v29 = vmax.f32 %v476_v14, 0.0 }
 0x157   :  { %v697_v33 = vpack.c.bf16 %v599_v23, %v597_v22  ;;  %v603_v54 = vmax.f32 %v475_v40, 0.0  ;;  %v1099_v23 = vld [vmem:[#allocation5 + $0x58] sm:$0xff]  ;;  %v1101_v40 = vld [vmem:[#allocation5 + $0x68] sm:$0xff] }
 0x158   :  { %v1218_v51 = vmul.f32 %v1154_v41, %v1090_v35  ;;  %v1155_v53 = vsub.f32 %v844_v42, %v11514_v52  ;;  %1055 = vmatmul.mubr.bf16.gmra.mrb[112].mxu0 %v693_v24  ;;  %10110 = vmatprep.mubr.bf16.mxu1 %v11537_v44  ;;  %v332_v24 = vmul.f32 %v11245_v31, %v192_v9  ;;  %v1094_v41 = vld [vmem:[#allocation5 + $0x30] sm:$0xff] }
 0x159   :  { %1062 = vmatprep.mubr.bf16.mxu0 %v696_v38  ;;  %v700_v42 = vpack.c.bf16 %v604_v29, %v602_v27 }
 0x15a   :  { %v1219_v61 = vmul.f32 %v1155_v53, %v1091_v48  ;;  %v1282_v6 = vadd.f32 %v1218_v51, %v11514_v52  ;;  %v473_v34 = vadd.f32 %v11249_v37, %v332_v24 }
 0x15b   :  { %v848_v62 = vpop.f32.mrb[8].mxu0 }
 0x15c   :  { %v849_v2 = vadd.f32 %v848_v62, %v11507_v46  ;;  %v850_v4 = vpop.f32.mrb[9].mxu0  ;;  %v1283_v8 = vadd.f32 %v1219_v61, %v11514_v52  ;;  %v601_v53 = vmax.f32 %v473_v34, 0.0  ;;  %v1096_v61 = vld [vmem:[#allocation5 + $0x40] sm:$0xff] }
 0x15d   :  { %v851_v11 = vpop.f32.mrb[10].mxu0  ;;  %v1100_v34 = vld [vmem:[#allocation5 + $0x60] sm:$0xff] }
 0x15e   :  { %v1156_v17 = vsub.f32 %v849_v2, %v11514_v52  ;;  %v852_v18 = vadd.f32 %v851_v11, %v11507_v46  ;;  %v853_v19 = vpop.f32.mrb[11].mxu0  ;;  %v11557_v20 = vpack.c.bf16 %v1283_v8, %v1282_v6  ;;  %v699_v58 = vpack.c.bf16 %v603_v54, %v601_v53  ;;  %v1102_v53 = vld [vmem:[#allocation5 + $0x70] sm:$0xff] }
 0x160   :  { %v1220_v25 = vmul.f32 %v1156_v17, %v1092_v10  ;;  %v1157_v26 = vsub.f32 %v852_v18, %v11514_v52  ;;  %1063 = vmatmul.mubr.bf16.gmra.mrb[116].mxu0 %v695_v5  ;;  %10111 = vmatmul.mubr.bf16.vlgmr.msra.gmra.mrb[0].mxu1 %v11557_v20  ;;  %v1097_v5 = vld [vmem:[#allocation5 + $0x48] sm:$0xff] }
 0x161   :  { %1070 = vmatprep.mubr.bf16.mxu0 %v698_v13  ;;  %10175 = vmatpush3.bf16.msra.mxu1 %v10610_v56 }
 0x162   :  { %v1221_v30 = vmul.f32 %v1157_v26, %v1093_v21  ;;  %v1284_v38 = vadd.f32 %v1220_v25, %v11514_v52 }
 0x163   :  { %v856_v32 = vpop.f32.mrb[12].mxu0 }
 0x164   :  { %v857_v35 = vadd.f32 %v856_v32, %v11507_v46  ;;  %v858_v36 = vpop.f32.mrb[13].mxu0  ;;  %v1285_v39 = vadd.f32 %v1221_v30, %v11514_v52 }
 0x165   :  { %v859_v31 = vpop.f32.mrb[14].mxu0 }
 0x166   :  { %v1158_v43 = vsub.f32 %v857_v35, %v11514_v52  ;;  %v860_v45 = vadd.f32 %v859_v31, %v11507_v46  ;;  %v861_v47 = vpop.f32.mrb[15].mxu0  ;;  %v11570_v48 = vpack.c.bf16 %v1285_v39, %v1284_v38 }
 0x168   :  { %v1222_v50 = vmul.f32 %v1158_v43, %v1094_v41  ;;  %v1159_v51 = vsub.f32 %v860_v45, %v11514_v52  ;;  %1071 = vmatmul.mubr.bf16.gmra.mrb[120].mxu0 %v697_v33  ;;  %10114 = vmatprep.mubr.bf16.mxu1 %v11570_v48 }
 0x169   :  { %1078 = vmatprep.mubr.bf16.mxu0 %v700_v42 }
 0x16a   :  { %v1223_v37 = vmul.f32 %v1159_v51, %v1095_v49  ;;  %v1286_v59 = vadd.f32 %v1222_v50, %v11514_v52 }
 0x16b   :  { %v864_v55 = vpop.f32.mrb[16].mxu0 }
 0x16c   :  { %v865_v56 = vadd.f32 %v864_v55, %v11507_v46  ;;  %v866_v57 = vpop.f32.mrb[17].mxu0  ;;  %v1287_v60 = vadd.f32 %v1223_v37, %v11514_v52 }
 0x16d   :  { %v867_v62 = vpop.f32.mrb[18].mxu0  ;;  %v1103_v57 = vld [vmem:[#allocation5 + $0x78] sm:$0xff] }
 0x16e   :  { %v1160_v63 = vsub.f32 %v865_v56, %v11514_v52  ;;  %v868_v1 = vadd.f32 %v867_v62, %v11507_v46  ;;  %v869_v2 = vpop.f32.mrb[19].mxu0  ;;  %v11579_v4 = vpack.c.bf16 %v1287_v60, %v1286_v59 }
 0x170   :  { %v1224_v6 = vmul.f32 %v1160_v63, %v1096_v61  ;;  %v1161_v8 = vsub.f32 %v868_v1, %v11514_v52  ;;  %1079 = vmatmul.mubr.bf16.gmra.mrb[124].mxu0 %v699_v58  ;;  %10115 = vmatmul.mubr.bf16.gmra.mrb[4].mxu1 %v11579_v4 }
 0x172   :  { %v1225_v9 = vmul.f32 %v1161_v8, %v1097_v5  ;;  %v1288_v12 = vadd.f32 %v1224_v6, %v11514_v52  ;;  %v1104_v6 = vld [vmem:[#allocation5 + $0x80] sm:$0xff] }
 0x173   :  { %v872_v10 = vpop.f32.mrb[20].mxu0 }
 0x174   :  { %v873_v11 = vadd.f32 %v872_v10, %v11507_v46  ;;  %v874_v13 = vpop.f32.mrb[21].mxu0  ;;  %v1289_v14 = vadd.f32 %v1225_v9, %v11514_v52 }
 0x175   :  { %v875_v17 = vpop.f32.mrb[22].mxu0  ;;  %v1105_v13 = vld [vmem:[#allocation5 + $0x88] sm:$0xff] }
 0x176   :  { %v1162_v18 = vsub.f32 %v873_v11, %v11514_v52  ;;  %v876_v19 = vadd.f32 %v875_v17, %v11507_v46  ;;  %v877_v21 = vpop.f32.mrb[23].mxu0  ;;  %v11588_v22 = vpack.c.bf16 %v1289_v14, %v1288_v12 }
 0x178   :  { %v1226_v24 = vmul.f32 %v1162_v18, %v1098_v16  ;;  %v1163_v25 = vsub.f32 %v876_v19, %v11514_v52  ;;  %10118 = vmatprep.mubr.bf16.mxu1 %v11588_v22 }
 0x17a   :  { %v1227_v26 = vmul.f32 %v1163_v25, %v1099_v23  ;;  %v1290_v30 = vadd.f32 %v1226_v24, %v11514_v52  ;;  %v1106_v25 = vld [vmem:[#allocation5 + $0x90] sm:$0xff] }
 0x17b   :  { %v880_v15 = vpop.f32.mrb[24].mxu0 }
 0x17c   :  { %v881_v27 = vadd.f32 %v880_v15, %v11507_v46  ;;  %v882_v29 = vpop.f32.mrb[25].mxu0  ;;  %v1291_v32 = vadd.f32 %v1227_v26, %v11514_v52 }
 0x17d   :  { %v883_v33 = vpop.f32.mrb[26].mxu0 }
 0x17e   :  { %v1164_v35 = vsub.f32 %v881_v27, %v11514_v52  ;;  %v884_v36 = vadd.f32 %v883_v33, %v11507_v46  ;;  %v885_v38 = vpop.f32.mrb[27].mxu0  ;;  %v11597_v39 = vpack.c.bf16 %v1291_v32, %v1290_v30  ;;  %v1107_v30 = vld [vmem:[#allocation5 + $0x98] sm:$0xff] }
 0x180   :  { %v1165_v41 = vsub.f32 %v884_v36, %v11514_v52  ;;  %10119 = vmatmul.mubr.bf16.gmra.mrb[8].mxu1 %v11597_v39  ;;  %v1228_v31 = vmul.f32 %v1164_v35, %v1100_v34 }
 0x182   :  { %v1229_v42 = vmul.f32 %v1165_v41, %v1101_v40  ;;  %v1292_v49 = vadd.f32 %v1228_v31, %v11514_v52 }
 0x183   :  { %v888_v43 = vpop.f32.mrb[28].mxu0 }
 0x184   :  { %v889_v45 = vadd.f32 %v888_v43, %v11507_v46  ;;  %v890_v47 = vpop.f32.mrb[29].mxu0  ;;  %v1293_v50 = vadd.f32 %v1229_v42, %v11514_v52  ;;  %v1108_v42 = vld [vmem:[#allocation5 + $0xa0] sm:$0xff] }
 0x185   :  { %v891_v51 = vpop.f32.mrb[30].mxu0 }
 0x186   :  { %v1166_v54 = vsub.f32 %v889_v45, %v11514_v52  ;;  %v892_v37 = vadd.f32 %v891_v51, %v11507_v46  ;;  %v893_v55 = vpop.f32.mrb[31].mxu0  ;;  %v11606_v56 = vpack.c.bf16 %v1293_v50, %v1292_v49  ;;  %v1109_v50 = vld [vmem:[#allocation5 + $0xa8] sm:$0xff] }
 0x188   :  { %v1167_v58 = vsub.f32 %v892_v37, %v11514_v52  ;;  %10122 = vmatprep.mubr.bf16.mxu1 %v11606_v56  ;;  %v1230_v59 = vmul.f32 %v1166_v54, %v1102_v53 }
 0x18a   :  { %v1231_v60 = vmul.f32 %v1167_v58, %v1103_v57  ;;  %v1294_v1 = vadd.f32 %v1230_v59, %v11514_v52 }
 0x18b   :  { %v896_v61 = vpop.f32.mrb[32].mxu0 }
 0x18c   :  { %v897_v62 = vadd.f32 %v896_v61, %v11507_v46  ;;  %v898_v63 = vpop.f32.mrb[33].mxu0  ;;  %v1295_v2 = vadd.f32 %v1231_v60, %v11514_v52  ;;  %v1110_v61 = vld [vmem:[#allocation5 + $0xb0] sm:$0xff] }
 0x18d   :  { %v899_v5 = vpop.f32.mrb[34].mxu0 }
 0x18e   :  { %v1168_v8 = vsub.f32 %v897_v62, %v11514_v52  ;;  %v900_v9 = vadd.f32 %v899_v5, %v11507_v46  ;;  %v901_v10 = vpop.f32.mrb[35].mxu0  ;;  %v11615_v11 = vpack.c.bf16 %v1295_v2, %v1294_v1  ;;  %v1111_v5 = vld [vmem:[#allocation5 + $0xb8] sm:$0xff] }
 0x190   :  { %v1169_v12 = vsub.f32 %v900_v9, %v11514_v52  ;;  %10123 = vmatmul.mubr.bf16.gmra.mrb[12].mxu1 %v11615_v11  ;;  %v1232_v14 = vmul.f32 %v1168_v8, %v1104_v6 }
 0x192   :  { %v1233_v16 = vmul.f32 %v1169_v12, %v1105_v13  ;;  %v1296_v21 = vadd.f32 %v1232_v14, %v11514_v52 }
 0x193   :  { %v904_v17 = vpop.f32.mrb[36].mxu0 }
 0x194   :  { %v905_v18 = vadd.f32 %v904_v17, %v11507_v46  ;;  %v906_v19 = vpop.f32.mrb[37].mxu0  ;;  %v1297_v23 = vadd.f32 %v1233_v16, %v11514_v52 }
 0x195   :  { %v907_v24 = vpop.f32.mrb[38].mxu0 }
 0x196   :  { %v1170_v26 = vsub.f32 %v905_v18, %v11514_v52  ;;  %v908_v15 = vadd.f32 %v907_v24, %v11507_v46  ;;  %v909_v27 = vpop.f32.mrb[39].mxu0  ;;  %v11624_v29 = vpack.c.bf16 %v1297_v23, %v1296_v21  ;;  %v1112_v18 = vld [vmem:[#allocation5 + $0xc0] sm:$0xff] }
 0x198   :  { %v1171_v32 = vsub.f32 %v908_v15, %v11514_v52  ;;  %10126 = vmatprep.mubr.bf16.mxu1 %v11624_v29  ;;  %v1234_v33 = vmul.f32 %v1170_v26, %v1106_v25  ;;  %v1113_v25 = vld [vmem:[#allocation5 + $0xc8] sm:$0xff] }
 0x19a   :  { %v1235_v34 = vmul.f32 %v1171_v32, %v1107_v30  ;;  %v1298_v40 = vadd.f32 %v1234_v33, %v11514_v52 }
 0x19b   :  { %v912_v35 = vpop.f32.mrb[40].mxu0 }
 0x19c   :  { %v913_v36 = vadd.f32 %v912_v35, %v11507_v46  ;;  %v914_v38 = vpop.f32.mrb[41].mxu0  ;;  %v1299_v41 = vadd.f32 %v1235_v34, %v11514_v52 }
 0x19d   :  { %v915_v31 = vpop.f32.mrb[42].mxu0  ;;  %v1114_v38 = vld [vmem:[#allocation5 + $0xd0] sm:$0xff] }
 0x19e   :  { %v1172_v43 = vsub.f32 %v913_v36, %v11514_v52  ;;  %v916_v45 = vadd.f32 %v915_v31, %v11507_v46  ;;  %v917_v47 = vpop.f32.mrb[43].mxu0  ;;  %v11633_v49 = vpack.c.bf16 %v1299_v41, %v1298_v40 }
 0x1a0   :  { %v1173_v51 = vsub.f32 %v916_v45, %v11514_v52  ;;  %10127 = vmatmul.mubr.bf16.gmra.mrb[16].mxu1 %v11633_v49  ;;  %v1236_v53 = vmul.f32 %v1172_v43, %v1108_v42  ;;  %v1115_v43 = vld [vmem:[#allocation5 + $0xd8] sm:$0xff] }
 0x1a2   :  { %v1237_v54 = vmul.f32 %v1173_v51, %v1109_v50  ;;  %v1300_v58 = vadd.f32 %v1236_v53, %v11514_v52 }
 0x1a3   :  { %v920_v37 = vpop.f32.mrb[44].mxu0 }
 0x1a4   :  { %v921_v55 = vadd.f32 %v920_v37, %v11507_v46  ;;  %v922_v57 = vpop.f32.mrb[45].mxu0  ;;  %v1301_v59 = vadd.f32 %v1237_v54, %v11514_v52 }
 0x1a5   :  { %v923_v60 = vpop.f32.mrb[46].mxu0 }
 0x1a6   :  { %v1174_v62 = vsub.f32 %v921_v55, %v11514_v52  ;;  %v924_v63 = vadd.f32 %v923_v60, %v11507_v46  ;;  %v925_v1 = vpop.f32.mrb[47].mxu0  ;;  %v11642_v2 = vpack.c.bf16 %v1301_v59, %v1300_v58  ;;  %v1116_v58 = vld [vmem:[#allocation5 + $0xe0] sm:$0xff] }
 0x1a8   :  { %v1175_v6 = vsub.f32 %v924_v63, %v11514_v52  ;;  %10130 = vmatprep.mubr.bf16.mxu1 %v11642_v2  ;;  %v1238_v8 = vmul.f32 %v1174_v62, %v1110_v61  ;;  %v1117_v63 = vld [vmem:[#allocation5 + $0xe8] sm:$0xff] }
 0x1aa   :  { %v1239_v9 = vmul.f32 %v1175_v6, %v1111_v5  ;;  %v1302_v14 = vadd.f32 %v1238_v8, %v11514_v52 }
 0x1ab   :  { %v928_v10 = vpop.f32.mrb[48].mxu0 }
 0x1ac   :  { %v929_v13 = vadd.f32 %v928_v10, %v11507_v46  ;;  %v930_v12 = vpop.f32.mrb[49].mxu0  ;;  %v1303_v16 = vadd.f32 %v1239_v9, %v11514_v52 }
 0x1ad   :  { %v931_v17 = vpop.f32.mrb[50].mxu0 }
 0x1ae   :  { %v1176_v19 = vsub.f32 %v929_v13, %v11514_v52  ;;  %v932_v21 = vadd.f32 %v931_v17, %v11507_v46  ;;  %v933_v23 = vpop.f32.mrb[51].mxu0  ;;  %v11651_v24 = vpack.c.bf16 %v1303_v16, %v1302_v14  ;;  %v1118_v16 = vld [vmem:[#allocation5 + $0xf0] sm:$0xff] }
 0x1af   :  { %v1119_v23 = vld [vmem:[#allocation5 + $0xf8] sm:$0xff] }
 0x1b0   :  { %v1177_v26 = vsub.f32 %v932_v21, %v11514_v52  ;;  %10131 = vmatmul.mubr.bf16.gmra.mrb[20].mxu1 %v11651_v24  ;;  %v1240_v15 = vmul.f32 %v1176_v19, %v1112_v18 }
 0x1b2   :  { %v1241_v27 = vmul.f32 %v1177_v26, %v1113_v25  ;;  %v1304_v34 = vadd.f32 %v1240_v15, %v11514_v52 }
 0x1b3   :  { %v936_v30 = vpop.f32.mrb[52].mxu0 }
 0x1b4   :  { %v937_v32 = vadd.f32 %v936_v30, %v11507_v46  ;;  %v938_v33 = vpop.f32.mrb[53].mxu0  ;;  %v1305_v35 = vadd.f32 %v1241_v27, %v11514_v52 }
 0x1b5   :  { %v939_v36 = vpop.f32.mrb[54].mxu0 }
 0x1b6   :  { %v1178_v40 = vsub.f32 %v937_v32, %v11514_v52  ;;  %v940_v41 = vadd.f32 %v939_v36, %v11507_v46  ;;  %v941_v31 = vpop.f32.mrb[55].mxu0  ;;  %v11660_v42 = vpack.c.bf16 %v1305_v35, %v1304_v34  ;;  %v1120_v36 = vld [vmem:[#allocation5 + $0x100] sm:$0xff] }
 0x1b8   :  { %v1179_v45 = vsub.f32 %v940_v41, %v11514_v52  ;;  %10134 = vmatprep.mubr.bf16.mxu1 %v11660_v42  ;;  %v1242_v47 = vmul.f32 %v1178_v40, %v1114_v38 }
 0x1ba   :  { %v1243_v50 = vmul.f32 %v1179_v45, %v1115_v43  ;;  %v1306_v37 = vadd.f32 %v1242_v47, %v11514_v52  ;;  %v1121_v43 = vld [vmem:[#allocation5 + $0x108] sm:$0xff] }
 0x1bb   :  { %v944_v51 = vpop.f32.mrb[56].mxu0 }
 0x1bc   :  { %v945_v53 = vadd.f32 %v944_v51, %v11507_v46  ;;  %v946_v54 = vpop.f32.mrb[57].mxu0  ;;  %v1307_v55 = vadd.f32 %v1243_v50, %v11514_v52 }
 0x1bd   :  { %v947_v57 = vpop.f32.mrb[58].mxu0 }
 0x1be   :  { %v1180_v59 = vsub.f32 %v945_v53, %v11514_v52  ;;  %v948_v60 = vadd.f32 %v947_v57, %v11507_v46  ;;  %v949_v61 = vpop.f32.mrb[59].mxu0  ;;  %v11669_v62 = vpack.c.bf16 %v1307_v55, %v1306_v37 }
 0x1c0   :  { %v1181_v1 = vsub.f32 %v948_v60, %v11514_v52  ;;  %10135 = vmatmul.mubr.bf16.gmra.mrb[24].mxu1 %v11669_v62  ;;  %v1244_v5 = vmul.f32 %v1180_v59, %v1116_v58  ;;  %v1122_v58 = vld [vmem:[#allocation5 + $0x110] sm:$0xff] }
 0x1c2   :  { %v1245_v6 = vmul.f32 %v1181_v1, %v1117_v63  ;;  %v1308_v13 = vadd.f32 %v1244_v5, %v11514_v52  ;;  %v1123_v1 = vld [vmem:[#allocation5 + $0x118] sm:$0xff] }
 0x1c3   :  { %v952_v8 = vpop.f32.mrb[60].mxu0 }
 0x1c4   :  { %v953_v9 = vadd.f32 %v952_v8, %v11507_v46  ;;  %v954_v10 = vpop.f32.mrb[61].mxu0  ;;  %v1309_v12 = vadd.f32 %v1245_v6, %v11514_v52 }
 0x1c5   :  { %v955_v14 = vpop.f32.mrb[62].mxu0 }
 0x1c6   :  { %v1182_v17 = vsub.f32 %v953_v9, %v11514_v52  ;;  %v956_v18 = vadd.f32 %v955_v14, %v11507_v46  ;;  %v957_v19 = vpop.f32.mrb[63].mxu0  ;;  %v11678_v21 = vpack.c.bf16 %v1309_v12, %v1308_v13 }
 0x1c8   :  { %v1183_v25 = vsub.f32 %v956_v18, %v11514_v52  ;;  %10138 = vmatprep.mubr.bf16.mxu1 %v11678_v21  ;;  %v1246_v26 = vmul.f32 %v1182_v17, %v1118_v16  ;;  %v1124_v17 = vld [vmem:[#allocation5 + $0x120] sm:$0xff] }
 0x1ca   :  { %v1247_v15 = vmul.f32 %v1183_v25, %v1119_v23  ;;  %v1310_v33 = vadd.f32 %v1246_v26, %v11514_v52  ;;  %v1125_v26 = vld [vmem:[#allocation5 + $0x128] sm:$0xff] }
 0x1cb   :  { %v960_v27 = vpop.f32.mrb[64].mxu0 }
 0x1cc   :  { %v961_v30 = vadd.f32 %v960_v27, %v11507_v46  ;;  %v962_v32 = vpop.f32.mrb[65].mxu0  ;;  %v1311_v34 = vadd.f32 %v1247_v15, %v11514_v52 }
 0x1cd   :  { %v963_v35 = vpop.f32.mrb[66].mxu0 }
 0x1ce   :  { %v1184_v38 = vsub.f32 %v961_v30, %v11514_v52  ;;  %v964_v40 = vadd.f32 %v963_v35, %v11507_v46  ;;  %v965_v41 = vpop.f32.mrb[67].mxu0  ;;  %v11687_v31 = vpack.c.bf16 %v1311_v34, %v1310_v33 }
 0x1d0   :  { %v1185_v45 = vsub.f32 %v964_v40, %v11514_v52  ;;  %10139 = vmatmul.mubr.bf16.gmra.mrb[28].mxu1 %v11687_v31  ;;  %v1248_v47 = vmul.f32 %v1184_v38, %v1120_v36  ;;  %v1126_v40 = vld [vmem:[#allocation5 + $0x130] sm:$0xff] }
 0x1d2   :  { %v1249_v50 = vmul.f32 %v1185_v45, %v1121_v43  ;;  %v1312_v37 = vadd.f32 %v1248_v47, %v11514_v52 }
 0x1d3   :  { %v968_v51 = vpop.f32.mrb[68].mxu0 }
 0x1d4   :  { %v969_v53 = vadd.f32 %v968_v51, %v11507_v46  ;;  %v970_v54 = vpop.f32.mrb[69].mxu0  ;;  %v1313_v55 = vadd.f32 %v1249_v50, %v11514_v52  ;;  %v1127_v50 = vld [vmem:[#allocation5 + $0x138] sm:$0xff] }
 0x1d5   :  { %v971_v57 = vpop.f32.mrb[70].mxu0 }
 0x1d6   :  { %v1186_v59 = vsub.f32 %v969_v53, %v11514_v52  ;;  %v972_v60 = vadd.f32 %v971_v57, %v11507_v46  ;;  %v973_v61 = vpop.f32.mrb[71].mxu0  ;;  %v11696_v63 = vpack.c.bf16 %v1313_v55, %v1312_v37 }
 0x1d7   :  { %v1128_v61 = vld [vmem:[#allocation5 + $0x140] sm:$0xff] }
 0x1d8   :  { %v1187_v5 = vsub.f32 %v972_v60, %v11514_v52  ;;  %10142 = vmatprep.mubr.bf16.mxu1 %v11696_v63  ;;  %v1250_v6 = vmul.f32 %v1186_v59, %v1122_v58 }
 0x1da   :  { %v1251_v8 = vmul.f32 %v1187_v5, %v1123_v1  ;;  %v1314_v12 = vadd.f32 %v1250_v6, %v11514_v52 }
 0x1db   :  { %v976_v9 = vpop.f32.mrb[72].mxu0 }
 0x1dc   :  { %v977_v10 = vadd.f32 %v976_v9, %v11507_v46  ;;  %v978_v13 = vpop.f32.mrb[73].mxu0  ;;  %v1315_v14 = vadd.f32 %v1251_v8, %v11514_v52  ;;  %v1129_v9 = vld [vmem:[#allocation5 + $0x148] sm:$0xff] }
 0x1dd   :  { %v979_v16 = vpop.f32.mrb[74].mxu0 }
 0x1de   :  { %v1188_v18 = vsub.f32 %v977_v10, %v11514_v52  ;;  %v980_v19 = vadd.f32 %v979_v16, %v11507_v46  ;;  %v981_v23 = vpop.f32.mrb[75].mxu0  ;;  %v11705_v25 = vpack.c.bf16 %v1315_v14, %v1314_v12 }
 0x1e0   :  { %v1189_v15 = vsub.f32 %v980_v19, %v11514_v52  ;;  %10143 = vmatmul.mubr.bf16.gmra.mrb[32].mxu1 %v11705_v25  ;;  %v1252_v27 = vmul.f32 %v1188_v18, %v1124_v17 }
 0x1e2   :  { %v1253_v30 = vmul.f32 %v1189_v15, %v1125_v26  ;;  %v1316_v35 = vadd.f32 %v1252_v27, %v11514_v52  ;;  %v1130_v26 = vld [vmem:[#allocation5 + $0x150] sm:$0xff] }
 0x1e3   :  { %v984_v32 = vpop.f32.mrb[76].mxu0 }
 0x1e4   :  { %v985_v33 = vadd.f32 %v984_v32, %v11507_v46  ;;  %v986_v34 = vpop.f32.mrb[77].mxu0  ;;  %v1317_v36 = vadd.f32 %v1253_v30, %v11514_v52 }
 0x1e5   :  { %v987_v38 = vpop.f32.mrb[78].mxu0 }
 0x1e6   :  { %v1190_v41 = vsub.f32 %v985_v33, %v11514_v52  ;;  %v988_v43 = vadd.f32 %v987_v38, %v11507_v46  ;;  %v989_v45 = vpop.f32.mrb[79].mxu0  ;;  %v11714_v47 = vpack.c.bf16 %v1317_v36, %v1316_v35  ;;  %v1131_v33 = vld [vmem:[#allocation5 + $0x158] sm:$0xff] }
 0x1e8   :  { %v1191_v51 = vsub.f32 %v988_v43, %v11514_v52  ;;  %10146 = vmatprep.mubr.bf16.mxu1 %v11714_v47  ;;  %v1254_v53 = vmul.f32 %v1190_v41, %v1126_v40 }
 0x1ea   :  { %v1255_v54 = vmul.f32 %v1191_v51, %v1127_v50  ;;  %v1318_v58 = vadd.f32 %v1254_v53, %v11514_v52  ;;  %v1132_v51 = vld [vmem:[#allocation5 + $0x160] sm:$0xff] }
 0x1eb   :  { %v992_v37 = vpop.f32.mrb[80].mxu0 }
 0x1ec   :  { %v993_v55 = vadd.f32 %v992_v37, %v11507_v46  ;;  %v994_v57 = vpop.f32.mrb[81].mxu0  ;;  %v1319_v59 = vadd.f32 %v1255_v54, %v11514_v52 }
 0x1ed   :  { %v995_v60 = vpop.f32.mrb[82].mxu0  ;;  %v1133_v57 = vld [vmem:[#allocation5 + $0x168] sm:$0xff] }
 0x1ee   :  { %v1192_v1 = vsub.f32 %v993_v55, %v11514_v52  ;;  %v996_v5 = vadd.f32 %v995_v60, %v11507_v46  ;;  %v997_v6 = vpop.f32.mrb[83].mxu0  ;;  %v11723_v8 = vpack.c.bf16 %v1319_v59, %v1318_v58 }
 0x1f0   :  { %v1193_v10 = vsub.f32 %v996_v5, %v11514_v52  ;;  %10147 = vmatmul.mubr.bf16.gmra.mrb[36].mxu1 %v11723_v8  ;;  %v1256_v13 = vmul.f32 %v1192_v1, %v1128_v61 }
 0x1f2   :  { %v1257_v12 = vmul.f32 %v1193_v10, %v1129_v9  ;;  %v1320_v18 = vadd.f32 %v1256_v13, %v11514_v52  ;;  %v1134_v13 = vld [vmem:[#allocation5 + $0x170] sm:$0xff] }
 0x1f3   :  { %v1000_v14 = vpop.f32.mrb[84].mxu0 }
 0x1f4   :  { %v1001_v16 = vadd.f32 %v1000_v14, %v11507_v46  ;;  %v1002_v17 = vpop.f32.mrb[85].mxu0  ;;  %v1321_v19 = vadd.f32 %v1257_v12, %v11514_v52 }
 0x1f5   :  { %v1003_v23 = vpop.f32.mrb[86].mxu0 }
 0x1f6   :  { %v1194_v15 = vsub.f32 %v1001_v16, %v11514_v52  ;;  %v1004_v27 = vadd.f32 %v1003_v23, %v11507_v46  ;;  %v1005_v30 = vpop.f32.mrb[87].mxu0  ;;  %v11732_v32 = vpack.c.bf16 %v1321_v19, %v1320_v18  ;;  %v1135_v18 = vld [vmem:[#allocation5 + $0x178] sm:$0xff] }
 0x1f8   :  { %v1195_v34 = vsub.f32 %v1004_v27, %v11514_v52  ;;  %10150 = vmatprep.mubr.bf16.mxu1 %v11732_v32  ;;  %v1258_v35 = vmul.f32 %v1194_v15, %v1130_v26 }
 0x1fa   :  { %v1259_v36 = vmul.f32 %v1195_v34, %v1131_v33  ;;  %v1322_v43 = vadd.f32 %v1258_v35, %v11514_v52 }
 0x1fb   :  { %v1008_v38 = vpop.f32.mrb[88].mxu0 }
 0x1fc   :  { %v1009_v40 = vadd.f32 %v1008_v38, %v11507_v46  ;;  %v1010_v41 = vpop.f32.mrb[89].mxu0  ;;  %v1323_v45 = vadd.f32 %v1259_v36, %v11514_v52  ;;  %v1136_v36 = vld [vmem:[#allocation5 + $0x180] sm:$0xff] }
 0x1fd   :  { %v1011_v50 = vpop.f32.mrb[90].mxu0 }
 0x1fe   :  { %v1196_v53 = vsub.f32 %v1009_v40, %v11514_v52  ;;  %v1012_v54 = vadd.f32 %v1011_v50, %v11507_v46  ;;  %v1013_v37 = vpop.f32.mrb[91].mxu0  ;;  %v11741_v55 = vpack.c.bf16 %v1323_v45, %v1322_v43  ;;  %v1137_v45 = vld [vmem:[#allocation5 + $0x188] sm:$0xff] }
 0x200   :  { %v1197_v58 = vsub.f32 %v1012_v54, %v11514_v52  ;;  %10151 = vmatmul.mubr.bf16.gmra.mrb[40].mxu1 %v11741_v55  ;;  %v1260_v59 = vmul.f32 %v1196_v53, %v1132_v51 }
 0x202   :  { %v1261_v60 = vmul.f32 %v1197_v58, %v1133_v57  ;;  %v1324_v6 = vadd.f32 %v1260_v59, %v11514_v52 }
 0x203   :  { %v1016_v61 = vpop.f32.mrb[92].mxu0 }
 0x204   :  { %v1017_v1 = vadd.f32 %v1016_v61, %v11507_v46  ;;  %v1018_v5 = vpop.f32.mrb[93].mxu0  ;;  %v1325_v9 = vadd.f32 %v1261_v60, %v11514_v52  ;;  %v1138_v61 = vld [vmem:[#allocation5 + $0x190] sm:$0xff] }
 0x205   :  { %v1019_v10 = vpop.f32.mrb[94].mxu0 }
 0x206   :  { %v1198_v12 = vsub.f32 %v1017_v1, %v11514_v52  ;;  %v1020_v14 = vadd.f32 %v1019_v10, %v11507_v46  ;;  %v1021_v16 = vpop.f32.mrb[95].mxu0  ;;  %v11750_v17 = vpack.c.bf16 %v1325_v9, %v1324_v6  ;;  %v1139_v10 = vld [vmem:[#allocation5 + $0x198] sm:$0xff] }
 0x208   :  { %v1199_v19 = vsub.f32 %v1020_v14, %v11514_v52  ;;  %10154 = vmatprep.mubr.bf16.mxu1 %v11750_v17  ;;  %v1262_v23 = vmul.f32 %v1198_v12, %v1134_v13 }
 0x20a   :  { %v1263_v26 = vmul.f32 %v1199_v19, %v1135_v18  ;;  %v1326_v33 = vadd.f32 %v1262_v23, %v11514_v52 }
 0x20b   :  { %v1024_v15 = vpop.f32.mrb[96].mxu0 }
 0x20c   :  { %v1025_v27 = vadd.f32 %v1024_v15, %v11507_v46  ;;  %v1026_v30 = vpop.f32.mrb[97].mxu0  ;;  %v1327_v34 = vadd.f32 %v1263_v26, %v11514_v52 }
 0x20d   :  { %v1027_v35 = vpop.f32.mrb[98].mxu0 }
 0x20e   :  { %v1200_v38 = vsub.f32 %v1025_v27, %v11514_v52  ;;  %v1028_v40 = vadd.f32 %v1027_v35, %v11507_v46  ;;  %v1029_v41 = vpop.f32.mrb[99].mxu0  ;;  %v11759_v43 = vpack.c.bf16 %v1327_v34, %v1326_v33  ;;  %v1140_v27 = vld [vmem:[#allocation5 + $0x1a0] sm:$0xff] }
 0x210   :  { %v1201_v50 = vsub.f32 %v1028_v40, %v11514_v52  ;;  %10155 = vmatmul.mubr.bf16.gmra.mrb[44].mxu1 %v11759_v43  ;;  %v1264_v51 = vmul.f32 %v1200_v38, %v1136_v36  ;;  %v1141_v36 = vld [vmem:[#allocation5 + $0x1a8] sm:$0xff] }
 0x212   :  { %v1265_v53 = vmul.f32 %v1201_v50, %v1137_v45  ;;  %v1328_v58 = vadd.f32 %v1264_v51, %v11514_v52 }
 0x213   :  { %v1032_v54 = vpop.f32.mrb[100].mxu0 }
 0x214   :  { %v1033_v37 = vadd.f32 %v1032_v54, %v11507_v46  ;;  %v1034_v57 = vpop.f32.mrb[101].mxu0  ;;  %v1329_v59 = vadd.f32 %v1265_v53, %v11514_v52 }
 0x215   :  { %v1035_v60 = vpop.f32.mrb[102].mxu0  ;;  %v1142_v57 = vld [vmem:[#allocation5 + $0x1b0] sm:$0xff] }
 0x216   :  { %v1202_v1 = vsub.f32 %v1033_v37, %v11514_v52  ;;  %v1036_v5 = vadd.f32 %v1035_v60, %v11507_v46  ;;  %v1037_v6 = vpop.f32.mrb[103].mxu0  ;;  %v11768_v9 = vpack.c.bf16 %v1329_v59, %v1328_v58  ;;  %v11788_v59 = vld [vmem:[%s16049_s3 + $0x4] ss:$0 sm:$0xff] }
 0x218   :  { %v1203_v13 = vsub.f32 %v1036_v5, %v11514_v52  ;;  %10158 = vmatprep.mubr.bf16.mxu1 %v11768_v9  ;;  %v1266_v12 = vmul.f32 %v1202_v1, %v1138_v61 }
 0x21a   :  { %v1267_v14 = vmul.f32 %v1203_v13, %v1139_v10  ;;  %v1330_v23 = vadd.f32 %v1266_v12, %v11514_v52 }
 0x21b   :  { %v1040_v16 = vpop.f32.mrb[104].mxu0 }
 0x21c   :  { %v1041_v18 = vadd.f32 %v1040_v16, %v11507_v46  ;;  %v1042_v19 = vpop.f32.mrb[105].mxu0  ;;  %v1331_v26 = vadd.f32 %v1267_v14, %v11514_v52  ;;  %v11799_v16 = vld [vmem:[%s16049_s3 + $0x3] ss:$0 sm:$0xff] }
 0x21d   :  { %v1043_v15 = vpop.f32.mrb[106].mxu0 }
 0x21e   :  { %v1204_v30 = vsub.f32 %v1041_v18, %v11514_v52  ;;  %v1044_v33 = vadd.f32 %v1043_v15, %v11507_v46  ;;  %v1045_v34 = vpop.f32.mrb[107].mxu0  ;;  %v11777_v35 = vpack.c.bf16 %v1331_v26, %v1330_v23  ;;  %v1144_v26 = vld [vmem:[#allocation5 + $0x1c0] sm:$0xff] }
 0x220   :  { %v1205_v38 = vsub.f32 %v1044_v33, %v11514_v52  ;;  %10159 = vmatmul.mubr.bf16.gmra.mrb[48].mxu1 %v11777_v35  ;;  %v1268_v40 = vmul.f32 %v1204_v30, %v1140_v27  ;;  %v1145_v33 = vld [vmem:[#allocation5 + $0x1c8] sm:$0xff] }
 0x222   :  { %v1269_v41 = vmul.f32 %v1205_v38, %v1141_v36  ;;  %v1332_v53 = vadd.f32 %v1268_v40, %v11514_v52  ;;  %v11812_v38 = vld [vmem:[%s16049_s3 + $0x16] ss:$0 sm:$0xff] }
 0x223   :  { %v1048_v45 = vpop.f32.mrb[108].mxu0 }
 0x224   :  { %v1049_v50 = vadd.f32 %v1048_v45, %v11507_v46  ;;  %v1050_v51 = vpop.f32.mrb[109].mxu0  ;;  %v1333_v54 = vadd.f32 %v1269_v41, %v11514_v52  ;;  %v1143_v46 = vld [vmem:[#allocation5 + $0x1b8] sm:$0xff] }
 0x225   :  { %v1051_v37 = vpop.f32.mrb[110].mxu0 }
 0x226   :  { %v1206_v58 = vsub.f32 %v1049_v50, %v11514_v52  ;;  %v1052_v60 = vadd.f32 %v11788_v59, %v1051_v37  ;;  %v1053_v61 = vpop.f32.mrb[111].mxu0  ;;  %v11791_v1 = vpack.c.bf16 %v1333_v54, %v1332_v53 }
 0x227   :  { %v1146_v61 = vld [vmem:[#allocation5 + $0x1d0] sm:$0xff] }
 0x228   :  { %v1207_v5 = vsub.f32 %v1052_v60, %v11514_v52  ;;  %10162 = vmatprep.mubr.bf16.mxu1 %v11791_v1  ;;  %v1270_v6 = vmul.f32 %v1206_v58, %v1142_v57 }
 0x22a   :  { %v1271_v10 = vmul.f32 %v1207_v5, %v1143_v46  ;;  %v1334_v18 = vadd.f32 %v11799_v16, %v1270_v6 }
 0x22b   :  { %v1056_v13 = vpop.f32.mrb[112].mxu0 }
 0x22c   :  { %v1057_v12 = vadd.f32 %v11788_v59, %v1056_v13  ;;  %v1058_v14 = vpop.f32.mrb[113].mxu0  ;;  %v1335_v19 = vadd.f32 %v11799_v16, %v1271_v10 }
 0x22d   :  { %v1059_v23 = vpop.f32.mrb[114].mxu0 }
 0x22e   :  { %v1208_v52 = vsub.f32 %v1057_v12, %v11799_v16  ;;  %v1060_v15 = vadd.f32 %v11788_v59, %v1059_v23  ;;  %v1061_v27 = vpop.f32.mrb[115].mxu0  ;;  %v11805_v30 = vpack.c.bf16 %v1335_v19, %v1334_v18  ;;  %v1147_v19 = vld [vmem:[#allocation5 + $0x1d8] sm:$0xff] }
 0x230   :  { %v1209_v34 = vsub.f32 %v1060_v15, %v11799_v16  ;;  %10163 = vmatmul.mubr.bf16.gmra.mrb[52].mxu1 %v11805_v30  ;;  %v1272_v36 = vmul.f32 %v1208_v52, %v1144_v26  ;;  %v11836_v15 = vld [vmem:[%s16052_s6 + $0x48] sm:$0xff]  }
 0x231   :  { %10240 = vmatprep.subr.bf16.mxu1 %v11836_v15 }
 0x232   :  { %v1273_v40 = vmul.f32 %v1209_v34, %v1145_v33  ;;  %v1336_v54 = vadd.f32 %v11799_v16, %v1272_v36 }
 0x233   :  { %v1064_v41 = vpop.f32.mrb[116].mxu0  ;;  %v10112_v45 = vpop.f32.mrb[0].mxu1 }
 0x234   :  { %v1065_v50 = vadd.f32 %v11788_v59, %v1064_v41  ;;  %v1066_v51 = vpop.f32.mrb[117].mxu0  ;;  %v1538_v53 = vpop.f32.mrb[1].mxu1  ;;  %v1337_v37 = vadd.f32 %v11799_v16, %v1273_v40  ;;  %v11818_v57 = vadd.f32 %v10112_v45, %v11812_v38 }
 0x235   :  { %v1067_v58 = vpop.f32.mrb[118].mxu0  ;;  %v10113_v60 = vpop.f32.mrb[2].mxu1  ;;  %v1794_v14 = vadd.f32 %v11812_v38, %v1538_v53  ;;  %v1148_v51 = vld [vmem:[#allocation5 + $0x1e0] sm:$0xff] }
 0x236   :  { %v1210_v46 = vsub.f32 %v1065_v50, %v11799_v16  ;;  %v1068_v5 = vadd.f32 %v11788_v59, %v1067_v58  ;;  %v11823_v6 = vadd.f32 %v10113_v60, %v11812_v38  ;;  %v1069_v10 = vpop.f32.mrb[119].mxu0  ;;  %v1541_v13 = vpop.f32.mrb[3].mxu1  ;;  %v11825_v12 = vpack.c.bf16 %v1337_v37, %v1336_v54  ;;  %v1149_v60 = vld [vmem:[#allocation5 + $0x1e8] sm:$0xff] }
 0x237   :  { %v1795_v18 = vadd.f32 %v11812_v38, %v1541_v13 }
 0x238   :  { %v1211_v23 = vsub.f32 %v1068_v5, %v11799_v16  ;;  %v1861_v26 = vpack.c.bf16 %v11823_v6, %v11818_v57  ;;  %10166 = vmatprep.mubr.bf16.mxu1 %v11825_v12  ;;  %v1274_v52 = vmul.f32 %v1210_v46, %v1146_v61 }
 0x239   :  { %v1860_v27 = vpack.c.bf16 %v1795_v18, %v1794_v14 }
 0x23a   :  { %v1275_v33 = vmul.f32 %v1211_v23, %v1147_v19  ;;  %v1338_v41 = vadd.f32 %v11799_v16, %v1274_v52 }
 0x23b   :  { %v1072_v34 = vpop.f32.mrb[120].mxu0 }
 0x23c   :  { %v1073_v36 = vadd.f32 %v11788_v59, %v1072_v34  ;;  %v1074_v40 = vpop.f32.mrb[121].mxu0  ;;  %v1339_v45 = vadd.f32 %v11799_v16, %v1275_v33 }
 0x23d   :  { %v1075_v50 = vpop.f32.mrb[122].mxu0  ;;  %v1150_v40 = vld [vmem:[#allocation5 + $0x1f0] sm:$0xff] }
 0x23e   :  { %v1212_v53 = vsub.f32 %v1073_v36, %v11799_v16  ;;  %v1076_v54 = vadd.f32 %v11788_v59, %v1075_v50  ;;  %v1077_v37 = vpop.f32.mrb[123].mxu0  ;;  %v11844_v58 = vpack.c.bf16 %v1339_v45, %v1338_v41 }
 0x240   :  { %v1213_v61 = vsub.f32 %v1076_v54, %v11799_v16  ;;  %10167 = vmatmul.mubr.bf16.gmra.mrb[56].mxu1 %v11844_v58  ;;  %v1276_v46 = vmul.f32 %v1212_v53, %v1148_v51 }
 0x242   :  { %v1277_v5 = vmul.f32 %v1213_v61, %v1149_v60  ;;  %v1340_v23 = vadd.f32 %v11799_v16, %v1276_v46  ;;  %v1151_v61 = vld [vmem:[#allocation5 + $0x1f8] sm:$0xff] }
 0x243   :  { %v1080_v10 = vpop.f32.mrb[124].mxu0  ;;  %v10116_v13 = vpop.f32.mrb[4].mxu1 }
 0x244   :  { %v1081_v14 = vadd.f32 %v11788_v59, %v1080_v10  ;;  %v1082_v18 = vpop.f32.mrb[125].mxu0  ;;  %v1554_v19 = vpop.f32.mrb[5].mxu1  ;;  %v1341_v52 = vadd.f32 %v11799_v16, %v1277_v5  ;;  %v1800_v33 = vadd.f32 %v10116_v13, %v11812_v38 }
 0x245   :  { %v1083_v34 = vpop.f32.mrb[126].mxu0  ;;  %v10117_v36 = vpop.f32.mrb[6].mxu1  ;;  %v1798_v37 = vadd.f32 %v11812_v38, %v1554_v19 }
 0x246   :  { %v1214_v41 = vsub.f32 %v1081_v14, %v11799_v16  ;;  %v1084_v45 = vadd.f32 %v11788_v59, %v1083_v34  ;;  %v1801_v50 = vadd.f32 %v10117_v36, %v11812_v38  ;;  %v1085_v51 = vpop.f32.mrb[127].mxu0  ;;  %v1557_v53 = vpop.f32.mrb[7].mxu1  ;;  %v11855_v54 = vpack.c.bf16 %v1341_v52, %v1340_v23 }
 0x247   :  { %v1799_v60 = vadd.f32 %v11812_v38, %v1557_v53 }
 0x248   :  { %v1215_v46 = vsub.f32 %v1084_v45, %v11799_v16  ;;  %v1863_v5 = vpack.c.bf16 %v1801_v50, %v1800_v33  ;;  %10170 = vmatprep.mubr.bf16.mxu1 %v11855_v54  ;;  %v1278_v10 = vmul.f32 %v1214_v41, %v1150_v40 }
 0x249   :  { %v1862_v13 = vpack.c.bf16 %v1799_v60, %v1798_v37 }
 0x24a   :  { %v1279_v14 = vmul.f32 %v1215_v46, %v1151_v61  ;;  %v1342_v59 = vadd.f32 %v11799_v16, %v1278_v10 }
 0x24c   :  { %v1343_v18 = vadd.f32 %v11799_v16, %v1279_v14 }
 0x24e   :  { %v11863_v34 = vpack.c.bf16 %v1343_v18, %v1342_v59 }
 0x250   :  { %10171 = vmatmul.mubr.bf16.gmra.mrb[60].mxu1 %v11863_v34 }
 0x251   :  { %10176 = vmatprep.mubr.msk.bf16.mxu1 %vm1899_vm0, %v1860_v27 }
 0x253   :  { %v10120_v19 = vpop.f32.mrb[8].mxu1 }
 0x254   :  { %v1570_v23 = vpop.f32.mrb[9].mxu1  ;;  %v1804_v33 = vadd.f32 %v10120_v19, %v11812_v38 }
 0x255   :  { %v10121_v52 = vpop.f32.mrb[10].mxu1  ;;  %v1802_v41 = vadd.f32 %v11812_v38, %v1570_v23 }
 0x256   :  { %v1805_v36 = vadd.f32 %v10121_v52, %v11812_v38  ;;  %v1573_v40 = vpop.f32.mrb[11].mxu1  ;;  %v10612_v52 = vld [vmem:[%s16052_s6 + $0x50] sm:$0xff]  }
 0x257   :  { %v1803_v45 = vadd.f32 %v11812_v38, %v1573_v40 }
 0x258   :  { %v1865_v16 = vpack.c.bf16 %v1805_v36, %v1804_v33  ;;  %10177 = vmatmul.mubr.msk.bf16.vlgmr.msra.gmra.mrb[64].mxu1 %vm1899_vm0, %v1861_v26 }
 0x259   :  { %v1864_v50 = vpack.c.bf16 %v1803_v45, %v1802_v41  ;;  %10180 = vmatprep.mubr.msk.bf16.mxu1 %vm1899_vm0, %v1862_v13  ;;  %10241 = vmatpush3.bf16.msra.mxu1 %v11836_v15 }
 0x25a   :  { %10242 = vmatprep.subr.bf16.mxu1 %v10612_v52 }
 0x25d   :  { %10243 = vmatpush3.bf16.msra.mxu1 %v10612_v52 }
 0x260   :  { %10181 = vmatmul.mubr.msk.bf16.gmra.mrb[68].mxu1 %vm1899_vm0, %v1863_v5 }
 0x261   :  { %10184 = vmatprep.mubr.msk.bf16.mxu1 %vm1899_vm0, %v1864_v50 }
 0x263   :  { %v10124_v27 = vpop.f32.mrb[12].mxu1 }
 0x264   :  { %v1586_v51 = vpop.f32.mrb[13].mxu1  ;;  %v1808_v37 = vadd.f32 %v10124_v27, %v11812_v38 }
 0x265   :  { %v10125_v53 = vpop.f32.mrb[14].mxu1  ;;  %v1806_v57 = vadd.f32 %v11812_v38, %v1586_v51 }
 0x266   :  { %v1809_v60 = vadd.f32 %v10125_v53, %v11812_v38  ;;  %v1589_v61 = vpop.f32.mrb[15].mxu1 }
 0x267   :  { %v1807_v6 = vadd.f32 %v11812_v38, %v1589_v61 }
 0x268   :  { %v1867_v26 = vpack.c.bf16 %v1809_v60, %v1808_v37  ;;  %10185 = vmatmul.mubr.msk.bf16.gmra.mrb[72].mxu1 %vm1899_vm0, %v1865_v16 }
 0x269   :  { %v1866_v15 = vpack.c.bf16 %v1807_v6, %v1806_v57  ;;  %v11904_v57 = vld [vmem:[%s16052_s6 + $0x58] sm:$0xff]  }
 0x26a   :  { %10308 = vmatprep.subr.bf16.mxu0 %v11904_v57  ;;  %10444 = vmatprep.subr.bf16.mxu1 %v11904_v57 }
 0x26b   :  { %10188 = vmatprep.mubr.msk.bf16.mxu1 %vm1899_vm0, %v1866_v15  ;;  %10309 = vmatpush3.bf16.msra.mxu0 %v11904_v57 }
 0x270   :  { %10189 = vmatmul.mubr.msk.bf16.gmra.mrb[76].mxu1 %vm1899_vm0, %v1867_v26 }
 0x273   :  { %v10128_v46 = vpop.f32.mrb[16].mxu1 }
 0x274   :  { %v1602_v5 = vpop.f32.mrb[17].mxu1  ;;  %v1812_v13 = vadd.f32 %v10128_v46, %v11812_v38 }
 0x275   :  { %v10129_v10 = vpop.f32.mrb[18].mxu1  ;;  %v1810_v18 = vadd.f32 %v11812_v38, %v1602_v5 }
 0x276   :  { %v1813_v14 = vadd.f32 %v10129_v10, %v11812_v38  ;;  %v1605_v59 = vpop.f32.mrb[19].mxu1 }
 0x277   :  { %v1811_v19 = vadd.f32 %v11812_v38, %v1605_v59 }
 0x278   :  { %v1869_v23 = vpack.c.bf16 %v1813_v14, %v1812_v13 }
 0x279   :  { %v1868_v33 = vpack.c.bf16 %v1811_v19, %v1810_v18 }
 0x27b   :  { %10192 = vmatprep.mubr.msk.bf16.mxu1 %vm1899_vm0, %v1868_v33 }
 0x27c   :  { %10193 = vmatmul.mubr.msk.bf16.gmra.mrb[80].mxu1 %vm1899_vm0, %v1869_v23 }
 0x283   :  { %v10132_v36 = vpop.f32.mrb[20].mxu1 }
 0x284   :  { %v1618_v40 = vpop.f32.mrb[21].mxu1  ;;  %v1816_v45 = vadd.f32 %v10132_v36, %v11812_v38 }
 0x285   :  { %v10133_v41 = vpop.f32.mrb[22].mxu1  ;;  %v1814_v27 = vadd.f32 %v11812_v38, %v1618_v40 }
 0x286   :  { %v1817_v16 = vadd.f32 %v10133_v41, %v11812_v38  ;;  %v1621_v50 = vpop.f32.mrb[23].mxu1 }
 0x287   :  { %v1815_v51 = vadd.f32 %v11812_v38, %v1621_v50 }
 0x288   :  { %v1871_v53 = vpack.c.bf16 %v1817_v16, %v1816_v45 }
 0x289   :  { %v1870_v37 = vpack.c.bf16 %v1815_v51, %v1814_v27 }
 0x28b   :  { %10196 = vmatprep.mubr.msk.bf16.mxu1 %vm1899_vm0, %v1870_v37 }
 0x28c   :  { %10197 = vmatmul.mubr.msk.bf16.gmra.mrb[84].mxu1 %vm1899_vm0, %v1871_v53 }
 0x293   :  { %v10136_v60 = vpop.f32.mrb[24].mxu1 }
 0x294   :  { %v1634_v61 = vpop.f32.mrb[25].mxu1  ;;  %v1820_v26 = vadd.f32 %v10136_v60, %v11812_v38 }
 0x295   :  { %v10137_v6 = vpop.f32.mrb[26].mxu1  ;;  %v1818_v5 = vadd.f32 %v11812_v38, %v1634_v61 }
 0x296   :  { %v1821_v15 = vadd.f32 %v10137_v6, %v11812_v38  ;;  %v1637_v46 = vpop.f32.mrb[27].mxu1 }
 0x297   :  { %v1819_v10 = vadd.f32 %v11812_v38, %v1637_v46 }
 0x298   :  { %v1873_v13 = vpack.c.bf16 %v1821_v15, %v1820_v26 }
 0x299   :  { %v1872_v14 = vpack.c.bf16 %v1819_v10, %v1818_v5 }
 0x29b   :  { %10200 = vmatprep.mubr.msk.bf16.mxu1 %vm1899_vm0, %v1872_v14 }
 0x29c   :  { %10201 = vmatmul.mubr.msk.bf16.gmra.mrb[88].mxu1 %vm1899_vm0, %v1873_v13 }
 0x2a3   :  { %v10140_v59 = vpop.f32.mrb[28].mxu1 }
 0x2a4   :  { %v1650_v18 = vpop.f32.mrb[29].mxu1  ;;  %v1824_v23 = vadd.f32 %v10140_v59, %v11812_v38 }
 0x2a5   :  { %v10141_v19 = vpop.f32.mrb[30].mxu1  ;;  %v1822_v36 = vadd.f32 %v11812_v38, %v1650_v18 }
 0x2a6   :  { %v1825_v52 = vadd.f32 %v10141_v19, %v11812_v38  ;;  %v1653_v33 = vpop.f32.mrb[31].mxu1 }
 0x2a7   :  { %v1823_v40 = vadd.f32 %v11812_v38, %v1653_v33 }
 0x2a8   :  { %v1875_v41 = vpack.c.bf16 %v1825_v52, %v1824_v23 }
 0x2a9   :  { %v1874_v45 = vpack.c.bf16 %v1823_v40, %v1822_v36 }
 0x2ab   :  { %10204 = vmatprep.mubr.msk.bf16.mxu1 %vm1899_vm0, %v1874_v45 }
 0x2ac   :  { %10205 = vmatmul.mubr.msk.bf16.gmra.mrb[92].mxu1 %vm1899_vm0, %v1875_v41 }
 0x2b3   :  { %v10144_v16 = vpop.f32.mrb[32].mxu1 }
 0x2b4   :  { %v1666_v50 = vpop.f32.mrb[33].mxu1  ;;  %v1828_v51 = vadd.f32 %v10144_v16, %v11812_v38 }
 0x2b5   :  { %v10145_v27 = vpop.f32.mrb[34].mxu1  ;;  %v1826_v60 = vadd.f32 %v11812_v38, %v1666_v50 }
 0x2b6   :  { %v1829_v53 = vadd.f32 %v10145_v27, %v11812_v38  ;;  %v1669_v37 = vpop.f32.mrb[35].mxu1 }
 0x2b7   :  { %v1827_v61 = vadd.f32 %v11812_v38, %v1669_v37 }
 0x2b8   :  { %v1877_v6 = vpack.c.bf16 %v1829_v53, %v1828_v51 }
 0x2b9   :  { %v1876_v26 = vpack.c.bf16 %v1827_v61, %v1826_v60 }
 0x2bb   :  { %10208 = vmatprep.mubr.msk.bf16.mxu1 %vm1899_vm0, %v1876_v26 }
 0x2bc   :  { %10209 = vmatmul.mubr.msk.bf16.gmra.mrb[96].mxu1 %vm1899_vm0, %v1877_v6 }
 0x2c3   :  { %v10148_v15 = vpop.f32.mrb[36].mxu1 }
 0x2c4   :  { %v1682_v46 = vpop.f32.mrb[37].mxu1  ;;  %v1832_v10 = vadd.f32 %v10148_v15, %v11812_v38 }
 0x2c5   :  { %v10149_v5 = vpop.f32.mrb[38].mxu1  ;;  %v1830_v59 = vadd.f32 %v11812_v38, %v1682_v46 }
 0x2c6   :  { %v1833_v13 = vadd.f32 %v10149_v5, %v11812_v38  ;;  %v1685_v14 = vpop.f32.mrb[39].mxu1 }
 0x2c7   :  { %v1831_v18 = vadd.f32 %v11812_v38, %v1685_v14 }
 0x2c8   :  { %v1879_v19 = vpack.c.bf16 %v1833_v13, %v1832_v10 }
 0x2c9   :  { %v1878_v23 = vpack.c.bf16 %v1831_v18, %v1830_v59 }
 0x2cb   :  { %10212 = vmatprep.mubr.msk.bf16.mxu1 %vm1899_vm0, %v1878_v23 }
 0x2cc   :  { %10213 = vmatmul.mubr.msk.bf16.gmra.mrb[100].mxu1 %vm1899_vm0, %v1879_v19 }
 0x2d3   :  { %v10152_v52 = vpop.f32.mrb[40].mxu1 }
 0x2d4   :  { %v1698_v33 = vpop.f32.mrb[41].mxu1  ;;  %v1836_v40 = vadd.f32 %v10152_v52, %v11812_v38 }
 0x2d5   :  { %v10153_v36 = vpop.f32.mrb[42].mxu1  ;;  %v1834_v16 = vadd.f32 %v11812_v38, %v1698_v33 }
 0x2d6   :  { %v1837_v41 = vadd.f32 %v10153_v36, %v11812_v38  ;;  %v1701_v45 = vpop.f32.mrb[43].mxu1 }
 0x2d7   :  { %v1835_v50 = vadd.f32 %v11812_v38, %v1701_v45 }
 0x2d8   :  { %v1881_v27 = vpack.c.bf16 %v1837_v41, %v1836_v40 }
 0x2d9   :  { %v1880_v51 = vpack.c.bf16 %v1835_v50, %v1834_v16 }
 0x2db   :  { %10216 = vmatprep.mubr.msk.bf16.mxu1 %vm1899_vm0, %v1880_v51 }
 0x2dc   :  { %10217 = vmatmul.mubr.msk.bf16.gmra.mrb[104].mxu1 %vm1899_vm0, %v1881_v27 }
 0x2e3   :  { %v10156_v53 = vpop.f32.mrb[44].mxu1 }
 0x2e4   :  { %v1714_v37 = vpop.f32.mrb[45].mxu1  ;;  %v1840_v61 = vadd.f32 %v10156_v53, %v11812_v38 }
 0x2e5   :  { %v10157_v60 = vpop.f32.mrb[46].mxu1  ;;  %v1838_v15 = vadd.f32 %v11812_v38, %v1714_v37 }
 0x2e6   :  { %v1841_v6 = vadd.f32 %v10157_v60, %v11812_v38  ;;  %v1717_v26 = vpop.f32.mrb[47].mxu1 }
 0x2e7   :  { %v1839_v46 = vadd.f32 %v11812_v38, %v1717_v26 }
 0x2e8   :  { %v1883_v5 = vpack.c.bf16 %v1841_v6, %v1840_v61 }
 0x2e9   :  { %v1882_v10 = vpack.c.bf16 %v1839_v46, %v1838_v15 }
 0x2eb   :  { %10220 = vmatprep.mubr.msk.bf16.mxu1 %vm1899_vm0, %v1882_v10 }
 0x2ec   :  { %10221 = vmatmul.mubr.msk.bf16.gmra.mrb[108].mxu1 %vm1899_vm0, %v1883_v5 }
 0x2f3   :  { %v10160_v13 = vpop.f32.mrb[48].mxu1 }
 0x2f4   :  { %v1730_v14 = vpop.f32.mrb[49].mxu1  ;;  %v1844_v18 = vadd.f32 %v10160_v13, %v11812_v38 }
 0x2f5   :  { %v10161_v59 = vpop.f32.mrb[50].mxu1  ;;  %v1842_v52 = vadd.f32 %v11812_v38, %v1730_v14 }
 0x2f6   :  { %v1845_v19 = vadd.f32 %v10161_v59, %v11812_v38  ;;  %v1733_v23 = vpop.f32.mrb[51].mxu1  ;;  %v10614_v59 = vld [vmem:[%s16052_s6 + $0x60] sm:$0xff]  }
 0x2f7   :  { %v1843_v33 = vadd.f32 %v11812_v38, %v1733_v23  ;;  %10310 = vmatprep.subr.bf16.mxu0 %v10614_v59 }
 0x2f8   :  { %v1885_v36 = vpack.c.bf16 %v1845_v19, %v1844_v18  ;;  %10311 = vmatpush3.bf16.msra.mxu0 %v10614_v59 }
 0x2f9   :  { %v1884_v40 = vpack.c.bf16 %v1843_v33, %v1842_v52 }
 0x2fb   :  { %10224 = vmatprep.mubr.msk.bf16.mxu1 %vm1899_vm0, %v1884_v40 }
 0x2fc   :  { %10225 = vmatmul.mubr.msk.bf16.gmra.mrb[112].mxu1 %vm1899_vm0, %v1885_v36 }
 0x303   :  { %v10164_v41 = vpop.f32.mrb[52].mxu1 }
 0x304   :  { %v1746_v45 = vpop.f32.mrb[53].mxu1  ;;  %v1848_v50 = vadd.f32 %v10164_v41, %v11812_v38 }
 0x305   :  { %v10165_v16 = vpop.f32.mrb[54].mxu1  ;;  %v1846_v53 = vadd.f32 %v11812_v38, %v1746_v45 }
 0x306   :  { %v1849_v27 = vadd.f32 %v10165_v16, %v11812_v38  ;;  %v1749_v51 = vpop.f32.mrb[55].mxu1 }
 0x307   :  { %v1847_v37 = vadd.f32 %v11812_v38, %v1749_v51  ;;  %v11973_v51 = vld [vmem:[%s16049_s3 + $0x12] ss:$0 sm:$0xff] }
 0x308   :  { %v1887_v60 = vpack.c.bf16 %v1849_v27, %v1848_v50 }
 0x309   :  { %v1886_v61 = vpack.c.bf16 %v1847_v37, %v1846_v53 }
 0x30b   :  { %10228 = vmatprep.mubr.msk.bf16.mxu1 %vm1899_vm0, %v1886_v61 }
 0x30c   :  { %10229 = vmatmul.mubr.msk.bf16.gmra.mrb[116].mxu1 %vm1899_vm0, %v1887_v60 }
 0x313   :  { %v10168_v6 = vpop.f32.mrb[56].mxu1 }
 0x314   :  { %v1762_v26 = vpop.f32.mrb[57].mxu1  ;;  %v1852_v46 = vadd.f32 %v10168_v6, %v11812_v38 }
 0x315   :  { %v10169_v15 = vpop.f32.mrb[58].mxu1  ;;  %v1850_v13 = vadd.f32 %v11812_v38, %v1762_v26 }
 0x316   :  { %v1853_v5 = vadd.f32 %v10169_v15, %v11812_v38  ;;  %v1765_v10 = vpop.f32.mrb[59].mxu1 }
 0x317   :  { %v1851_v14 = vadd.f32 %v11812_v38, %v1765_v10 }
 0x318   :  { %v1889_v18 = vpack.c.bf16 %v1853_v5, %v1852_v46 }
 0x319   :  { %v1888_v19 = vpack.c.bf16 %v1851_v14, %v1850_v13 }
 0x31b   :  { %10232 = vmatprep.mubr.msk.bf16.mxu1 %vm1899_vm0, %v1888_v19 }
 0x31c   :  { %10233 = vmatmul.mubr.msk.bf16.gmra.mrb[120].mxu1 %vm1899_vm0, %v1889_v18 }
 0x323   :  { %v10172_v23 = vpop.f32.mrb[60].mxu1 }
 0x324   :  { %v1778_v52 = vpop.f32.mrb[61].mxu1  ;;  %v1856_v36 = vadd.f32 %v10172_v23, %v11812_v38 }
 0x325   :  { %v10173_v33 = vpop.f32.mrb[62].mxu1  ;;  %v1854_v45 = vadd.f32 %v11812_v38, %v1778_v52 }
 0x326   :  { %v1857_v40 = vadd.f32 %v10173_v33, %v11812_v38  ;;  %v1781_v41 = vpop.f32.mrb[63].mxu1 }
 0x327   :  { %v1855_v16 = vadd.f32 %v11812_v38, %v1781_v41 }
 0x328   :  { %v1891_v50 = vpack.c.bf16 %v1857_v40, %v1856_v36 }
 0x329   :  { %v1890_v27 = vpack.c.bf16 %v1855_v16, %v1854_v45 }
 0x32b   :  { %v10178_v53 = vpop.f32.mrb[64].mxu1  ;;  %10236 = vmatprep.mubr.msk.bf16.mxu1 %vm1899_vm0, %v1890_v27 }
 0x32c   :  { %v2039_v37 = vadd.f32 %v10178_v53, %v11973_v51  ;;  %v2030_v60 = vpop.f32.mrb[65].mxu1  ;;  %10237 = vmatmul.mubr.msk.bf16.gmra.mrb[124].mxu1 %vm1899_vm0, %v1891_v50 }
 0x32d   :  { %v2031_v61 = vadd.f32 %v2030_v60, %v11973_v51  ;;  %v10179_v6 = vpop.f32.mrb[66].mxu1 }
 0x32e   :  { %v2042_v38 = vadd.f32 %v10179_v6, %v11973_v51  ;;  %v2033_v26 = vpop.f32.mrb[67].mxu1  ;;  %v2287_v46 = vmax.f32 %v2039_v37, 0.0 }
 0x32f   :  { %v2034_v15 = vadd.f32 %v2033_v26, %v11973_v51  ;;  %v2285_v10 = vmax.f32 %v2031_v61, 0.0 }
 0x330   :  { %v2288_v5 = vmax.f32 %v2042_v38, 0.0 }
 0x331   :  { %v2286_v13 = vmax.f32 %v2034_v15, 0.0 }
 0x332   :  { %v2354_v14 = vpack.c.bf16 %v2288_v5, %v2287_v46 }
 0x333   :  { %v2353_v18 = vpack.c.bf16 %v2286_v13, %v2285_v10  ;;  %v10182_v19 = vpop.f32.mrb[68].mxu1 }
 0x334   :  { %v2055_v23 = vadd.f32 %v10182_v19, %v11973_v51  ;;  %v2046_v52 = vpop.f32.mrb[69].mxu1 }
 0x335   :  { %v2047_v33 = vadd.f32 %v2046_v52, %v11973_v51  ;;  %v10183_v36 = vpop.f32.mrb[70].mxu1  ;;  %10244 = vmatprep.mubr.msk.bf16.mxu1 %vm2398_vm1, %v2353_v18 }
 0x336   :  { %v2058_v40 = vadd.f32 %v10183_v36, %v11973_v51  ;;  %v2049_v41 = vpop.f32.mrb[71].mxu1  ;;  %10245 = vmatmul.mubr.msk.bf16.vlgmr.msra.gmra.mrb[128].mxu1 %vm2398_vm1, %v2354_v14  ;;  %v2291_v16 = vmax.f32 %v2055_v23, 0.0 }
 0x337   :  { %v2050_v45 = vadd.f32 %v2049_v41, %v11973_v51  ;;  %10446 = vmatpush3.bf16.msra.mxu1 %v11904_v57  ;;  %v2289_v27 = vmax.f32 %v2047_v33, 0.0 }
 0x338   :  { %v2292_v50 = vmax.f32 %v2058_v40, 0.0  ;;  %10445 = vmatprep.subr.bf16.mxu1 %v10614_v59 }
 0x339   :  { %v2290_v53 = vmax.f32 %v2050_v45, 0.0 }
 0x33a   :  { %v2356_v37 = vpack.c.bf16 %v2292_v50, %v2291_v16 }
 0x33b   :  { %v2355_v60 = vpack.c.bf16 %v2290_v53, %v2289_v27  ;;  %v10186_v61 = vpop.f32.mrb[72].mxu1  ;;  %10447 = vmatpush3.bf16.msra.mxu1 %v10614_v59 }
 0x33c   :  { %v2071_v6 = vadd.f32 %v10186_v61, %v11973_v51  ;;  %v2062_v38 = vpop.f32.mrb[73].mxu1 }
 0x33d   :  { %v2063_v26 = vadd.f32 %v2062_v38, %v11973_v51  ;;  %v10187_v15 = vpop.f32.mrb[74].mxu1  ;;  %10248 = vmatprep.mubr.msk.bf16.mxu1 %vm2398_vm1, %v2355_v60 }
 0x33e   :  { %v2074_v46 = vadd.f32 %v10187_v15, %v11973_v51  ;;  %v2065_v57 = vpop.f32.mrb[75].mxu1  ;;  %10249 = vmatmul.mubr.msk.bf16.gmra.mrb[132].mxu1 %vm2398_vm1, %v2356_v37  ;;  %v2295_v10 = vmax.f32 %v2071_v6, 0.0 }
 0x33f   :  { %v2066_v5 = vadd.f32 %v2065_v57, %v11973_v51  ;;  %v2293_v14 = vmax.f32 %v2063_v26, 0.0 }
 0x340   :  { %v2296_v13 = vmax.f32 %v2074_v46, 0.0 }
 0x341   :  { %v2294_v18 = vmax.f32 %v2066_v5, 0.0 }
 0x342   :  { %v2358_v59 = vpack.c.bf16 %v2296_v13, %v2295_v10 }
 0x343   :  { %v2357_v19 = vpack.c.bf16 %v2294_v18, %v2293_v14  ;;  %v10190_v23 = vpop.f32.mrb[76].mxu1 }
 0x344   :  { %v2087_v52 = vadd.f32 %v10190_v23, %v11973_v51  ;;  %v2078_v33 = vpop.f32.mrb[77].mxu1 }
 0x345   :  { %v2079_v36 = vadd.f32 %v2078_v33, %v11973_v51  ;;  %v10191_v40 = vpop.f32.mrb[78].mxu1  ;;  %10252 = vmatprep.mubr.msk.bf16.mxu1 %vm2398_vm1, %v2357_v19 }
 0x346   :  { %v2090_v41 = vadd.f32 %v10191_v40, %v11973_v51  ;;  %v2081_v45 = vpop.f32.mrb[79].mxu1  ;;  %10253 = vmatmul.mubr.msk.bf16.gmra.mrb[136].mxu1 %vm2398_vm1, %v2358_v59  ;;  %v2299_v50 = vmax.f32 %v2087_v52, 0.0 }
 0x347   :  { %v2082_v16 = vadd.f32 %v2081_v45, %v11973_v51  ;;  %v2297_v53 = vmax.f32 %v2079_v36, 0.0 }
 0x348   :  { %v2300_v27 = vmax.f32 %v2090_v41, 0.0 }
 0x349   :  { %v2298_v37 = vmax.f32 %v2082_v16, 0.0 }
 0x34a   :  { %v2360_v60 = vpack.c.bf16 %v2300_v27, %v2299_v50 }
 0x34b   :  { %v2359_v61 = vpack.c.bf16 %v2298_v37, %v2297_v53 }
 0x34d   :  { %10256 = vmatprep.mubr.msk.bf16.mxu1 %vm2398_vm1, %v2359_v61 }
 0x34e   :  { %10257 = vmatmul.mubr.msk.bf16.gmra.mrb[140].mxu1 %vm2398_vm1, %v2360_v60 }
 0x34f   :  { %v10194_v6 = vpop.f32.mrb[80].mxu1 }
 0x350   :  { %v2103_v38 = vadd.f32 %v10194_v6, %v11973_v51  ;;  %v2094_v26 = vpop.f32.mrb[81].mxu1 }
 0x351   :  { %v2095_v15 = vadd.f32 %v2094_v26, %v11973_v51  ;;  %v10195_v46 = vpop.f32.mrb[82].mxu1 }
 0x352   :  { %v2106_v57 = vadd.f32 %v10195_v46, %v11973_v51  ;;  %v2097_v5 = vpop.f32.mrb[83].mxu1  ;;  %v2303_v13 = vmax.f32 %v2103_v38, 0.0 }
 0x353   :  { %v2098_v10 = vadd.f32 %v2097_v5, %v11973_v51  ;;  %v2301_v18 = vmax.f32 %v2095_v15, 0.0 }
 0x354   :  { %v2304_v14 = vmax.f32 %v2106_v57, 0.0 }
 0x355   :  { %v2302_v59 = vmax.f32 %v2098_v10, 0.0 }
 0x356   :  { %v2362_v19 = vpack.c.bf16 %v2304_v14, %v2303_v13 }
 0x357   :  { %v2361_v23 = vpack.c.bf16 %v2302_v59, %v2301_v18 }
 0x359   :  { %10260 = vmatprep.mubr.msk.bf16.mxu1 %vm2398_vm1, %v2361_v23 }
 0x35a   :  { %10261 = vmatmul.mubr.msk.bf16.gmra.mrb[144].mxu1 %vm2398_vm1, %v2362_v19 }
 0x35f   :  { %v10198_v52 = vpop.f32.mrb[84].mxu1 }
 0x360   :  { %v2119_v33 = vadd.f32 %v10198_v52, %v11973_v51  ;;  %v2110_v36 = vpop.f32.mrb[85].mxu1 }
 0x361   :  { %v2111_v40 = vadd.f32 %v2110_v36, %v11973_v51  ;;  %v10199_v41 = vpop.f32.mrb[86].mxu1 }
 0x362   :  { %v2122_v45 = vadd.f32 %v10199_v41, %v11973_v51  ;;  %v2113_v16 = vpop.f32.mrb[87].mxu1  ;;  %v2307_v27 = vmax.f32 %v2119_v33, 0.0 }
 0x363   :  { %v2114_v50 = vadd.f32 %v2113_v16, %v11973_v51  ;;  %v2305_v37 = vmax.f32 %v2111_v40, 0.0 }
 0x364   :  { %v2308_v53 = vmax.f32 %v2122_v45, 0.0 }
 0x365   :  { %v2306_v60 = vmax.f32 %v2114_v50, 0.0 }
 0x366   :  { %v2364_v61 = vpack.c.bf16 %v2308_v53, %v2307_v27 }
 0x367   :  { %v2363_v6 = vpack.c.bf16 %v2306_v60, %v2305_v37 }
 0x369   :  { %10264 = vmatprep.mubr.msk.bf16.mxu1 %vm2398_vm1, %v2363_v6 }
 0x36a   :  { %10265 = vmatmul.mubr.msk.bf16.gmra.mrb[148].mxu1 %vm2398_vm1, %v2364_v61 }
 0x36f   :  { %v10202_v38 = vpop.f32.mrb[88].mxu1 }
 0x370   :  { %v2135_v26 = vadd.f32 %v10202_v38, %v11973_v51  ;;  %v2126_v15 = vpop.f32.mrb[89].mxu1 }
 0x371   :  { %v2127_v46 = vadd.f32 %v2126_v15, %v11973_v51  ;;  %v10203_v57 = vpop.f32.mrb[90].mxu1 }
 0x372   :  { %v2138_v5 = vadd.f32 %v10203_v57, %v11973_v51  ;;  %v2129_v10 = vpop.f32.mrb[91].mxu1  ;;  %v2311_v14 = vmax.f32 %v2135_v26, 0.0 }
 0x373   :  { %v2130_v13 = vadd.f32 %v2129_v10, %v11973_v51  ;;  %v2309_v59 = vmax.f32 %v2127_v46, 0.0 }
 0x374   :  { %v2312_v18 = vmax.f32 %v2138_v5, 0.0 }
 0x375   :  { %v2310_v19 = vmax.f32 %v2130_v13, 0.0 }
 0x376   :  { %v2366_v23 = vpack.c.bf16 %v2312_v18, %v2311_v14 }
 0x377   :  { %v2365_v52 = vpack.c.bf16 %v2310_v19, %v2309_v59 }
 0x379   :  { %10268 = vmatprep.mubr.msk.bf16.mxu1 %vm2398_vm1, %v2365_v52 }
 0x37a   :  { %10269 = vmatmul.mubr.msk.bf16.gmra.mrb[152].mxu1 %vm2398_vm1, %v2366_v23 }
 0x37f   :  { %v10206_v33 = vpop.f32.mrb[92].mxu1 }
 0x380   :  { %v2151_v36 = vadd.f32 %v10206_v33, %v11973_v51  ;;  %v2142_v40 = vpop.f32.mrb[93].mxu1 }
 0x381   :  { %v2143_v41 = vadd.f32 %v2142_v40, %v11973_v51  ;;  %v10207_v45 = vpop.f32.mrb[94].mxu1 }
 0x382   :  { %v2154_v16 = vadd.f32 %v10207_v45, %v11973_v51  ;;  %v2145_v50 = vpop.f32.mrb[95].mxu1  ;;  %v2315_v53 = vmax.f32 %v2151_v36, 0.0 }
 0x383   :  { %v2146_v27 = vadd.f32 %v2145_v50, %v11973_v51  ;;  %v2313_v60 = vmax.f32 %v2143_v41, 0.0 }
 0x384   :  { %v2316_v37 = vmax.f32 %v2154_v16, 0.0 }
 0x385   :  { %v2314_v61 = vmax.f32 %v2146_v27, 0.0 }
 0x386   :  { %v2368_v6 = vpack.c.bf16 %v2316_v37, %v2315_v53 }
 0x387   :  { %v2367_v38 = vpack.c.bf16 %v2314_v61, %v2313_v60 }
 0x389   :  { %10272 = vmatprep.mubr.msk.bf16.mxu1 %vm2398_vm1, %v2367_v38 }
 0x38a   :  { %10273 = vmatmul.mubr.msk.bf16.gmra.mrb[156].mxu1 %vm2398_vm1, %v2368_v6 }
 0x38f   :  { %v10210_v26 = vpop.f32.mrb[96].mxu1 }
 0x390   :  { %v2167_v15 = vadd.f32 %v10210_v26, %v11973_v51  ;;  %v2158_v46 = vpop.f32.mrb[97].mxu1 }
 0x391   :  { %v2159_v57 = vadd.f32 %v2158_v46, %v11973_v51  ;;  %v10211_v5 = vpop.f32.mrb[98].mxu1 }
 0x392   :  { %v2170_v10 = vadd.f32 %v10211_v5, %v11973_v51  ;;  %v2161_v13 = vpop.f32.mrb[99].mxu1  ;;  %v2319_v18 = vmax.f32 %v2167_v15, 0.0 }
 0x393   :  { %v2162_v14 = vadd.f32 %v2161_v13, %v11973_v51  ;;  %v2317_v19 = vmax.f32 %v2159_v57, 0.0 }
 0x394   :  { %v2320_v59 = vmax.f32 %v2170_v10, 0.0 }
 0x395   :  { %v2318_v23 = vmax.f32 %v2162_v14, 0.0 }
 0x396   :  { %v2370_v52 = vpack.c.bf16 %v2320_v59, %v2319_v18 }
 0x397   :  { %v2369_v33 = vpack.c.bf16 %v2318_v23, %v2317_v19 }
 0x399   :  { %10276 = vmatprep.mubr.msk.bf16.mxu1 %vm2398_vm1, %v2369_v33 }
 0x39a   :  { %10277 = vmatmul.mubr.msk.bf16.gmra.mrb[160].mxu1 %vm2398_vm1, %v2370_v52 }
 0x39f   :  { %v10214_v36 = vpop.f32.mrb[100].mxu1 }
 0x3a0   :  { %v2183_v40 = vadd.f32 %v10214_v36, %v11973_v51  ;;  %v2174_v41 = vpop.f32.mrb[101].mxu1 }
 0x3a1   :  { %v2175_v45 = vadd.f32 %v2174_v41, %v11973_v51  ;;  %v10215_v16 = vpop.f32.mrb[102].mxu1 }
 0x3a2   :  { %v2186_v50 = vadd.f32 %v10215_v16, %v11973_v51  ;;  %v2177_v27 = vpop.f32.mrb[103].mxu1  ;;  %v2323_v37 = vmax.f32 %v2183_v40, 0.0 }
 0x3a3   :  { %v2178_v53 = vadd.f32 %v2177_v27, %v11973_v51  ;;  %v2321_v61 = vmax.f32 %v2175_v45, 0.0 }
 0x3a4   :  { %v2324_v60 = vmax.f32 %v2186_v50, 0.0 }
 0x3a5   :  { %v2322_v6 = vmax.f32 %v2178_v53, 0.0 }
 0x3a6   :  { %v2372_v38 = vpack.c.bf16 %v2324_v60, %v2323_v37 }
 0x3a7   :  { %v2371_v26 = vpack.c.bf16 %v2322_v6, %v2321_v61 }
 0x3a9   :  { %10280 = vmatprep.mubr.msk.bf16.mxu1 %vm2398_vm1, %v2371_v26 }
 0x3aa   :  { %10281 = vmatmul.mubr.msk.bf16.gmra.mrb[164].mxu1 %vm2398_vm1, %v2372_v38 }
 0x3af   :  { %v10218_v15 = vpop.f32.mrb[104].mxu1 }
 0x3b0   :  { %v2199_v46 = vadd.f32 %v10218_v15, %v11973_v51  ;;  %v2190_v57 = vpop.f32.mrb[105].mxu1 }
 0x3b1   :  { %v2191_v5 = vadd.f32 %v2190_v57, %v11973_v51  ;;  %v10219_v10 = vpop.f32.mrb[106].mxu1 }
 0x3b2   :  { %v2202_v13 = vadd.f32 %v10219_v10, %v11973_v51  ;;  %v2193_v14 = vpop.f32.mrb[107].mxu1  ;;  %v2327_v59 = vmax.f32 %v2199_v46, 0.0 }
 0x3b3   :  { %v2194_v18 = vadd.f32 %v2193_v14, %v11973_v51  ;;  %v2325_v23 = vmax.f32 %v2191_v5, 0.0 }
 0x3b4   :  { %v2328_v19 = vmax.f32 %v2202_v13, 0.0 }
 0x3b5   :  { %v2326_v52 = vmax.f32 %v2194_v18, 0.0 }
 0x3b6   :  { %v2374_v33 = vpack.c.bf16 %v2328_v19, %v2327_v59 }
 0x3b7   :  { %v2373_v36 = vpack.c.bf16 %v2326_v52, %v2325_v23 }
 0x3b9   :  { %10284 = vmatprep.mubr.msk.bf16.mxu1 %vm2398_vm1, %v2373_v36 }
 0x3ba   :  { %10285 = vmatmul.mubr.msk.bf16.gmra.mrb[168].mxu1 %vm2398_vm1, %v2374_v33 }
 0x3bf   :  { %v10222_v40 = vpop.f32.mrb[108].mxu1 }
 0x3c0   :  { %v2215_v41 = vadd.f32 %v10222_v40, %v11973_v51  ;;  %v2206_v45 = vpop.f32.mrb[109].mxu1 }
 0x3c1   :  { %v2207_v16 = vadd.f32 %v2206_v45, %v11973_v51  ;;  %v10223_v50 = vpop.f32.mrb[110].mxu1 }
 0x3c2   :  { %v2218_v27 = vadd.f32 %v10223_v50, %v11973_v51  ;;  %v2209_v53 = vpop.f32.mrb[111].mxu1  ;;  %v2331_v60 = vmax.f32 %v2215_v41, 0.0 }
 0x3c3   :  { %v2210_v37 = vadd.f32 %v2209_v53, %v11973_v51  ;;  %v2329_v6 = vmax.f32 %v2207_v16, 0.0 }
 0x3c4   :  { %v2332_v61 = vmax.f32 %v2218_v27, 0.0 }
 0x3c5   :  { %v2330_v38 = vmax.f32 %v2210_v37, 0.0 }
 0x3c6   :  { %v2376_v26 = vpack.c.bf16 %v2332_v61, %v2331_v60 }
 0x3c7   :  { %v2375_v15 = vpack.c.bf16 %v2330_v38, %v2329_v6 }
 0x3c9   :  { %10288 = vmatprep.mubr.msk.bf16.mxu1 %vm2398_vm1, %v2375_v15 }
 0x3ca   :  { %10289 = vmatmul.mubr.msk.bf16.gmra.mrb[172].mxu1 %vm2398_vm1, %v2376_v26 }
 0x3cf   :  { %v10226_v46 = vpop.f32.mrb[112].mxu1 }
 0x3d0   :  { %v2231_v57 = vadd.f32 %v10226_v46, %v11973_v51  ;;  %v2222_v5 = vpop.f32.mrb[113].mxu1 }
 0x3d1   :  { %v2223_v10 = vadd.f32 %v2222_v5, %v11973_v51  ;;  %v10227_v13 = vpop.f32.mrb[114].mxu1 }
 0x3d2   :  { %v2234_v14 = vadd.f32 %v10227_v13, %v11973_v51  ;;  %v2225_v18 = vpop.f32.mrb[115].mxu1  ;;  %v2335_v19 = vmax.f32 %v2231_v57, 0.0 }
 0x3d3   :  { %v2226_v59 = vadd.f32 %v2225_v18, %v11973_v51  ;;  %v2333_v52 = vmax.f32 %v2223_v10, 0.0 }
 0x3d4   :  { %v2336_v23 = vmax.f32 %v2234_v14, 0.0 }
 0x3d5   :  { %v2334_v33 = vmax.f32 %v2226_v59, 0.0 }
 0x3d6   :  { %v2378_v36 = vpack.c.bf16 %v2336_v23, %v2335_v19 }
 0x3d7   :  { %v2377_v40 = vpack.c.bf16 %v2334_v33, %v2333_v52 }
 0x3d9   :  { %10292 = vmatprep.mubr.msk.bf16.mxu1 %vm2398_vm1, %v2377_v40 }
 0x3da   :  { %10293 = vmatmul.mubr.msk.bf16.gmra.mrb[176].mxu1 %vm2398_vm1, %v2378_v36 }
 0x3df   :  { %v10230_v41 = vpop.f32.mrb[116].mxu1 }
 0x3e0   :  { %v2247_v45 = vadd.f32 %v10230_v41, %v11973_v51  ;;  %v2238_v16 = vpop.f32.mrb[117].mxu1 }
 0x3e1   :  { %v2239_v50 = vadd.f32 %v2238_v16, %v11973_v51  ;;  %v10231_v27 = vpop.f32.mrb[118].mxu1 }
 0x3e2   :  { %v2250_v53 = vadd.f32 %v10231_v27, %v11973_v51  ;;  %v2241_v37 = vpop.f32.mrb[119].mxu1  ;;  %v2339_v61 = vmax.f32 %v2247_v45, 0.0 }
 0x3e3   :  { %v2242_v60 = vadd.f32 %v2241_v37, %v11973_v51  ;;  %v2337_v38 = vmax.f32 %v2239_v50, 0.0 }
 0x3e4   :  { %v2340_v6 = vmax.f32 %v2250_v53, 0.0 }
 0x3e5   :  { %v2338_v26 = vmax.f32 %v2242_v60, 0.0 }
 0x3e6   :  { %v2380_v15 = vpack.c.bf16 %v2340_v6, %v2339_v61 }
 0x3e7   :  { %v2379_v46 = vpack.c.bf16 %v2338_v26, %v2337_v38 }
 0x3e9   :  { %10296 = vmatprep.mubr.msk.bf16.mxu1 %vm2398_vm1, %v2379_v46 }
 0x3ea   :  { %10297 = vmatmul.mubr.msk.bf16.gmra.mrb[180].mxu1 %vm2398_vm1, %v2380_v15 }
 0x3ef   :  { %v10234_v57 = vpop.f32.mrb[120].mxu1 }
 0x3f0   :  { %v2263_v5 = vadd.f32 %v10234_v57, %v11973_v51  ;;  %v2254_v10 = vpop.f32.mrb[121].mxu1 }
 0x3f1   :  { %v2255_v13 = vadd.f32 %v2254_v10, %v11973_v51  ;;  %v10235_v14 = vpop.f32.mrb[122].mxu1 }
 0x3f2   :  { %v2266_v18 = vadd.f32 %v10235_v14, %v11973_v51  ;;  %v2257_v59 = vpop.f32.mrb[123].mxu1  ;;  %v2343_v23 = vmax.f32 %v2263_v5, 0.0  ;;  %v12075_v5 = vld [vmem:[%s16049_s3 + $0x13] ss:$0 sm:$0xff] }
 0x3f3   :  { %v2258_v19 = vadd.f32 %v2257_v59, %v11973_v51  ;;  %v2341_v33 = vmax.f32 %v2255_v13, 0.0 }
 0x3f4   :  { %v2344_v52 = vmax.f32 %v2266_v18, 0.0 }
 0x3f5   :  { %v2342_v36 = vmax.f32 %v2258_v19, 0.0 }
 0x3f6   :  { %v2382_v40 = vpack.c.bf16 %v2344_v52, %v2343_v23 }
 0x3f7   :  { %v2381_v41 = vpack.c.bf16 %v2342_v36, %v2341_v33 }
 0x3f9   :  { %10300 = vmatprep.mubr.msk.bf16.mxu1 %vm2398_vm1, %v2381_v41 }
 0x3fa   :  { %10301 = vmatmul.mubr.msk.bf16.gmra.mrb[184].mxu1 %vm2398_vm1, %v2382_v40 }
 0x3ff   :  { %v10238_v45 = vpop.f32.mrb[124].mxu1 }
 0x400   :  { %v2279_v16 = vadd.f32 %v10238_v45, %v11973_v51  ;;  %v2270_v50 = vpop.f32.mrb[125].mxu1 }
 0x401   :  { %v2271_v27 = vadd.f32 %v2270_v50, %v11973_v51  ;;  %v10239_v53 = vpop.f32.mrb[126].mxu1 }
 0x402   :  { %v2282_v37 = vadd.f32 %v10239_v53, %v11973_v51  ;;  %v2273_v60 = vpop.f32.mrb[127].mxu1  ;;  %v2347_v6 = vmax.f32 %v2279_v16, 0.0 }
 0x403   :  { %v2274_v61 = vadd.f32 %v2273_v60, %v11973_v51  ;;  %v2345_v26 = vmax.f32 %v2271_v27, 0.0 }
 0x404   :  { %v2348_v38 = vmax.f32 %v2282_v37, 0.0 }
 0x405   :  { %v2346_v15 = vmax.f32 %v2274_v61, 0.0 }
 0x406   :  { %v2384_v46 = vpack.c.bf16 %v2348_v38, %v2347_v6 }
 0x407   :  { %v2383_v57 = vpack.c.bf16 %v2346_v15, %v2345_v26 }
 0x409   :  { %v10246_v10 = vpop.f32.mrb[128].mxu1  ;;  %10304 = vmatprep.mubr.msk.bf16.mxu1 %vm2398_vm1, %v2383_v57 }
 0x40a   :  { %v2538_v13 = vadd.f32 %v10246_v10, %v12075_v5  ;;  %v2529_v14 = vpop.f32.mrb[129].mxu1  ;;  %10305 = vmatmul.mubr.msk.bf16.gmra.mrb[188].mxu1 %vm2398_vm1, %v2384_v46 }
 0x40b   :  { %v2530_v51 = vadd.f32 %v2529_v14, %v12075_v5  ;;  %v10247_v18 = vpop.f32.mrb[130].mxu1 }
 0x40c   :  { %v2541_v59 = vadd.f32 %v10247_v18, %v12075_v5  ;;  %v2532_v19 = vpop.f32.mrb[131].mxu1  ;;  %v2786_v52 = vmax.f32 %v2538_v13, 0.0 }
 0x40d   :  { %v2533_v23 = vadd.f32 %v2532_v19, %v12075_v5  ;;  %v2784_v36 = vmax.f32 %v2530_v51, 0.0 }
 0x40e   :  { %v2787_v33 = vmax.f32 %v2541_v59, 0.0 }
 0x40f   :  { %v2785_v40 = vmax.f32 %v2533_v23, 0.0 }
 0x410   :  { %v2853_v41 = vpack.c.bf16 %v2787_v33, %v2786_v52 }
 0x411   :  { %v2852_v45 = vpack.c.bf16 %v2785_v40, %v2784_v36  ;;  %v10250_v16 = vpop.f32.mrb[132].mxu1 }
 0x412   :  { %v2554_v50 = vadd.f32 %v10250_v16, %v12075_v5  ;;  %v2545_v27 = vpop.f32.mrb[133].mxu1 }
 0x413   :  { %v2546_v53 = vadd.f32 %v2545_v27, %v12075_v5  ;;  %v10251_v37 = vpop.f32.mrb[134].mxu1  ;;  %10312 = vmatprep.mubr.msk.bf16.mxu0 %vm2398_vm1, %v2852_v45 }
 0x414   :  { %v2557_v60 = vadd.f32 %v10251_v37, %v12075_v5  ;;  %v2548_v61 = vpop.f32.mrb[135].mxu1  ;;  %10313 = vmatmul.mubr.msk.bf16.vlgmr.msra.gmra.mrb[128].mxu0 %vm2398_vm1, %v2853_v41  ;;  %v2790_v38 = vmax.f32 %v2554_v50, 0.0 }
 0x415   :  { %v2549_v6 = vadd.f32 %v2548_v61, %v12075_v5  ;;  %v2788_v15 = vmax.f32 %v2546_v53, 0.0 }
 0x416   :  { %v2791_v26 = vmax.f32 %v2557_v60, 0.0 }
 0x417   :  { %v2789_v46 = vmax.f32 %v2549_v6, 0.0 }
 0x418   :  { %v2855_v57 = vpack.c.bf16 %v2791_v26, %v2790_v38  ;;  %v10615_v26 = vld [vmem:[%s16052_s6 + $0x68] sm:$0xff]  }
 0x419   :  { %v2854_v10 = vpack.c.bf16 %v2789_v46, %v2788_v15  ;;  %v10254_v13 = vpop.f32.mrb[136].mxu1  ;;  %10376 = vmatprep.subr.bf16.mxu1 %v10615_v26 }
 0x41a   :  { %v2570_v14 = vadd.f32 %v10254_v13, %v12075_v5  ;;  %v2561_v51 = vpop.f32.mrb[137].mxu1 }
 0x41b   :  { %v2562_v18 = vadd.f32 %v2561_v51, %v12075_v5  ;;  %v10255_v59 = vpop.f32.mrb[138].mxu1  ;;  %10316 = vmatprep.mubr.msk.bf16.mxu0 %vm2398_vm1, %v2854_v10 }
 0x41c   :  { %v2573_v19 = vadd.f32 %v10255_v59, %v12075_v5  ;;  %v2564_v23 = vpop.f32.mrb[139].mxu1  ;;  %10317 = vmatmul.mubr.msk.bf16.gmra.mrb[132].mxu0 %vm2398_vm1, %v2855_v57  ;;  %v2794_v33 = vmax.f32 %v2570_v14, 0.0 }
 0x41d   :  { %v2565_v52 = vadd.f32 %v2564_v23, %v12075_v5  ;;  %v2792_v40 = vmax.f32 %v2562_v18, 0.0 }
 0x41e   :  { %v2795_v36 = vmax.f32 %v2573_v19, 0.0 }
 0x41f   :  { %v2793_v41 = vmax.f32 %v2565_v52, 0.0 }
 0x420   :  { %v2857_v45 = vpack.c.bf16 %v2795_v36, %v2794_v33 }
 0x421   :  { %v2856_v16 = vpack.c.bf16 %v2793_v41, %v2792_v40  ;;  %v10258_v50 = vpop.f32.mrb[140].mxu1 }
 0x422   :  { %v2586_v27 = vadd.f32 %v10258_v50, %v12075_v5  ;;  %v2577_v53 = vpop.f32.mrb[141].mxu1 }
 0x423   :  { %v2578_v37 = vadd.f32 %v2577_v53, %v12075_v5  ;;  %v10259_v60 = vpop.f32.mrb[142].mxu1  ;;  %10320 = vmatprep.mubr.msk.bf16.mxu0 %vm2398_vm1, %v2856_v16 }
 0x424   :  { %v2589_v61 = vadd.f32 %v10259_v60, %v12075_v5  ;;  %v2580_v6 = vpop.f32.mrb[143].mxu1  ;;  %10321 = vmatmul.mubr.msk.bf16.gmra.mrb[136].mxu0 %vm2398_vm1, %v2857_v45  ;;  %v2798_v15 = vmax.f32 %v2586_v27, 0.0 }
 0x425   :  { %v2581_v38 = vadd.f32 %v2580_v6, %v12075_v5  ;;  %v2796_v57 = vmax.f32 %v2578_v37, 0.0 }
 0x426   :  { %v2799_v46 = vmax.f32 %v2589_v61, 0.0 }
 0x427   :  { %v2797_v10 = vmax.f32 %v2581_v38, 0.0 }
 0x428   :  { %v2859_v13 = vpack.c.bf16 %v2799_v46, %v2798_v15 }
 0x429   :  { %v2858_v14 = vpack.c.bf16 %v2797_v10, %v2796_v57 }
 0x42b   :  { %10324 = vmatprep.mubr.msk.bf16.mxu0 %vm2398_vm1, %v2858_v14 }
 0x42c   :  { %10325 = vmatmul.mubr.msk.bf16.gmra.mrb[140].mxu0 %vm2398_vm1, %v2859_v13 }
 0x42d   :  { %v10262_v51 = vpop.f32.mrb[144].mxu1 }
 0x42e   :  { %v2602_v18 = vadd.f32 %v10262_v51, %v12075_v5  ;;  %v2593_v59 = vpop.f32.mrb[145].mxu1 }
 0x42f   :  { %v2594_v19 = vadd.f32 %v2593_v59, %v12075_v5  ;;  %v10263_v23 = vpop.f32.mrb[146].mxu1 }
 0x430   :  { %v2605_v52 = vadd.f32 %v10263_v23, %v12075_v5  ;;  %v2596_v33 = vpop.f32.mrb[147].mxu1  ;;  %v2802_v40 = vmax.f32 %v2602_v18, 0.0 }
 0x431   :  { %v2597_v36 = vadd.f32 %v2596_v33, %v12075_v5  ;;  %v2800_v45 = vmax.f32 %v2594_v19, 0.0 }
 0x432   :  { %v2803_v41 = vmax.f32 %v2605_v52, 0.0 }
 0x433   :  { %v2801_v16 = vmax.f32 %v2597_v36, 0.0 }
 0x434   :  { %v2861_v50 = vpack.c.bf16 %v2803_v41, %v2802_v40 }
 0x435   :  { %v2860_v27 = vpack.c.bf16 %v2801_v16, %v2800_v45 }
 0x437   :  { %10328 = vmatprep.mubr.msk.bf16.mxu0 %vm2398_vm1, %v2860_v27 }
 0x438   :  { %10329 = vmatmul.mubr.msk.bf16.gmra.mrb[144].mxu0 %vm2398_vm1, %v2861_v50 }
 0x43d   :  { %v10266_v53 = vpop.f32.mrb[148].mxu1 }
 0x43e   :  { %v2618_v37 = vadd.f32 %v10266_v53, %v12075_v5  ;;  %v2609_v60 = vpop.f32.mrb[149].mxu1 }
 0x43f   :  { %v2610_v61 = vadd.f32 %v2609_v60, %v12075_v5  ;;  %v10267_v6 = vpop.f32.mrb[150].mxu1  ;;  %v10616_v60 = vld [vmem:[%s16052_s6 + $0x70] sm:$0xff]  }
 0x440   :  { %v2621_v38 = vadd.f32 %v10267_v6, %v12075_v5  ;;  %v2612_v15 = vpop.f32.mrb[151].mxu1  ;;  %v2806_v57 = vmax.f32 %v2618_v37, 0.0 }
 0x441   :  { %v2613_v46 = vadd.f32 %v2612_v15, %v12075_v5  ;;  %v2804_v13 = vmax.f32 %v2610_v61, 0.0 }
 0x442   :  { %v2807_v10 = vmax.f32 %v2621_v38, 0.0 }
 0x443   :  { %v2805_v14 = vmax.f32 %v2613_v46, 0.0 }
 0x444   :  { %v2863_v51 = vpack.c.bf16 %v2807_v10, %v2806_v57 }
 0x445   :  { %v2862_v18 = vpack.c.bf16 %v2805_v14, %v2804_v13 }
 0x447   :  { %10332 = vmatprep.mubr.msk.bf16.mxu0 %vm2398_vm1, %v2862_v18 }
 0x448   :  { %10333 = vmatmul.mubr.msk.bf16.gmra.mrb[148].mxu0 %vm2398_vm1, %v2863_v51 }
 0x449   :  { %4031 = vmatprep.mubr.bf16.mxu0 %v16099_v0 }
 0x44d   :  { %v10270_v59 = vpop.f32.mrb[152].mxu1 }
 0x44e   :  { %v2634_v19 = vadd.f32 %v10270_v59, %v12075_v5  ;;  %v2625_v23 = vpop.f32.mrb[153].mxu1 }
 0x44f   :  { %v2626_v52 = vadd.f32 %v2625_v23, %v12075_v5  ;;  %v10271_v33 = vpop.f32.mrb[154].mxu1 }
 0x450   :  { %v2637_v36 = vadd.f32 %v10271_v33, %v12075_v5  ;;  %v2628_v40 = vpop.f32.mrb[155].mxu1  ;;  %v2810_v45 = vmax.f32 %v2634_v19, 0.0 }
 0x451   :  { %v2629_v41 = vadd.f32 %v2628_v40, %v12075_v5  ;;  %v2808_v50 = vmax.f32 %v2626_v52, 0.0 }
 0x452   :  { %v2811_v16 = vmax.f32 %v2637_v36, 0.0 }
 0x453   :  { %v2809_v27 = vmax.f32 %v2629_v41, 0.0 }
 0x454   :  { %v2865_v53 = vpack.c.bf16 %v2811_v16, %v2810_v45 }
 0x455   :  { %v2864_v37 = vpack.c.bf16 %v2809_v27, %v2808_v50 }
 0x457   :  { %10336 = vmatprep.mubr.msk.bf16.mxu1 %vm2398_vm1, %v2864_v37 }
 0x458   :  { %10337 = vmatmul.mubr.msk.bf16.vlgmr.msra.gmra.mrb[192].mxu1 %vm2398_vm1, %v2865_v53 }
 0x459   :  { %10377 = vmatpush3.bf16.msra.mxu1 %v10615_v26 }
 0x45a   :  { %10378 = vmatprep.subr.bf16.mxu1 %v10616_v60 }
 0x45d   :  { %v10274_v61 = vpop.f32.mrb[156].mxu1  ;;  %10379 = vmatpush3.bf16.msra.mxu1 %v10616_v60 }
 0x45e   :  { %v2650_v6 = vadd.f32 %v10274_v61, %v12075_v5  ;;  %v2641_v38 = vpop.f32.mrb[157].mxu1  ;;  %4673 = vmatprep.subr.bf16.mxu1 %v16099_v0 }
 0x45f   :  { %v2642_v15 = vadd.f32 %v2641_v38, %v12075_v5  ;;  %v10275_v46 = vpop.f32.mrb[158].mxu1 }
 0x460   :  { %v2653_v57 = vadd.f32 %v10275_v46, %v12075_v5  ;;  %v2644_v10 = vpop.f32.mrb[159].mxu1  ;;  %v2814_v14 = vmax.f32 %v2650_v6, 0.0 }
 0x461   :  { %v2645_v13 = vadd.f32 %v2644_v10, %v12075_v5  ;;  %v2812_v18 = vmax.f32 %v2642_v15, 0.0 }
 0x462   :  { %v2815_v51 = vmax.f32 %v2653_v57, 0.0 }
 0x463   :  { %v2813_v26 = vmax.f32 %v2645_v13, 0.0 }
 0x464   :  { %v2867_v59 = vpack.c.bf16 %v2815_v51, %v2814_v14 }
 0x465   :  { %v2866_v19 = vpack.c.bf16 %v2813_v26, %v2812_v18 }
 0x467   :  { %10340 = vmatprep.mubr.msk.bf16.mxu1 %vm2398_vm1, %v2866_v19 }
 0x468   :  { %10341 = vmatmul.mubr.msk.bf16.gmra.mrb[196].mxu1 %vm2398_vm1, %v2867_v59 }
 0x46d   :  { %v10278_v23 = vpop.f32.mrb[160].mxu1 }
 0x46e   :  { %v2666_v52 = vadd.f32 %v10278_v23, %v12075_v5  ;;  %v2657_v33 = vpop.f32.mrb[161].mxu1 }
 0x46f   :  { %v2658_v36 = vadd.f32 %v2657_v33, %v12075_v5  ;;  %v10279_v40 = vpop.f32.mrb[162].mxu1 }
 0x470   :  { %v2669_v41 = vadd.f32 %v10279_v40, %v12075_v5  ;;  %v2660_v45 = vpop.f32.mrb[163].mxu1  ;;  %v2818_v50 = vmax.f32 %v2666_v52, 0.0 }
 0x471   :  { %v2661_v16 = vadd.f32 %v2660_v45, %v12075_v5  ;;  %v2816_v53 = vmax.f32 %v2658_v36, 0.0 }
 0x472   :  { %v2819_v27 = vmax.f32 %v2669_v41, 0.0 }
 0x473   :  { %v2817_v37 = vmax.f32 %v2661_v16, 0.0 }
 0x474   :  { %v2869_v60 = vpack.c.bf16 %v2819_v27, %v2818_v50 }
 0x475   :  { %v2868_v61 = vpack.c.bf16 %v2817_v37, %v2816_v53 }
 0x477   :  { %10344 = vmatprep.mubr.msk.bf16.mxu1 %vm2398_vm1, %v2868_v61 }
 0x478   :  { %10345 = vmatmul.mubr.msk.bf16.gmra.mrb[200].mxu1 %vm2398_vm1, %v2869_v60 }
 0x47d   :  { %v10282_v6 = vpop.f32.mrb[164].mxu1 }
 0x47e   :  { %v2682_v38 = vadd.f32 %v10282_v6, %v12075_v5  ;;  %v2673_v15 = vpop.f32.mrb[165].mxu1 }
 0x47f   :  { %v2674_v46 = vadd.f32 %v2673_v15, %v12075_v5  ;;  %v10283_v57 = vpop.f32.mrb[166].mxu1 }
 0x480   :  { %v2685_v10 = vadd.f32 %v10283_v57, %v12075_v5  ;;  %v2676_v13 = vpop.f32.mrb[167].mxu1  ;;  %v2822_v51 = vmax.f32 %v2682_v38, 0.0 }
 0x481   :  { %v2677_v14 = vadd.f32 %v2676_v13, %v12075_v5  ;;  %v2820_v26 = vmax.f32 %v2674_v46, 0.0 }
 0x482   :  { %v2823_v18 = vmax.f32 %v2685_v10, 0.0 }
 0x483   :  { %v2821_v59 = vmax.f32 %v2677_v14, 0.0 }
 0x484   :  { %v2871_v19 = vpack.c.bf16 %v2823_v18, %v2822_v51 }
 0x485   :  { %v2870_v23 = vpack.c.bf16 %v2821_v59, %v2820_v26 }
 0x487   :  { %10348 = vmatprep.mubr.msk.bf16.mxu1 %vm2398_vm1, %v2870_v23 }
 0x488   :  { %10349 = vmatmul.mubr.msk.bf16.gmra.mrb[204].mxu1 %vm2398_vm1, %v2871_v19 }
 0x48d   :  { %v10286_v52 = vpop.f32.mrb[168].mxu1 }
 0x48e   :  { %v2698_v33 = vadd.f32 %v10286_v52, %v12075_v5  ;;  %v2689_v36 = vpop.f32.mrb[169].mxu1 }
 0x48f   :  { %v2690_v40 = vadd.f32 %v2689_v36, %v12075_v5  ;;  %v10287_v41 = vpop.f32.mrb[170].mxu1 }
 0x490   :  { %v2701_v45 = vadd.f32 %v10287_v41, %v12075_v5  ;;  %v2692_v16 = vpop.f32.mrb[171].mxu1  ;;  %v2826_v27 = vmax.f32 %v2698_v33, 0.0 }
 0x491   :  { %v2693_v50 = vadd.f32 %v2692_v16, %v12075_v5  ;;  %v2824_v37 = vmax.f32 %v2690_v40, 0.0 }
 0x492   :  { %v2827_v53 = vmax.f32 %v2701_v45, 0.0 }
 0x493   :  { %v2825_v60 = vmax.f32 %v2693_v50, 0.0 }
 0x494   :  { %v2873_v61 = vpack.c.bf16 %v2827_v53, %v2826_v27 }
 0x495   :  { %v2872_v6 = vpack.c.bf16 %v2825_v60, %v2824_v37 }
 0x497   :  { %10352 = vmatprep.mubr.msk.bf16.mxu1 %vm2398_vm1, %v2872_v6 }
 0x498   :  { %10353 = vmatmul.mubr.msk.bf16.gmra.mrb[208].mxu1 %vm2398_vm1, %v2873_v61 }
 0x49d   :  { %v10290_v38 = vpop.f32.mrb[172].mxu1 }
 0x49e   :  { %v2714_v15 = vadd.f32 %v10290_v38, %v12075_v5  ;;  %v2705_v46 = vpop.f32.mrb[173].mxu1 }
 0x49f   :  { %v2706_v57 = vadd.f32 %v2705_v46, %v12075_v5  ;;  %v10291_v10 = vpop.f32.mrb[174].mxu1 }
 0x4a0   :  { %v2717_v13 = vadd.f32 %v10291_v10, %v12075_v5  ;;  %v2708_v14 = vpop.f32.mrb[175].mxu1  ;;  %v2830_v18 = vmax.f32 %v2714_v15, 0.0 }
 0x4a1   :  { %v2709_v51 = vadd.f32 %v2708_v14, %v12075_v5  ;;  %v2828_v59 = vmax.f32 %v2706_v57, 0.0 }
 0x4a2   :  { %v2831_v26 = vmax.f32 %v2717_v13, 0.0 }
 0x4a3   :  { %v2829_v19 = vmax.f32 %v2709_v51, 0.0 }
 0x4a4   :  { %v2875_v23 = vpack.c.bf16 %v2831_v26, %v2830_v18 }
 0x4a5   :  { %v2874_v52 = vpack.c.bf16 %v2829_v19, %v2828_v59 }
 0x4a7   :  { %10356 = vmatprep.mubr.msk.bf16.mxu1 %vm2398_vm1, %v2874_v52 }
 0x4a8   :  { %10357 = vmatmul.mubr.msk.bf16.gmra.mrb[212].mxu1 %vm2398_vm1, %v2875_v23 }
 0x4ad   :  { %v10294_v33 = vpop.f32.mrb[176].mxu1 }
 0x4ae   :  { %v2730_v36 = vadd.f32 %v10294_v33, %v12075_v5  ;;  %v2721_v40 = vpop.f32.mrb[177].mxu1 }
 0x4af   :  { %v2722_v41 = vadd.f32 %v2721_v40, %v12075_v5  ;;  %v10295_v45 = vpop.f32.mrb[178].mxu1 }
 0x4b0   :  { %v2733_v16 = vadd.f32 %v10295_v45, %v12075_v5  ;;  %v2724_v50 = vpop.f32.mrb[179].mxu1  ;;  %v2834_v53 = vmax.f32 %v2730_v36, 0.0 }
 0x4b1   :  { %v2725_v27 = vadd.f32 %v2724_v50, %v12075_v5  ;;  %v2832_v60 = vmax.f32 %v2722_v41, 0.0 }
 0x4b2   :  { %v2835_v37 = vmax.f32 %v2733_v16, 0.0 }
 0x4b3   :  { %v2833_v61 = vmax.f32 %v2725_v27, 0.0 }
 0x4b4   :  { %v2877_v6 = vpack.c.bf16 %v2835_v37, %v2834_v53 }
 0x4b5   :  { %v2876_v38 = vpack.c.bf16 %v2833_v61, %v2832_v60 }
 0x4b7   :  { %10360 = vmatprep.mubr.msk.bf16.mxu1 %vm2398_vm1, %v2876_v38 }
 0x4b8   :  { %10361 = vmatmul.mubr.msk.bf16.gmra.mrb[216].mxu1 %vm2398_vm1, %v2877_v6 }
 0x4bd   :  { %v10298_v15 = vpop.f32.mrb[180].mxu1 }
 0x4be   :  { %v2746_v46 = vadd.f32 %v10298_v15, %v12075_v5  ;;  %v2737_v57 = vpop.f32.mrb[181].mxu1 }
 0x4bf   :  { %v2738_v10 = vadd.f32 %v2737_v57, %v12075_v5  ;;  %v10299_v13 = vpop.f32.mrb[182].mxu1 }
 0x4c0   :  { %v2749_v14 = vadd.f32 %v10299_v13, %v12075_v5  ;;  %v2740_v51 = vpop.f32.mrb[183].mxu1  ;;  %v2838_v26 = vmax.f32 %v2746_v46, 0.0 }
 0x4c1   :  { %v2741_v18 = vadd.f32 %v2740_v51, %v12075_v5  ;;  %v2836_v19 = vmax.f32 %v2738_v10, 0.0 }
 0x4c2   :  { %v2839_v59 = vmax.f32 %v2749_v14, 0.0 }
 0x4c3   :  { %v2837_v23 = vmax.f32 %v2741_v18, 0.0 }
 0x4c4   :  { %v2879_v52 = vpack.c.bf16 %v2839_v59, %v2838_v26 }
 0x4c5   :  { %v2878_v33 = vpack.c.bf16 %v2837_v23, %v2836_v19 }
 0x4c7   :  { %10364 = vmatprep.mubr.msk.bf16.mxu1 %vm2398_vm1, %v2878_v33 }
 0x4c8   :  { %10365 = vmatmul.mubr.msk.bf16.gmra.mrb[220].mxu1 %vm2398_vm1, %v2879_v52 }
 0x4cd   :  { %v10302_v36 = vpop.f32.mrb[184].mxu1 }
 0x4ce   :  { %v2762_v40 = vadd.f32 %v10302_v36, %v12075_v5  ;;  %v2753_v41 = vpop.f32.mrb[185].mxu1 }
 0x4cf   :  { %v2754_v45 = vadd.f32 %v2753_v41, %v12075_v5  ;;  %v10303_v16 = vpop.f32.mrb[186].mxu1 }
 0x4d0   :  { %v2765_v50 = vadd.f32 %v10303_v16, %v12075_v5  ;;  %v2756_v27 = vpop.f32.mrb[187].mxu1  ;;  %v2842_v37 = vmax.f32 %v2762_v40, 0.0  ;;  %v12184_v40 = vld [vmem:[%s16049_s3 + $0x14] ss:$0 sm:$0xff] }
 0x4d1   :  { %v2757_v53 = vadd.f32 %v2756_v27, %v12075_v5  ;;  %v2840_v61 = vmax.f32 %v2754_v45, 0.0 }
 0x4d2   :  { %v2843_v60 = vmax.f32 %v2765_v50, 0.0 }
 0x4d3   :  { %v2841_v6 = vmax.f32 %v2757_v53, 0.0 }
 0x4d4   :  { %v2881_v38 = vpack.c.bf16 %v2843_v60, %v2842_v37 }
 0x4d5   :  { %v2880_v15 = vpack.c.bf16 %v2841_v6, %v2840_v61 }
 0x4d7   :  { %10368 = vmatprep.mubr.msk.bf16.mxu1 %vm2398_vm1, %v2880_v15 }
 0x4d8   :  { %10369 = vmatmul.mubr.msk.bf16.gmra.mrb[224].mxu1 %vm2398_vm1, %v2881_v38 }
 0x4dd   :  { %v10306_v46 = vpop.f32.mrb[188].mxu1 }
 0x4de   :  { %v2778_v57 = vadd.f32 %v10306_v46, %v12075_v5  ;;  %v2769_v10 = vpop.f32.mrb[189].mxu1 }
 0x4df   :  { %v2770_v13 = vadd.f32 %v2769_v10, %v12075_v5  ;;  %v10307_v14 = vpop.f32.mrb[190].mxu1 }
 0x4e0   :  { %v2781_v51 = vadd.f32 %v10307_v14, %v12075_v5  ;;  %v2772_v18 = vpop.f32.mrb[191].mxu1  ;;  %v2846_v59 = vmax.f32 %v2778_v57, 0.0 }
 0x4e1   :  { %v2773_v26 = vadd.f32 %v2772_v18, %v12075_v5  ;;  %v2844_v23 = vmax.f32 %v2770_v13, 0.0 }
 0x4e2   :  { %v2847_v19 = vmax.f32 %v2781_v51, 0.0 }
 0x4e3   :  { %v2845_v52 = vmax.f32 %v2773_v26, 0.0 }
 0x4e4   :  { %v2883_v33 = vpack.c.bf16 %v2847_v19, %v2846_v59 }
 0x4e5   :  { %v2882_v36 = vpack.c.bf16 %v2845_v52, %v2844_v23 }
 0x4e7   :  { %v10314_v41 = vpop.f32.mrb[128].mxu0  ;;  %10372 = vmatprep.mubr.msk.bf16.mxu1 %vm2398_vm1, %v2882_v36 }
 0x4e8   :  { %v3036_v45 = vadd.f32 %v10314_v41, %v12184_v40  ;;  %v3027_v16 = vpop.f32.mrb[129].mxu0  ;;  %10373 = vmatmul.mubr.msk.bf16.gmra.mrb[228].mxu1 %vm2398_vm1, %v2883_v33 }
 0x4e9   :  { %v3028_v5 = vadd.f32 %v3027_v16, %v12184_v40  ;;  %v10315_v50 = vpop.f32.mrb[130].mxu0 }
 0x4ea   :  { %v3039_v27 = vadd.f32 %v10315_v50, %v12184_v40  ;;  %v3030_v53 = vpop.f32.mrb[131].mxu0  ;;  %v3284_v60 = vmax.f32 %v3036_v45, 0.0 }
 0x4eb   :  { %v3031_v37 = vadd.f32 %v3030_v53, %v12184_v40  ;;  %v3282_v6 = vmax.f32 %v3028_v5, 0.0 }
 0x4ec   :  { %v3285_v61 = vmax.f32 %v3039_v27, 0.0 }
 0x4ed   :  { %v3283_v38 = vmax.f32 %v3031_v37, 0.0 }
 0x4ee   :  { %v3351_v15 = vpack.c.bf16 %v3285_v61, %v3284_v60 }
 0x4ef   :  { %v10318_v46 = vpop.f32.mrb[132].mxu0  ;;  %v3350_v57 = vpack.c.bf16 %v3283_v38, %v3282_v6 }
 0x4f0   :  { %v3052_v10 = vadd.f32 %v10318_v46, %v12184_v40  ;;  %v3043_v13 = vpop.f32.mrb[133].mxu0 }
 0x4f1   :  { %v3044_v14 = vadd.f32 %v3043_v13, %v12184_v40  ;;  %v10319_v51 = vpop.f32.mrb[134].mxu0  ;;  %10380 = vmatprep.mubr.msk.bf16.mxu1 %vm2398_vm1, %v3350_v57 }
 0x4f2   :  { %v3055_v18 = vadd.f32 %v10319_v51, %v12184_v40  ;;  %v3046_v26 = vpop.f32.mrb[135].mxu0  ;;  %10381 = vmatmul.mubr.msk.bf16.vlgmr.msra.gmra.mrb[232].mxu1 %vm2398_vm1, %v3351_v15  ;;  %v3288_v19 = vmax.f32 %v3052_v10, 0.0 }
 0x4f3   :  { %v3047_v59 = vadd.f32 %v3046_v26, %v12184_v40  ;;  %v3286_v52 = vmax.f32 %v3044_v14, 0.0 }
 0x4f4   :  { %v3289_v23 = vmax.f32 %v3055_v18, 0.0 }
 0x4f5   :  { %v3287_v33 = vmax.f32 %v3047_v59, 0.0 }
 0x4f6   :  { %v3353_v36 = vpack.c.bf16 %v3289_v23, %v3288_v19 }
 0x4f7   :  { %v10322_v41 = vpop.f32.mrb[136].mxu0  ;;  %v3352_v45 = vpack.c.bf16 %v3287_v33, %v3286_v52 }
 0x4f8   :  { %v3068_v16 = vadd.f32 %v10322_v41, %v12184_v40  ;;  %v3059_v5 = vpop.f32.mrb[137].mxu0 }
 0x4f9   :  { %v3060_v50 = vadd.f32 %v3059_v5, %v12184_v40  ;;  %v10323_v27 = vpop.f32.mrb[138].mxu0  ;;  %10384 = vmatprep.mubr.msk.bf16.mxu1 %vm2398_vm1, %v3352_v45 }
 0x4fa   :  { %v3071_v53 = vadd.f32 %v10323_v27, %v12184_v40  ;;  %v3062_v37 = vpop.f32.mrb[139].mxu0  ;;  %10385 = vmatmul.mubr.msk.bf16.gmra.mrb[236].mxu1 %vm2398_vm1, %v3353_v36  ;;  %v3292_v61 = vmax.f32 %v3068_v16, 0.0 }
 0x4fb   :  { %v3063_v60 = vadd.f32 %v3062_v37, %v12184_v40  ;;  %v3290_v38 = vmax.f32 %v3060_v50, 0.0 }
 0x4fc   :  { %v3293_v6 = vmax.f32 %v3071_v53, 0.0 }
 0x4fd   :  { %v3291_v15 = vmax.f32 %v3063_v60, 0.0 }
 0x4fe   :  { %v3355_v46 = vpack.c.bf16 %v3293_v6, %v3292_v61 }
 0x4ff   :  { %v10326_v57 = vpop.f32.mrb[140].mxu0  ;;  %v3354_v10 = vpack.c.bf16 %v3291_v15, %v3290_v38 }
 0x500   :  { %v3084_v13 = vadd.f32 %v10326_v57, %v12184_v40  ;;  %v3075_v14 = vpop.f32.mrb[141].mxu0 }
 0x501   :  { %v3076_v51 = vadd.f32 %v3075_v14, %v12184_v40  ;;  %v10327_v18 = vpop.f32.mrb[142].mxu0  ;;  %10388 = vmatprep.mubr.msk.bf16.mxu1 %vm2398_vm1, %v3354_v10 }
 0x502   :  { %v3087_v26 = vadd.f32 %v10327_v18, %v12184_v40  ;;  %v3078_v59 = vpop.f32.mrb[143].mxu0  ;;  %10389 = vmatmul.mubr.msk.bf16.gmra.mrb[240].mxu1 %vm2398_vm1, %v3355_v46  ;;  %v3296_v23 = vmax.f32 %v3084_v13, 0.0 }
 0x503   :  { %v3079_v19 = vadd.f32 %v3078_v59, %v12184_v40  ;;  %v3294_v33 = vmax.f32 %v3076_v51, 0.0 }
 0x504   :  { %v3297_v52 = vmax.f32 %v3087_v26, 0.0 }
 0x505   :  { %v3295_v36 = vmax.f32 %v3079_v19, 0.0 }
 0x506   :  { %v3357_v41 = vpack.c.bf16 %v3297_v52, %v3296_v23  ;;  %v3844_v52 = vld [vmem:[%s16051_s5 + $0x300] sm:$0xff] }
 0x507   :  { %v3356_v45 = vpack.c.bf16 %v3295_v36, %v3294_v33 }
 0x509   :  { %10392 = vmatprep.mubr.msk.bf16.mxu1 %vm2398_vm1, %v3356_v45 }
 0x50a   :  { %10393 = vmatmul.mubr.msk.bf16.gmra.mrb[244].mxu1 %vm2398_vm1, %v3357_v41  ;;  %v9754_v41 = vcombine.high %v3844_v52, %v3844_v52 }
 0x50b   :  { %v10330_v16 = vpop.f32.mrb[144].mxu0 }
 0x50c   :  { %v3100_v5 = vadd.f32 %v10330_v16, %v12184_v40  ;;  %v3091_v50 = vpop.f32.mrb[145].mxu0  ;;  %9755 = vmatprep.subr.msk.bf16.mxu0 %vm3992_vm2, %v9754_v41 }
 0x50d   :  { %v3092_v27 = vadd.f32 %v3091_v50, %v12184_v40  ;;  %v10331_v53 = vpop.f32.mrb[146].mxu0  ;;  %v9753_v50 = vcombine.low %v3844_v52, %v3844_v52 }
 0x50e   :  { %v3103_v37 = vadd.f32 %v10331_v53, %v12184_v40  ;;  %v3094_v60 = vpop.f32.mrb[147].mxu0  ;;  %v3300_v6 = vmax.f32 %v3100_v5, 0.0 }
 0x50f   :  { %v3095_v61 = vadd.f32 %v3094_v60, %v12184_v40  ;;  %v3298_v15 = vmax.f32 %v3092_v27, 0.0  ;;  %v3994_v53 = vsel %vm3992_vm2, %v9753_v50, 0 }
 0x510   :  { %v3301_v38 = vmax.f32 %v3103_v37, 0.0  ;;  %4000 = vmatpush1.bf16.msra.mxu0 %v3994_v53 }
 0x511   :  { %v3299_v46 = vmax.f32 %v3095_v61, 0.0 }
 0x512   :  { %v3359_v57 = vpack.c.bf16 %v3301_v38, %v3300_v6 }
 0x513   :  { %v3358_v10 = vpack.c.bf16 %v3299_v46, %v3298_v15 }
 0x515   :  { %10396 = vmatprep.mubr.msk.bf16.mxu1 %vm2398_vm1, %v3358_v10 }
 0x516   :  { %10397 = vmatmul.mubr.msk.bf16.gmra.mrb[248].mxu1 %vm2398_vm1, %v3359_v57 }
 0x51b   :  { %v10334_v13 = vpop.f32.mrb[148].mxu0 }
 0x51c   :  { %v3116_v14 = vadd.f32 %v10334_v13, %v12184_v40  ;;  %v3107_v51 = vpop.f32.mrb[149].mxu0 }
 0x51d   :  { %v3108_v18 = vadd.f32 %v3107_v51, %v12184_v40  ;;  %v10335_v26 = vpop.f32.mrb[150].mxu0 }
 0x51e   :  { %v3119_v59 = vadd.f32 %v10335_v26, %v12184_v40  ;;  %v3110_v19 = vpop.f32.mrb[151].mxu0  ;;  %v3304_v33 = vmax.f32 %v3116_v14, 0.0 }
 0x51f   :  { %v3111_v23 = vadd.f32 %v3110_v19, %v12184_v40  ;;  %v3302_v45 = vmax.f32 %v3108_v18, 0.0 }
 0x520   :  { %v3305_v36 = vmax.f32 %v3119_v59, 0.0 }
 0x521   :  { %v3303_v16 = vmax.f32 %v3111_v23, 0.0 }
 0x522   :  { %v3361_v5 = vpack.c.bf16 %v3305_v36, %v3304_v33 }
 0x523   :  { %v3360_v27 = vpack.c.bf16 %v3303_v16, %v3302_v45 }
 0x525   :  { %10400 = vmatprep.mubr.msk.bf16.mxu1 %vm2398_vm1, %v3360_v27 }
 0x526   :  { %10401 = vmatmul.mubr.msk.bf16.gmra.mrb[252].mxu1 %vm2398_vm1, %v3361_v5 }
 0x52b   :  { %v10338_v37 = vpop.f32.mrb[192].mxu1 }
 0x52c   :  { %v3132_v60 = vadd.f32 %v10338_v37, %v12184_v40  ;;  %v3123_v61 = vpop.f32.mrb[193].mxu1 }
 0x52d   :  { %v3124_v6 = vadd.f32 %v3123_v61, %v12184_v40  ;;  %v10339_v38 = vpop.f32.mrb[194].mxu1  ;;  %v10621_v61 = vld [vmem:[%s16051_s5 + $0x84] ss:$8 sps:$4 sm:$0xff]  }
 0x52e   :  { %v3135_v15 = vadd.f32 %v10339_v38, %v12184_v40  ;;  %v3126_v46 = vpop.f32.mrb[195].mxu1  ;;  %v3308_v10 = vmax.f32 %v3132_v60, 0.0  ;;  %5202 = vmatprep.subr.bf16.mxu0 %v10621_v61 }
 0x52f   :  { %v3127_v57 = vadd.f32 %v3126_v46, %v12184_v40  ;;  %v3306_v14 = vmax.f32 %v3124_v6, 0.0 }
 0x530   :  { %v3309_v13 = vmax.f32 %v3135_v15, 0.0 }
 0x531   :  { %v3307_v51 = vmax.f32 %v3127_v57, 0.0 }
 0x532   :  { %v3363_v18 = vpack.c.bf16 %v3309_v13, %v3308_v10 }
 0x533   :  { %v3362_v26 = vpack.c.bf16 %v3307_v51, %v3306_v14 }
 0x535   :  { %10404 = vmatprep.mubr.msk.bf16.mxu1 %vm2398_vm1, %v3362_v26 }
 0x536   :  { %10405 = vmatmul.mubr.msk.bf16.gmra.mrb[0].mxu1 %vm2398_vm1, %v3363_v18 }
 0x53b   :  { %v10342_v59 = vpop.f32.mrb[196].mxu1 }
 0x53c   :  { %v3148_v19 = vadd.f32 %v10342_v59, %v12184_v40  ;;  %v3139_v23 = vpop.f32.mrb[197].mxu1 }
 0x53d   :  { %v3140_v52 = vadd.f32 %v3139_v23, %v12184_v40  ;;  %v10343_v33 = vpop.f32.mrb[198].mxu1 }
 0x53e   :  { %v3151_v36 = vadd.f32 %v10343_v33, %v12184_v40  ;;  %v3142_v41 = vpop.f32.mrb[199].mxu1  ;;  %v3312_v16 = vmax.f32 %v3148_v19, 0.0 }
 0x53f   :  { %v3143_v45 = vadd.f32 %v3142_v41, %v12184_v40  ;;  %v3310_v50 = vmax.f32 %v3140_v52, 0.0 }
 0x540   :  { %v3313_v5 = vmax.f32 %v3151_v36, 0.0 }
 0x541   :  { %v3311_v27 = vmax.f32 %v3143_v45, 0.0 }
 0x542   :  { %v3365_v53 = vpack.c.bf16 %v3313_v5, %v3312_v16 }
 0x543   :  { %v3364_v37 = vpack.c.bf16 %v3311_v27, %v3310_v50 }
 0x545   :  { %10408 = vmatprep.mubr.msk.bf16.mxu1 %vm2398_vm1, %v3364_v37 }
 0x546   :  { %10409 = vmatmul.mubr.msk.bf16.gmra.mrb[4].mxu1 %vm2398_vm1, %v3365_v53 }
 0x54b   :  { %v10346_v60 = vpop.f32.mrb[200].mxu1 }
 0x54c   :  { %v3164_v6 = vadd.f32 %v10346_v60, %v12184_v40  ;;  %v3155_v38 = vpop.f32.mrb[201].mxu1 }
 0x54d   :  { %v3156_v15 = vadd.f32 %v3155_v38, %v12184_v40  ;;  %v10347_v46 = vpop.f32.mrb[202].mxu1 }
 0x54e   :  { %v3167_v57 = vadd.f32 %v10347_v46, %v12184_v40  ;;  %v3158_v10 = vpop.f32.mrb[203].mxu1  ;;  %v3316_v14 = vmax.f32 %v3164_v6, 0.0 }
 0x54f   :  { %v3159_v13 = vadd.f32 %v3158_v10, %v12184_v40  ;;  %v3314_v18 = vmax.f32 %v3156_v15, 0.0 }
 0x550   :  { %v3317_v51 = vmax.f32 %v3167_v57, 0.0 }
 0x551   :  { %v3315_v26 = vmax.f32 %v3159_v13, 0.0 }
 0x552   :  { %v3367_v59 = vpack.c.bf16 %v3317_v51, %v3316_v14 }
 0x553   :  { %v3366_v19 = vpack.c.bf16 %v3315_v26, %v3314_v18 }
 0x555   :  { %10412 = vmatprep.mubr.msk.bf16.mxu1 %vm2398_vm1, %v3366_v19 }
 0x556   :  { %10413 = vmatmul.mubr.msk.bf16.gmra.mrb[8].mxu1 %vm2398_vm1, %v3367_v59 }
 0x55b   :  { %v10350_v23 = vpop.f32.mrb[204].mxu1 }
 0x55c   :  { %v3180_v52 = vadd.f32 %v10350_v23, %v12184_v40  ;;  %v3171_v33 = vpop.f32.mrb[205].mxu1 }
 0x55d   :  { %v3172_v36 = vadd.f32 %v3171_v33, %v12184_v40  ;;  %v10351_v41 = vpop.f32.mrb[206].mxu1 }
 0x55e   :  { %v3183_v45 = vadd.f32 %v10351_v41, %v12184_v40  ;;  %v3174_v16 = vpop.f32.mrb[207].mxu1  ;;  %v3320_v50 = vmax.f32 %v3180_v52, 0.0 }
 0x55f   :  { %v3175_v5 = vadd.f32 %v3174_v16, %v12184_v40  ;;  %v3318_v53 = vmax.f32 %v3172_v36, 0.0 }
 0x560   :  { %v3321_v27 = vmax.f32 %v3183_v45, 0.0 }
 0x561   :  { %v3319_v37 = vmax.f32 %v3175_v5, 0.0 }
 0x562   :  { %v3369_v60 = vpack.c.bf16 %v3321_v27, %v3320_v50 }
 0x563   :  { %v3368_v61 = vpack.c.bf16 %v3319_v37, %v3318_v53 }
 0x565   :  { %10416 = vmatprep.mubr.msk.bf16.mxu1 %vm2398_vm1, %v3368_v61 }
 0x566   :  { %10417 = vmatmul.mubr.msk.bf16.gmra.mrb[12].mxu1 %vm2398_vm1, %v3369_v60 }
 0x56b   :  { %v10354_v6 = vpop.f32.mrb[208].mxu1 }
 0x56c   :  { %v3196_v38 = vadd.f32 %v10354_v6, %v12184_v40  ;;  %v3187_v15 = vpop.f32.mrb[209].mxu1 }
 0x56d   :  { %v3188_v46 = vadd.f32 %v3187_v15, %v12184_v40  ;;  %v10355_v57 = vpop.f32.mrb[210].mxu1 }
 0x56e   :  { %v3199_v10 = vadd.f32 %v10355_v57, %v12184_v40  ;;  %v3190_v13 = vpop.f32.mrb[211].mxu1  ;;  %v3324_v51 = vmax.f32 %v3196_v38, 0.0 }
 0x56f   :  { %v3191_v14 = vadd.f32 %v3190_v13, %v12184_v40  ;;  %v3322_v26 = vmax.f32 %v3188_v46, 0.0 }
 0x570   :  { %v3325_v18 = vmax.f32 %v3199_v10, 0.0 }
 0x571   :  { %v3323_v59 = vmax.f32 %v3191_v14, 0.0 }
 0x572   :  { %v3371_v19 = vpack.c.bf16 %v3325_v18, %v3324_v51 }
 0x573   :  { %v3370_v23 = vpack.c.bf16 %v3323_v59, %v3322_v26 }
 0x575   :  { %10420 = vmatprep.mubr.msk.bf16.mxu1 %vm2398_vm1, %v3370_v23 }
 0x576   :  { %10421 = vmatmul.mubr.msk.bf16.gmra.mrb[16].mxu1 %vm2398_vm1, %v3371_v19 }
 0x57b   :  { %v10358_v52 = vpop.f32.mrb[212].mxu1 }
 0x57c   :  { %v3212_v33 = vadd.f32 %v10358_v52, %v12184_v40  ;;  %v3203_v36 = vpop.f32.mrb[213].mxu1 }
 0x57d   :  { %v3204_v41 = vadd.f32 %v3203_v36, %v12184_v40  ;;  %v10359_v45 = vpop.f32.mrb[214].mxu1 }
 0x57e   :  { %v3215_v16 = vadd.f32 %v10359_v45, %v12184_v40  ;;  %v3206_v5 = vpop.f32.mrb[215].mxu1  ;;  %v3328_v27 = vmax.f32 %v3212_v33, 0.0 }
 0x57f   :  { %v3207_v50 = vadd.f32 %v3206_v5, %v12184_v40  ;;  %v3326_v37 = vmax.f32 %v3204_v41, 0.0 }
 0x580   :  { %v3329_v53 = vmax.f32 %v3215_v16, 0.0 }
 0x581   :  { %v3327_v60 = vmax.f32 %v3207_v50, 0.0 }
 0x582   :  { %v3373_v61 = vpack.c.bf16 %v3329_v53, %v3328_v27 }
 0x583   :  { %v3372_v6 = vpack.c.bf16 %v3327_v60, %v3326_v37 }
 0x585   :  { %10424 = vmatprep.mubr.msk.bf16.mxu1 %vm2398_vm1, %v3372_v6 }
 0x586   :  { %10425 = vmatmul.mubr.msk.bf16.gmra.mrb[20].mxu1 %vm2398_vm1, %v3373_v61 }
 0x58b   :  { %v10362_v38 = vpop.f32.mrb[216].mxu1 }
 0x58c   :  { %v3228_v15 = vadd.f32 %v10362_v38, %v12184_v40  ;;  %v3219_v46 = vpop.f32.mrb[217].mxu1 }
 0x58d   :  { %v3220_v57 = vadd.f32 %v3219_v46, %v12184_v40  ;;  %v10363_v10 = vpop.f32.mrb[218].mxu1 }
 0x58e   :  { %v3231_v13 = vadd.f32 %v10363_v10, %v12184_v40  ;;  %v3222_v14 = vpop.f32.mrb[219].mxu1  ;;  %v3332_v18 = vmax.f32 %v3228_v15, 0.0 }
 0x58f   :  { %v3223_v51 = vadd.f32 %v3222_v14, %v12184_v40  ;;  %v3330_v59 = vmax.f32 %v3220_v57, 0.0 }
 0x590   :  { %v3333_v26 = vmax.f32 %v3231_v13, 0.0 }
 0x591   :  { %v3331_v19 = vmax.f32 %v3223_v51, 0.0 }
 0x592   :  { %v3375_v23 = vpack.c.bf16 %v3333_v26, %v3332_v18 }
 0x593   :  { %v3374_v52 = vpack.c.bf16 %v3331_v19, %v3330_v59 }
 0x595   :  { %10428 = vmatprep.mubr.msk.bf16.mxu1 %vm2398_vm1, %v3374_v52 }
 0x596   :  { %10429 = vmatmul.mubr.msk.bf16.gmra.mrb[24].mxu1 %vm2398_vm1, %v3375_v23 }
 0x59b   :  { %v10366_v33 = vpop.f32.mrb[220].mxu1 }
 0x59c   :  { %v3244_v36 = vadd.f32 %v10366_v33, %v12184_v40  ;;  %v3235_v41 = vpop.f32.mrb[221].mxu1 }
 0x59d   :  { %v3236_v45 = vadd.f32 %v3235_v41, %v12184_v40  ;;  %v10367_v16 = vpop.f32.mrb[222].mxu1 }
 0x59e   :  { %v3247_v5 = vadd.f32 %v10367_v16, %v12184_v40  ;;  %v3238_v50 = vpop.f32.mrb[223].mxu1  ;;  %v3336_v53 = vmax.f32 %v3244_v36, 0.0 }
 0x59f   :  { %v3239_v27 = vadd.f32 %v3238_v50, %v12184_v40  ;;  %v3334_v60 = vmax.f32 %v3236_v45, 0.0 }
 0x5a0   :  { %v3337_v37 = vmax.f32 %v3247_v5, 0.0 }
 0x5a1   :  { %v3335_v61 = vmax.f32 %v3239_v27, 0.0 }
 0x5a2   :  { %v3377_v6 = vpack.c.bf16 %v3337_v37, %v3336_v53 }
 0x5a3   :  { %v3376_v38 = vpack.c.bf16 %v3335_v61, %v3334_v60 }
 0x5a5   :  { %10432 = vmatprep.mubr.msk.bf16.mxu1 %vm2398_vm1, %v3376_v38 }
 0x5a6   :  { %10433 = vmatmul.mubr.msk.bf16.gmra.mrb[28].mxu1 %vm2398_vm1, %v3377_v6 }
 0x5ab   :  { %v10370_v15 = vpop.f32.mrb[224].mxu1 }
 0x5ac   :  { %v3260_v46 = vadd.f32 %v10370_v15, %v12184_v40  ;;  %v3251_v57 = vpop.f32.mrb[225].mxu1 }
 0x5ad   :  { %v3252_v10 = vadd.f32 %v3251_v57, %v12184_v40  ;;  %v10371_v13 = vpop.f32.mrb[226].mxu1  ;;  %v12291_v57 = vld [vmem:[%s16049_s3 + $0x15] ss:$0 sm:$0xff] }
 0x5ae   :  { %v3263_v14 = vadd.f32 %v10371_v13, %v12184_v40  ;;  %v3254_v51 = vpop.f32.mrb[227].mxu1  ;;  %v3340_v26 = vmax.f32 %v3260_v46, 0.0 }
 0x5af   :  { %v3255_v18 = vadd.f32 %v3254_v51, %v12184_v40  ;;  %v3338_v19 = vmax.f32 %v3252_v10, 0.0 }
 0x5b0   :  { %v3341_v59 = vmax.f32 %v3263_v14, 0.0 }
 0x5b1   :  { %v3339_v23 = vmax.f32 %v3255_v18, 0.0 }
 0x5b2   :  { %v3379_v52 = vpack.c.bf16 %v3341_v59, %v3340_v26 }
 0x5b3   :  { %v3378_v33 = vpack.c.bf16 %v3339_v23, %v3338_v19  ;;  %v10619_v19 = vld [vmem:[%s16051_s5 + $0x80] ss:$8 sps:$4 sm:$0xff]  }
 0x5b5   :  { %10436 = vmatprep.mubr.msk.bf16.mxu1 %vm2398_vm1, %v3378_v33 }
 0x5b6   :  { %10437 = vmatmul.mubr.msk.bf16.gmra.mrb[32].mxu1 %vm2398_vm1, %v3379_v52  ;;  %v10624_v52 = vld [vmem:[%s16051_s5 + $0x94] ss:$8 sps:$4 sm:$0xff]  }
 0x5bb   :  { %v10374_v36 = vpop.f32.mrb[228].mxu1 }
 0x5bc   :  { %v3276_v41 = vadd.f32 %v10374_v36, %v12184_v40  ;;  %v3267_v45 = vpop.f32.mrb[229].mxu1 }
 0x5bd   :  { %v3268_v16 = vadd.f32 %v3267_v45, %v12184_v40  ;;  %v10375_v5 = vpop.f32.mrb[230].mxu1 }
 0x5be   :  { %v3279_v50 = vadd.f32 %v10375_v5, %v12184_v40  ;;  %v3270_v27 = vpop.f32.mrb[231].mxu1  ;;  %v3344_v37 = vmax.f32 %v3276_v41, 0.0  ;;  %v10622_v41 = vld [vmem:[%s16051_s5 + $0x90] ss:$8 sps:$4 sm:$0xff]  }
 0x5bf   :  { %v3271_v53 = vadd.f32 %v3270_v27, %v12184_v40  ;;  %v3342_v61 = vmax.f32 %v3268_v16, 0.0  ;;  %v10627_v16 = vld [vmem:[%s16051_s5 + $0xa4] ss:$8 sps:$4 sm:$0xff]  }
 0x5c0   :  { %v3345_v60 = vmax.f32 %v3279_v50, 0.0 }
 0x5c1   :  { %v3343_v6 = vmax.f32 %v3271_v53, 0.0 }
 0x5c2   :  { %v3381_v38 = vpack.c.bf16 %v3345_v60, %v3344_v37 }
 0x5c3   :  { %v3380_v15 = vpack.c.bf16 %v3343_v6, %v3342_v61  ;;  %v10625_v61 = vld [vmem:[%s16051_s5 + $0xa0] ss:$8 sps:$4 sm:$0xff]  }
 0x5c5   :  { %v10382_v46 = vpop.f32.mrb[232].mxu1  ;;  %10440 = vmatprep.mubr.msk.bf16.mxu1 %vm2398_vm1, %v3380_v15 }
 0x5c6   :  { %v3524_v10 = vpop.f32.mrb[233].mxu1  ;;  %10441 = vmatmul.mubr.msk.bf16.gmra.mrb[36].mxu1 %vm2398_vm1, %v3381_v38  ;;  %v12296_v40 = vadd.f32 %v10382_v46, %v12291_v57  ;;  %v10630_v38 = vld [vmem:[%s16051_s5 + $0xb4] ss:$8 sps:$4 sm:$0xff]  }
 0x5c7   :  { %v10383_v13 = vpop.f32.mrb[234].mxu1  ;;  %v12302_v18 = vadd.f32 %v12291_v57, %v3524_v10  ;;  %v10628_v10 = vld [vmem:[%s16051_s5 + $0xb0] ss:$8 sps:$4 sm:$0xff]  }
 0x5c8   :  { %v12299_v14 = vadd.f32 %v10383_v13, %v12291_v57  ;;  %v3527_v51 = vpop.f32.mrb[235].mxu1 }
 0x5c9   :  { %v12305_v26 = vadd.f32 %v12291_v57, %v3527_v51  ;;  %v10633_v51 = vld [vmem:[%s16051_s5 + $0xc4] ss:$8 sps:$4 sm:$0xff]  }
 0x5ca   :  { %v3846_v59 = vpack.c.bf16 %v12299_v14, %v12296_v40 }
 0x5cb   :  { %16118 = vst [vmem:[#allocation10_spill] sm:$0xff] %v12305_v26  ;;  %v3845_v23 = vpack.c.bf16 %v12305_v26, %v12302_v18 }
 0x5cd   :  { %v10386_v33 = vpop.f32.mrb[236].mxu1  ;;  %9756 = vmatmul.mubr.msk.bf16.vlgmr.msra.gmra.mrb[152].mxu0 %vm3895_vm3, %v3845_v23 }
 0x5ce   :  { %5203 = vmatpush1.bf16.msra.mxu0 %v10619_v19  ;;  %v3540_v36 = vpop.f32.mrb[237].mxu1  ;;  %4041 = vmatprep.mubr.bf16.mxu0 %v16099_v0  ;;  %v12326_v5 = vadd.f32 %v10386_v33, %v12291_v57 }
 0x5cf   :  { %v10387_v45 = vpop.f32.mrb[238].mxu1  ;;  %5204 = vmatprep.subr.bf16.mxu0 %v10624_v52  ;;  %v12332_v53 = vadd.f32 %v12291_v57, %v3540_v36 }
 0x5d0   :  { %16119 = vst [vmem:[#allocation11_spill] sm:$0xff] %v12326_v5  ;;  %v12329_v50 = vadd.f32 %v10387_v45, %v12291_v57  ;;  %v3543_v27 = vpop.f32.mrb[239].mxu1 }
 0x5d1   :  { %16121 = vst [vmem:[#allocation13_spill] sm:$0xff] %v12332_v53  ;;  %v12335_v37 = vadd.f32 %v12291_v57, %v3543_v27 }
 0x5d2   :  { %16120 = vst [vmem:[#allocation12_spill] sm:$0xff] %v12329_v50  ;;  %v3848_v60 = vpack.c.bf16 %v12329_v50, %v12326_v5  ;;  %5205 = vmatpush1.bf16.msra.mxu0 %v10622_v41  ;;  %v10631_v41 = vld [vmem:[%s16051_s5 + $0xc0] ss:$8 sps:$4 sm:$0xff]  }
 0x5d3   :  { %16122 = vst [vmem:[#allocation14_spill] sm:$0xff] %v12335_v37  ;;  %v3847_v6 = vpack.c.bf16 %v12335_v37, %v12332_v53  ;;  %5206 = vmatprep.subr.bf16.mxu0 %v10627_v16 }
 0x5d5   :  { %v10390_v15 = vpop.f32.mrb[240].mxu1  ;;  %9757 = vmatmul.mubr.msk.bf16.gmra.mrb[156].mxu0 %vm3895_vm3, %v3846_v59 }
 0x5d6   :  { %v3556_v46 = vpop.f32.mrb[241].mxu1  ;;  %4051 = vmatprep.mubr.bf16.mxu0 %v16099_v0  ;;  %5207 = vmatpush1.bf16.msra.mxu0 %v10625_v61  ;;  %v12356_v19 = vadd.f32 %v10390_v15, %v12291_v57 }
 0x5d7   :  { %v10391_v13 = vpop.f32.mrb[242].mxu1  ;;  %5208 = vmatprep.subr.bf16.mxu0 %v10630_v38  ;;  %v12362_v52 = vadd.f32 %v12291_v57, %v3556_v46 }
 0x5d8   :  { %16123 = vst [vmem:[#allocation15_spill] sm:$0xff] %v12356_v19  ;;  %v12359_v23 = vadd.f32 %v10391_v13, %v12291_v57  ;;  %v3559_v59 = vpop.f32.mrb[243].mxu1 }
 0x5d9   :  { %16125 = vst [vmem:[#allocation17_spill] sm:$0xff] %v12362_v52  ;;  %v12365_v33 = vadd.f32 %v12291_v57, %v3559_v59 }
 0x5da   :  { %16124 = vst [vmem:[#allocation16_spill] sm:$0xff] %v12359_v23  ;;  %v3850_v36 = vpack.c.bf16 %v12359_v23, %v12356_v19  ;;  %5209 = vmatpush1.bf16.msra.mxu0 %v10628_v10 }
 0x5db   :  { %16126 = vst [vmem:[#allocation18_spill] sm:$0xff] %v12365_v33  ;;  %v3849_v45 = vpack.c.bf16 %v12365_v33, %v12362_v52  ;;  %5210 = vmatprep.subr.bf16.mxu0 %v10633_v51 }
 0x5dd   :  { %v10394_v16 = vpop.f32.mrb[244].mxu1  ;;  %9758 = vmatmul.mubr.msk.bf16.gmra.mrb[160].mxu0 %vm3895_vm3, %v3847_v6 }
 0x5de   :  { %v3572_v27 = vpop.f32.mrb[245].mxu1  ;;  %4061 = vmatprep.mubr.bf16.mxu0 %v16099_v0  ;;  %5211 = vmatpush1.bf16.msra.mxu0 %v10631_v41  ;;  %v12377_v38 = vadd.f32 %v10394_v16, %v12291_v57  ;;  %v10634_v16 = vld [vmem:[#allocation7 + $0x80] sm:$0xff]  }
 0x5df   :  { %v10395_v61 = vpop.f32.mrb[246].mxu1  ;;  %v12383_v10 = vadd.f32 %v12291_v57, %v3572_v27  ;;  %4674 = vmatpush1.bf16.msra.mxu1 %v10634_v16  ;;  %v10640_v16 = vld [vmem:[#allocation7 + $0x98] sm:$0xff]  }
 0x5e0   :  { %16127 = vst [vmem:[#allocation19_spill] sm:$0xff] %v12377_v38  ;;  %v12380_v15 = vadd.f32 %v10395_v61, %v12291_v57  ;;  %v3575_v46 = vpop.f32.mrb[247].mxu1  ;;  %4675 = vmatprep.subr.bf16.mxu1 %v16099_v0 }
 0x5e1   :  { %16129 = vst [vmem:[#allocation21_spill] sm:$0xff] %v12383_v10  ;;  %v12386_v13 = vadd.f32 %v12291_v57, %v3575_v46 }
 0x5e2   :  { %16128 = vst [vmem:[#allocation20_spill] sm:$0xff] %v12380_v15  ;;  %v3852_v6 = vpack.c.bf16 %v12380_v15, %v12377_v38 }
 0x5e3   :  { %16130 = vst [vmem:[#allocation22_spill] sm:$0xff] %v12386_v13  ;;  %v3851_v51 = vpack.c.bf16 %v12386_v13, %v12383_v10 }
 0x5e5   :  { %9759 = vmatmul.mubr.msk.bf16.gmra.mrb[164].mxu0 %vm3895_vm3, %v3848_v60 }
 0x5e6   :  { %4071 = vmatprep.mubr.bf16.mxu0 %v16099_v0 }
 0x5e9   :  { %v10398_v59 = vpop.f32.mrb[248].mxu1 }
 0x5ea   :  { %v3588_v41 = vpop.f32.mrb[249].mxu1  ;;  %v12395_v27 = vadd.f32 %v10398_v59, %v12291_v57  ;;  %v10638_v59 = vld [vmem:[#allocation7 + $0x88] sm:$0xff]  }
 0x5eb   :  { %v10399_v61 = vpop.f32.mrb[250].mxu1  ;;  %v12401_v15 = vadd.f32 %v12291_v57, %v3588_v41  ;;  %v10635_v41 = vld [vmem:[%s16051_s5 + $0xd0] ss:$8 sps:$4 sm:$0xff]   ;;  %4676 = vmatpush1.bf16.msra.mxu1 %v10638_v59 }
 0x5ec   :  { %16131 = vst [vmem:[#allocation23_spill] sm:$0xff] %v12395_v27  ;;  %v12398_v46 = vadd.f32 %v10399_v61, %v12291_v57  ;;  %v3591_v3 = vpop.f32.mrb[251].mxu1  ;;  %4677 = vmatprep.subr.bf16.mxu1 %v16099_v0 }
 0x5ed   :  { %16133 = vst [vmem:[#allocation25_spill] sm:$0xff] %v12401_v15  ;;  %v12404_v13 = vadd.f32 %v12291_v57, %v3591_v3  ;;  %9760 = vmatmul.mubr.msk.bf16.gmra.mrb[168].mxu0 %vm3895_vm3, %v3849_v45  ;;  %v10637_v3 = vld [vmem:[%s16051_s5 + $0xd4] ss:$8 sps:$4 sm:$0xff]  }
 0x5ee   :  { %16132 = vst [vmem:[#allocation24_spill] sm:$0xff] %v12398_v46  ;;  %4081 = vmatprep.mubr.bf16.mxu0 %v16099_v0  ;;  %v10639_v45 = vld [vmem:[#allocation7 + $0x90] sm:$0xff]   ;;  %5212 = vmatprep.subr.bf16.mxu0 %v10637_v3 }
 0x5ef   :  { %16134 = vst [vmem:[#allocation26_spill] sm:$0xff] %v12404_v13  ;;  %v3853_v61 = vpack.c.bf16 %v12404_v13, %v12401_v15  ;;  %5213 = vmatpush1.bf16.msra.mxu0 %v10635_v41  ;;  %4678 = vmatpush1.bf16.msra.mxu1 %v10639_v45  ;;  %v10641_v15 = vld [vmem:[#allocation7 + $0xa0] sm:$0xff]  }
 0x5f0   :  { %4679 = vmatprep.subr.bf16.mxu1 %v16099_v0 }
 0x5f3   :  { %4680 = vmatpush1.bf16.msra.mxu1 %v10640_v16  ;;  %v10645_v16 = vld [vmem:[#allocation7 + $0xc0] sm:$0xff]  }
 0x5f4   :  { %4681 = vmatprep.subr.bf16.mxu1 %v16099_v0 }
 0x5f5   :  { %9761 = vmatmul.mubr.msk.bf16.gmra.mrb[172].mxu0 %vm3895_vm3, %v3850_v36 }
 0x5f6   :  { %4091 = vmatprep.mubr.bf16.mxu0 %v16099_v0 }
 0x5f7   :  { %4682 = vmatpush1.bf16.msra.mxu1 %v10641_v15  ;;  %v10643_v15 = vld [vmem:[#allocation7 + $0xb0] sm:$0xff]  }
 0x5f8   :  { %4683 = vmatprep.subr.bf16.mxu1 %v16099_v0 }
 0x5f9   :  { %v10402_v60 = vpop.f32.mrb[252].mxu1 }
 0x5fa   :  { %v3604_v13 = vpop.f32.mrb[253].mxu1  ;;  %v12425_v3 = vadd.f32 %v10402_v60, %v12291_v57  ;;  %v10642_v60 = vld [vmem:[#allocation7 + $0xa8] sm:$0xff]  }
 0x5fb   :  { %v10403_v59 = vpop.f32.mrb[254].mxu1  ;;  %v12431_v36 = vadd.f32 %v12291_v57, %v3604_v13  ;;  %4684 = vmatpush1.bf16.msra.mxu1 %v10642_v60  ;;  %v10644_v13 = vld [vmem:[#allocation7 + $0xb8] sm:$0xff]  }
 0x5fc   :  { %16135 = vst [vmem:[#allocation27_spill] sm:$0xff] %v12425_v3  ;;  %v12428_v41 = vadd.f32 %v10403_v59, %v12291_v57  ;;  %v3607_v45 = vpop.f32.mrb[255].mxu1  ;;  %4685 = vmatprep.subr.bf16.mxu1 %v16099_v0 }
 0x5fd   :  { %16137 = vst [vmem:[#allocation29_spill] sm:$0xff] %v12431_v36  ;;  %v12434_v10 = vadd.f32 %v12291_v57, %v3607_v45  ;;  %9762 = vmatmul.mubr.msk.bf16.gmra.mrb[176].mxu0 %vm3895_vm3, %v3851_v51 }
 0x5fe   :  { %16136 = vst [vmem:[#allocation28_spill] sm:$0xff] %v12428_v41  ;;  %4101 = vmatprep.mubr.bf16.mxu0 %v16099_v0 }
 0x5ff   :  { %16138 = vst [vmem:[#allocation30_spill] sm:$0xff] %v12434_v10  ;;  %v3855_v59 = vpack.c.bf16 %v12434_v10, %v12431_v36  ;;  %4686 = vmatpush1.bf16.msra.mxu1 %v10643_v15 }
 0x600   :  { %4687 = vmatprep.subr.bf16.mxu1 %v16099_v0 }
 0x603   :  { %4688 = vmatpush1.bf16.msra.mxu1 %v10644_v13 }
 0x604   :  { %4689 = vmatprep.subr.bf16.mxu1 %v16099_v0 }
 0x605   :  { %9763 = vmatmul.mubr.msk.bf16.gmra.mrb[180].mxu0 %vm3895_vm3, %v3852_v6 }
 0x606   :  { %4111 = vmatprep.mubr.bf16.mxu0 %v16099_v0 }
 0x607   :  { %4690 = vmatpush1.bf16.msra.mxu1 %v10645_v16  ;;  %v10646_v16 = vld [vmem:[%s16051_s5 + $0xe0] ss:$8 sps:$4 sm:$0xff]  }
 0x608   :  { %4691 = vmatprep.subr.bf16.mxu1 %v16099_v0 }
 0x609   :  { %v10406_v51 = vpop.f32.mrb[0].mxu1 }
 0x60a   :  { %v3620_v45 = vpop.f32.mrb[1].mxu1  ;;  %v12449_v60 = vadd.f32 %v10406_v51, %v12291_v57  ;;  %v10649_v51 = vld [vmem:[#allocation7 + $0xc8] sm:$0xff]  }
 0x60b   :  { %v10407_v38 = vpop.f32.mrb[2].mxu1  ;;  %v12455_v6 = vadd.f32 %v12291_v57, %v3620_v45  ;;  %v10648_v45 = vld [vmem:[%s16051_s5 + $0xe4] ss:$8 sps:$4 sm:$0xff]   ;;  %4692 = vmatpush1.bf16.msra.mxu1 %v10649_v51 }
 0x60c   :  { %16139 = vst [vmem:[#allocation31_spill] sm:$0xff] %v12449_v60  ;;  %v12452_v10 = vadd.f32 %v10407_v38, %v12291_v57  ;;  %v3623_v15 = vpop.f32.mrb[3].mxu1  ;;  %5214 = vmatprep.subr.bf16.mxu0 %v10648_v45  ;;  %4693 = vmatprep.subr.bf16.mxu1 %v16099_v0  ;;  %v10652_v45 = vld [vmem:[#allocation7 + $0xe0] sm:$0xff]  }
 0x60d   :  { %16141 = vst [vmem:[#allocation33_spill] sm:$0xff] %v12455_v6  ;;  %v12458_v36 = vadd.f32 %v12291_v57, %v3623_v15  ;;  %9764 = vmatmul.mubr.msk.bf16.gmra.mrb[184].mxu0 %vm3895_vm3, %v3853_v61  ;;  %v10650_v61 = vld [vmem:[#allocation7 + $0xd0] sm:$0xff]   ;;  %v16143_v15 = vpack.c.bf16 %v12398_v46, %v12395_v27 }
 0x60e   :  { %16140 = vst [vmem:[#allocation32_spill] sm:$0xff] %v12452_v10  ;;  %v3858_v13 = vpack.c.bf16 %v12452_v10, %v12449_v60  ;;  %4121 = vmatprep.mubr.bf16.mxu0 %v16099_v0  ;;  %5215 = vmatpush1.bf16.msra.mxu0 %v10646_v16 }
 0x60f   :  { %16142 = vst [vmem:[#allocation34_spill] sm:$0xff] %v12458_v36  ;;  %v3857_v38 = vpack.c.bf16 %v12458_v36, %v12455_v6  ;;  %4694 = vmatpush1.bf16.msra.mxu1 %v10650_v61  ;;  %v10651_v36 = vld [vmem:[#allocation7 + $0xd8] sm:$0xff]  }
 0x610   :  { %4695 = vmatprep.subr.bf16.mxu1 %v16099_v0 }
 0x613   :  { %4696 = vmatpush1.bf16.msra.mxu1 %v10651_v36 }
 0x614   :  { %4697 = vmatprep.subr.bf16.mxu1 %v16099_v0 }
 0x615   :  { %9765 = vmatmul.mubr.msk.bf16.gmra.mrb[188].mxu0 %vm3895_vm3, %v16143_v15 }
 0x616   :  { %4131 = vmatprep.mubr.bf16.mxu0 %v16099_v0 }
 0x617   :  { %4698 = vmatpush1.bf16.msra.mxu1 %v10652_v45 }
 0x618   :  { %4699 = vmatprep.subr.bf16.mxu1 %v16099_v0 }
 0x619   :  { %v10410_v10 = vpop.f32.mrb[4].mxu1 }
 0x61a   :  { %v3636_v51 = vpop.f32.mrb[5].mxu1  ;;  %v12482_v16 = vadd.f32 %v10410_v10, %v12291_v57  ;;  %v10653_v10 = vld [vmem:[#allocation7 + $0xe8] sm:$0xff]  }
 0x61b   :  { %v10411_v6 = vpop.f32.mrb[6].mxu1  ;;  %v12488_v15 = vadd.f32 %v12291_v57, %v3636_v51  ;;  %4700 = vmatpush1.bf16.msra.mxu1 %v10653_v10  ;;  %v10654_v51 = vld [vmem:[#allocation7 + $0xf0] sm:$0xff]  }
 0x61c   :  { %16144 = vst [vmem:[#allocation35_spill] sm:$0xff] %v12482_v16  ;;  %v12485_v61 = vadd.f32 %v10411_v6, %v12291_v57  ;;  %v3639_v60 = vpop.f32.mrb[7].mxu1  ;;  %4701 = vmatprep.subr.bf16.mxu1 %v16099_v0 }
 0x61d   :  { %16146 = vst [vmem:[#allocation37_spill] sm:$0xff] %v12488_v15  ;;  %v12491_v46 = vadd.f32 %v12291_v57, %v3639_v60  ;;  %9766 = vmatmul.mubr.msk.bf16.gmra.mrb[192].mxu0 %vm3895_vm3, %v3855_v59  ;;  %v16148_v60 = vpack.c.bf16 %v12428_v41, %v12425_v3  ;;  %v10655_v59 = vld [vmem:[#allocation7 + $0xf8] sm:$0xff]  }
 0x61e   :  { %16145 = vst [vmem:[#allocation36_spill] sm:$0xff] %v12485_v61  ;;  %v3860_v36 = vpack.c.bf16 %v12485_v61, %v12482_v16  ;;  %4141 = vmatprep.mubr.bf16.mxu0 %v16099_v0 }
 0x61f   :  { %16147 = vst [vmem:[#allocation38_spill] sm:$0xff] %v12491_v46  ;;  %v3859_v6 = vpack.c.bf16 %v12491_v46, %v12488_v15  ;;  %4702 = vmatpush1.bf16.msra.mxu1 %v10654_v51 }
 0x620   :  { %4703 = vmatprep.subr.bf16.mxu1 %v16099_v0 }
 0x623   :  { %4704 = vmatpush1.bf16.msra.mxu1 %v10655_v59 }
 0x625   :  { %9767 = vmatmul.mubr.msk.bf16.gmra.mrb[196].mxu0 %vm3895_vm3, %v16148_v60 }
 0x626   :  { %4151 = vmatprep.mubr.bf16.mxu0 %v16099_v0 }
 0x629   :  { %v10414_v45 = vpop.f32.mrb[8].mxu1 }
 0x62a   :  { %v3652_v61 = vpop.f32.mrb[9].mxu1  ;;  %v12508_v10 = vadd.f32 %v10414_v45, %v12291_v57 }
 0x62b   :  { %v10415_v16 = vpop.f32.mrb[10].mxu1  ;;  %v12514_v15 = vadd.f32 %v12291_v57, %v3652_v61  ;;  %v10658_v61 = vld [vmem:[%s16051_s5 + $0xf4] ss:$8 sps:$4 sm:$0xff]  }
 0x62c   :  { %16149 = vst [vmem:[#allocation39_spill] sm:$0xff] %v12508_v10  ;;  %v12511_v46 = vadd.f32 %v10415_v16, %v12291_v57  ;;  %v3655_v51 = vpop.f32.mrb[11].mxu1  ;;  %v10656_v16 = vld [vmem:[%s16051_s5 + $0xf0] ss:$8 sps:$4 sm:$0xff]   ;;  %5216 = vmatprep.subr.bf16.mxu0 %v10658_v61 }
 0x62d   :  { %16151 = vst [vmem:[#allocation41_spill] sm:$0xff] %v12514_v15  ;;  %v12517_v60 = vadd.f32 %v12291_v57, %v3655_v51  ;;  %9768 = vmatmul.mubr.msk.bf16.gmra.mrb[200].mxu0 %vm3895_vm3, %v3857_v38 }
 0x62e   :  { %16150 = vst [vmem:[#allocation40_spill] sm:$0xff] %v12511_v46  ;;  %v3862_v59 = vpack.c.bf16 %v12511_v46, %v12508_v10  ;;  %4161 = vmatprep.mubr.bf16.mxu0 %v16099_v0  ;;  %5217 = vmatpush1.bf16.msra.mxu0 %v10656_v16 }
 0x62f   :  { %16152 = vst [vmem:[#allocation42_spill] sm:$0xff] %v12517_v60  ;;  %v3861_v45 = vpack.c.bf16 %v12517_v60, %v12514_v15 }
 0x635   :  { %9769 = vmatmul.mubr.msk.bf16.gmra.mrb[204].mxu0 %vm3895_vm3, %v3858_v13 }
 0x636   :  { %4171 = vmatprep.mubr.bf16.mxu0 %v16099_v0 }
 0x639   :  { %v10418_v38 = vpop.f32.mrb[12].mxu1 }
 0x63a   :  { %v3668_v51 = vpop.f32.mrb[13].mxu1  ;;  %v12534_v10 = vadd.f32 %v10418_v38, %v12291_v57 }
 0x63b   :  { %v10419_v46 = vpop.f32.mrb[14].mxu1  ;;  %v12540_v41 = vadd.f32 %v12291_v57, %v3668_v51 }
 0x63c   :  { %16153 = vst [vmem:[#allocation43_spill] sm:$0xff] %v12534_v10  ;;  %v12537_v60 = vadd.f32 %v10419_v46, %v12291_v57  ;;  %v3671_v15 = vpop.f32.mrb[15].mxu1 }
 0x63d   :  { %16155 = vst [vmem:[#allocation45_spill] sm:$0xff] %v12540_v41  ;;  %v12543_v61 = vadd.f32 %v12291_v57, %v3671_v15  ;;  %9770 = vmatmul.mubr.msk.bf16.gmra.mrb[208].mxu0 %vm3895_vm3, %v3859_v6 }
 0x63e   :  { %16154 = vst [vmem:[#allocation44_spill] sm:$0xff] %v12537_v60  ;;  %v3864_v13 = vpack.c.bf16 %v12537_v60, %v12534_v10  ;;  %4181 = vmatprep.mubr.bf16.mxu0 %v16099_v0 }
 0x63f   :  { %16156 = vst [vmem:[#allocation46_spill] sm:$0xff] %v12543_v61  ;;  %v3863_v16 = vpack.c.bf16 %v12543_v61, %v12540_v41 }
 0x645   :  { %9771 = vmatmul.mubr.msk.bf16.gmra.mrb[212].mxu0 %vm3895_vm3, %v3860_v36 }
 0x646   :  { %4191 = vmatprep.mubr.bf16.mxu0 %v16099_v0 }
 0x649   :  { %v10422_v46 = vpop.f32.mrb[16].mxu1 }
 0x64a   :  { %v3684_v38 = vpop.f32.mrb[17].mxu1  ;;  %v12554_v15 = vadd.f32 %v10422_v46, %v12291_v57 }
 0x64b   :  { %v10423_v51 = vpop.f32.mrb[18].mxu1  ;;  %v12560_v60 = vadd.f32 %v12291_v57, %v3684_v38 }
 0x64c   :  { %16157 = vst [vmem:[#allocation47_spill] sm:$0xff] %v12554_v15  ;;  %v12557_v6 = vadd.f32 %v10423_v51, %v12291_v57  ;;  %v3687_v3 = vpop.f32.mrb[19].mxu1  ;;  %v10661_v51 = vld [vmem:[%s16051_s5 + $0x4] ss:$8 sps:$4 sm:$0xff]  }
 0x64d   :  { %16159 = vst [vmem:[#allocation49_spill] sm:$0xff] %v12560_v60  ;;  %v12563_v10 = vadd.f32 %v12291_v57, %v3687_v3  ;;  %9772 = vmatmul.mubr.msk.bf16.gmra.mrb[216].mxu0 %vm3895_vm3, %v3861_v45  ;;  %5635 = vmatprep.subr.bf16.mxu0 %v10661_v51 }
 0x64e   :  { %16158 = vst [vmem:[#allocation48_spill] sm:$0xff] %v12557_v6  ;;  %v3866_v36 = vpack.c.bf16 %v12557_v6, %v12554_v15  ;;  %4201 = vmatprep.mubr.bf16.mxu0 %v16099_v0 }
 0x64f   :  { %16160 = vst [vmem:[#allocation50_spill] sm:$0xff] %v12563_v10  ;;  %v3865_v46 = vpack.c.bf16 %v12563_v10, %v12560_v60 }
 0x655   :  { %9773 = vmatmul.mubr.msk.bf16.gmra.mrb[220].mxu0 %vm3895_vm3, %v3862_v59 }
 0x656   :  { %4211 = vmatprep.mubr.bf16.mxu0 %v16099_v0 }
 0x659   :  { %v10426_v3 = vpop.f32.mrb[20].mxu1 }
 0x65a   :  { %v3700_v38 = vpop.f32.mrb[21].mxu1  ;;  %v12577_v61 = vadd.f32 %v10426_v3, %v12291_v57 }
 0x65b   :  { %v10427_v45 = vpop.f32.mrb[22].mxu1  ;;  %v12583_v10 = vadd.f32 %v12291_v57, %v3700_v38 }
 0x65c   :  { %16161 = vst [vmem:[#allocation51_spill] sm:$0xff] %v12577_v61  ;;  %v12580_v6 = vadd.f32 %v10427_v45, %v12291_v57  ;;  %v3703_v15 = vpop.f32.mrb[23].mxu1 }
 0x65d   :  { %16163 = vst [vmem:[#allocation53_spill] sm:$0xff] %v12583_v10  ;;  %v12586_v60 = vadd.f32 %v12291_v57, %v3703_v15  ;;  %9774 = vmatmul.mubr.msk.bf16.gmra.mrb[224].mxu0 %vm3895_vm3, %v3863_v16 }
 0x65e   :  { %16162 = vst [vmem:[#allocation52_spill] sm:$0xff] %v12580_v6  ;;  %v3868_v59 = vpack.c.bf16 %v12580_v6, %v12577_v61  ;;  %4221 = vmatprep.mubr.bf16.mxu0 %v16099_v0 }
 0x65f   :  { %16164 = vst [vmem:[#allocation54_spill] sm:$0xff] %v12586_v60  ;;  %v3867_v51 = vpack.c.bf16 %v12586_v60, %v12583_v10 }
 0x665   :  { %9775 = vmatmul.mubr.msk.bf16.gmra.mrb[228].mxu0 %vm3895_vm3, %v3864_v13 }
 0x666   :  { %4231 = vmatprep.mubr.bf16.mxu0 %v16099_v0 }
 0x669   :  { %v10430_v3 = vpop.f32.mrb[24].mxu1 }
 0x66a   :  { %v3716_v38 = vpop.f32.mrb[25].mxu1  ;;  %v12597_v15 = vadd.f32 %v10430_v3, %v12291_v57 }
 0x66b   :  { %v10431_v45 = vpop.f32.mrb[26].mxu1  ;;  %v12603_v6 = vadd.f32 %v12291_v57, %v3716_v38 }
 0x66c   :  { %16165 = vst [vmem:[#allocation55_spill] sm:$0xff] %v12597_v15  ;;  %v12600_v16 = vadd.f32 %v10431_v45, %v12291_v57  ;;  %v3719_v41 = vpop.f32.mrb[27].mxu1 }
 0x66d   :  { %16167 = vst [vmem:[#allocation57_spill] sm:$0xff] %v12603_v6  ;;  %v12606_v61 = vadd.f32 %v12291_v57, %v3719_v41  ;;  %9776 = vmatmul.mubr.msk.bf16.gmra.mrb[232].mxu0 %vm3895_vm3, %v3865_v46 }
 0x66e   :  { %16166 = vst [vmem:[#allocation56_spill] sm:$0xff] %v12600_v16  ;;  %v3870_v13 = vpack.c.bf16 %v12600_v16, %v12597_v15  ;;  %4241 = vmatprep.mubr.bf16.mxu0 %v16099_v0 }
 0x66f   :  { %16168 = vst [vmem:[#allocation58_spill] sm:$0xff] %v12606_v61  ;;  %v3869_v3 = vpack.c.bf16 %v12606_v61, %v12603_v6 }
 0x675   :  { %9777 = vmatmul.mubr.msk.bf16.gmra.mrb[236].mxu0 %vm3895_vm3, %v3866_v36 }
 0x676   :  { %4251 = vmatprep.mubr.bf16.mxu0 %v16099_v0 }
 0x679   :  { %v10434_v45 = vpop.f32.mrb[28].mxu1 }
 0x67a   :  { %v3732_v38 = vpop.f32.mrb[29].mxu1  ;;  %v12617_v41 = vadd.f32 %v10434_v45, %v12291_v57 }
 0x67b   :  { %v10435_v60 = vpop.f32.mrb[30].mxu1  ;;  %v12623_v16 = vadd.f32 %v12291_v57, %v3732_v38 }
 0x67c   :  { %16169 = vst [vmem:[#allocation59_spill] sm:$0xff] %v12617_v41  ;;  %v12620_v46 = vadd.f32 %v10435_v60, %v12291_v57  ;;  %v3735_v10 = vpop.f32.mrb[31].mxu1 }
 0x67d   :  { %16171 = vst [vmem:[#allocation61_spill] sm:$0xff] %v12623_v16  ;;  %v12626_v15 = vadd.f32 %v12291_v57, %v3735_v10  ;;  %9778 = vmatmul.mubr.msk.bf16.gmra.mrb[240].mxu0 %vm3895_vm3, %v3867_v51 }
 0x67e   :  { %16170 = vst [vmem:[#allocation60_spill] sm:$0xff] %v12620_v46  ;;  %v3872_v36 = vpack.c.bf16 %v12620_v46, %v12617_v41  ;;  %4261 = vmatprep.mubr.bf16.mxu0 %v16099_v0 }
 0x67f   :  { %16172 = vst [vmem:[#allocation62_spill] sm:$0xff] %v12626_v15  ;;  %v3871_v45 = vpack.c.bf16 %v12626_v15, %v12623_v16 }
 0x685   :  { %9779 = vmatmul.mubr.msk.bf16.gmra.mrb[244].mxu0 %vm3895_vm3, %v3868_v59 }
 0x686   :  { %4271 = vmatprep.mubr.bf16.mxu0 %v16099_v0 }
 0x689   :  { %v10438_v60 = vpop.f32.mrb[32].mxu1 }
 0x68a   :  { %v3748_v38 = vpop.f32.mrb[33].mxu1  ;;  %v12637_v10 = vadd.f32 %v10438_v60, %v12291_v57 }
 0x68b   :  { %v10439_v61 = vpop.f32.mrb[34].mxu1  ;;  %v12643_v46 = vadd.f32 %v12291_v57, %v3748_v38 }
 0x68c   :  { %16173 = vst [vmem:[#allocation63_spill] sm:$0xff] %v12637_v10  ;;  %v12640_v51 = vadd.f32 %v10439_v61, %v12291_v57  ;;  %v3751_v6 = vpop.f32.mrb[35].mxu1 }
 0x68d   :  { %16175 = vst [vmem:[#allocation65_spill] sm:$0xff] %v12643_v46  ;;  %v12646_v41 = vadd.f32 %v12291_v57, %v3751_v6  ;;  %9780 = vmatmul.mubr.msk.bf16.gmra.mrb[248].mxu0 %vm3895_vm3, %v3869_v3  ;;  %v9752_v6 = vld [vmem:[%s16049_s3 + $0x2] ss:$8 sm:$0x3] }
 0x68e   :  { %16174 = vst [vmem:[#allocation64_spill] sm:$0xff] %v12640_v51  ;;  %4281 = vmatprep.mubr.bf16.mxu0 %v16099_v0 }
 0x68f   :  { %16176 = vst [vmem:[#allocation66_spill] sm:$0xff] %v12646_v41  ;;  %v3873_v60 = vpack.c.bf16 %v12646_v41, %v12643_v46 }
 0x695   :  { %9781 = vmatmul.mubr.msk.bf16.gmra.mrb[252].mxu0 %vm3895_vm3, %v3870_v13 }
 0x696   :  { %4291 = vmatprep.mubr.bf16.mxu0 %v16099_v0  ;;  %v12673_v0 = vrot.slane %v9752_v6, %v11241_v28 }
 0x699   :  { %v10442_v61 = vpop.f32.mrb[36].mxu1 }
 0x69a   :  { %v3764_v38 = vpop.f32.mrb[37].mxu1  ;;  %v12660_v3 = vadd.f32 %v10442_v61, %v12291_v57  ;;  %v12678_v61 = vrot.slane %v9752_v6, %v11216_v7 }
 0x69b   :  { %v10443_v15 = vpop.f32.mrb[38].mxu1  ;;  %v12666_v41 = vadd.f32 %v12291_v57, %v3764_v38 }
 0x69c   :  { %16177 = vst [vmem:[#allocation67_spill] sm:$0xff] %v12660_v3  ;;  %v12663_v59 = vadd.f32 %v10443_v15, %v12291_v57  ;;  %v3767_v16 = vpop.f32.mrb[39].mxu1  ;;  %v16181_v15 = vmov 0  }
 0x69d   :  { %16179 = vst [vmem:[#allocation69_spill] sm:$0xff] %v12666_v41  ;;  %v12669_v13 = vadd.f32 %v12291_v57, %v3767_v16  ;;  %9782 = vmatmul.mubr.msk.bf16.gmra.mrb[0].mxu0 %vm3895_vm3, %v3871_v45 }
 0x69e   :  { %16178 = vst [vmem:[#allocation68_spill] sm:$0xff] %v12663_v59  ;;  %4301 = vmatprep.mubr.bf16.mxu0 %v16181_v15 }
 0x69f   :  { %16180 = vst [vmem:[#allocation70_spill] sm:$0xff] %v12669_v13 }
 0x6a0   :  { %v4033_v27 = vpop.f32.mrb[152].mxu0 }
 0x6a1   :  { %v4034_v57 = vadd.f32 %v4033_v27, %v12673_v0  ;;  %v4035_v16 = vpop.f32.mrb[153].mxu0 }
 0x6a2   :  { %v4036_v45 = vadd.f32 %v4035_v16, %v12678_v61  ;;  %v4037_v33 = vpop.f32.mrb[154].mxu0 }
 0x6a3   :  { %v4038_v23 = vadd.f32 %v4037_v33, %v12673_v0  ;;  %v4039_v52 = vpop.f32.mrb[155].mxu0  ;;  %v4352_v19 = vmax.f32 %v4034_v57, 0.0 }
 0x6a4   :  { %v4040_v46 = vadd.f32 %v4039_v52, %v12678_v61  ;;  %v4353_v37 = vmax.f32 %v4036_v45, 0.0 }
 0x6a5   :  { %v4354_v6 = vmax.f32 %v4038_v23, 0.0  ;;  %9783 = vmatmul.mubr.msk.bf16.gmra.mrb[4].mxu0 %vm3895_vm3, %v3872_v36 }
 0x6a6   :  { %v4355_v50 = vmax.f32 %v4040_v46, 0.0  ;;  %4311 = vmatprep.mubr.bf16.mxu0 %v16181_v15 }
 0x6a7   :  { %v4512_v38 = vpack.c.bf16 %v4354_v6, %v4352_v19 }
 0x6a8   :  { %v4043_v53 = vpop.f32.mrb[156].mxu0  ;;  %v4513_v27 = vpack.c.bf16 %v4355_v50, %v4353_v37 }
 0x6a9   :  { %v4044_v5 = vadd.f32 %v4043_v53, %v12673_v0  ;;  %v4045_v16 = vpop.f32.mrb[157].mxu0 }
 0x6aa   :  { %v4046_v26 = vadd.f32 %v4045_v16, %v12678_v61  ;;  %v4047_v33 = vpop.f32.mrb[158].mxu0  ;;  %4705 = vmatprep.mubr.bf16.mxu1 %v4513_v27 }
 0x6ab   :  { %v4048_v52 = vadd.f32 %v4047_v33, %v12673_v0  ;;  %v4049_v57 = vpop.f32.mrb[159].mxu0  ;;  %4706 = vmatmul.mubr.bf16.vlgmr.msra.gmra.mrb[40].mxu1 %v4512_v38  ;;  %v4356_v36 = vmax.f32 %v4044_v5, 0.0 }
 0x6ac   :  { %v4050_v23 = vadd.f32 %v4049_v57, %v12678_v61  ;;  %v4357_v19 = vmax.f32 %v4046_v26, 0.0  ;;  %v16182_v57 = vpack.c.bf16 %v12640_v51, %v12637_v10 }
 0x6ad   :  { %v4358_v46 = vmax.f32 %v4048_v52, 0.0  ;;  %9784 = vmatmul.mubr.msk.bf16.gmra.mrb[8].mxu0 %vm3895_vm3, %v3873_v60 }
 0x6ae   :  { %v4359_v45 = vmax.f32 %v4050_v23, 0.0  ;;  %4321 = vmatprep.mubr.bf16.mxu0 %v16181_v15 }
 0x6af   :  { %v4514_v50 = vpack.c.bf16 %v4358_v46, %v4356_v36 }
 0x6b0   :  { %v4053_v53 = vpop.f32.mrb[160].mxu0  ;;  %v4515_v37 = vpack.c.bf16 %v4359_v45, %v4357_v19 }
 0x6b1   :  { %v4054_v6 = vadd.f32 %v4053_v53, %v12673_v0  ;;  %v4055_v27 = vpop.f32.mrb[161].mxu0 }
 0x6b2   :  { %v4056_v16 = vadd.f32 %v4055_v27, %v12678_v61  ;;  %v4057_v33 = vpop.f32.mrb[162].mxu0  ;;  %4713 = vmatprep.mubr.bf16.mxu1 %v4515_v37 }
 0x6b3   :  { %v4058_v38 = vadd.f32 %v4057_v33, %v12673_v0  ;;  %v4059_v5 = vpop.f32.mrb[163].mxu0  ;;  %4714 = vmatmul.mubr.bf16.gmra.mrb[44].mxu1 %v4514_v50  ;;  %v4360_v26 = vmax.f32 %v4054_v6, 0.0 }
 0x6b4   :  { %v4060_v60 = vadd.f32 %v4059_v5, %v12678_v61  ;;  %v4361_v23 = vmax.f32 %v4056_v16, 0.0 }
 0x6b5   :  { %v4362_v52 = vmax.f32 %v4058_v38, 0.0  ;;  %9785 = vmatmul.mubr.msk.bf16.gmra.mrb[12].mxu0 %vm3895_vm3, %v16182_v57 }
 0x6b6   :  { %v4363_v36 = vmax.f32 %v4060_v60, 0.0  ;;  %4331 = vmatprep.mubr.bf16.mxu0 %v16181_v15  ;;  %v16183_v60 = vpack.c.bf16 %v12669_v13, %v12666_v41 }
 0x6b7   :  { %v4516_v46 = vpack.c.bf16 %v4362_v52, %v4360_v26 }
 0x6b8   :  { %v4063_v19 = vpop.f32.mrb[164].mxu0  ;;  %v4517_v45 = vpack.c.bf16 %v4363_v36, %v4361_v23 }
 0x6b9   :  { %v4064_v53 = vadd.f32 %v4063_v19, %v12673_v0  ;;  %v4065_v37 = vpop.f32.mrb[165].mxu0 }
 0x6ba   :  { %v4066_v50 = vadd.f32 %v4065_v37, %v12678_v61  ;;  %v4067_v27 = vpop.f32.mrb[166].mxu0  ;;  %4721 = vmatprep.mubr.bf16.mxu1 %v4517_v45 }
 0x6bb   :  { %v4068_v6 = vadd.f32 %v4067_v27, %v12673_v0  ;;  %v4069_v33 = vpop.f32.mrb[167].mxu0  ;;  %4722 = vmatmul.mubr.bf16.gmra.mrb[48].mxu1 %v4516_v46  ;;  %v4364_v16 = vmax.f32 %v4064_v53, 0.0 }
 0x6bc   :  { %v4070_v38 = vadd.f32 %v4069_v33, %v12678_v61  ;;  %v4365_v26 = vmax.f32 %v4066_v50, 0.0 }
 0x6bd   :  { %v4366_v5 = vmax.f32 %v4068_v6, 0.0  ;;  %9786 = vmatmul.mubr.msk.bf16.gmra.mrb[16].mxu0 %vm3895_vm3, %v16183_v60 }
 0x6be   :  { %v4367_v52 = vmax.f32 %v4070_v38, 0.0  ;;  %4341 = vmatprep.mubr.bf16.mxu0 %v16181_v15  ;;  %v16184_v38 = vpack.c.bf16 %v12663_v59, %v12660_v3 }
 0x6bf   :  { %v4518_v57 = vpack.c.bf16 %v4366_v5, %v4364_v16 }
 0x6c0   :  { %v4073_v23 = vpop.f32.mrb[168].mxu0  ;;  %v4519_v36 = vpack.c.bf16 %v4367_v52, %v4365_v26 }
 0x6c1   :  { %v4074_v19 = vadd.f32 %v4073_v23, %v12673_v0  ;;  %v4075_v45 = vpop.f32.mrb[169].mxu0 }
 0x6c2   :  { %v4076_v46 = vadd.f32 %v4075_v45, %v12678_v61  ;;  %v4077_v37 = vpop.f32.mrb[170].mxu0  ;;  %4729 = vmatprep.mubr.bf16.mxu1 %v4519_v36 }
 0x6c3   :  { %v4078_v53 = vadd.f32 %v4077_v37, %v12673_v0  ;;  %v4079_v27 = vpop.f32.mrb[171].mxu0  ;;  %4730 = vmatmul.mubr.bf16.gmra.mrb[52].mxu1 %v4518_v57  ;;  %v4368_v50 = vmax.f32 %v4074_v19, 0.0  ;;  %v10659_v19 = vld [vmem:[%s16051_s5] ss:$8 sps:$4 sm:$0xff]  }
 0x6c4   :  { %v4080_v6 = vadd.f32 %v4079_v27, %v12678_v61  ;;  %v4369_v16 = vmax.f32 %v4076_v46, 0.0 }
 0x6c5   :  { %v4370_v33 = vmax.f32 %v4078_v53, 0.0  ;;  %9787 = vmatmul.mubr.msk.bf16.gmra.mrb[20].mxu0 %vm3895_vm3, %v16184_v38  ;;  %v10664_v53 = vld [vmem:[%s16051_s5 + $0x14] ss:$8 sps:$4 sm:$0xff]  }
 0x6c6   :  { %v4371_v5 = vmax.f32 %v4080_v6, 0.0  ;;  %5234 = vmatprep.mubr.bf16.mxu0 %v16181_v15 }
 0x6c7   :  { %v4520_v60 = vpack.c.bf16 %v4370_v33, %v4368_v50 }
 0x6c8   :  { %v4083_v26 = vpop.f32.mrb[172].mxu0  ;;  %v4521_v52 = vpack.c.bf16 %v4371_v5, %v4369_v16  ;;  %v10662_v16 = vld [vmem:[%s16051_s5 + $0x10] ss:$8 sps:$4 sm:$0xff]  }
 0x6c9   :  { %v4084_v23 = vadd.f32 %v4083_v26, %v12673_v0  ;;  %v4085_v36 = vpop.f32.mrb[173].mxu0 }
 0x6ca   :  { %v4086_v57 = vadd.f32 %v4085_v36, %v12678_v61  ;;  %v4087_v45 = vpop.f32.mrb[174].mxu0  ;;  %4737 = vmatprep.mubr.bf16.mxu1 %v4521_v52 }
 0x6cb   :  { %v4088_v37 = vadd.f32 %v4087_v45, %v12673_v0  ;;  %v4089_v46 = vpop.f32.mrb[175].mxu0  ;;  %4738 = vmatmul.mubr.bf16.gmra.mrb[56].mxu1 %v4520_v60  ;;  %v4372_v6 = vmax.f32 %v4084_v23, 0.0  ;;  %v10667_v60 = vld [vmem:[%s16051_s5 + $0x24] ss:$8 sps:$4 sm:$0xff]   ;;  %v10665_v45 = vld [vmem:[%s16051_s5 + $0x20] ss:$8 sps:$4 sm:$0xff]  }
 0x6cc   :  { %v4090_v27 = vadd.f32 %v4089_v46, %v12678_v61  ;;  %v4373_v33 = vmax.f32 %v4086_v57, 0.0  ;;  %v10670_v46 = vld [vmem:[%s16051_s5 + $0x34] ss:$8 sps:$4 sm:$0xff]  }
 0x6cd   :  { %v4374_v50 = vmax.f32 %v4088_v37, 0.0  ;;  %5235 = vmatmul.mubr.bf16.vlgmr.msra.gmra.mrb[24].mxu0 %v11537_v44 }
 0x6ce   :  { %v4375_v38 = vmax.f32 %v4090_v27, 0.0  ;;  %5636 = vmatpush1.bf16.msra.mxu0 %v10659_v19  ;;  %5244 = vmatprep.mubr.bf16.mxu0 %v16181_v15 }
 0x6cf   :  { %v4522_v5 = vpack.c.bf16 %v4374_v50, %v4372_v6  ;;  %5637 = vmatprep.subr.bf16.mxu0 %v10664_v53 }
 0x6d0   :  { %v4093_v26 = vpop.f32.mrb[176].mxu0  ;;  %v4523_v52 = vpack.c.bf16 %v4375_v38, %v4373_v33  ;;  %v10668_v38 = vld [vmem:[%s16051_s5 + $0x30] ss:$8 sps:$4 sm:$0xff]  }
 0x6d1   :  { %v4094_v23 = vadd.f32 %v4093_v26, %v12673_v0  ;;  %v4095_v44 = vpop.f32.mrb[177].mxu0 }
 0x6d2   :  { %v4096_v36 = vadd.f32 %v4095_v44, %v12678_v61  ;;  %v4097_v57 = vpop.f32.mrb[178].mxu0  ;;  %4745 = vmatprep.mubr.bf16.mxu1 %v4523_v52  ;;  %5638 = vmatpush1.bf16.msra.mxu0 %v10662_v16 }
 0x6d3   :  { %v4098_v19 = vadd.f32 %v4097_v57, %v12673_v0  ;;  %v4099_v37 = vpop.f32.mrb[179].mxu0  ;;  %4746 = vmatmul.mubr.bf16.gmra.mrb[60].mxu1 %v4522_v5  ;;  %5639 = vmatprep.subr.bf16.mxu0 %v10667_v60  ;;  %v4376_v27 = vmax.f32 %v4094_v23, 0.0  ;;  %v10673_v5 = vld [vmem:[%s16051_s5 + $0x44] ss:$8 sps:$4 sm:$0xff]  }
 0x6d4   :  { %v4100_v53 = vadd.f32 %v4099_v37, %v12678_v61  ;;  %v4377_v50 = vmax.f32 %v4096_v36, 0.0  ;;  %v10671_v36 = vld [vmem:[%s16051_s5 + $0x40] ss:$8 sps:$4 sm:$0xff]  }
 0x6d5   :  { %v4378_v6 = vmax.f32 %v4098_v19, 0.0  ;;  %5245 = vmatmul.mubr.bf16.gmra.mrb[28].mxu0 %v11557_v20 }
 0x6d6   :  { %v4379_v33 = vmax.f32 %v4100_v53, 0.0  ;;  %5254 = vmatprep.mubr.bf16.mxu0 %v16181_v15  ;;  %5640 = vmatpush1.bf16.msra.mxu0 %v10665_v45 }
 0x6d7   :  { %v4524_v16 = vpack.c.bf16 %v4378_v6, %v4376_v27  ;;  %5641 = vmatprep.subr.bf16.mxu0 %v10670_v46 }
 0x6d8   :  { %v4103_v60 = vpop.f32.mrb[180].mxu0  ;;  %v4525_v26 = vpack.c.bf16 %v4379_v33, %v4377_v50 }
 0x6d9   :  { %v4104_v52 = vadd.f32 %v4103_v60, %v12673_v0  ;;  %v4105_v20 = vpop.f32.mrb[181].mxu0 }
 0x6da   :  { %v4106_v23 = vadd.f32 %v4105_v20, %v12678_v61  ;;  %v4107_v44 = vpop.f32.mrb[182].mxu0  ;;  %4753 = vmatprep.mubr.bf16.mxu1 %v4525_v26  ;;  %5642 = vmatpush1.bf16.msra.mxu0 %v10668_v38 }
 0x6db   :  { %v4108_v57 = vadd.f32 %v4107_v44, %v12673_v0  ;;  %v4109_v45 = vpop.f32.mrb[183].mxu0  ;;  %4754 = vmatmul.mubr.bf16.gmra.mrb[64].mxu1 %v4524_v16  ;;  %5643 = vmatprep.subr.bf16.mxu0 %v10673_v5  ;;  %v4380_v37 = vmax.f32 %v4104_v52, 0.0 }
 0x6dc   :  { %v4110_v19 = vadd.f32 %v4109_v45, %v12678_v61  ;;  %v4381_v53 = vmax.f32 %v4106_v23, 0.0 }
 0x6dd   :  { %v4382_v46 = vmax.f32 %v4108_v57, 0.0  ;;  %5255 = vmatmul.mubr.bf16.gmra.mrb[32].mxu0 %v11570_v48 }
 0x6de   :  { %v4383_v27 = vmax.f32 %v4110_v19, 0.0  ;;  %5264 = vmatprep.mubr.bf16.mxu0 %v16181_v15  ;;  %5644 = vmatpush1.bf16.msra.mxu0 %v10671_v36 }
 0x6df   :  { %v4526_v6 = vpack.c.bf16 %v4382_v46, %v4380_v37 }
 0x6e0   :  { %v4113_v50 = vpop.f32.mrb[184].mxu0  ;;  %v4527_v33 = vpack.c.bf16 %v4383_v27, %v4381_v53 }
 0x6e1   :  { %v4114_v38 = vadd.f32 %v4113_v50, %v12673_v0  ;;  %v4115_v60 = vpop.f32.mrb[185].mxu0 }
 0x6e2   :  { %v4116_v16 = vadd.f32 %v4115_v60, %v12678_v61  ;;  %v4117_v5 = vpop.f32.mrb[186].mxu0  ;;  %4761 = vmatprep.mubr.bf16.mxu1 %v4527_v33 }
 0x6e3   :  { %v4118_v26 = vadd.f32 %v4117_v5, %v12673_v0  ;;  %v4119_v52 = vpop.f32.mrb[187].mxu0  ;;  %4762 = vmatmul.mubr.bf16.gmra.mrb[68].mxu1 %v4526_v6  ;;  %v4384_v20 = vmax.f32 %v4114_v38, 0.0 }
 0x6e4   :  { %v4120_v48 = vadd.f32 %v4119_v52, %v12678_v61  ;;  %v4385_v44 = vmax.f32 %v4116_v16, 0.0  ;;  %v10676_v52 = vld [vmem:[%s16051_s5 + $0x54] ss:$8 sps:$4 sm:$0xff]  }
 0x6e5   :  { %v4386_v23 = vmax.f32 %v4118_v26, 0.0  ;;  %5265 = vmatmul.mubr.bf16.gmra.mrb[36].mxu0 %v11579_v4  ;;  %v10674_v26 = vld [vmem:[%s16051_s5 + $0x50] ss:$8 sps:$4 sm:$0xff]   ;;  %5645 = vmatprep.subr.bf16.mxu0 %v10676_v52 }
 0x6e6   :  { %v4387_v36 = vmax.f32 %v4120_v48, 0.0  ;;  %5274 = vmatprep.mubr.bf16.mxu0 %v16181_v15  ;;  %5646 = vmatpush1.bf16.msra.mxu0 %v10674_v26 }
 0x6e7   :  { %v4528_v57 = vpack.c.bf16 %v4386_v23, %v4384_v20 }
 0x6e8   :  { %v4123_v45 = vpop.f32.mrb[188].mxu0  ;;  %v4529_v19 = vpack.c.bf16 %v4387_v36, %v4385_v44 }
 0x6e9   :  { %v4124_v37 = vadd.f32 %v4123_v45, %v12673_v0  ;;  %v4125_v46 = vpop.f32.mrb[189].mxu0 }
 0x6ea   :  { %v4126_v53 = vadd.f32 %v4125_v46, %v12678_v61  ;;  %v4127_v27 = vpop.f32.mrb[190].mxu0  ;;  %4769 = vmatprep.mubr.bf16.mxu1 %v4529_v19 }
 0x6eb   :  { %v4128_v6 = vadd.f32 %v4127_v27, %v12673_v0  ;;  %v4129_v50 = vpop.f32.mrb[191].mxu0  ;;  %4770 = vmatmul.mubr.bf16.gmra.mrb[72].mxu1 %v4528_v57  ;;  %v4388_v33 = vmax.f32 %v4124_v37, 0.0 }
 0x6ec   :  { %v4130_v4 = vadd.f32 %v4129_v50, %v12678_v61  ;;  %v4389_v60 = vmax.f32 %v4126_v53, 0.0 }
 0x6ed   :  { %v4390_v38 = vmax.f32 %v4128_v6, 0.0  ;;  %5275 = vmatmul.mubr.bf16.gmra.mrb[40].mxu0 %v11588_v22 }
 0x6ee   :  { %v4391_v16 = vmax.f32 %v4130_v4, 0.0  ;;  %5284 = vmatprep.mubr.bf16.mxu0 %v16181_v15 }
 0x6ef   :  { %v4530_v5 = vpack.c.bf16 %v4390_v38, %v4388_v33 }
 0x6f0   :  { %v4133_v48 = vpop.f32.mrb[192].mxu0  ;;  %v4531_v20 = vpack.c.bf16 %v4391_v16, %v4389_v60 }
 0x6f1   :  { %v4134_v23 = vadd.f32 %v4133_v48, %v12673_v0  ;;  %v4135_v44 = vpop.f32.mrb[193].mxu0 }
 0x6f2   :  { %v4136_v22 = vadd.f32 %v4135_v44, %v12678_v61  ;;  %v4137_v36 = vpop.f32.mrb[194].mxu0  ;;  %4777 = vmatprep.mubr.bf16.mxu1 %v4531_v20 }
 0x6f3   :  { %v4138_v57 = vadd.f32 %v4137_v36, %v12673_v0  ;;  %v4139_v45 = vpop.f32.mrb[195].mxu0  ;;  %4778 = vmatmul.mubr.bf16.gmra.mrb[76].mxu1 %v4530_v5  ;;  %v4392_v37 = vmax.f32 %v4134_v23, 0.0 }
 0x6f4   :  { %v4140_v19 = vadd.f32 %v4139_v45, %v12678_v61  ;;  %v4393_v53 = vmax.f32 %v4136_v22, 0.0 }
 0x6f5   :  { %v4394_v46 = vmax.f32 %v4138_v57, 0.0  ;;  %5285 = vmatmul.mubr.bf16.gmra.mrb[44].mxu0 %v11597_v39 }
 0x6f6   :  { %v4395_v27 = vmax.f32 %v4140_v19, 0.0  ;;  %5294 = vmatprep.mubr.bf16.mxu0 %v16181_v15 }
 0x6f7   :  { %v4532_v6 = vpack.c.bf16 %v4394_v46, %v4392_v37 }
 0x6f8   :  { %v4143_v50 = vpop.f32.mrb[196].mxu0  ;;  %v4533_v4 = vpack.c.bf16 %v4395_v27, %v4393_v53 }
 0x6f9   :  { %v4144_v33 = vadd.f32 %v4143_v50, %v12673_v0  ;;  %v4145_v38 = vpop.f32.mrb[197].mxu0 }
 0x6fa   :  { %v4146_v60 = vadd.f32 %v4145_v38, %v12678_v61  ;;  %v4147_v16 = vpop.f32.mrb[198].mxu0  ;;  %4785 = vmatprep.mubr.bf16.mxu1 %v4533_v4 }
 0x6fb   :  { %v4148_v5 = vadd.f32 %v4147_v16, %v12673_v0  ;;  %v4149_v26 = vpop.f32.mrb[199].mxu0  ;;  %4786 = vmatmul.mubr.bf16.gmra.mrb[80].mxu1 %v4532_v6  ;;  %v4396_v52 = vmax.f32 %v4144_v33, 0.0 }
 0x6fc   :  { %v4150_v39 = vadd.f32 %v4149_v26, %v12678_v61  ;;  %v4397_v20 = vmax.f32 %v4146_v60, 0.0 }
 0x6fd   :  { %v4398_v48 = vmax.f32 %v4148_v5, 0.0  ;;  %5295 = vmatmul.mubr.bf16.gmra.mrb[48].mxu0 %v11606_v56 }
 0x6fe   :  { %v4399_v23 = vmax.f32 %v4150_v39, 0.0  ;;  %5304 = vmatprep.mubr.bf16.mxu0 %v16181_v15 }
 0x6ff   :  { %v4534_v44 = vpack.c.bf16 %v4398_v48, %v4396_v52 }
 0x700   :  { %v4153_v22 = vpop.f32.mrb[200].mxu0  ;;  %v4535_v36 = vpack.c.bf16 %v4399_v23, %v4397_v20 }
 0x701   :  { %v4154_v57 = vadd.f32 %v4153_v22, %v12673_v0  ;;  %v4155_v45 = vpop.f32.mrb[201].mxu0 }
 0x702   :  { %v4156_v19 = vadd.f32 %v4155_v45, %v12678_v61  ;;  %v4157_v37 = vpop.f32.mrb[202].mxu0  ;;  %4793 = vmatprep.mubr.bf16.mxu1 %v4535_v36  ;;  %v10679_v45 = vld [vmem:[%s16051_s5 + $0x64] ss:$8 sps:$4 sm:$0xff]  }
 0x703   :  { %v4158_v46 = vadd.f32 %v4157_v37, %v12673_v0  ;;  %v4159_v53 = vpop.f32.mrb[203].mxu0  ;;  %4794 = vmatmul.mubr.bf16.gmra.mrb[84].mxu1 %v4534_v44  ;;  %v4400_v27 = vmax.f32 %v4154_v57, 0.0  ;;  %v10677_v57 = vld [vmem:[%s16051_s5 + $0x60] ss:$8 sps:$4 sm:$0xff]   ;;  %5647 = vmatprep.subr.bf16.mxu0 %v10679_v45 }
 0x704   :  { %v4160_v56 = vadd.f32 %v4159_v53, %v12678_v61  ;;  %v4401_v50 = vmax.f32 %v4156_v19, 0.0  ;;  %5648 = vmatpush1.bf16.msra.mxu0 %v10677_v57 }
 0x705   :  { %v4402_v6 = vmax.f32 %v4158_v46, 0.0  ;;  %5305 = vmatmul.mubr.bf16.gmra.mrb[52].mxu0 %v11615_v11 }
 0x706   :  { %v4403_v4 = vmax.f32 %v4160_v56, 0.0  ;;  %5314 = vmatprep.mubr.bf16.mxu0 %v16181_v15 }
 0x707   :  { %v4536_v33 = vpack.c.bf16 %v4402_v6, %v4400_v27 }
 0x708   :  { %v4163_v38 = vpop.f32.mrb[204].mxu0  ;;  %v4537_v60 = vpack.c.bf16 %v4403_v4, %v4401_v50 }
 0x709   :  { %v4164_v16 = vadd.f32 %v4163_v38, %v12673_v0  ;;  %v4165_v5 = vpop.f32.mrb[205].mxu0 }
 0x70a   :  { %v4166_v26 = vadd.f32 %v4165_v5, %v12678_v61  ;;  %v4167_v39 = vpop.f32.mrb[206].mxu0  ;;  %4801 = vmatprep.mubr.bf16.mxu1 %v4537_v60 }
 0x70b   :  { %v4168_v52 = vadd.f32 %v4167_v39, %v12673_v0  ;;  %v4169_v48 = vpop.f32.mrb[207].mxu0  ;;  %4802 = vmatmul.mubr.bf16.gmra.mrb[88].mxu1 %v4536_v33  ;;  %v4404_v20 = vmax.f32 %v4164_v16, 0.0 }
 0x70c   :  { %v4170_v11 = vadd.f32 %v4169_v48, %v12678_v61  ;;  %v4405_v44 = vmax.f32 %v4166_v26, 0.0 }
 0x70d   :  { %v4406_v23 = vmax.f32 %v4168_v52, 0.0  ;;  %5315 = vmatmul.mubr.bf16.gmra.mrb[56].mxu0 %v11624_v29 }
 0x70e   :  { %v4407_v22 = vmax.f32 %v4170_v11, 0.0  ;;  %5324 = vmatprep.mubr.bf16.mxu0 %v16181_v15 }
 0x70f   :  { %v4538_v36 = vpack.c.bf16 %v4406_v23, %v4404_v20 }
 0x710   :  { %v4173_v19 = vpop.f32.mrb[208].mxu0  ;;  %v4539_v37 = vpack.c.bf16 %v4407_v22, %v4405_v44 }
 0x711   :  { %v4174_v46 = vadd.f32 %v4173_v19, %v12673_v0  ;;  %v4175_v53 = vpop.f32.mrb[209].mxu0 }
 0x712   :  { %v4176_v29 = vadd.f32 %v4175_v53, %v12678_v61  ;;  %v4177_v56 = vpop.f32.mrb[210].mxu0  ;;  %4809 = vmatprep.mubr.bf16.mxu1 %v4539_v37 }
 0x713   :  { %v4178_v27 = vadd.f32 %v4177_v56, %v12673_v0  ;;  %v4179_v6 = vpop.f32.mrb[211].mxu0  ;;  %4810 = vmatmul.mubr.bf16.gmra.mrb[92].mxu1 %v4538_v36  ;;  %v4408_v4 = vmax.f32 %v4174_v46, 0.0 }
 0x714   :  { %v4180_v50 = vadd.f32 %v4179_v6, %v12678_v61  ;;  %v4409_v38 = vmax.f32 %v4176_v29, 0.0 }
 0x715   :  { %v4410_v33 = vmax.f32 %v4178_v27, 0.0  ;;  %5325 = vmatmul.mubr.bf16.gmra.mrb[60].mxu0 %v11633_v49 }
 0x716   :  { %v4411_v60 = vmax.f32 %v4180_v50, 0.0  ;;  %5334 = vmatprep.mubr.bf16.mxu0 %v16181_v15 }
 0x717   :  { %v4540_v16 = vpack.c.bf16 %v4410_v33, %v4408_v4 }
 0x718   :  { %v4183_v5 = vpop.f32.mrb[212].mxu0  ;;  %v4541_v26 = vpack.c.bf16 %v4411_v60, %v4409_v38 }
 0x719   :  { %v4184_v39 = vadd.f32 %v4183_v5, %v12673_v0  ;;  %v4185_v52 = vpop.f32.mrb[213].mxu0 }
 0x71a   :  { %v4186_v48 = vadd.f32 %v4185_v52, %v12678_v61  ;;  %v4187_v11 = vpop.f32.mrb[214].mxu0  ;;  %4817 = vmatprep.mubr.bf16.mxu1 %v4541_v26 }
 0x71b   :  { %v4188_v20 = vadd.f32 %v4187_v11, %v12673_v0  ;;  %v4189_v23 = vpop.f32.mrb[215].mxu0  ;;  %4818 = vmatmul.mubr.bf16.gmra.mrb[96].mxu1 %v4540_v16  ;;  %v4412_v44 = vmax.f32 %v4184_v39, 0.0 }
 0x71c   :  { %v4190_v49 = vadd.f32 %v4189_v23, %v12678_v61  ;;  %v4413_v36 = vmax.f32 %v4186_v48, 0.0  ;;  %v10682_v23 = vld [vmem:[%s16051_s5 + $0x104] ss:$8 sps:$4 sm:$0xff]  }
 0x71d   :  { %v4414_v22 = vmax.f32 %v4188_v20, 0.0  ;;  %5335 = vmatmul.mubr.bf16.gmra.mrb[64].mxu0 %v11642_v2  ;;  %6526 = vmatprep.subr.bf16.mxu1 %v10682_v23  ;;  %v10688_v23 = vld [vmem:[%s16051_s5 + $0x114] ss:$8 sps:$4 sm:$0xff]  }
 0x71e   :  { %v4415_v57 = vmax.f32 %v4190_v49, 0.0  ;;  %5344 = vmatprep.mubr.bf16.mxu0 %v16181_v15 }
 0x71f   :  { %v4542_v45 = vpack.c.bf16 %v4414_v22, %v4412_v44  ;;  %v10683_v44 = vld [vmem:[%s16051_s5 + $0x70] ss:$8 sps:$4 sm:$0xff]   ;;  %v10685_v22 = vld [vmem:[%s16051_s5 + $0x74] ss:$8 sps:$4 sm:$0xff]  }
 0x720   :  { %v4193_v19 = vpop.f32.mrb[216].mxu0  ;;  %v4543_v37 = vpack.c.bf16 %v4415_v57, %v4413_v36  ;;  %5649 = vmatprep.subr.bf16.mxu0 %v10685_v22 }
 0x721   :  { %v4194_v46 = vadd.f32 %v4193_v19, %v12673_v0  ;;  %v4195_v53 = vpop.f32.mrb[217].mxu0  ;;  %5650 = vmatpush1.bf16.msra.mxu0 %v10683_v44 }
 0x722   :  { %v4196_v29 = vadd.f32 %v4195_v53, %v12678_v61  ;;  %v4197_v56 = vpop.f32.mrb[218].mxu0  ;;  %4825 = vmatprep.mubr.bf16.mxu1 %v4543_v37  ;;  %7949 = vmatprep.subr.bf16.mxu0 %v16181_v15 }
 0x723   :  { %v4198_v27 = vadd.f32 %v4197_v56, %v12673_v0  ;;  %v4199_v6 = vpop.f32.mrb[219].mxu0  ;;  %4826 = vmatmul.mubr.bf16.gmra.mrb[100].mxu1 %v4542_v45  ;;  %v4416_v50 = vmax.f32 %v4194_v46, 0.0 }
 0x724   :  { %v4200_v2 = vadd.f32 %v4199_v6, %v12678_v61  ;;  %v4417_v33 = vmax.f32 %v4196_v29, 0.0 }
 0x725   :  { %v4418_v4 = vmax.f32 %v4198_v27, 0.0  ;;  %5345 = vmatmul.mubr.bf16.gmra.mrb[68].mxu0 %v11651_v24  ;;  %v10680_v24 = vld [vmem:[%s16051_s5 + $0x100] ss:$8 sps:$4 sm:$0xff]  }
 0x726   :  { %v4419_v38 = vmax.f32 %v4200_v2, 0.0  ;;  %5354 = vmatprep.mubr.bf16.mxu0 %v16181_v15  ;;  %6527 = vmatpush1.bf16.msra.mxu1 %v10680_v24 }
 0x727   :  { %v4544_v60 = vpack.c.bf16 %v4418_v4, %v4416_v50  ;;  %6528 = vmatprep.subr.bf16.mxu1 %v10688_v23 }
 0x728   :  { %v4203_v16 = vpop.f32.mrb[220].mxu0  ;;  %v4545_v5 = vpack.c.bf16 %v4419_v38, %v4417_v33 }
 0x729   :  { %v4204_v26 = vadd.f32 %v4203_v16, %v12673_v0  ;;  %v4205_v39 = vpop.f32.mrb[221].mxu0 }
 0x72a   :  { %v4206_v52 = vadd.f32 %v4205_v39, %v12678_v61  ;;  %v4207_v48 = vpop.f32.mrb[222].mxu0  ;;  %4833 = vmatprep.mubr.bf16.mxu1 %v4545_v5 }
 0x72b   :  { %v4208_v11 = vadd.f32 %v4207_v48, %v12673_v0  ;;  %v4209_v20 = vpop.f32.mrb[223].mxu0  ;;  %4834 = vmatmul.mubr.bf16.gmra.mrb[104].mxu1 %v4544_v60  ;;  %v4420_v36 = vmax.f32 %v4204_v26, 0.0 }
 0x72c   :  { %v4210_v49 = vadd.f32 %v4209_v20, %v12678_v61  ;;  %v4421_v45 = vmax.f32 %v4206_v52, 0.0 }
 0x72d   :  { %v4422_v57 = vmax.f32 %v4208_v11, 0.0  ;;  %5355 = vmatmul.mubr.bf16.gmra.mrb[72].mxu0 %v11660_v42 }
 0x72e   :  { %v4423_v19 = vmax.f32 %v4210_v49, 0.0  ;;  %5364 = vmatprep.mubr.bf16.mxu0 %v16181_v15 }
 0x72f   :  { %v4546_v37 = vpack.c.bf16 %v4422_v57, %v4420_v36 }
 0x730   :  { %v4213_v46 = vpop.f32.mrb[224].mxu0  ;;  %v4547_v53 = vpack.c.bf16 %v4423_v19, %v4421_v45 }
 0x731   :  { %v4214_v29 = vadd.f32 %v4213_v46, %v12673_v0  ;;  %v4215_v56 = vpop.f32.mrb[225].mxu0 }
 0x732   :  { %v4216_v27 = vadd.f32 %v4215_v56, %v12678_v61  ;;  %v4217_v6 = vpop.f32.mrb[226].mxu0  ;;  %4841 = vmatprep.mubr.bf16.mxu1 %v4547_v53 }
 0x733   :  { %v4218_v42 = vadd.f32 %v4217_v6, %v12673_v0  ;;  %v4219_v2 = vpop.f32.mrb[227].mxu0  ;;  %4842 = vmatmul.mubr.bf16.gmra.mrb[108].mxu1 %v4546_v37  ;;  %v4424_v4 = vmax.f32 %v4214_v29, 0.0 }
 0x734   :  { %v4220_v50 = vadd.f32 %v4219_v2, %v12678_v61  ;;  %v4425_v38 = vmax.f32 %v4216_v27, 0.0 }
 0x735   :  { %v4426_v33 = vmax.f32 %v4218_v42, 0.0  ;;  %5365 = vmatmul.mubr.bf16.gmra.mrb[76].mxu0 %v11669_v62  ;;  %v10686_v62 = vld [vmem:[%s16051_s5 + $0x110] ss:$8 sps:$4 sm:$0xff]  }
 0x736   :  { %v4427_v60 = vmax.f32 %v4220_v50, 0.0  ;;  %5374 = vmatprep.mubr.bf16.mxu0 %v16181_v15  ;;  %6529 = vmatpush1.bf16.msra.mxu1 %v10686_v62 }
 0x737   :  { %v4548_v16 = vpack.c.bf16 %v4426_v33, %v4424_v4 }
 0x738   :  { %v4223_v5 = vpop.f32.mrb[228].mxu0  ;;  %v4549_v26 = vpack.c.bf16 %v4427_v60, %v4425_v38 }
 0x739   :  { %v4224_v39 = vadd.f32 %v4223_v5, %v12673_v0  ;;  %v4225_v52 = vpop.f32.mrb[229].mxu0 }
 0x73a   :  { %v4226_v48 = vadd.f32 %v4225_v52, %v12678_v61  ;;  %v4227_v11 = vpop.f32.mrb[230].mxu0  ;;  %4849 = vmatprep.mubr.bf16.mxu1 %v4549_v26 }
 0x73b   :  { %v4228_v20 = vadd.f32 %v4227_v11, %v12673_v0  ;;  %v4229_v24 = vpop.f32.mrb[231].mxu0  ;;  %4850 = vmatmul.mubr.bf16.gmra.mrb[112].mxu1 %v4548_v16  ;;  %v4428_v44 = vmax.f32 %v4224_v39, 0.0  ;;  %v10691_v11 = vld [vmem:[%s16051_s5 + $0x124] ss:$8 sps:$4 sm:$0xff]  }
 0x73c   :  { %v4230_v49 = vadd.f32 %v4229_v24, %v12678_v61  ;;  %v4429_v36 = vmax.f32 %v4226_v48, 0.0  ;;  %6530 = vmatprep.subr.bf16.mxu1 %v10691_v11 }
 0x73d   :  { %v4430_v22 = vmax.f32 %v4228_v20, 0.0  ;;  %5375 = vmatmul.mubr.bf16.gmra.mrb[80].mxu0 %v11678_v21 }
 0x73e   :  { %v4431_v57 = vmax.f32 %v4230_v49, 0.0  ;;  %5384 = vmatprep.mubr.bf16.mxu0 %v16181_v15 }
 0x73f   :  { %v4550_v45 = vpack.c.bf16 %v4430_v22, %v4428_v44 }
 0x740   :  { %v4233_v19 = vpop.f32.mrb[232].mxu0  ;;  %v4551_v37 = vpack.c.bf16 %v4431_v57, %v4429_v36 }
 0x741   :  { %v4234_v46 = vadd.f32 %v4233_v19, %v12673_v0  ;;  %v4235_v53 = vpop.f32.mrb[233].mxu0 }
 0x742   :  { %v4236_v29 = vadd.f32 %v4235_v53, %v12678_v61  ;;  %v4237_v56 = vpop.f32.mrb[234].mxu0  ;;  %4857 = vmatprep.mubr.bf16.mxu1 %v4551_v37 }
 0x743   :  { %v4238_v27 = vadd.f32 %v4237_v56, %v12673_v0  ;;  %v4239_v6 = vpop.f32.mrb[235].mxu0  ;;  %4858 = vmatmul.mubr.bf16.gmra.mrb[116].mxu1 %v4550_v45  ;;  %v4432_v42 = vmax.f32 %v4234_v46, 0.0 }
 0x744   :  { %v4240_v21 = vadd.f32 %v4239_v6, %v12678_v61  ;;  %v4433_v50 = vmax.f32 %v4236_v29, 0.0 }
 0x745   :  { %v4434_v2 = vmax.f32 %v4238_v27, 0.0  ;;  %5385 = vmatmul.mubr.bf16.gmra.mrb[84].mxu0 %v11687_v31  ;;  %v10689_v31 = vld [vmem:[%s16051_s5 + $0x120] ss:$8 sps:$4 sm:$0xff]  }
 0x746   :  { %v4435_v4 = vmax.f32 %v4240_v21, 0.0  ;;  %5394 = vmatprep.mubr.bf16.mxu0 %v16181_v15  ;;  %6531 = vmatpush1.bf16.msra.mxu1 %v10689_v31 }
 0x747   :  { %v4552_v33 = vpack.c.bf16 %v4434_v2, %v4432_v42 }
 0x748   :  { %v4243_v38 = vpop.f32.mrb[236].mxu0  ;;  %v4553_v60 = vpack.c.bf16 %v4435_v4, %v4433_v50 }
 0x749   :  { %v4244_v16 = vadd.f32 %v4243_v38, %v12673_v0  ;;  %v4245_v5 = vpop.f32.mrb[237].mxu0 }
 0x74a   :  { %v4246_v26 = vadd.f32 %v4245_v5, %v12678_v61  ;;  %v4247_v39 = vpop.f32.mrb[238].mxu0  ;;  %4865 = vmatprep.mubr.bf16.mxu1 %v4553_v60  ;;  %v10694_v5 = vld [vmem:[%s16051_s5 + $0x134] ss:$8 sps:$4 sm:$0xff]  }
 0x74b   :  { %v4248_v52 = vadd.f32 %v4247_v39, %v12673_v0  ;;  %v4249_v48 = vpop.f32.mrb[239].mxu0  ;;  %4866 = vmatmul.mubr.bf16.gmra.mrb[120].mxu1 %v4552_v33  ;;  %v4436_v24 = vmax.f32 %v4244_v16, 0.0  ;;  %6532 = vmatprep.subr.bf16.mxu1 %v10694_v5 }
 0x74c   :  { %v4250_v20 = vadd.f32 %v4249_v48, %v12678_v61  ;;  %v4437_v23 = vmax.f32 %v4246_v26, 0.0 }
 0x74d   :  { %v4438_v62 = vmax.f32 %v4248_v52, 0.0  ;;  %5395 = vmatmul.mubr.bf16.gmra.mrb[88].mxu0 %v11696_v63 }
 0x74e   :  { %v4439_v49 = vmax.f32 %v4250_v20, 0.0  ;;  %5404 = vmatprep.mubr.bf16.mxu0 %v16181_v15 }
 0x74f   :  { %v4554_v44 = vpack.c.bf16 %v4438_v62, %v4436_v24 }
 0x750   :  { %v4253_v22 = vpop.f32.mrb[240].mxu0  ;;  %v4555_v36 = vpack.c.bf16 %v4439_v49, %v4437_v23 }
 0x751   :  { %v4254_v57 = vadd.f32 %v4253_v22, %v12673_v0  ;;  %v4255_v45 = vpop.f32.mrb[241].mxu0 }
 0x752   :  { %v4256_v19 = vadd.f32 %v4255_v45, %v12678_v61  ;;  %v4257_v37 = vpop.f32.mrb[242].mxu0  ;;  %4873 = vmatprep.mubr.bf16.mxu1 %v4555_v36 }
 0x753   :  { %v4258_v46 = vadd.f32 %v4257_v37, %v12673_v0  ;;  %v4259_v53 = vpop.f32.mrb[243].mxu0  ;;  %4874 = vmatmul.mubr.bf16.gmra.mrb[124].mxu1 %v4554_v44  ;;  %v4440_v29 = vmax.f32 %v4254_v57, 0.0 }
 0x754   :  { %v4260_v63 = vadd.f32 %v4259_v53, %v12678_v61  ;;  %v4441_v27 = vmax.f32 %v4256_v19, 0.0 }
 0x755   :  { %v4442_v56 = vmax.f32 %v4258_v46, 0.0  ;;  %5405 = vmatmul.mubr.bf16.gmra.mrb[92].mxu0 %v11705_v25  ;;  %v10692_v25 = vld [vmem:[%s16051_s5 + $0x130] ss:$8 sps:$4 sm:$0xff]  }
 0x756   :  { %v4443_v6 = vmax.f32 %v4260_v63, 0.0  ;;  %5414 = vmatprep.mubr.bf16.mxu0 %v16181_v15  ;;  %6533 = vmatpush1.bf16.msra.mxu1 %v10692_v25 }
 0x757   :  { %v4556_v21 = vpack.c.bf16 %v4442_v56, %v4440_v29 }
 0x758   :  { %v4263_v42 = vpop.f32.mrb[244].mxu0  ;;  %v4557_v2 = vpack.c.bf16 %v4443_v6, %v4441_v27 }
 0x759   :  { %v4264_v50 = vadd.f32 %v4263_v42, %v12673_v0  ;;  %v4265_v4 = vpop.f32.mrb[245].mxu0 }
 0x75a   :  { %v4266_v33 = vadd.f32 %v4265_v4, %v12678_v61  ;;  %v4267_v38 = vpop.f32.mrb[246].mxu0  ;;  %4881 = vmatprep.mubr.bf16.mxu1 %v4557_v2  ;;  %v10697_v2 = vld [vmem:[%s16051_s5 + $0x144] ss:$8 sps:$4 sm:$0xff]  }
 0x75b   :  { %v4268_v60 = vadd.f32 %v4267_v38, %v12673_v0  ;;  %v4269_v16 = vpop.f32.mrb[247].mxu0  ;;  %4882 = vmatmul.mubr.bf16.gmra.mrb[128].mxu1 %v4556_v21  ;;  %v4444_v39 = vmax.f32 %v4264_v50, 0.0  ;;  %6534 = vmatprep.subr.bf16.mxu1 %v10697_v2 }
 0x75c   :  { %v4270_v26 = vadd.f32 %v4269_v16, %v12678_v61  ;;  %v4445_v48 = vmax.f32 %v4266_v33, 0.0 }
 0x75d   :  { %v4446_v52 = vmax.f32 %v4268_v60, 0.0  ;;  %5415 = vmatmul.mubr.bf16.gmra.mrb[96].mxu0 %v11714_v47 }
 0x75e   :  { %v4447_v31 = vmax.f32 %v4270_v26, 0.0  ;;  %5424 = vmatprep.mubr.bf16.mxu0 %v16181_v15 }
 0x75f   :  { %v4558_v11 = vpack.c.bf16 %v4446_v52, %v4444_v39 }
 0x760   :  { %v4273_v20 = vpop.f32.mrb[248].mxu0  ;;  %v4559_v24 = vpack.c.bf16 %v4447_v31, %v4445_v48 }
 0x761   :  { %v4274_v62 = vadd.f32 %v4273_v20, %v12673_v0  ;;  %v4275_v23 = vpop.f32.mrb[249].mxu0 }
 0x762   :  { %v4276_v49 = vadd.f32 %v4275_v23, %v12678_v61  ;;  %v4277_v44 = vpop.f32.mrb[250].mxu0  ;;  %4889 = vmatprep.mubr.bf16.mxu1 %v4559_v24 }
 0x763   :  { %v4278_v22 = vadd.f32 %v4277_v44, %v12673_v0  ;;  %v4279_v36 = vpop.f32.mrb[251].mxu0  ;;  %4890 = vmatmul.mubr.bf16.gmra.mrb[132].mxu1 %v4558_v11  ;;  %v4448_v57 = vmax.f32 %v4274_v62, 0.0 }
 0x764   :  { %v4280_v47 = vadd.f32 %v4279_v36, %v12678_v61  ;;  %v4449_v19 = vmax.f32 %v4276_v49, 0.0 }
 0x765   :  { %v4450_v45 = vmax.f32 %v4278_v22, 0.0  ;;  %5425 = vmatmul.mubr.bf16.gmra.mrb[100].mxu0 %v11723_v8  ;;  %v10695_v8 = vld [vmem:[%s16051_s5 + $0x140] ss:$8 sps:$4 sm:$0xff]  }
 0x766   :  { %v4451_v37 = vmax.f32 %v4280_v47, 0.0  ;;  %5434 = vmatprep.mubr.bf16.mxu0 %v16181_v15  ;;  %6535 = vmatpush1.bf16.msra.mxu1 %v10695_v8 }
 0x767   :  { %v4560_v46 = vpack.c.bf16 %v4450_v45, %v4448_v57 }
 0x768   :  { %v4283_v53 = vpop.f32.mrb[252].mxu0  ;;  %v4561_v63 = vpack.c.bf16 %v4451_v37, %v4449_v19 }
 0x769   :  { %v4284_v29 = vadd.f32 %v4283_v53, %v12673_v0  ;;  %v4285_v56 = vpop.f32.mrb[253].mxu0 }
 0x76a   :  { %v4286_v27 = vadd.f32 %v4285_v56, %v12678_v61  ;;  %v4287_v6 = vpop.f32.mrb[254].mxu0  ;;  %4897 = vmatprep.mubr.bf16.mxu1 %v4561_v63 }
 0x76b   :  { %v4288_v21 = vadd.f32 %v4287_v6, %v12673_v0  ;;  %v4289_v42 = vpop.f32.mrb[255].mxu0  ;;  %4898 = vmatmul.mubr.bf16.gmra.mrb[136].mxu1 %v4560_v46  ;;  %v4452_v4 = vmax.f32 %v4284_v29, 0.0  ;;  %v10700_v46 = vld [vmem:[%s16051_s5 + $0x154] ss:$8 sps:$4 sm:$0xff]   ;;  %v12944_v6 = vld [vmem:[%s16049_s3 + $0x5] ss:$0 sm:$0xff] }
 0x76c   :  { %v4290_v50 = vadd.f32 %v4289_v42, %v12678_v61  ;;  %v4453_v38 = vmax.f32 %v4286_v27, 0.0  ;;  %6536 = vmatprep.subr.bf16.mxu1 %v10700_v46 }
 0x76d   :  { %v4454_v33 = vmax.f32 %v4288_v21, 0.0  ;;  %5435 = vmatmul.mubr.bf16.gmra.mrb[104].mxu0 %v11732_v32 }
 0x76e   :  { %v4455_v60 = vmax.f32 %v4290_v50, 0.0  ;;  %5444 = vmatprep.mubr.bf16.mxu0 %v16181_v15 }
 0x76f   :  { %v4562_v16 = vpack.c.bf16 %v4454_v33, %v4452_v4 }
 0x770   :  { %v4293_v25 = vpop.f32.mrb[0].mxu0  ;;  %v4563_v5 = vpack.c.bf16 %v4455_v60, %v4453_v38 }
 0x771   :  { %v4294_v26 = vadd.f32 %v4293_v25, %v12673_v0  ;;  %v4295_v39 = vpop.f32.mrb[1].mxu0 }
 0x772   :  { %v4296_v52 = vadd.f32 %v4295_v39, %v12678_v61  ;;  %v4297_v48 = vpop.f32.mrb[2].mxu0  ;;  %4905 = vmatprep.mubr.bf16.mxu1 %v4563_v5 }
 0x773   :  { %v4298_v31 = vadd.f32 %v4297_v48, %v12673_v0  ;;  %v4299_v11 = vpop.f32.mrb[3].mxu0  ;;  %4906 = vmatmul.mubr.bf16.gmra.mrb[140].mxu1 %v4562_v16  ;;  %v4456_v20 = vmax.f32 %v4294_v26, 0.0 }
 0x774   :  { %v4300_v32 = vadd.f32 %v4299_v11, %v12678_v61  ;;  %v4457_v62 = vmax.f32 %v4296_v52, 0.0 }
 0x775   :  { %v4458_v24 = vmax.f32 %v4298_v31, 0.0  ;;  %5445 = vmatmul.mubr.bf16.gmra.mrb[108].mxu0 %v11741_v55  ;;  %v10698_v55 = vld [vmem:[%s16051_s5 + $0x150] ss:$8 sps:$4 sm:$0xff]  }
 0x776   :  { %v4459_v23 = vmax.f32 %v4300_v32, 0.0  ;;  %5454 = vmatprep.mubr.bf16.mxu0 %v16181_v15  ;;  %6537 = vmatpush1.bf16.msra.mxu1 %v10698_v55 }
 0x777   :  { %v4564_v49 = vpack.c.bf16 %v4458_v24, %v4456_v20 }
 0x778   :  { %v4303_v44 = vpop.f32.mrb[4].mxu0  ;;  %v4565_v22 = vpack.c.bf16 %v4459_v23, %v4457_v62 }
 0x779   :  { %v4304_v36 = vadd.f32 %v4303_v44, %v12673_v0  ;;  %v4305_v47 = vpop.f32.mrb[5].mxu0 }
 0x77a   :  { %v4306_v57 = vadd.f32 %v4305_v47, %v12678_v61  ;;  %v4307_v45 = vpop.f32.mrb[6].mxu0  ;;  %4913 = vmatprep.mubr.bf16.mxu1 %v4565_v22 }
 0x77b   :  { %v4308_v19 = vadd.f32 %v4307_v45, %v12673_v0  ;;  %v4309_v37 = vpop.f32.mrb[7].mxu0  ;;  %4914 = vmatmul.mubr.bf16.gmra.mrb[144].mxu1 %v4564_v49  ;;  %v4460_v63 = vmax.f32 %v4304_v36, 0.0 }
 0x77c   :  { %v4310_v53 = vadd.f32 %v4309_v37, %v12678_v61  ;;  %v4461_v56 = vmax.f32 %v4306_v57, 0.0 }
 0x77d   :  { %v4462_v29 = vmax.f32 %v4308_v19, 0.0  ;;  %5455 = vmatmul.mubr.bf16.gmra.mrb[112].mxu0 %v11750_v17 }
 0x77e   :  { %v4463_v27 = vmax.f32 %v4310_v53, 0.0  ;;  %v4707_v21 = vpop.f32.mrb[40].mxu1  ;;  %5464 = vmatprep.mubr.bf16.mxu0 %v16181_v15 }
 0x77f   :  { %v4566_v42 = vpack.c.bf16 %v4462_v29, %v4460_v63  ;;  %v4709_v8 = vpop.f32.mrb[41].mxu1  ;;  %v12948_v33 = vadd.f32 %v4707_v21, %v12944_v6  ;;  %v10701_v63 = vld [vmem:[%s16051_s5 + $0x160] ss:$8 sps:$4 sm:$0xff]   ;;  %v10703_v29 = vld [vmem:[%s16051_s5 + $0x164] ss:$8 sps:$4 sm:$0xff]  }
 0x780   :  { %v4313_v2 = vpop.f32.mrb[8].mxu0  ;;  %v4710_v50 = vpop.f32.mrb[42].mxu1  ;;  %v4567_v4 = vpack.c.bf16 %v4463_v27, %v4461_v56  ;;  %6538 = vmatprep.subr.bf16.mxu1 %v10703_v29 }
 0x781   :  { %v4314_v17 = vadd.f32 %v4313_v2, %v12673_v0  ;;  %v12952_v38 = vadd.f32 %v4710_v50, %v12944_v6  ;;  %v4315_v60 = vpop.f32.mrb[9].mxu0  ;;  %v4712_v16 = vpop.f32.mrb[43].mxu1  ;;  %6539 = vmatpush1.bf16.msra.mxu1 %v10701_v63 }
 0x782   :  { %v4316_v25 = vadd.f32 %v4315_v60, %v12678_v61  ;;  %v4317_v5 = vpop.f32.mrb[10].mxu0  ;;  %4921 = vmatprep.mubr.bf16.mxu1 %v4567_v4 }
 0x783   :  { %v5042_v26 = vpack.c.bf16 %v12952_v38, %v12948_v33  ;;  %v4318_v39 = vadd.f32 %v4317_v5, %v12673_v0  ;;  %v4319_v52 = vpop.f32.mrb[11].mxu0  ;;  %4922 = vmatmul.mubr.bf16.gmra.mrb[148].mxu1 %v4566_v42  ;;  %v4464_v31 = vmax.f32 %v4314_v17, 0.0 }
 0x784   :  { %v4320_v48 = vadd.f32 %v4319_v52, %v12678_v61  ;;  %v4465_v32 = vmax.f32 %v4316_v25, 0.0 }
 0x785   :  { %v4466_v11 = vmax.f32 %v4318_v39, 0.0  ;;  %5465 = vmatmul.mubr.bf16.gmra.mrb[116].mxu0 %v11759_v43 }
 0x786   :  { %v4467_v20 = vmax.f32 %v4320_v48, 0.0  ;;  %v4715_v24 = vpop.f32.mrb[44].mxu1  ;;  %5474 = vmatprep.mubr.bf16.mxu0 %v16181_v15 }
 0x787   :  { %v4568_v62 = vpack.c.bf16 %v4466_v11, %v4464_v31  ;;  %v4717_v23 = vpop.f32.mrb[45].mxu1  ;;  %v12962_v36 = vadd.f32 %v4715_v24, %v12944_v6 }
 0x788   :  { %v4323_v49 = vpop.f32.mrb[12].mxu0  ;;  %v4718_v44 = vpop.f32.mrb[46].mxu1  ;;  %v4569_v22 = vpack.c.bf16 %v4467_v20, %v4465_v32 }
 0x789   :  { %v4324_v47 = vadd.f32 %v4323_v49, %v12673_v0  ;;  %v12966_v57 = vadd.f32 %v4718_v44, %v12944_v6  ;;  %v4325_v45 = vpop.f32.mrb[13].mxu0  ;;  %v4720_v43 = vpop.f32.mrb[47].mxu1 }
 0x78a   :  { %v4326_v19 = vadd.f32 %v4325_v45, %v12678_v61  ;;  %v4327_v37 = vpop.f32.mrb[14].mxu0  ;;  %4929 = vmatprep.mubr.bf16.mxu1 %v4569_v22 }
 0x78b   :  { %v5043_v55 = vpack.c.bf16 %v12966_v57, %v12962_v36  ;;  %v4328_v46 = vadd.f32 %v4327_v37, %v12673_v0  ;;  %v4329_v53 = vpop.f32.mrb[15].mxu0  ;;  %4930 = vmatmul.mubr.bf16.gmra.mrb[152].mxu1 %v4568_v62  ;;  %v4468_v27 = vmax.f32 %v4324_v47, 0.0  ;;  %v10716_v36 = vld [vmem:[%s16051_s5 + $0x1b0] ss:$8 sps:$4 sm:$0xff]   ;;  %v10718_v57 = vld [vmem:[%s16051_s5 + $0x1b4] ss:$8 sps:$4 sm:$0xff]  }
 0x78c   :  { %v4330_v56 = vadd.f32 %v4329_v53, %v12678_v61  ;;  %v4469_v42 = vmax.f32 %v4326_v19, 0.0 }
 0x78d   :  { %v4470_v21 = vmax.f32 %v4328_v46, 0.0  ;;  %5475 = vmatmul.mubr.bf16.gmra.mrb[120].mxu0 %v11768_v9 }
 0x78e   :  { %v4471_v8 = vmax.f32 %v4330_v56, 0.0  ;;  %v4723_v2 = vpop.f32.mrb[48].mxu1  ;;  %5484 = vmatprep.mubr.bf16.mxu0 %v16181_v15 }
 0x78f   :  { %v4570_v50 = vpack.c.bf16 %v4470_v21, %v4468_v27  ;;  %v4725_v4 = vpop.f32.mrb[49].mxu1  ;;  %v12982_v25 = vadd.f32 %v4723_v2, %v12944_v6  ;;  %v10704_v2 = vld [vmem:[%s16051_s5 + $0x170] ss:$8 sps:$4 sm:$0xff]  }
 0x790   :  { %v4333_v17 = vpop.f32.mrb[16].mxu0  ;;  %v4726_v60 = vpop.f32.mrb[50].mxu1  ;;  %v4571_v16 = vpack.c.bf16 %v4471_v8, %v4469_v42 }
 0x791   :  { %v4334_v5 = vadd.f32 %v4333_v17, %v12673_v0  ;;  %v12986_v39 = vadd.f32 %v4726_v60, %v12944_v6  ;;  %v4335_v9 = vpop.f32.mrb[17].mxu0  ;;  %v4728_v52 = vpop.f32.mrb[51].mxu1 }
 0x792   :  { %v4336_v48 = vadd.f32 %v4335_v9, %v12678_v61  ;;  %v4337_v31 = vpop.f32.mrb[18].mxu0  ;;  %4937 = vmatprep.mubr.bf16.mxu1 %v4571_v16 }
 0x793   :  { %v5044_v11 = vpack.c.bf16 %v12986_v39, %v12982_v25  ;;  %v4338_v32 = vadd.f32 %v4337_v31, %v12673_v0  ;;  %v4339_v20 = vpop.f32.mrb[19].mxu0  ;;  %4938 = vmatmul.mubr.bf16.gmra.mrb[156].mxu1 %v4570_v50  ;;  %v4472_v62 = vmax.f32 %v4334_v5, 0.0  ;;  %v10706_v50 = vld [vmem:[%s16051_s5 + $0x174] ss:$8 sps:$4 sm:$0xff]  }
 0x794   :  { %v4340_v24 = vadd.f32 %v4339_v20, %v12678_v61  ;;  %v4473_v49 = vmax.f32 %v4336_v48, 0.0  ;;  %6540 = vmatprep.subr.bf16.mxu1 %v10706_v50 }
 0x795   :  { %v4474_v23 = vmax.f32 %v4338_v32, 0.0  ;;  %5485 = vmatmul.mubr.bf16.gmra.mrb[124].mxu0 %v11777_v35  ;;  %6541 = vmatpush1.bf16.msra.mxu1 %v10704_v2 }
 0x796   :  { %v4475_v44 = vmax.f32 %v4340_v24, 0.0  ;;  %v4731_v22 = vpop.f32.mrb[52].mxu1  ;;  %5494 = vmatprep.mubr.bf16.mxu0 %v16181_v15 }
 0x797   :  { %v4572_v47 = vpack.c.bf16 %v4474_v23, %v4472_v62  ;;  %v4733_v45 = vpop.f32.mrb[53].mxu1  ;;  %v12996_v46 = vadd.f32 %v4731_v22, %v12944_v6 }
 0x798   :  { %v4343_v43 = vpop.f32.mrb[20].mxu0  ;;  %v4734_v19 = vpop.f32.mrb[54].mxu1  ;;  %v4573_v37 = vpack.c.bf16 %v4475_v44, %v4473_v49  ;;  %v10707_v45 = vld [vmem:[%s16051_s5 + $0x180] ss:$8 sps:$4 sm:$0xff]  }
 0x799   :  { %v4344_v53 = vadd.f32 %v4343_v43, %v12673_v0  ;;  %v13000_v63 = vadd.f32 %v4734_v19, %v12944_v6  ;;  %v4345_v29 = vpop.f32.mrb[21].mxu0  ;;  %v4736_v35 = vpop.f32.mrb[55].mxu1 }
 0x79a   :  { %v4346_v56 = vadd.f32 %v4345_v29, %v12678_v61  ;;  %v4347_v27 = vpop.f32.mrb[22].mxu0  ;;  %4945 = vmatprep.mubr.bf16.mxu1 %v4573_v37 }
 0x79b   :  { %v5045_v21 = vpack.c.bf16 %v13000_v63, %v12996_v46  ;;  %v4348_v42 = vadd.f32 %v4347_v27, %v12673_v0  ;;  %v4349_v8 = vpop.f32.mrb[23].mxu0  ;;  %4946 = vmatmul.mubr.bf16.gmra.mrb[160].mxu1 %v4572_v47  ;;  %v4476_v17 = vmax.f32 %v4344_v53, 0.0  ;;  %v10719_v46 = vld [vmem:[%s16051_s5 + $0x1c0] ss:$8 sps:$4 sm:$0xff]   ;;  %v10721_v63 = vld [vmem:[%s16051_s5 + $0x1c4] ss:$8 sps:$4 sm:$0xff]  }
 0x79c   :  { %v4350_v4 = vadd.f32 %v4349_v8, %v12678_v61  ;;  %v4477_v16 = vmax.f32 %v4346_v56, 0.0 }
 0x79d   :  { %v4478_v60 = vmax.f32 %v4348_v42, 0.0  ;;  %5495 = vmatmul.mubr.bf16.gmra.mrb[128].mxu0 %v11791_v1 }
 0x79e   :  { %v4479_v5 = vmax.f32 %v4350_v4, 0.0  ;;  %v4739_v0 = vpop.f32.mrb[56].mxu1  ;;  %5504 = vmatprep.mubr.bf16.mxu0 %v16181_v15 }
 0x79f   :  { %v4574_v9 = vpack.c.bf16 %v4478_v60, %v4476_v17  ;;  %v4741_v52 = vpop.f32.mrb[57].mxu1  ;;  %v13016_v32 = vadd.f32 %v4739_v0, %v12944_v6  ;;  %v10710_v17 = vld [vmem:[%s16051_s5 + $0x190] ss:$8 sps:$4 sm:$0xff]  }
 0x7a0   :  { %v4742_v48 = vpop.f32.mrb[58].mxu1  ;;  %v4575_v31 = vpack.c.bf16 %v4479_v5, %v4477_v16 }
 0x7a1   :  { %v13019_v61 = vadd.f32 %v4742_v48, %v12944_v6  ;;  %v4744_v20 = vpop.f32.mrb[59].mxu1 }
 0x7a2   :  { %4953 = vmatprep.mubr.bf16.mxu1 %v4575_v31 }
 0x7a3   :  { %v5046_v1 = vpack.c.bf16 %v13019_v61, %v13016_v32  ;;  %4954 = vmatmul.mubr.bf16.gmra.mrb[164].mxu1 %v4574_v9 }
 0x7a5   :  { %5505 = vmatmul.mubr.bf16.gmra.mrb[132].mxu0 %v11805_v30  ;;  %v10709_v30 = vld [vmem:[%s16051_s5 + $0x184] ss:$8 sps:$4 sm:$0xff]  }
 0x7a6   :  { %v4747_v24 = vpop.f32.mrb[60].mxu1  ;;  %5514 = vmatprep.mubr.bf16.mxu0 %v16181_v15  ;;  %6542 = vmatprep.subr.bf16.mxu1 %v10709_v30 }
 0x7a7   :  { %v4749_v62 = vpop.f32.mrb[61].mxu1  ;;  %v13026_v49 = vadd.f32 %v4747_v24, %v12944_v6  ;;  %6543 = vmatpush1.bf16.msra.mxu1 %v10707_v45  ;;  %v10713_v45 = vld [vmem:[%s16051_s5 + $0x1a0] ss:$8 sps:$4 sm:$0xff]  }
 0x7a8   :  { %v4750_v23 = vpop.f32.mrb[62].mxu1 }
 0x7a9   :  { %v13029_v44 = vadd.f32 %v4750_v23, %v12944_v6  ;;  %v4752_v22 = vpop.f32.mrb[63].mxu1 }
 0x7ab   :  { %v5047_v47 = vpack.c.bf16 %v13029_v44, %v13026_v49  ;;  %v10722_v49 = vld [vmem:[%s16051_s5 + $0x1d0] ss:$8 sps:$4 sm:$0xff]   ;;  %v10724_v44 = vld [vmem:[%s16051_s5 + $0x1d4] ss:$8 sps:$4 sm:$0xff]  }
 0x7ad   :  { %5515 = vmatmul.mubr.bf16.gmra.mrb[136].mxu0 %v11825_v12 }
 0x7ae   :  { %v4755_v43 = vpop.f32.mrb[64].mxu1  ;;  %5524 = vmatprep.mubr.bf16.mxu0 %v16181_v15 }
 0x7af   :  { %v4757_v19 = vpop.f32.mrb[65].mxu1  ;;  %v13042_v53 = vadd.f32 %v4755_v43, %v12944_v6 }
 0x7b0   :  { %v4758_v37 = vpop.f32.mrb[66].mxu1 }
 0x7b1   :  { %v13045_v29 = vadd.f32 %v4758_v37, %v12944_v6  ;;  %v4760_v35 = vpop.f32.mrb[67].mxu1 }
 0x7b3   :  { %v5048_v56 = vpack.c.bf16 %v13045_v29, %v13042_v53  ;;  %v10725_v53 = vld [vmem:[%s16051_s5 + $0x1e0] ss:$8 sps:$4 sm:$0xff]   ;;  %v10727_v29 = vld [vmem:[%s16051_s5 + $0x1e4] ss:$8 sps:$4 sm:$0xff]  }
 0x7b5   :  { %5525 = vmatmul.mubr.bf16.gmra.mrb[140].mxu0 %v11844_v58  ;;  %v10712_v58 = vld [vmem:[%s16051_s5 + $0x194] ss:$8 sps:$4 sm:$0xff]  }
 0x7b6   :  { %v4763_v12 = vpop.f32.mrb[68].mxu1  ;;  %5534 = vmatprep.mubr.bf16.mxu0 %v16181_v15  ;;  %6544 = vmatprep.subr.bf16.mxu1 %v10712_v58 }
 0x7b7   :  { %v4765_v27 = vpop.f32.mrb[69].mxu1  ;;  %v13052_v8 = vadd.f32 %v4763_v12, %v12944_v6  ;;  %6545 = vmatpush1.bf16.msra.mxu1 %v10710_v17 }
 0x7b8   :  { %v4766_v42 = vpop.f32.mrb[70].mxu1 }
 0x7b9   :  { %v13055_v2 = vadd.f32 %v4766_v42, %v12944_v6  ;;  %v4768_v50 = vpop.f32.mrb[71].mxu1 }
 0x7bb   :  { %v5049_v4 = vpack.c.bf16 %v13055_v2, %v13052_v8 }
 0x7bd   :  { %5535 = vmatmul.mubr.bf16.gmra.mrb[144].mxu0 %v11855_v54 }
 0x7be   :  { %v4771_v60 = vpop.f32.mrb[72].mxu1  ;;  %5544 = vmatprep.mubr.bf16.mxu0 %v16181_v15 }
 0x7bf   :  { %v4773_v16 = vpop.f32.mrb[73].mxu1  ;;  %v13068_v0 = vadd.f32 %v4771_v60, %v12944_v6 }
 0x7c0   :  { %v4774_v5 = vpop.f32.mrb[74].mxu1 }
 0x7c1   :  { %v13071_v9 = vadd.f32 %v4774_v5, %v12944_v6  ;;  %v4776_v52 = vpop.f32.mrb[75].mxu1 }
 0x7c3   :  { %v5050_v48 = vpack.c.bf16 %v13071_v9, %v13068_v0  ;;  %v10728_v0 = vld [vmem:[%s16051_s5 + $0x1f0] ss:$8 sps:$4 sm:$0xff]   ;;  %v10730_v9 = vld [vmem:[%s16051_s5 + $0x1f4] ss:$8 sps:$4 sm:$0xff]  }
 0x7c5   :  { %5545 = vmatmul.mubr.bf16.gmra.mrb[148].mxu0 %v11863_v34  ;;  %v10715_v34 = vld [vmem:[%s16051_s5 + $0x1a4] ss:$8 sps:$4 sm:$0xff]  }
 0x7c6   :  { %v4779_v54 = vpop.f32.mrb[76].mxu1  ;;  %5667 = vmatprep.mubr.bf16.mxu0 %v16181_v15  ;;  %6546 = vmatprep.subr.bf16.mxu1 %v10715_v34 }
 0x7c7   :  { %v4781_v31 = vpop.f32.mrb[77].mxu1  ;;  %v13078_v24 = vadd.f32 %v4779_v54, %v12944_v6  ;;  %6547 = vmatpush1.bf16.msra.mxu1 %v10713_v45 }
 0x7c8   :  { %v4782_v20 = vpop.f32.mrb[78].mxu1  ;;  %6548 = vmatprep.subr.bf16.mxu1 %v10718_v57 }
 0x7c9   :  { %v13081_v62 = vadd.f32 %v4782_v20, %v12944_v6  ;;  %v4784_v23 = vpop.f32.mrb[79].mxu1 }
 0x7cb   :  { %v5051_v22 = vpack.c.bf16 %v13081_v62, %v13078_v24  ;;  %6549 = vmatpush1.bf16.msra.mxu1 %v10716_v36 }
 0x7cc   :  { %6550 = vmatprep.subr.bf16.mxu1 %v10721_v63 }
 0x7cd   :  { %5668 = vmatmul.mubr.bf16.vlgmr.msra.gmra.mrb[24].mxu0 %v5042_v26 }
 0x7ce   :  { %v4787_v30 = vpop.f32.mrb[80].mxu1  ;;  %5677 = vmatprep.mubr.bf16.mxu0 %v16181_v15 }
 0x7cf   :  { %v4789_v43 = vpop.f32.mrb[81].mxu1  ;;  %v13096_v37 = vadd.f32 %v4787_v30, %v12944_v6  ;;  %6551 = vmatpush1.bf16.msra.mxu1 %v10719_v46 }
 0x7d0   :  { %v4790_v19 = vpop.f32.mrb[82].mxu1  ;;  %6552 = vmatprep.subr.bf16.mxu1 %v10724_v44 }
 0x7d1   :  { %v13099_v35 = vadd.f32 %v4790_v19, %v12944_v6  ;;  %v4792_v12 = vpop.f32.mrb[83].mxu1 }
 0x7d3   :  { %v5052_v27 = vpack.c.bf16 %v13099_v35, %v13096_v37  ;;  %6553 = vmatpush1.bf16.msra.mxu1 %v10722_v49 }
 0x7d4   :  { %6554 = vmatprep.subr.bf16.mxu1 %v10727_v29 }
 0x7d5   :  { %5678 = vmatmul.mubr.bf16.gmra.mrb[28].mxu0 %v5043_v55 }
 0x7d6   :  { %v4795_v33 = vpop.f32.mrb[84].mxu1  ;;  %5687 = vmatprep.mubr.bf16.mxu0 %v16181_v15 }
 0x7d7   :  { %v4797_v38 = vpop.f32.mrb[85].mxu1  ;;  %v13108_v42 = vadd.f32 %v4795_v33, %v12944_v6  ;;  %6555 = vmatpush1.bf16.msra.mxu1 %v10725_v53 }
 0x7d8   :  { %v4798_v26 = vpop.f32.mrb[86].mxu1  ;;  %6556 = vmatprep.subr.bf16.mxu1 %v10730_v9 }
 0x7d9   :  { %v13111_v50 = vadd.f32 %v4798_v26, %v12944_v6  ;;  %v4800_v17 = vpop.f32.mrb[87].mxu1 }
 0x7db   :  { %v5053_v58 = vpack.c.bf16 %v13111_v50, %v13108_v42  ;;  %6557 = vmatpush1.bf16.msra.mxu1 %v10728_v0 }
 0x7dd   :  { %5688 = vmatmul.mubr.bf16.gmra.mrb[32].mxu0 %v5044_v11 }
 0x7de   :  { %v4803_v55 = vpop.f32.mrb[88].mxu1  ;;  %5697 = vmatprep.mubr.bf16.mxu0 %v16181_v15 }
 0x7df   :  { %v4805_v60 = vpop.f32.mrb[89].mxu1  ;;  %v13126_v5 = vadd.f32 %v4803_v55, %v12944_v6 }
 0x7e0   :  { %v4806_v16 = vpop.f32.mrb[90].mxu1 }
 0x7e1   :  { %v13129_v52 = vadd.f32 %v4806_v16, %v12944_v6  ;;  %v4808_v54 = vpop.f32.mrb[91].mxu1 }
 0x7e3   :  { %v5054_v31 = vpack.c.bf16 %v13129_v52, %v13126_v5 }
 0x7e5   :  { %5698 = vmatmul.mubr.bf16.gmra.mrb[36].mxu0 %v5045_v21 }
 0x7e6   :  { %v4811_v25 = vpop.f32.mrb[92].mxu1  ;;  %5707 = vmatprep.mubr.bf16.mxu0 %v16181_v15 }
 0x7e7   :  { %v4813_v39 = vpop.f32.mrb[93].mxu1  ;;  %v13138_v20 = vadd.f32 %v4811_v25, %v12944_v6 }
 0x7e8   :  { %v4814_v11 = vpop.f32.mrb[94].mxu1 }
 0x7e9   :  { %v13141_v23 = vadd.f32 %v4814_v11, %v12944_v6  ;;  %v4816_v45 = vpop.f32.mrb[95].mxu1 }
 0x7eb   :  { %v5055_v34 = vpack.c.bf16 %v13141_v23, %v13138_v20 }
 0x7ed   :  { %5708 = vmatmul.mubr.bf16.gmra.mrb[40].mxu0 %v5046_v1 }
 0x7ee   :  { %v4819_v21 = vpop.f32.mrb[96].mxu1  ;;  %5717 = vmatprep.mubr.bf16.mxu0 %v16181_v15 }
 0x7ef   :  { %v4821_v30 = vpop.f32.mrb[97].mxu1  ;;  %v13156_v19 = vadd.f32 %v4819_v21, %v12944_v6 }
 0x7f0   :  { %v4822_v43 = vpop.f32.mrb[98].mxu1 }
 0x7f1   :  { %v13159_v12 = vadd.f32 %v4822_v43, %v12944_v6  ;;  %v4824_v33 = vpop.f32.mrb[99].mxu1 }
 0x7f3   :  { %v5056_v38 = vpack.c.bf16 %v13159_v12, %v13156_v19 }
 0x7f5   :  { %5718 = vmatmul.mubr.bf16.gmra.mrb[44].mxu0 %v5047_v47 }
 0x7f6   :  { %v4827_v32 = vpop.f32.mrb[100].mxu1  ;;  %5727 = vmatprep.mubr.bf16.mxu0 %v16181_v15 }
 0x7f7   :  { %v4829_v61 = vpop.f32.mrb[101].mxu1  ;;  %v13168_v26 = vadd.f32 %v4827_v32, %v12944_v6 }
 0x7f8   :  { %v4830_v1 = vpop.f32.mrb[102].mxu1 }
 0x7f9   :  { %v13171_v17 = vadd.f32 %v4830_v1, %v12944_v6  ;;  %v4832_v36 = vpop.f32.mrb[103].mxu1 }
 0x7fb   :  { %v5057_v57 = vpack.c.bf16 %v13171_v17, %v13168_v26 }
 0x7fd   :  { %5728 = vmatmul.mubr.bf16.gmra.mrb[48].mxu0 %v5048_v56 }
 0x7fe   :  { %v4835_v47 = vpop.f32.mrb[104].mxu1  ;;  %5737 = vmatprep.mubr.bf16.mxu0 %v16181_v15 }
 0x7ff   :  { %v4837_v55 = vpop.f32.mrb[105].mxu1  ;;  %v13186_v16 = vadd.f32 %v4835_v47, %v12944_v6 }
 0x800   :  { %v4838_v60 = vpop.f32.mrb[106].mxu1 }
 0x801   :  { %v13189_v54 = vadd.f32 %v4838_v60, %v12944_v6  ;;  %v4840_v25 = vpop.f32.mrb[107].mxu1 }
 0x803   :  { %v5058_v39 = vpack.c.bf16 %v13189_v54, %v13186_v16 }
 0x805   :  { %5738 = vmatmul.mubr.bf16.gmra.mrb[52].mxu0 %v5049_v4 }
 0x806   :  { %v4843_v56 = vpop.f32.mrb[108].mxu1  ;;  %5747 = vmatprep.mubr.bf16.mxu0 %v16181_v15 }
 0x807   :  { %v4845_v11 = vpop.f32.mrb[109].mxu1  ;;  %v13204_v46 = vadd.f32 %v4843_v56, %v12944_v6 }
 0x808   :  { %v4846_v45 = vpop.f32.mrb[110].mxu1 }
 0x809   :  { %v13207_v8 = vadd.f32 %v4846_v45, %v12944_v6  ;;  %v4848_v2 = vpop.f32.mrb[111].mxu1 }
 0x80b   :  { %v5059_v4 = vpack.c.bf16 %v13207_v8, %v13204_v46 }
 0x80d   :  { %5748 = vmatmul.mubr.bf16.gmra.mrb[56].mxu0 %v5050_v48 }
 0x80e   :  { %v4851_v63 = vpop.f32.mrb[112].mxu1  ;;  %5757 = vmatprep.mubr.bf16.mxu0 %v16181_v15 }
 0x80f   :  { %v4853_v21 = vpop.f32.mrb[113].mxu1  ;;  %v13216_v43 = vadd.f32 %v4851_v63, %v12944_v6 }
 0x810   :  { %v4854_v30 = vpop.f32.mrb[114].mxu1 }
 0x811   :  { %v13219_v33 = vadd.f32 %v4854_v30, %v12944_v6  ;;  %v4856_v32 = vpop.f32.mrb[115].mxu1 }
 0x813   :  { %v5060_v61 = vpack.c.bf16 %v13219_v33, %v13216_v43 }
 0x815   :  { %5758 = vmatmul.mubr.bf16.gmra.mrb[60].mxu0 %v5051_v22 }
 0x816   :  { %v4859_v48 = vpop.f32.mrb[116].mxu1  ;;  %5767 = vmatprep.mubr.bf16.mxu0 %v16181_v15 }
 0x817   :  { %v4861_v1 = vpop.f32.mrb[117].mxu1  ;;  %v13234_v49 = vadd.f32 %v4859_v48, %v12944_v6 }
 0x818   :  { %v4862_v36 = vpop.f32.mrb[118].mxu1 }
 0x819   :  { %v13237_v24 = vadd.f32 %v4862_v36, %v12944_v6  ;;  %v4864_v62 = vpop.f32.mrb[119].mxu1 }
 0x81b   :  { %v5061_v22 = vpack.c.bf16 %v13237_v24, %v13234_v49 }
 0x81d   :  { %5768 = vmatmul.mubr.bf16.gmra.mrb[64].mxu0 %v5052_v27 }
 0x81e   :  { %v4867_v44 = vpop.f32.mrb[120].mxu1  ;;  %5777 = vmatprep.mubr.bf16.mxu0 %v16181_v15 }
 0x81f   :  { %v4869_v47 = vpop.f32.mrb[121].mxu1  ;;  %v13246_v60 = vadd.f32 %v4867_v44, %v12944_v6 }
 0x820   :  { %v4870_v55 = vpop.f32.mrb[122].mxu1 }
 0x821   :  { %v13249_v25 = vadd.f32 %v4870_v55, %v12944_v6  ;;  %v4872_v53 = vpop.f32.mrb[123].mxu1 }
 0x823   :  { %v5062_v29 = vpack.c.bf16 %v13249_v25, %v13246_v60 }
 0x825   :  { %5778 = vmatmul.mubr.bf16.gmra.mrb[68].mxu0 %v5053_v58  ;;  %v10733_v58 = vld [vmem:[%s16051_s5 + $0x204] ss:$8 sps:$4 sm:$0xff]  }
 0x826   :  { %v4875_v37 = vpop.f32.mrb[124].mxu1  ;;  %5787 = vmatprep.mubr.bf16.mxu0 %v16181_v15  ;;  %7276 = vmatprep.subr.bf16.mxu1 %v10733_v58 }
 0x827   :  { %v4877_v35 = vpop.f32.mrb[125].mxu1  ;;  %v13258_v56 = vadd.f32 %v4875_v37, %v12944_v6 }
 0x828   :  { %v4878_v27 = vpop.f32.mrb[126].mxu1 }
 0x829   :  { %v13261_v11 = vadd.f32 %v4878_v27, %v12944_v6  ;;  %v4880_v45 = vpop.f32.mrb[127].mxu1 }
 0x82b   :  { %v5063_v2 = vpack.c.bf16 %v13261_v11, %v13258_v56 }
 0x82d   :  { %5788 = vmatmul.mubr.bf16.gmra.mrb[72].mxu0 %v5054_v31 }
 0x82e   :  { %v4883_v42 = vpop.f32.mrb[128].mxu1  ;;  %5797 = vmatprep.mubr.bf16.mxu0 %v16181_v15 }
 0x82f   :  { %v4885_v50 = vpop.f32.mrb[129].mxu1  ;;  %v13273_v21 = vadd.f32 %v4883_v42, %v12944_v6 }
 0x830   :  { %v4886_v63 = vpop.f32.mrb[130].mxu1 }
 0x831   :  { %v13276_v30 = vadd.f32 %v4886_v63, %v12944_v6  ;;  %v4888_v32 = vpop.f32.mrb[131].mxu1 }
 0x833   :  { %v5064_v5 = vpack.c.bf16 %v13276_v30, %v13273_v21 }
 0x835   :  { %5798 = vmatmul.mubr.bf16.gmra.mrb[76].mxu0 %v5055_v34 }
 0x836   :  { %v4891_v52 = vpop.f32.mrb[132].mxu1  ;;  %5807 = vmatprep.mubr.bf16.mxu0 %v16181_v15 }
 0x837   :  { %v4893_v31 = vpop.f32.mrb[133].mxu1  ;;  %v13285_v9 = vadd.f32 %v4891_v52, %v12944_v6 }
 0x838   :  { %v4894_v0 = vpop.f32.mrb[134].mxu1 }
 0x839   :  { %v13288_v48 = vadd.f32 %v4894_v0, %v12944_v6  ;;  %v4896_v1 = vpop.f32.mrb[135].mxu1 }
 0x83b   :  { %v5065_v36 = vpack.c.bf16 %v13288_v48, %v13285_v9 }
 0x83d   :  { %5808 = vmatmul.mubr.bf16.gmra.mrb[80].mxu0 %v5056_v38 }
 0x83e   :  { %v4899_v20 = vpop.f32.mrb[136].mxu1  ;;  %5817 = vmatprep.mubr.bf16.mxu0 %v16181_v15 }
 0x83f   :  { %v4901_v23 = vpop.f32.mrb[137].mxu1  ;;  %v13297_v62 = vadd.f32 %v4899_v20, %v12944_v6 }
 0x840   :  { %v4902_v34 = vpop.f32.mrb[138].mxu1 }
 0x841   :  { %v13300_v44 = vadd.f32 %v4902_v34, %v12944_v6  ;;  %v4904_v47 = vpop.f32.mrb[139].mxu1 }
 0x843   :  { %v5066_v55 = vpack.c.bf16 %v13300_v44, %v13297_v62 }
 0x845   :  { %5818 = vmatmul.mubr.bf16.gmra.mrb[84].mxu0 %v5057_v57 }
 0x846   :  { %v4907_v19 = vpop.f32.mrb[140].mxu1  ;;  %5827 = vmatprep.mubr.bf16.mxu0 %v16181_v15 }
 0x847   :  { %v4909_v12 = vpop.f32.mrb[141].mxu1  ;;  %v13309_v53 = vadd.f32 %v4907_v19, %v12944_v6 }
 0x848   :  { %v4910_v38 = vpop.f32.mrb[142].mxu1 }
 0x849   :  { %v13312_v37 = vadd.f32 %v4910_v38, %v12944_v6  ;;  %v4912_v35 = vpop.f32.mrb[143].mxu1 }
 0x84b   :  { %v5067_v27 = vpack.c.bf16 %v13312_v37, %v13309_v53 }
 0x84d   :  { %5828 = vmatmul.mubr.bf16.gmra.mrb[88].mxu0 %v5058_v39 }
 0x84e   :  { %v4915_v26 = vpop.f32.mrb[144].mxu1  ;;  %5837 = vmatprep.mubr.bf16.mxu0 %v16181_v15 }
 0x84f   :  { %v4917_v17 = vpop.f32.mrb[145].mxu1  ;;  %v4916_v45 = vadd.f32 %v4915_v26, %v12944_v6 }
 0x850   :  { %v4918_v57 = vpop.f32.mrb[146].mxu1 }
 0x851   :  { %v4919_v42 = vadd.f32 %v4918_v57, %v12944_v6  ;;  %v4920_v50 = vpop.f32.mrb[147].mxu1 }
 0x853   :  { %v5068_v58 = vpack.c.bf16 %v4919_v42, %v4916_v45 }
 0x855   :  { %5838 = vmatmul.mubr.bf16.gmra.mrb[92].mxu0 %v5059_v4 }
 0x856   :  { %v4923_v63 = vpop.f32.mrb[148].mxu1  ;;  %5847 = vmatprep.mubr.bf16.mxu0 %v16181_v15 }
 0x857   :  { %v4925_v16 = vpop.f32.mrb[149].mxu1  ;;  %v13327_v39 = vadd.f32 %v4923_v63, %v12944_v6 }
 0x858   :  { %v4926_v54 = vpop.f32.mrb[150].mxu1  ;;  %v10731_v16 = vld [vmem:[%s16051_s5 + $0x200] ss:$8 sps:$4 sm:$0xff]  }
 0x859   :  { %v4927_v32 = vadd.f32 %v4926_v54, %v12944_v6  ;;  %v4928_v52 = vpop.f32.mrb[151].mxu1 }
 0x85b   :  { %v5069_v31 = vpack.c.bf16 %v4927_v32, %v13327_v39  ;;  %v10736_v32 = vld [vmem:[%s16051_s5 + $0x214] ss:$8 sps:$4 sm:$0xff]  }
 0x85d   :  { %5848 = vmatmul.mubr.bf16.gmra.mrb[96].mxu0 %v5060_v61 }
 0x85e   :  { %v4931_v0 = vpop.f32.mrb[152].mxu1  ;;  %5857 = vmatprep.mubr.bf16.mxu0 %v16181_v15 }
 0x85f   :  { %v4933_v46 = vpop.f32.mrb[153].mxu1  ;;  %v13336_v4 = vadd.f32 %v4931_v0, %v12944_v6 }
 0x860   :  { %v4934_v8 = vpop.f32.mrb[154].mxu1 }
 0x861   :  { %v13339_v1 = vadd.f32 %v4934_v8, %v12944_v6  ;;  %v4936_v20 = vpop.f32.mrb[155].mxu1 }
 0x862   :  { %v10734_v20 = vld [vmem:[%s16051_s5 + $0x210] ss:$8 sps:$4 sm:$0xff]  }
 0x863   :  { %v5070_v23 = vpack.c.bf16 %v13339_v1, %v13336_v4 }
 0x865   :  { %5858 = vmatmul.mubr.bf16.gmra.mrb[100].mxu0 %v5061_v22 }
 0x866   :  { %v4939_v43 = vpop.f32.mrb[156].mxu1  ;;  %5867 = vmatprep.mubr.bf16.mxu0 %v16181_v15 }
 0x867   :  { %v4941_v33 = vpop.f32.mrb[157].mxu1  ;;  %v13348_v34 = vadd.f32 %v4939_v43, %v12944_v6 }
 0x868   :  { %v4942_v61 = vpop.f32.mrb[158].mxu1 }
 0x869   :  { %v13351_v47 = vadd.f32 %v4942_v61, %v12944_v6  ;;  %v4944_v19 = vpop.f32.mrb[159].mxu1  ;;  %v10739_v61 = vld [vmem:[%s16051_s5 + $0x224] ss:$8 sps:$4 sm:$0xff]  }
 0x86b   :  { %v5071_v12 = vpack.c.bf16 %v13351_v47, %v13348_v34 }
 0x86d   :  { %5868 = vmatmul.mubr.bf16.gmra.mrb[104].mxu0 %v5062_v29 }
 0x86e   :  { %v4947_v49 = vpop.f32.mrb[160].mxu1  ;;  %5877 = vmatprep.mubr.bf16.mxu0 %v16181_v15 }
 0x86f   :  { %v4949_v24 = vpop.f32.mrb[161].mxu1  ;;  %v13360_v38 = vadd.f32 %v4947_v49, %v12944_v6 }
 0x870   :  { %v4950_v22 = vpop.f32.mrb[162].mxu1 }
 0x871   :  { %v13363_v53 = vadd.f32 %v4950_v22, %v12944_v6  ;;  %v4952_v37 = vpop.f32.mrb[163].mxu1 }
 0x873   :  { %v5072_v35 = vpack.c.bf16 %v13363_v53, %v13360_v38 }
 0x875   :  { %5878 = vmatmul.mubr.bf16.gmra.mrb[108].mxu0 %v5063_v2 }
 0x876   :  { %v4955_v60 = vpop.f32.mrb[164].mxu1  ;;  %5887 = vmatprep.mubr.bf16.mxu0 %v16181_v15 }
 0x877   :  { %v4957_v25 = vpop.f32.mrb[165].mxu1  ;;  %v13372_v26 = vadd.f32 %v4955_v60, %v12944_v6  ;;  %v10737_v60 = vld [vmem:[%s16051_s5 + $0x220] ss:$8 sps:$4 sm:$0xff]  }
 0x878   :  { %v4958_v29 = vpop.f32.mrb[166].mxu1 }
 0x879   :  { %v13375_v17 = vadd.f32 %v4958_v29, %v12944_v6  ;;  %v4960_v57 = vpop.f32.mrb[167].mxu1  ;;  %v9836_v6 = vld [vmem:[%s16049_s3 + $0x6] ss:$8 sm:$0x3] }
 0x87a   :  { %v13396_v56 = vrot.slane %v9836_v6, %v11241_v28  ;;  %v13399_v11 = vrot.slane %v9836_v6, %v11216_v7 }
 0x87b   :  { %v5073_v45 = vpack.c.bf16 %v13375_v17, %v13372_v26  ;;  %v10760_v26 = vld [vmem:[%s16051_s5 + $0x294] ss:$8 sps:$4 sm:$0xff]  }
 0x87d   :  { %5888 = vmatmul.mubr.bf16.gmra.mrb[112].mxu0 %v5064_v5 }
 0x87e   :  { %5897 = vmatprep.mubr.bf16.mxu0 %v16181_v15 }
 0x885   :  { %5898 = vmatmul.mubr.bf16.gmra.mrb[116].mxu0 %v5065_v36 }
 0x886   :  { %5907 = vmatprep.mubr.bf16.mxu0 %v16181_v15 }
 0x88d   :  { %5908 = vmatmul.mubr.bf16.gmra.mrb[120].mxu0 %v5066_v55 }
 0x88e   :  { %5917 = vmatprep.mubr.bf16.mxu0 %v16181_v15 }
 0x895   :  { %5918 = vmatmul.mubr.bf16.gmra.mrb[124].mxu0 %v5067_v27 }
 0x896   :  { %5927 = vmatprep.mubr.bf16.mxu0 %v16181_v15 }
 0x89d   :  { %5928 = vmatmul.mubr.bf16.gmra.mrb[128].mxu0 %v5068_v58 }
 0x89e   :  { %5937 = vmatprep.mubr.bf16.mxu0 %v16181_v15 }
 0x8a0   :  { %v5669_v2 = vpop.f32.mrb[24].mxu0 }
 0x8a1   :  { %v6001_v21 = vadd.f32 %v13396_v56, %v5669_v2  ;;  %v5671_v30 = vpop.f32.mrb[25].mxu0 }
 0x8a2   :  { %v6002_v5 = vadd.f32 %v13399_v11, %v5671_v30  ;;  %v5673_v9 = vpop.f32.mrb[26].mxu0 }
 0x8a3   :  { %v6003_v48 = vadd.f32 %v13396_v56, %v5673_v9  ;;  %v5675_v36 = vpop.f32.mrb[27].mxu0  ;;  %v6129_v44 = vmax.f32 %v6001_v21, 0.0  ;;  %v10740_v21 = vld [vmem:[%s16051_s5 + $0x230] ss:$8 sps:$4 sm:$0xff]   ;;  %v10745_v9 = vld [vmem:[%s16051_s5 + $0x244] ss:$8 sps:$4 sm:$0xff]  }
 0x8a4   :  { %v6004_v62 = vadd.f32 %v13399_v11, %v5675_v36  ;;  %v6130_v27 = vmax.f32 %v6002_v5, 0.0 }
 0x8a5   :  { %v6131_v55 = vmax.f32 %v6003_v48, 0.0  ;;  %5938 = vmatmul.mubr.bf16.gmra.mrb[132].mxu0 %v5069_v31 }
 0x8a6   :  { %v6132_v42 = vmax.f32 %v6004_v62, 0.0  ;;  %5947 = vmatprep.mubr.bf16.mxu0 %v16181_v15 }
 0x8a7   :  { %v6289_v50 = vpack.c.bf16 %v6131_v55, %v6129_v44 }
 0x8a8   :  { %v6290_v58 = vpack.c.bf16 %v6132_v42, %v6130_v27  ;;  %v5679_v63 = vpop.f32.mrb[28].mxu0  ;;  %v10743_v27 = vld [vmem:[%s16051_s5 + $0x240] ss:$8 sps:$4 sm:$0xff]  }
 0x8a9   :  { %v6005_v54 = vadd.f32 %v13396_v56, %v5679_v63  ;;  %v5681_v39 = vpop.f32.mrb[29].mxu0 }
 0x8aa   :  { %v6006_v52 = vadd.f32 %v13399_v11, %v5681_v39  ;;  %v5683_v31 = vpop.f32.mrb[30].mxu0  ;;  %6558 = vmatprep.mubr.bf16.mxu1 %v6290_v58 }
 0x8ab   :  { %v6007_v0 = vadd.f32 %v13396_v56, %v5683_v31  ;;  %v5685_v46 = vpop.f32.mrb[31].mxu0  ;;  %6559 = vmatmul.mubr.bf16.vlgmr.msra.gmra.mrb[168].mxu1 %v6289_v50  ;;  %v6133_v43 = vmax.f32 %v6005_v54, 0.0  ;;  %v10746_v54 = vld [vmem:[%s16051_s5 + $0x250] ss:$8 sps:$4 sm:$0xff]  }
 0x8ac   :  { %v6008_v8 = vadd.f32 %v13399_v11, %v5685_v46  ;;  %7277 = vmatpush1.bf16.msra.mxu1 %v10731_v16  ;;  %v6134_v19 = vmax.f32 %v6006_v52, 0.0  ;;  %v10751_v52 = vld [vmem:[%s16051_s5 + $0x264] ss:$8 sps:$4 sm:$0xff]  }
 0x8ad   :  { %v6135_v33 = vmax.f32 %v6007_v0, 0.0  ;;  %5948 = vmatmul.mubr.bf16.gmra.mrb[136].mxu0 %v5070_v23  ;;  %7278 = vmatprep.subr.bf16.mxu1 %v10736_v32  ;;  %v10742_v23 = vld [vmem:[%s16051_s5 + $0x234] ss:$8 sps:$4 sm:$0xff]  }
 0x8ae   :  { %v6136_v49 = vmax.f32 %v6008_v8, 0.0  ;;  %5957 = vmatprep.mubr.bf16.mxu0 %v16181_v15 }
 0x8af   :  { %v6291_v24 = vpack.c.bf16 %v6135_v33, %v6133_v43  ;;  %v10749_v43 = vld [vmem:[%s16051_s5 + $0x260] ss:$8 sps:$4 sm:$0xff]  }
 0x8b0   :  { %v6292_v22 = vpack.c.bf16 %v6136_v49, %v6134_v19  ;;  %v5689_v37 = vpop.f32.mrb[32].mxu0  ;;  %7279 = vmatpush1.bf16.msra.mxu1 %v10734_v20 }
 0x8b1   :  { %v6009_v4 = vadd.f32 %v13396_v56, %v5689_v37  ;;  %v5691_v1 = vpop.f32.mrb[33].mxu0  ;;  %7280 = vmatprep.subr.bf16.mxu1 %v10739_v61 }
 0x8b2   :  { %v6010_v25 = vadd.f32 %v13399_v11, %v5691_v1  ;;  %v5693_v29 = vpop.f32.mrb[34].mxu0  ;;  %6568 = vmatprep.mubr.bf16.mxu1 %v6292_v22  ;;  %v10752_v22 = vld [vmem:[%s16051_s5 + $0x270] ss:$8 sps:$4 sm:$0xff]  }
 0x8b3   :  { %v6011_v57 = vadd.f32 %v13396_v56, %v5693_v29  ;;  %v5695_v6 = vpop.f32.mrb[35].mxu0  ;;  %6569 = vmatmul.mubr.bf16.gmra.mrb[172].mxu1 %v6291_v24  ;;  %v6137_v30 = vmax.f32 %v6009_v4, 0.0  ;;  %v10757_v4 = vld [vmem:[%s16051_s5 + $0x284] ss:$8 sps:$4 sm:$0xff]  }
 0x8b4   :  { %v6012_v2 = vadd.f32 %v13399_v11, %v5695_v6  ;;  %7281 = vmatpush1.bf16.msra.mxu1 %v10737_v60  ;;  %v6138_v48 = vmax.f32 %v6010_v25, 0.0  ;;  %v10755_v6 = vld [vmem:[%s16051_s5 + $0x280] ss:$8 sps:$4 sm:$0xff]  }
 0x8b5   :  { %v6139_v5 = vmax.f32 %v6011_v57, 0.0  ;;  %5958 = vmatmul.mubr.bf16.gmra.mrb[140].mxu0 %v5071_v12  ;;  %7282 = vmatprep.subr.bf16.mxu1 %v10742_v23  ;;  %v10748_v12 = vld [vmem:[%s16051_s5 + $0x254] ss:$8 sps:$4 sm:$0xff]  }
 0x8b6   :  { %v6140_v36 = vmax.f32 %v6012_v2, 0.0  ;;  %5967 = vmatprep.mubr.bf16.mxu0 %v16181_v15 }
 0x8b7   :  { %v6293_v62 = vpack.c.bf16 %v6139_v5, %v6137_v30 }
 0x8b8   :  { %v6294_v44 = vpack.c.bf16 %v6140_v36, %v6138_v48  ;;  %v5699_v55 = vpop.f32.mrb[36].mxu0  ;;  %7283 = vmatpush1.bf16.msra.mxu1 %v10740_v21  ;;  %v10758_v48 = vld [vmem:[%s16051_s5 + $0x290] ss:$8 sps:$4 sm:$0xff]  }
 0x8b9   :  { %v6013_v34 = vadd.f32 %v13396_v56, %v5699_v55  ;;  %v5701_v47 = vpop.f32.mrb[37].mxu0  ;;  %7284 = vmatprep.subr.bf16.mxu1 %v10745_v9 }
 0x8ba   :  { %v6014_v42 = vadd.f32 %v13399_v11, %v5701_v47  ;;  %v5703_v50 = vpop.f32.mrb[38].mxu0  ;;  %6578 = vmatprep.mubr.bf16.mxu1 %v6294_v44 }
 0x8bb   :  { %v6015_v58 = vadd.f32 %v13396_v56, %v5703_v50  ;;  %v5705_v63 = vpop.f32.mrb[39].mxu0  ;;  %6579 = vmatmul.mubr.bf16.gmra.mrb[176].mxu1 %v6293_v62  ;;  %v6141_v39 = vmax.f32 %v6013_v34, 0.0  ;;  %v10763_v34 = vld [vmem:[%s16051_s5 + $0x2a4] ss:$8 sps:$4 sm:$0xff]  }
 0x8bc   :  { %v6016_v16 = vadd.f32 %v13399_v11, %v5705_v63  ;;  %7285 = vmatpush1.bf16.msra.mxu1 %v10743_v27  ;;  %v6142_v31 = vmax.f32 %v6014_v42, 0.0  ;;  %v10761_v42 = vld [vmem:[%s16051_s5 + $0x2a0] ss:$8 sps:$4 sm:$0xff]  }
 0x8bd   :  { %v6143_v32 = vmax.f32 %v6015_v58, 0.0  ;;  %5968 = vmatmul.mubr.bf16.gmra.mrb[144].mxu0 %v5072_v35  ;;  %7286 = vmatprep.subr.bf16.mxu1 %v10748_v12  ;;  %v10754_v35 = vld [vmem:[%s16051_s5 + $0x274] ss:$8 sps:$4 sm:$0xff]  }
 0x8be   :  { %v6144_v0 = vmax.f32 %v6016_v16, 0.0  ;;  %5977 = vmatprep.mubr.bf16.mxu0 %v16181_v15 }
 0x8bf   :  { %v6295_v46 = vpack.c.bf16 %v6143_v32, %v6141_v39 }
 0x8c0   :  { %v6296_v8 = vpack.c.bf16 %v6144_v0, %v6142_v31  ;;  %v5709_v20 = vpop.f32.mrb[40].mxu0  ;;  %7287 = vmatpush1.bf16.msra.mxu1 %v10746_v54 }
 0x8c1   :  { %v6017_v38 = vadd.f32 %v13396_v56, %v5709_v20  ;;  %v5711_v53 = vpop.f32.mrb[41].mxu0  ;;  %7288 = vmatprep.subr.bf16.mxu1 %v10751_v52 }
 0x8c2   :  { %v6018_v33 = vadd.f32 %v13399_v11, %v5711_v53  ;;  %v5713_v61 = vpop.f32.mrb[42].mxu0  ;;  %6588 = vmatprep.mubr.bf16.mxu1 %v6296_v8 }
 0x8c3   :  { %v6019_v19 = vadd.f32 %v13396_v56, %v5713_v61  ;;  %v5715_v49 = vpop.f32.mrb[43].mxu0  ;;  %6589 = vmatmul.mubr.bf16.gmra.mrb[180].mxu1 %v6295_v46  ;;  %v6145_v37 = vmax.f32 %v6017_v38, 0.0 }
 0x8c4   :  { %v6020_v24 = vadd.f32 %v13399_v11, %v5715_v49  ;;  %7289 = vmatpush1.bf16.msra.mxu1 %v10749_v43  ;;  %v6146_v1 = vmax.f32 %v6018_v33, 0.0 }
 0x8c5   :  { %v6147_v60 = vmax.f32 %v6019_v19, 0.0  ;;  %5978 = vmatmul.mubr.bf16.gmra.mrb[148].mxu0 %v5073_v45  ;;  %7290 = vmatprep.subr.bf16.mxu1 %v10754_v35 }
 0x8c6   :  { %v6148_v23 = vmax.f32 %v6020_v24, 0.0 }
 0x8c7   :  { %v6297_v25 = vpack.c.bf16 %v6147_v60, %v6145_v37 }
 0x8c8   :  { %v6298_v29 = vpack.c.bf16 %v6148_v23, %v6146_v1  ;;  %v5719_v57 = vpop.f32.mrb[44].mxu0  ;;  %7291 = vmatpush1.bf16.msra.mxu1 %v10752_v22  ;;  %v10764_v1 = vld [vmem:[%s16051_s5 + $0x2b0] ss:$8 sps:$4 sm:$0xff]   ;;  %v10766_v23 = vld [vmem:[%s16051_s5 + $0x2b4] ss:$8 sps:$4 sm:$0xff]  }
 0x8c9   :  { %v6021_v2 = vadd.f32 %v13396_v56, %v5719_v57  ;;  %v5721_v21 = vpop.f32.mrb[45].mxu0  ;;  %7292 = vmatprep.subr.bf16.mxu1 %v10757_v4 }
 0x8ca   :  { %v6022_v17 = vadd.f32 %v13399_v11, %v5721_v21  ;;  %v5723_v45 = vpop.f32.mrb[46].mxu0  ;;  %6598 = vmatprep.mubr.bf16.mxu1 %v6298_v29 }
 0x8cb   :  { %v6023_v30 = vadd.f32 %v13396_v56, %v5723_v45  ;;  %v5725_v5 = vpop.f32.mrb[47].mxu0  ;;  %6599 = vmatmul.mubr.bf16.gmra.mrb[184].mxu1 %v6297_v25  ;;  %v6149_v36 = vmax.f32 %v6021_v2, 0.0 }
 0x8cc   :  { %v6024_v9 = vadd.f32 %v13399_v11, %v5725_v5  ;;  %7293 = vmatpush1.bf16.msra.mxu1 %v10755_v6  ;;  %v6150_v44 = vmax.f32 %v6022_v17, 0.0 }
 0x8cd   :  { %v6151_v62 = vmax.f32 %v6023_v30, 0.0  ;;  %7294 = vmatprep.subr.bf16.mxu1 %v10760_v26 }
 0x8ce   :  { %v6152_v55 = vmax.f32 %v6024_v9, 0.0 }
 0x8cf   :  { %v6299_v27 = vpack.c.bf16 %v6151_v62, %v6149_v36 }
 0x8d0   :  { %v6300_v47 = vpack.c.bf16 %v6152_v55, %v6150_v44  ;;  %v5729_v12 = vpop.f32.mrb[48].mxu0  ;;  %7295 = vmatpush1.bf16.msra.mxu1 %v10758_v48 }
 0x8d1   :  { %v6025_v50 = vadd.f32 %v13396_v56, %v5729_v12  ;;  %v5731_v58 = vpop.f32.mrb[49].mxu0  ;;  %7296 = vmatprep.subr.bf16.mxu1 %v10763_v34 }
 0x8d2   :  { %v6026_v63 = vadd.f32 %v13399_v11, %v5731_v58  ;;  %v5733_v16 = vpop.f32.mrb[50].mxu0  ;;  %6608 = vmatprep.mubr.bf16.mxu1 %v6300_v47 }
 0x8d3   :  { %v6027_v54 = vadd.f32 %v13396_v56, %v5733_v16  ;;  %v5735_v39 = vpop.f32.mrb[51].mxu0  ;;  %6609 = vmatmul.mubr.bf16.gmra.mrb[188].mxu1 %v6299_v27  ;;  %v6153_v52 = vmax.f32 %v6025_v50, 0.0 }
 0x8d4   :  { %v6028_v32 = vadd.f32 %v13399_v11, %v5735_v39  ;;  %7297 = vmatpush1.bf16.msra.mxu1 %v10761_v42  ;;  %v6154_v0 = vmax.f32 %v6026_v63, 0.0 }
 0x8d5   :  { %v6155_v31 = vmax.f32 %v6027_v54, 0.0  ;;  %7298 = vmatprep.subr.bf16.mxu1 %v10766_v23 }
 0x8d6   :  { %v6156_v46 = vmax.f32 %v6028_v32, 0.0  ;;  %v10767_v32 = vld [vmem:[%s16051_s5 + $0x2c0] ss:$8 sps:$4 sm:$0xff]  }
 0x8d7   :  { %v6301_v8 = vpack.c.bf16 %v6155_v31, %v6153_v52  ;;  %v10769_v52 = vld [vmem:[%s16051_s5 + $0x2c4] ss:$8 sps:$4 sm:$0xff]  }
 0x8d8   :  { %v6302_v20 = vpack.c.bf16 %v6156_v46, %v6154_v0  ;;  %v5739_v43 = vpop.f32.mrb[52].mxu0  ;;  %7299 = vmatpush1.bf16.msra.mxu1 %v10764_v1 }
 0x8d9   :  { %v6029_v38 = vadd.f32 %v13396_v56, %v5739_v43  ;;  %v5741_v53 = vpop.f32.mrb[53].mxu0  ;;  %7300 = vmatprep.subr.bf16.mxu1 %v10769_v52 }
 0x8da   :  { %v6030_v35 = vadd.f32 %v13399_v11, %v5741_v53  ;;  %v5743_v33 = vpop.f32.mrb[54].mxu0  ;;  %6618 = vmatprep.mubr.bf16.mxu1 %v6302_v20 }
 0x8db   :  { %v6031_v61 = vadd.f32 %v13396_v56, %v5743_v33  ;;  %v5745_v19 = vpop.f32.mrb[55].mxu0  ;;  %6619 = vmatmul.mubr.bf16.gmra.mrb[192].mxu1 %v6301_v8  ;;  %v6157_v24 = vmax.f32 %v6029_v38, 0.0 }
 0x8dc   :  { %v6032_v49 = vadd.f32 %v13399_v11, %v5745_v19  ;;  %v6158_v37 = vmax.f32 %v6030_v35, 0.0  ;;  %7301 = vmatpush1.bf16.msra.mxu1 %v10767_v32 }
 0x8dd   :  { %v6159_v22 = vmax.f32 %v6031_v61, 0.0 }
 0x8de   :  { %v6160_v60 = vmax.f32 %v6032_v49, 0.0 }
 0x8df   :  { %v6303_v4 = vpack.c.bf16 %v6159_v22, %v6157_v24 }
 0x8e0   :  { %v6304_v25 = vpack.c.bf16 %v6160_v60, %v6158_v37  ;;  %v5749_v29 = vpop.f32.mrb[56].mxu0 }
 0x8e1   :  { %v6033_v57 = vadd.f32 %v13396_v56, %v5749_v29  ;;  %v5751_v6 = vpop.f32.mrb[57].mxu0 }
 0x8e2   :  { %v6034_v2 = vadd.f32 %v13399_v11, %v5751_v6  ;;  %v5753_v21 = vpop.f32.mrb[58].mxu0  ;;  %6628 = vmatprep.mubr.bf16.mxu1 %v6304_v25 }
 0x8e3   :  { %v6035_v26 = vadd.f32 %v13396_v56, %v5753_v21  ;;  %v5755_v17 = vpop.f32.mrb[59].mxu0  ;;  %6629 = vmatmul.mubr.bf16.gmra.mrb[196].mxu1 %v6303_v4  ;;  %v6161_v30 = vmax.f32 %v6033_v57, 0.0 }
 0x8e4   :  { %v6036_v45 = vadd.f32 %v13399_v11, %v5755_v17  ;;  %v6162_v9 = vmax.f32 %v6034_v2, 0.0 }
 0x8e5   :  { %v6163_v5 = vmax.f32 %v6035_v26, 0.0 }
 0x8e6   :  { %v6164_v48 = vmax.f32 %v6036_v45, 0.0  ;;  %v10770_v45 = vld [vmem:[%s16051_s5 + $0x2d0] ss:$8 sps:$4 sm:$0xff]  }
 0x8e7   :  { %v6305_v36 = vpack.c.bf16 %v6163_v5, %v6161_v30  ;;  %v10772_v30 = vld [vmem:[%s16051_s5 + $0x2d4] ss:$8 sps:$4 sm:$0xff]  }
 0x8e8   :  { %v6306_v62 = vpack.c.bf16 %v6164_v48, %v6162_v9  ;;  %v5759_v44 = vpop.f32.mrb[60].mxu0  ;;  %7302 = vmatprep.subr.bf16.mxu1 %v10772_v30 }
 0x8e9   :  { %v6037_v55 = vadd.f32 %v13396_v56, %v5759_v44  ;;  %v5761_v27 = vpop.f32.mrb[61].mxu0  ;;  %7303 = vmatpush1.bf16.msra.mxu1 %v10770_v45 }
 0x8ea   :  { %v6038_v34 = vadd.f32 %v13399_v11, %v5761_v27  ;;  %v5763_v47 = vpop.f32.mrb[62].mxu0  ;;  %6638 = vmatprep.mubr.bf16.mxu1 %v6306_v62 }
 0x8eb   :  { %v6039_v12 = vadd.f32 %v13396_v56, %v5763_v47  ;;  %v5765_v42 = vpop.f32.mrb[63].mxu0  ;;  %6639 = vmatmul.mubr.bf16.gmra.mrb[200].mxu1 %v6305_v36  ;;  %v6165_v58 = vmax.f32 %v6037_v55, 0.0 }
 0x8ec   :  { %v6040_v50 = vadd.f32 %v13399_v11, %v5765_v42  ;;  %v6166_v16 = vmax.f32 %v6038_v34, 0.0 }
 0x8ed   :  { %v6167_v63 = vmax.f32 %v6039_v12, 0.0 }
 0x8ee   :  { %v6168_v54 = vmax.f32 %v6040_v50, 0.0 }
 0x8ef   :  { %v6307_v39 = vpack.c.bf16 %v6167_v63, %v6165_v58 }
 0x8f0   :  { %v6308_v31 = vpack.c.bf16 %v6168_v54, %v6166_v16  ;;  %v5769_v0 = vpop.f32.mrb[64].mxu0 }
 0x8f1   :  { %v6041_v46 = vadd.f32 %v13396_v56, %v5769_v0  ;;  %v5771_v8 = vpop.f32.mrb[65].mxu0 }
 0x8f2   :  { %v6042_v20 = vadd.f32 %v13399_v11, %v5771_v8  ;;  %v5773_v43 = vpop.f32.mrb[66].mxu0  ;;  %6648 = vmatprep.mubr.bf16.mxu1 %v6308_v31 }
 0x8f3   :  { %v6043_v38 = vadd.f32 %v13396_v56, %v5773_v43  ;;  %v5775_v53 = vpop.f32.mrb[67].mxu0  ;;  %6649 = vmatmul.mubr.bf16.gmra.mrb[204].mxu1 %v6307_v39  ;;  %v6169_v33 = vmax.f32 %v6041_v46, 0.0 }
 0x8f4   :  { %v6044_v35 = vadd.f32 %v13399_v11, %v5775_v53  ;;  %v6170_v19 = vmax.f32 %v6042_v20, 0.0  ;;  %v10773_v53 = vld [vmem:[%s16052_s6 + $0x78] sm:$0xff]  }
 0x8f5   :  { %v6171_v61 = vmax.f32 %v6043_v38, 0.0  ;;  %7950 = vmatpush1.bf16.msra.mxu0 %v10773_v53 }
 0x8f6   :  { %v6172_v49 = vmax.f32 %v6044_v35, 0.0  ;;  %7951 = vmatprep.subr.bf16.mxu0 %v16181_v15 }
 0x8f7   :  { %v6309_v24 = vpack.c.bf16 %v6171_v61, %v6169_v33  ;;  %v10774_v33 = vld [vmem:[%s16051_s5 + $0x2e0] ss:$8 sps:$4 sm:$0xff]   ;;  %v10776_v61 = vld [vmem:[%s16051_s5 + $0x2e4] ss:$8 sps:$4 sm:$0xff]  }
 0x8f8   :  { %v6310_v22 = vpack.c.bf16 %v6172_v49, %v6170_v19  ;;  %v5779_v37 = vpop.f32.mrb[68].mxu0  ;;  %7304 = vmatprep.subr.bf16.mxu1 %v10776_v61 }
 0x8f9   :  { %v6045_v60 = vadd.f32 %v13396_v56, %v5779_v37  ;;  %v5781_v4 = vpop.f32.mrb[69].mxu0  ;;  %7305 = vmatpush1.bf16.msra.mxu1 %v10774_v33 }
 0x8fa   :  { %v6046_v1 = vadd.f32 %v13399_v11, %v5781_v4  ;;  %v5783_v23 = vpop.f32.mrb[70].mxu0  ;;  %6658 = vmatprep.mubr.bf16.mxu1 %v6310_v22 }
 0x8fb   :  { %v6047_v25 = vadd.f32 %v13396_v56, %v5783_v23  ;;  %v5785_v29 = vpop.f32.mrb[71].mxu0  ;;  %6659 = vmatmul.mubr.bf16.gmra.mrb[208].mxu1 %v6309_v24  ;;  %v6173_v6 = vmax.f32 %v6045_v60, 0.0 }
 0x8fc   :  { %v6048_v57 = vadd.f32 %v13399_v11, %v5785_v29  ;;  %v6174_v21 = vmax.f32 %v6046_v1, 0.0 }
 0x8fd   :  { %v6175_v2 = vmax.f32 %v6047_v25, 0.0 }
 0x8fe   :  { %v6176_v26 = vmax.f32 %v6048_v57, 0.0 }
 0x8ff   :  { %v6311_v17 = vpack.c.bf16 %v6175_v2, %v6173_v6 }
 0x900   :  { %v6312_v5 = vpack.c.bf16 %v6176_v26, %v6174_v21  ;;  %v5789_v9 = vpop.f32.mrb[72].mxu0 }
 0x901   :  { %v6049_v48 = vadd.f32 %v13396_v56, %v5789_v9  ;;  %v5791_v36 = vpop.f32.mrb[73].mxu0 }
 0x902   :  { %v6050_v62 = vadd.f32 %v13399_v11, %v5791_v36  ;;  %v5793_v44 = vpop.f32.mrb[74].mxu0  ;;  %6668 = vmatprep.mubr.bf16.mxu1 %v6312_v5 }
 0x903   :  { %v6051_v55 = vadd.f32 %v13396_v56, %v5793_v44  ;;  %v5795_v27 = vpop.f32.mrb[75].mxu0  ;;  %6669 = vmatmul.mubr.bf16.gmra.mrb[212].mxu1 %v6311_v17  ;;  %v6177_v47 = vmax.f32 %v6049_v48, 0.0 }
 0x904   :  { %v6052_v34 = vadd.f32 %v13399_v11, %v5795_v27  ;;  %v6178_v42 = vmax.f32 %v6050_v62, 0.0 }
 0x905   :  { %v6179_v12 = vmax.f32 %v6051_v55, 0.0 }
 0x906   :  { %v6180_v50 = vmax.f32 %v6052_v34, 0.0  ;;  %v10777_v34 = vld [vmem:[%s16052_s6 + $0x80] sm:$0xff]  }
 0x907   :  { %v6313_v58 = vpack.c.bf16 %v6179_v12, %v6177_v47  ;;  %v10778_v12 = vld [vmem:[%s16051_s5 + $0x2f0] ss:$8 sps:$4 sm:$0xff]   ;;  %7952 = vmatpush1.bf16.msra.mxu0 %v10777_v34 }
 0x908   :  { %v6314_v63 = vpack.c.bf16 %v6180_v50, %v6178_v42  ;;  %v5799_v16 = vpop.f32.mrb[76].mxu0  ;;  %v10780_v42 = vld [vmem:[%s16051_s5 + $0x2f4] ss:$8 sps:$4 sm:$0xff]   ;;  %7953 = vmatprep.subr.bf16.mxu0 %v16181_v15 }
 0x909   :  { %v6053_v54 = vadd.f32 %v13396_v56, %v5799_v16  ;;  %v5801_v39 = vpop.f32.mrb[77].mxu0  ;;  %7306 = vmatprep.subr.bf16.mxu1 %v10780_v42 }
 0x90a   :  { %v6054_v32 = vadd.f32 %v13399_v11, %v5801_v39  ;;  %v5803_v52 = vpop.f32.mrb[78].mxu0  ;;  %6678 = vmatprep.mubr.bf16.mxu1 %v6314_v63  ;;  %7307 = vmatpush1.bf16.msra.mxu1 %v10778_v12 }
 0x90b   :  { %v6055_v31 = vadd.f32 %v13396_v56, %v5803_v52  ;;  %v5805_v0 = vpop.f32.mrb[79].mxu0  ;;  %6679 = vmatmul.mubr.bf16.gmra.mrb[216].mxu1 %v6313_v58  ;;  %v6181_v8 = vmax.f32 %v6053_v54, 0.0 }
 0x90c   :  { %v6056_v46 = vadd.f32 %v13399_v11, %v5805_v0  ;;  %v6182_v43 = vmax.f32 %v6054_v32, 0.0 }
 0x90d   :  { %v6183_v20 = vmax.f32 %v6055_v31, 0.0 }
 0x90e   :  { %v6184_v38 = vmax.f32 %v6056_v46, 0.0 }
 0x90f   :  { %v6315_v35 = vpack.c.bf16 %v6183_v20, %v6181_v8 }
 0x910   :  { %v6316_v19 = vpack.c.bf16 %v6184_v38, %v6182_v43  ;;  %v5809_v49 = vpop.f32.mrb[80].mxu0 }
 0x911   :  { %v6057_v24 = vadd.f32 %v13396_v56, %v5809_v49  ;;  %v5811_v22 = vpop.f32.mrb[81].mxu0 }
 0x912   :  { %v6058_v37 = vadd.f32 %v13399_v11, %v5811_v22  ;;  %v5813_v60 = vpop.f32.mrb[82].mxu0  ;;  %6688 = vmatprep.mubr.bf16.mxu1 %v6316_v19 }
 0x913   :  { %v6059_v4 = vadd.f32 %v13396_v56, %v5813_v60  ;;  %v5815_v1 = vpop.f32.mrb[83].mxu0  ;;  %6689 = vmatmul.mubr.bf16.gmra.mrb[220].mxu1 %v6315_v35  ;;  %v6185_v25 = vmax.f32 %v6057_v24, 0.0 }
 0x914   :  { %v6060_v23 = vadd.f32 %v13399_v11, %v5815_v1  ;;  %v6186_v57 = vmax.f32 %v6058_v37, 0.0 }
 0x915   :  { %v6187_v29 = vmax.f32 %v6059_v4, 0.0 }
 0x916   :  { %v6188_v6 = vmax.f32 %v6060_v23, 0.0  ;;  %v10781_v23 = vld [vmem:[%s16052_s6 + $0x88] sm:$0xff]  }
 0x917   :  { %v6317_v2 = vpack.c.bf16 %v6187_v29, %v6185_v25  ;;  %7954 = vmatpush1.bf16.msra.mxu0 %v10781_v23 }
 0x918   :  { %v6318_v21 = vpack.c.bf16 %v6188_v6, %v6186_v57  ;;  %v5819_v26 = vpop.f32.mrb[84].mxu0  ;;  %7955 = vmatprep.subr.bf16.mxu0 %v16181_v15 }
 0x919   :  { %v6061_v17 = vadd.f32 %v13396_v56, %v5819_v26  ;;  %v5821_v45 = vpop.f32.mrb[85].mxu0 }
 0x91a   :  { %v6062_v30 = vadd.f32 %v13399_v11, %v5821_v45  ;;  %v5823_v5 = vpop.f32.mrb[86].mxu0  ;;  %6698 = vmatprep.mubr.bf16.mxu1 %v6318_v21 }
 0x91b   :  { %v6063_v9 = vadd.f32 %v13396_v56, %v5823_v5  ;;  %v5825_v48 = vpop.f32.mrb[87].mxu0  ;;  %6699 = vmatmul.mubr.bf16.gmra.mrb[224].mxu1 %v6317_v2  ;;  %v6189_v62 = vmax.f32 %v6061_v17, 0.0 }
 0x91c   :  { %v6064_v36 = vadd.f32 %v13399_v11, %v5825_v48  ;;  %v6190_v55 = vmax.f32 %v6062_v30, 0.0 }
 0x91d   :  { %v6191_v44 = vmax.f32 %v6063_v9, 0.0 }
 0x91e   :  { %v6192_v27 = vmax.f32 %v6064_v36, 0.0 }
 0x91f   :  { %v6319_v47 = vpack.c.bf16 %v6191_v44, %v6189_v62 }
 0x920   :  { %v6320_v50 = vpack.c.bf16 %v6192_v27, %v6190_v55  ;;  %v5829_v58 = vpop.f32.mrb[88].mxu0 }
 0x921   :  { %v6065_v63 = vadd.f32 %v13396_v56, %v5829_v58  ;;  %v5831_v16 = vpop.f32.mrb[89].mxu0 }
 0x922   :  { %v6066_v54 = vadd.f32 %v13399_v11, %v5831_v16  ;;  %v5833_v39 = vpop.f32.mrb[90].mxu0  ;;  %6708 = vmatprep.mubr.bf16.mxu1 %v6320_v50 }
 0x923   :  { %v6067_v32 = vadd.f32 %v13396_v56, %v5833_v39  ;;  %v5835_v52 = vpop.f32.mrb[91].mxu0  ;;  %6709 = vmatmul.mubr.bf16.gmra.mrb[228].mxu1 %v6319_v47  ;;  %v6193_v0 = vmax.f32 %v6065_v63, 0.0 }
 0x924   :  { %v6068_v31 = vadd.f32 %v13399_v11, %v5835_v52  ;;  %v6194_v8 = vmax.f32 %v6066_v54, 0.0 }
 0x925   :  { %v6195_v46 = vmax.f32 %v6067_v32, 0.0  ;;  %v10782_v32 = vld [vmem:[%s16052_s6 + $0x90] sm:$0xff]  }
 0x926   :  { %v6196_v20 = vmax.f32 %v6068_v31, 0.0  ;;  %7956 = vmatpush1.bf16.msra.mxu0 %v10782_v32 }
 0x927   :  { %v6321_v43 = vpack.c.bf16 %v6195_v46, %v6193_v0  ;;  %7957 = vmatprep.subr.bf16.mxu0 %v16181_v15 }
 0x928   :  { %v6322_v38 = vpack.c.bf16 %v6196_v20, %v6194_v8  ;;  %v5839_v53 = vpop.f32.mrb[92].mxu0 }
 0x929   :  { %v6069_v35 = vadd.f32 %v13396_v56, %v5839_v53  ;;  %v5841_v33 = vpop.f32.mrb[93].mxu0 }
 0x92a   :  { %v6070_v61 = vadd.f32 %v13399_v11, %v5841_v33  ;;  %v5843_v19 = vpop.f32.mrb[94].mxu0  ;;  %6718 = vmatprep.mubr.bf16.mxu1 %v6322_v38 }
 0x92b   :  { %v6071_v49 = vadd.f32 %v13396_v56, %v5843_v19  ;;  %v5845_v24 = vpop.f32.mrb[95].mxu0  ;;  %6719 = vmatmul.mubr.bf16.gmra.mrb[232].mxu1 %v6321_v43  ;;  %v6197_v37 = vmax.f32 %v6069_v35, 0.0 }
 0x92c   :  { %v6072_v22 = vadd.f32 %v13399_v11, %v5845_v24  ;;  %v6198_v4 = vmax.f32 %v6070_v61, 0.0 }
 0x92d   :  { %v6199_v60 = vmax.f32 %v6071_v49, 0.0 }
 0x92e   :  { %v6200_v1 = vmax.f32 %v6072_v22, 0.0 }
 0x92f   :  { %v6323_v25 = vpack.c.bf16 %v6199_v60, %v6197_v37 }
 0x930   :  { %v6324_v29 = vpack.c.bf16 %v6200_v1, %v6198_v4  ;;  %v5849_v57 = vpop.f32.mrb[96].mxu0 }
 0x931   :  { %v6073_v6 = vadd.f32 %v13396_v56, %v5849_v57  ;;  %v5851_v2 = vpop.f32.mrb[97].mxu0 }
 0x932   :  { %v6074_v21 = vadd.f32 %v13399_v11, %v5851_v2  ;;  %v5853_v26 = vpop.f32.mrb[98].mxu0  ;;  %6728 = vmatprep.mubr.bf16.mxu1 %v6324_v29 }
 0x933   :  { %v6075_v17 = vadd.f32 %v13396_v56, %v5853_v26  ;;  %v5855_v45 = vpop.f32.mrb[99].mxu0  ;;  %6729 = vmatmul.mubr.bf16.gmra.mrb[236].mxu1 %v6323_v25  ;;  %v6201_v5 = vmax.f32 %v6073_v6, 0.0 }
 0x934   :  { %v6076_v30 = vadd.f32 %v13399_v11, %v5855_v45  ;;  %v6202_v48 = vmax.f32 %v6074_v21, 0.0 }
 0x935   :  { %v6203_v9 = vmax.f32 %v6075_v17, 0.0  ;;  %v10783_v17 = vld [vmem:[%s16052_s6 + $0x98] sm:$0xff]  }
 0x936   :  { %v6204_v36 = vmax.f32 %v6076_v30, 0.0  ;;  %7958 = vmatpush1.bf16.msra.mxu0 %v10783_v17 }
 0x937   :  { %v6325_v62 = vpack.c.bf16 %v6203_v9, %v6201_v5  ;;  %7959 = vmatprep.subr.bf16.mxu0 %v16181_v15 }
 0x938   :  { %v6326_v44 = vpack.c.bf16 %v6204_v36, %v6202_v48  ;;  %v5859_v55 = vpop.f32.mrb[100].mxu0 }
 0x939   :  { %v6077_v27 = vadd.f32 %v13396_v56, %v5859_v55  ;;  %v5861_v34 = vpop.f32.mrb[101].mxu0 }
 0x93a   :  { %v6078_v47 = vadd.f32 %v13399_v11, %v5861_v34  ;;  %v5863_v12 = vpop.f32.mrb[102].mxu0  ;;  %6738 = vmatprep.mubr.bf16.mxu1 %v6326_v44 }
 0x93b   :  { %v6079_v42 = vadd.f32 %v13396_v56, %v5863_v12  ;;  %v5865_v50 = vpop.f32.mrb[103].mxu0  ;;  %6739 = vmatmul.mubr.bf16.gmra.mrb[240].mxu1 %v6325_v62  ;;  %v6205_v63 = vmax.f32 %v6077_v27, 0.0 }
 0x93c   :  { %v6080_v58 = vadd.f32 %v13399_v11, %v5865_v50  ;;  %v6206_v54 = vmax.f32 %v6078_v47, 0.0 }
 0x93d   :  { %v6207_v16 = vmax.f32 %v6079_v42, 0.0 }
 0x93e   :  { %v6208_v39 = vmax.f32 %v6080_v58, 0.0 }
 0x93f   :  { %v6327_v52 = vpack.c.bf16 %v6207_v16, %v6205_v63 }
 0x940   :  { %v6328_v31 = vpack.c.bf16 %v6208_v39, %v6206_v54  ;;  %v5869_v0 = vpop.f32.mrb[104].mxu0 }
 0x941   :  { %v6081_v46 = vadd.f32 %v13396_v56, %v5869_v0  ;;  %v5871_v8 = vpop.f32.mrb[105].mxu0 }
 0x942   :  { %v6082_v20 = vadd.f32 %v13399_v11, %v5871_v8  ;;  %v5873_v43 = vpop.f32.mrb[106].mxu0  ;;  %6748 = vmatprep.mubr.bf16.mxu1 %v6328_v31 }
 0x943   :  { %v6083_v38 = vadd.f32 %v13396_v56, %v5873_v43  ;;  %v5875_v53 = vpop.f32.mrb[107].mxu0  ;;  %6749 = vmatmul.mubr.bf16.gmra.mrb[244].mxu1 %v6327_v52  ;;  %v6209_v33 = vmax.f32 %v6081_v46, 0.0 }
 0x944   :  { %v6084_v35 = vadd.f32 %v13399_v11, %v5875_v53  ;;  %v6210_v19 = vmax.f32 %v6082_v20, 0.0 }
 0x945   :  { %v6211_v61 = vmax.f32 %v6083_v38, 0.0  ;;  %v10784_v38 = vld [vmem:[%s16052_s6 + $0xa0] sm:$0xff]  }
 0x946   :  { %v6212_v49 = vmax.f32 %v6084_v35, 0.0  ;;  %7960 = vmatpush1.bf16.msra.mxu0 %v10784_v38 }
 0x947   :  { %v6329_v24 = vpack.c.bf16 %v6211_v61, %v6209_v33  ;;  %7961 = vmatprep.subr.bf16.mxu0 %v16181_v15 }
 0x948   :  { %v6330_v22 = vpack.c.bf16 %v6212_v49, %v6210_v19  ;;  %v5879_v37 = vpop.f32.mrb[108].mxu0 }
 0x949   :  { %v6085_v60 = vadd.f32 %v13396_v56, %v5879_v37  ;;  %v5881_v4 = vpop.f32.mrb[109].mxu0 }
 0x94a   :  { %v6086_v1 = vadd.f32 %v13399_v11, %v5881_v4  ;;  %v5883_v23 = vpop.f32.mrb[110].mxu0  ;;  %6758 = vmatprep.mubr.bf16.mxu1 %v6330_v22 }
 0x94b   :  { %v6087_v25 = vadd.f32 %v13396_v56, %v5883_v23  ;;  %v5885_v29 = vpop.f32.mrb[111].mxu0  ;;  %6759 = vmatmul.mubr.bf16.gmra.mrb[248].mxu1 %v6329_v24  ;;  %v6213_v6 = vmax.f32 %v6085_v60, 0.0 }
 0x94c   :  { %v6088_v57 = vadd.f32 %v13399_v11, %v5885_v29  ;;  %v6214_v21 = vmax.f32 %v6086_v1, 0.0 }
 0x94d   :  { %v6215_v2 = vmax.f32 %v6087_v25, 0.0 }
 0x94e   :  { %v6216_v26 = vmax.f32 %v6088_v57, 0.0 }
 0x94f   :  { %v6331_v45 = vpack.c.bf16 %v6215_v2, %v6213_v6 }
 0x950   :  { %v6332_v30 = vpack.c.bf16 %v6216_v26, %v6214_v21  ;;  %v5889_v5 = vpop.f32.mrb[112].mxu0 }
 0x951   :  { %v6089_v9 = vadd.f32 %v13396_v56, %v5889_v5  ;;  %v5891_v48 = vpop.f32.mrb[113].mxu0 }
 0x952   :  { %v6090_v36 = vadd.f32 %v13399_v11, %v5891_v48  ;;  %v5893_v62 = vpop.f32.mrb[114].mxu0  ;;  %6768 = vmatprep.mubr.bf16.mxu1 %v6332_v30 }
 0x953   :  { %v6091_v44 = vadd.f32 %v13396_v56, %v5893_v62  ;;  %v5895_v55 = vpop.f32.mrb[115].mxu0  ;;  %6769 = vmatmul.mubr.bf16.gmra.mrb[252].mxu1 %v6331_v45  ;;  %v6217_v34 = vmax.f32 %v6089_v9, 0.0 }
 0x954   :  { %v6092_v27 = vadd.f32 %v13399_v11, %v5895_v55  ;;  %v6218_v12 = vmax.f32 %v6090_v36, 0.0 }
 0x955   :  { %v6219_v47 = vmax.f32 %v6091_v44, 0.0  ;;  %v10785_v44 = vld [vmem:[%s16052_s6 + $0xa8] sm:$0xff]  }
 0x956   :  { %v6220_v42 = vmax.f32 %v6092_v27, 0.0  ;;  %7962 = vmatpush1.bf16.msra.mxu0 %v10785_v44 }
 0x957   :  { %v6333_v50 = vpack.c.bf16 %v6219_v47, %v6217_v34  ;;  %7963 = vmatprep.subr.bf16.mxu0 %v16181_v15 }
 0x958   :  { %v6334_v58 = vpack.c.bf16 %v6220_v42, %v6218_v12  ;;  %v5899_v63 = vpop.f32.mrb[116].mxu0 }
 0x959   :  { %v6093_v16 = vadd.f32 %v13396_v56, %v5899_v63  ;;  %v5901_v54 = vpop.f32.mrb[117].mxu0 }
 0x95a   :  { %v6094_v39 = vadd.f32 %v13399_v11, %v5901_v54  ;;  %v5903_v32 = vpop.f32.mrb[118].mxu0  ;;  %6778 = vmatprep.mubr.bf16.mxu1 %v6334_v58 }
 0x95b   :  { %v6095_v52 = vadd.f32 %v13396_v56, %v5903_v32  ;;  %v5905_v31 = vpop.f32.mrb[119].mxu0  ;;  %6779 = vmatmul.mubr.bf16.gmra.mrb[0].mxu1 %v6333_v50  ;;  %v6221_v46 = vmax.f32 %v6093_v16, 0.0 }
 0x95c   :  { %v6096_v0 = vadd.f32 %v13399_v11, %v5905_v31  ;;  %v6222_v20 = vmax.f32 %v6094_v39, 0.0 }
 0x95d   :  { %v6223_v8 = vmax.f32 %v6095_v52, 0.0 }
 0x95e   :  { %v6224_v43 = vmax.f32 %v6096_v0, 0.0 }
 0x95f   :  { %v6335_v53 = vpack.c.bf16 %v6223_v8, %v6221_v46  ;;  %v9837_v8 = vld [vmem:[%s16049_s3 + $0x7] ss:$8 sm:$0x3] }
 0x960   :  { %v6336_v35 = vpack.c.bf16 %v6224_v43, %v6222_v20  ;;  %v5909_v33 = vpop.f32.mrb[120].mxu0 }
 0x961   :  { %v6097_v61 = vadd.f32 %v13396_v56, %v5909_v33  ;;  %v5911_v19 = vpop.f32.mrb[121].mxu0 }
 0x962   :  { %v6098_v49 = vadd.f32 %v13399_v11, %v5911_v19  ;;  %v5913_v24 = vpop.f32.mrb[122].mxu0  ;;  %6788 = vmatprep.mubr.bf16.mxu1 %v6336_v35 }
 0x963   :  { %v6099_v22 = vadd.f32 %v13396_v56, %v5913_v24  ;;  %v5915_v37 = vpop.f32.mrb[123].mxu0  ;;  %6789 = vmatmul.mubr.bf16.gmra.mrb[4].mxu1 %v6335_v53  ;;  %v6225_v4 = vmax.f32 %v6097_v61, 0.0  ;;  %v13654_v61 = vrot.slane %v9837_v8, %v11241_v28 }
 0x964   :  { %v6100_v60 = vadd.f32 %v13399_v11, %v5915_v37  ;;  %v6226_v23 = vmax.f32 %v6098_v49, 0.0  ;;  %v13658_v49 = vrot.slane %v9837_v8, %v11216_v7 }
 0x965   :  { %v6227_v1 = vmax.f32 %v6099_v22, 0.0 }
 0x966   :  { %v6228_v25 = vmax.f32 %v6100_v60, 0.0 }
 0x967   :  { %v6337_v29 = vpack.c.bf16 %v6227_v1, %v6225_v4  ;;  %v10786_v1 = vld [vmem:[%s16052_s6 + $0xb0] sm:$0xff]  }
 0x968   :  { %v6338_v57 = vpack.c.bf16 %v6228_v25, %v6226_v23  ;;  %v5919_v6 = vpop.f32.mrb[124].mxu0  ;;  %7964 = vmatpush1.bf16.msra.mxu0 %v10786_v1 }
 0x969   :  { %v6101_v2 = vadd.f32 %v13396_v56, %v5919_v6  ;;  %v5921_v21 = vpop.f32.mrb[125].mxu0  ;;  %7965 = vmatprep.subr.bf16.mxu0 %v16181_v15 }
 0x96a   :  { %v6102_v26 = vadd.f32 %v13399_v11, %v5921_v21  ;;  %v5923_v17 = vpop.f32.mrb[126].mxu0  ;;  %6798 = vmatprep.mubr.bf16.mxu1 %v6338_v57 }
 0x96b   :  { %v6103_v45 = vadd.f32 %v13396_v56, %v5923_v17  ;;  %v5925_v30 = vpop.f32.mrb[127].mxu0  ;;  %6799 = vmatmul.mubr.bf16.gmra.mrb[8].mxu1 %v6337_v29  ;;  %v6229_v9 = vmax.f32 %v6101_v2, 0.0 }
 0x96c   :  { %v6104_v5 = vadd.f32 %v13399_v11, %v5925_v30  ;;  %v6230_v36 = vmax.f32 %v6102_v26, 0.0 }
 0x96d   :  { %v6231_v48 = vmax.f32 %v6103_v45, 0.0 }
 0x96e   :  { %v6232_v62 = vmax.f32 %v6104_v5, 0.0 }
 0x96f   :  { %v6339_v55 = vpack.c.bf16 %v6231_v48, %v6229_v9 }
 0x970   :  { %v6340_v27 = vpack.c.bf16 %v6232_v62, %v6230_v36  ;;  %v5929_v34 = vpop.f32.mrb[128].mxu0 }
 0x971   :  { %v6105_v47 = vadd.f32 %v13396_v56, %v5929_v34  ;;  %v5931_v12 = vpop.f32.mrb[129].mxu0 }
 0x972   :  { %v6106_v42 = vadd.f32 %v13399_v11, %v5931_v12  ;;  %v5933_v50 = vpop.f32.mrb[130].mxu0  ;;  %6808 = vmatprep.mubr.bf16.mxu1 %v6340_v27 }
 0x973   :  { %v6107_v58 = vadd.f32 %v13396_v56, %v5933_v50  ;;  %v5935_v63 = vpop.f32.mrb[131].mxu0  ;;  %6809 = vmatmul.mubr.bf16.gmra.mrb[12].mxu1 %v6339_v55  ;;  %v6233_v54 = vmax.f32 %v6105_v47, 0.0 }
 0x974   :  { %v6108_v16 = vadd.f32 %v13399_v11, %v5935_v63  ;;  %v6234_v32 = vmax.f32 %v6106_v42, 0.0 }
 0x975   :  { %v6235_v39 = vmax.f32 %v6107_v58, 0.0 }
 0x976   :  { %v6236_v52 = vmax.f32 %v6108_v16, 0.0 }
 0x977   :  { %v6341_v31 = vpack.c.bf16 %v6235_v39, %v6233_v54 }
 0x978   :  { %v6342_v0 = vpack.c.bf16 %v6236_v52, %v6234_v32  ;;  %v5939_v46 = vpop.f32.mrb[132].mxu0 }
 0x979   :  { %v6109_v20 = vadd.f32 %v13396_v56, %v5939_v46  ;;  %v5941_v43 = vpop.f32.mrb[133].mxu0 }
 0x97a   :  { %v6110_v38 = vadd.f32 %v13399_v11, %v5941_v43  ;;  %v5943_v53 = vpop.f32.mrb[134].mxu0  ;;  %6818 = vmatprep.mubr.bf16.mxu1 %v6342_v0 }
 0x97b   :  { %v6111_v35 = vadd.f32 %v13396_v56, %v5943_v53  ;;  %v5945_v33 = vpop.f32.mrb[135].mxu0  ;;  %6819 = vmatmul.mubr.bf16.gmra.mrb[16].mxu1 %v6341_v31  ;;  %v6237_v24 = vmax.f32 %v6109_v20, 0.0 }
 0x97c   :  { %v6112_v19 = vadd.f32 %v13399_v11, %v5945_v33  ;;  %v6238_v37 = vmax.f32 %v6110_v38, 0.0 }
 0x97d   :  { %v6239_v22 = vmax.f32 %v6111_v35, 0.0 }
 0x97e   :  { %v6240_v60 = vmax.f32 %v6112_v19, 0.0  ;;  %v6560_v4 = vpop.f32.mrb[168].mxu1 }
 0x97f   :  { %v6343_v23 = vpack.c.bf16 %v6239_v22, %v6237_v24  ;;  %v6561_v25 = vadd.f32 %v6560_v4, %v13654_v61  ;;  %v6562_v29 = vpop.f32.mrb[169].mxu1 }
 0x980   :  { %v6344_v57 = vpack.c.bf16 %v6240_v60, %v6238_v37  ;;  %v6563_v6 = vadd.f32 %v6562_v29, %v13658_v49  ;;  %v5949_v2 = vpop.f32.mrb[136].mxu0  ;;  %v6564_v21 = vpop.f32.mrb[170].mxu1 }
 0x981   :  { %v6113_v26 = vadd.f32 %v13396_v56, %v5949_v2  ;;  %v6565_v17 = vadd.f32 %v6564_v21, %v13654_v61  ;;  %v5951_v45 = vpop.f32.mrb[137].mxu0  ;;  %v6566_v30 = vpop.f32.mrb[171].mxu1  ;;  %v6879_v36 = vmax.f32 %v6561_v25, 0.0 }
 0x982   :  { %v6114_v5 = vadd.f32 %v13399_v11, %v5951_v45  ;;  %v6567_v9 = vadd.f32 %v6566_v30, %v13658_v49  ;;  %v5953_v48 = vpop.f32.mrb[138].mxu0  ;;  %6828 = vmatprep.mubr.bf16.mxu1 %v6344_v57  ;;  %v6880_v27 = vmax.f32 %v6563_v6, 0.0 }
 0x983   :  { %v6881_v62 = vmax.f32 %v6565_v17, 0.0  ;;  %v6115_v44 = vadd.f32 %v13396_v56, %v5953_v48  ;;  %v5955_v55 = vpop.f32.mrb[139].mxu0  ;;  %6829 = vmatmul.mubr.bf16.gmra.mrb[20].mxu1 %v6343_v23  ;;  %v6241_v12 = vmax.f32 %v6113_v26, 0.0  ;;  %v10787_v17 = vld [vmem:[%s16052_s6 + $0xb8] sm:$0xff]  }
 0x984   :  { %v6882_v34 = vmax.f32 %v6567_v9, 0.0  ;;  %v6116_v47 = vadd.f32 %v13399_v11, %v5955_v55  ;;  %v6242_v58 = vmax.f32 %v6114_v5, 0.0  ;;  %7966 = vmatpush1.bf16.msra.mxu0 %v10787_v17 }
 0x985   :  { %v13672_v42 = vpack.c.bf16 %v6881_v62, %v6879_v36  ;;  %v6243_v50 = vmax.f32 %v6115_v44, 0.0  ;;  %7967 = vmatprep.subr.bf16.mxu0 %v16181_v15 }
 0x986   :  { %v13674_v63 = vpack.c.bf16 %v6882_v34, %v6880_v27  ;;  %v6244_v16 = vmax.f32 %v6116_v47, 0.0  ;;  %v6570_v54 = vpop.f32.mrb[172].mxu1 }
 0x987   :  { %v6345_v39 = vpack.c.bf16 %v6243_v50, %v6241_v12  ;;  %v6571_v32 = vadd.f32 %v6570_v54, %v13654_v61  ;;  %v6572_v52 = vpop.f32.mrb[173].mxu1 }
 0x988   :  { %v6346_v31 = vpack.c.bf16 %v6244_v16, %v6242_v58  ;;  %v6573_v0 = vadd.f32 %v6572_v52, %v13658_v49  ;;  %v5959_v46 = vpop.f32.mrb[140].mxu0  ;;  %v6574_v8 = vpop.f32.mrb[174].mxu1 }
 0x989   :  { %v6117_v20 = vadd.f32 %v13396_v56, %v5959_v46  ;;  %v6575_v43 = vadd.f32 %v6574_v8, %v13654_v61  ;;  %v5961_v38 = vpop.f32.mrb[141].mxu0  ;;  %v6576_v53 = vpop.f32.mrb[175].mxu1  ;;  %v6883_v24 = vmax.f32 %v6571_v32, 0.0 }
 0x98a   :  { %v6118_v35 = vadd.f32 %v13399_v11, %v5961_v38  ;;  %v6577_v33 = vadd.f32 %v6576_v53, %v13658_v49  ;;  %v5963_v19 = vpop.f32.mrb[142].mxu0  ;;  %6838 = vmatprep.mubr.bf16.mxu1 %v6346_v31  ;;  %v6884_v4 = vmax.f32 %v6573_v0, 0.0 }
 0x98b   :  { %v6885_v22 = vmax.f32 %v6575_v43, 0.0  ;;  %v6119_v37 = vadd.f32 %v13396_v56, %v5963_v19  ;;  %v5965_v60 = vpop.f32.mrb[143].mxu0  ;;  %6839 = vmatmul.mubr.bf16.gmra.mrb[24].mxu1 %v6345_v39  ;;  %v6245_v25 = vmax.f32 %v6117_v20, 0.0 }
 0x98c   :  { %v6886_v1 = vmax.f32 %v6577_v33, 0.0  ;;  %v6120_v23 = vadd.f32 %v13399_v11, %v5965_v60  ;;  %v6246_v6 = vmax.f32 %v6118_v35, 0.0 }
 0x98d   :  { %v13684_v29 = vpack.c.bf16 %v6885_v22, %v6883_v24  ;;  %v6247_v57 = vmax.f32 %v6119_v37, 0.0 }
 0x98e   :  { %v13686_v2 = vpack.c.bf16 %v6886_v1, %v6884_v4  ;;  %v6248_v21 = vmax.f32 %v6120_v23, 0.0  ;;  %v6580_v26 = vpop.f32.mrb[176].mxu1 }
 0x98f   :  { %v6347_v45 = vpack.c.bf16 %v6247_v57, %v6245_v25  ;;  %v6581_v30 = vadd.f32 %v6580_v26, %v13654_v61  ;;  %v6582_v5 = vpop.f32.mrb[177].mxu1 }
 0x990   :  { %v6348_v9 = vpack.c.bf16 %v6248_v21, %v6246_v6  ;;  %v6583_v48 = vadd.f32 %v6582_v5, %v13658_v49  ;;  %v5969_v36 = vpop.f32.mrb[144].mxu0  ;;  %v6584_v62 = vpop.f32.mrb[178].mxu1 }
 0x991   :  { %v6121_v44 = vadd.f32 %v13396_v56, %v5969_v36  ;;  %v6585_v55 = vadd.f32 %v6584_v62, %v13654_v61  ;;  %v5971_v27 = vpop.f32.mrb[145].mxu0  ;;  %v6586_v34 = vpop.f32.mrb[179].mxu1  ;;  %v6887_v58 = vmax.f32 %v6581_v30, 0.0 }
 0x992   :  { %v6122_v47 = vadd.f32 %v13399_v11, %v5971_v27  ;;  %v6587_v12 = vadd.f32 %v6586_v34, %v13658_v49  ;;  %v5973_v50 = vpop.f32.mrb[146].mxu0  ;;  %6848 = vmatprep.mubr.bf16.mxu1 %v6348_v9  ;;  %v6888_v32 = vmax.f32 %v6583_v48, 0.0 }
 0x993   :  { %v6889_v16 = vmax.f32 %v6585_v55, 0.0  ;;  %v6123_v54 = vadd.f32 %v13396_v56, %v5973_v50  ;;  %v5975_v39 = vpop.f32.mrb[147].mxu0  ;;  %6849 = vmatmul.mubr.bf16.gmra.mrb[28].mxu1 %v6347_v45  ;;  %v6249_v0 = vmax.f32 %v6121_v44, 0.0 }
 0x994   :  { %v6890_v52 = vmax.f32 %v6587_v12, 0.0  ;;  %v6124_v31 = vadd.f32 %v13399_v11, %v5975_v39  ;;  %v6250_v20 = vmax.f32 %v6122_v47, 0.0  ;;  %v10788_v12 = vld [vmem:[%s16052_s6 + $0xc0] sm:$0xff]  }
 0x995   :  { %v13700_v46 = vpack.c.bf16 %v6889_v16, %v6887_v58  ;;  %v6251_v8 = vmax.f32 %v6123_v54, 0.0  ;;  %7968 = vmatpush1.bf16.msra.mxu0 %v10788_v12 }
 0x996   :  { %v13702_v43 = vpack.c.bf16 %v6890_v52, %v6888_v32  ;;  %v6252_v38 = vmax.f32 %v6124_v31, 0.0  ;;  %v6590_v53 = vpop.f32.mrb[180].mxu1  ;;  %7969 = vmatprep.subr.bf16.mxu0 %v16181_v15 }
 0x997   :  { %v6349_v35 = vpack.c.bf16 %v6251_v8, %v6249_v0  ;;  %v6591_v33 = vadd.f32 %v6590_v53, %v13654_v61  ;;  %v6592_v19 = vpop.f32.mrb[181].mxu1 }
 0x998   :  { %v6350_v24 = vpack.c.bf16 %v6252_v38, %v6250_v20  ;;  %v6593_v22 = vadd.f32 %v6592_v19, %v13658_v49  ;;  %v5979_v37 = vpop.f32.mrb[148].mxu0  ;;  %v6594_v60 = vpop.f32.mrb[182].mxu1 }
 0x999   :  { %v6125_v4 = vadd.f32 %v13396_v56, %v5979_v37  ;;  %v6595_v1 = vadd.f32 %v6594_v60, %v13654_v61  ;;  %v5981_v23 = vpop.f32.mrb[149].mxu0  ;;  %v6596_v25 = vpop.f32.mrb[183].mxu1  ;;  %v6891_v26 = vmax.f32 %v6591_v33, 0.0 }
 0x99a   :  { %v6126_v57 = vadd.f32 %v13399_v11, %v5981_v23  ;;  %v6597_v6 = vadd.f32 %v6596_v25, %v13658_v49  ;;  %v5983_v21 = vpop.f32.mrb[150].mxu0  ;;  %6858 = vmatprep.mubr.bf16.mxu1 %v6350_v24  ;;  %v6892_v5 = vmax.f32 %v6593_v22, 0.0 }
 0x99b   :  { %v6893_v17 = vmax.f32 %v6595_v1, 0.0  ;;  %v6127_v45 = vadd.f32 %v13396_v56, %v5983_v21  ;;  %v5985_v30 = vpop.f32.mrb[151].mxu0  ;;  %6859 = vmatmul.mubr.bf16.gmra.mrb[32].mxu1 %v6349_v35  ;;  %v6253_v36 = vmax.f32 %v6125_v4, 0.0 }
 0x99c   :  { %v6894_v9 = vmax.f32 %v6597_v6, 0.0  ;;  %v6128_v48 = vadd.f32 %v13399_v11, %v5985_v30  ;;  %v6254_v55 = vmax.f32 %v6126_v57, 0.0 }
 0x99d   :  { %v13712_v62 = vpack.c.bf16 %v6893_v17, %v6891_v26  ;;  %v6255_v44 = vmax.f32 %v6127_v45, 0.0  ;;  %v10789_v26 = vld [vmem:[%s16052_s6 + $0xc8] sm:$0xff]  }
 0x99e   :  { %v13714_v27 = vpack.c.bf16 %v6894_v9, %v6892_v5  ;;  %v6256_v34 = vmax.f32 %v6128_v48, 0.0  ;;  %v6600_v47 = vpop.f32.mrb[184].mxu1  ;;  %7970 = vmatpush1.bf16.msra.mxu0 %v10789_v26 }
 0x99f   :  { %v6351_v56 = vpack.c.bf16 %v6255_v44, %v6253_v36  ;;  %v6601_v50 = vadd.f32 %v6600_v47, %v13654_v61  ;;  %v6602_v58 = vpop.f32.mrb[185].mxu1  ;;  %7971 = vmatprep.subr.bf16.mxu0 %v16181_v15 }
 0x9a0   :  { %v6352_v16 = vpack.c.bf16 %v6256_v34, %v6254_v55  ;;  %v6603_v11 = vadd.f32 %v6602_v58, %v13658_v49  ;;  %v6604_v54 = vpop.f32.mrb[186].mxu1 }
 0x9a1   :  { %v6605_v39 = vadd.f32 %v6604_v54, %v13654_v61  ;;  %v6606_v32 = vpop.f32.mrb[187].mxu1  ;;  %v6895_v31 = vmax.f32 %v6601_v50, 0.0 }
 0x9a2   :  { %v6607_v52 = vadd.f32 %v6606_v32, %v13658_v49  ;;  %6868 = vmatprep.mubr.bf16.mxu1 %v6352_v16  ;;  %v6896_v8 = vmax.f32 %v6603_v11, 0.0 }
 0x9a3   :  { %v6897_v0 = vmax.f32 %v6605_v39, 0.0  ;;  %6869 = vmatmul.mubr.bf16.gmra.mrb[36].mxu1 %v6351_v56 }
 0x9a4   :  { %v6898_v20 = vmax.f32 %v6607_v52, 0.0  ;;  %7308 = vmatprep.mubr.bf16.mxu1 %v13674_v63 }
 0x9a5   :  { %v13725_v38 = vpack.c.bf16 %v6897_v0, %v6895_v31 }
 0x9a6   :  { %v13727_v53 = vpack.c.bf16 %v6898_v20, %v6896_v8  ;;  %v6610_v35 = vpop.f32.mrb[188].mxu1  ;;  %v10790_v20 = vld [vmem:[%s16052_s6 + $0xd0] sm:$0xff]  }
 0x9a7   :  { %v6611_v33 = vadd.f32 %v6610_v35, %v13654_v61  ;;  %v6612_v19 = vpop.f32.mrb[189].mxu1  ;;  %7972 = vmatpush1.bf16.msra.mxu0 %v10790_v20 }
 0x9a8   :  { %v6613_v24 = vadd.f32 %v6612_v19, %v13658_v49  ;;  %v6614_v22 = vpop.f32.mrb[190].mxu1  ;;  %7973 = vmatprep.subr.bf16.mxu0 %v16181_v15 }
 0x9a9   :  { %v6615_v37 = vadd.f32 %v6614_v22, %v13654_v61  ;;  %v6616_v60 = vpop.f32.mrb[191].mxu1  ;;  %v6899_v1 = vmax.f32 %v6611_v33, 0.0 }
 0x9aa   :  { %v6617_v4 = vadd.f32 %v6616_v60, %v13658_v49  ;;  %v6900_v63 = vmax.f32 %v6613_v24, 0.0 }
 0x9ab   :  { %v6901_v23 = vmax.f32 %v6615_v37, 0.0  ;;  %7309 = vmatmul.mubr.bf16.vlgmr.msra.gmra.mrb[40].mxu1 %v13672_v42 }
 0x9ac   :  { %v6902_v25 = vmax.f32 %v6617_v4, 0.0  ;;  %7318 = vmatprep.mubr.bf16.mxu1 %v13686_v2 }
 0x9ad   :  { %v13735_v57 = vpack.c.bf16 %v6901_v23, %v6899_v1 }
 0x9ae   :  { %v13737_v6 = vpack.c.bf16 %v6902_v25, %v6900_v63  ;;  %v6620_v21 = vpop.f32.mrb[192].mxu1 }
 0x9af   :  { %v6621_v17 = vadd.f32 %v6620_v21, %v13654_v61  ;;  %v6622_v45 = vpop.f32.mrb[193].mxu1 }
 0x9b0   :  { %v6623_v30 = vadd.f32 %v6622_v45, %v13658_v49  ;;  %v6624_v5 = vpop.f32.mrb[194].mxu1 }
 0x9b1   :  { %v6625_v42 = vadd.f32 %v6624_v5, %v13654_v61  ;;  %v6626_v9 = vpop.f32.mrb[195].mxu1  ;;  %v6903_v48 = vmax.f32 %v6621_v17, 0.0 }
 0x9b2   :  { %v6627_v2 = vadd.f32 %v6626_v9, %v13658_v49  ;;  %v6904_v44 = vmax.f32 %v6623_v30, 0.0 }
 0x9b3   :  { %v6905_v36 = vmax.f32 %v6625_v42, 0.0  ;;  %7319 = vmatmul.mubr.bf16.gmra.mrb[44].mxu1 %v13684_v29 }
 0x9b4   :  { %v6906_v55 = vmax.f32 %v6627_v2, 0.0  ;;  %7328 = vmatprep.mubr.bf16.mxu1 %v13702_v43 }
 0x9b5   :  { %v13749_v34 = vpack.c.bf16 %v6905_v36, %v6903_v48 }
 0x9b6   :  { %v13751_v47 = vpack.c.bf16 %v6906_v55, %v6904_v44  ;;  %v6630_v12 = vpop.f32.mrb[196].mxu1  ;;  %v10791_v55 = vld [vmem:[%s16052_s6 + $0xd8] sm:$0xff]  }
 0x9b7   :  { %v6631_v56 = vadd.f32 %v6630_v12, %v13654_v61  ;;  %v6632_v50 = vpop.f32.mrb[197].mxu1  ;;  %7974 = vmatpush1.bf16.msra.mxu0 %v10791_v55 }
 0x9b8   :  { %v6633_v58 = vadd.f32 %v6632_v50, %v13658_v49  ;;  %v6634_v16 = vpop.f32.mrb[198].mxu1  ;;  %7975 = vmatprep.subr.bf16.mxu0 %v16181_v15 }
 0x9b9   :  { %v6635_v11 = vadd.f32 %v6634_v16, %v13654_v61  ;;  %v6636_v54 = vpop.f32.mrb[199].mxu1  ;;  %v6907_v39 = vmax.f32 %v6631_v56, 0.0 }
 0x9ba   :  { %v6637_v29 = vadd.f32 %v6636_v54, %v13658_v49  ;;  %v6908_v43 = vmax.f32 %v6633_v58, 0.0 }
 0x9bb   :  { %v6909_v32 = vmax.f32 %v6635_v11, 0.0  ;;  %7329 = vmatmul.mubr.bf16.gmra.mrb[48].mxu1 %v13700_v46 }
 0x9bc   :  { %v6910_v52 = vmax.f32 %v6637_v29, 0.0  ;;  %7338 = vmatprep.mubr.bf16.mxu1 %v13714_v27 }
 0x9bd   :  { %v13759_v31 = vpack.c.bf16 %v6909_v32, %v6907_v39 }
 0x9be   :  { %v13761_v0 = vpack.c.bf16 %v6910_v52, %v6908_v43  ;;  %v6640_v8 = vpop.f32.mrb[200].mxu1 }
 0x9bf   :  { %v6641_v35 = vadd.f32 %v6640_v8, %v13654_v61  ;;  %v6642_v33 = vpop.f32.mrb[201].mxu1 }
 0x9c0   :  { %v6643_v19 = vadd.f32 %v6642_v33, %v13658_v49  ;;  %v6644_v24 = vpop.f32.mrb[202].mxu1 }
 0x9c1   :  { %v6645_v46 = vadd.f32 %v6644_v24, %v13654_v61  ;;  %v6646_v22 = vpop.f32.mrb[203].mxu1  ;;  %v6911_v37 = vmax.f32 %v6641_v35, 0.0 }
 0x9c2   :  { %v6647_v27 = vadd.f32 %v6646_v22, %v13658_v49  ;;  %v6912_v4 = vmax.f32 %v6643_v19, 0.0 }
 0x9c3   :  { %v6913_v60 = vmax.f32 %v6645_v46, 0.0  ;;  %7339 = vmatmul.mubr.bf16.gmra.mrb[52].mxu1 %v13712_v62 }
 0x9c4   :  { %v6914_v1 = vmax.f32 %v6647_v27, 0.0  ;;  %7348 = vmatprep.mubr.bf16.mxu1 %v13727_v53 }
 0x9c5   :  { %v13773_v23 = vpack.c.bf16 %v6913_v60, %v6911_v37 }
 0x9c6   :  { %v13775_v63 = vpack.c.bf16 %v6914_v1, %v6912_v4  ;;  %v6650_v25 = vpop.f32.mrb[204].mxu1  ;;  %v10792_v1 = vld [vmem:[%s16052_s6 + $0xe0] sm:$0xff]  }
 0x9c7   :  { %v6651_v21 = vadd.f32 %v6650_v25, %v13654_v61  ;;  %v6652_v26 = vpop.f32.mrb[205].mxu1  ;;  %7976 = vmatpush1.bf16.msra.mxu0 %v10792_v1 }
 0x9c8   :  { %v6653_v17 = vadd.f32 %v6652_v26, %v13658_v49  ;;  %v6654_v45 = vpop.f32.mrb[206].mxu1  ;;  %7977 = vmatprep.subr.bf16.mxu0 %v16181_v15 }
 0x9c9   :  { %v6655_v30 = vadd.f32 %v6654_v45, %v13654_v61  ;;  %v6656_v5 = vpop.f32.mrb[207].mxu1  ;;  %v6915_v42 = vmax.f32 %v6651_v21, 0.0 }
 0x9ca   :  { %v6657_v62 = vadd.f32 %v6656_v5, %v13658_v49  ;;  %v6916_v53 = vmax.f32 %v6653_v17, 0.0 }
 0x9cb   :  { %v6917_v9 = vmax.f32 %v6655_v30, 0.0  ;;  %7349 = vmatmul.mubr.bf16.gmra.mrb[56].mxu1 %v13725_v38 }
 0x9cc   :  { %v6918_v2 = vmax.f32 %v6657_v62, 0.0  ;;  %7358 = vmatprep.mubr.bf16.mxu1 %v13737_v6 }
 0x9cd   :  { %v13783_v48 = vpack.c.bf16 %v6917_v9, %v6915_v42 }
 0x9ce   :  { %v13785_v36 = vpack.c.bf16 %v6918_v2, %v6916_v53  ;;  %v6660_v44 = vpop.f32.mrb[208].mxu1 }
 0x9cf   :  { %v6661_v12 = vadd.f32 %v6660_v44, %v13654_v61  ;;  %v6662_v56 = vpop.f32.mrb[209].mxu1 }
 0x9d0   :  { %v6663_v50 = vadd.f32 %v6662_v56, %v13658_v49  ;;  %v6664_v58 = vpop.f32.mrb[210].mxu1 }
 0x9d1   :  { %v6665_v38 = vadd.f32 %v6664_v58, %v13654_v61  ;;  %v6666_v16 = vpop.f32.mrb[211].mxu1  ;;  %v6919_v11 = vmax.f32 %v6661_v12, 0.0 }
 0x9d2   :  { %v6667_v6 = vadd.f32 %v6666_v16, %v13658_v49  ;;  %v6920_v29 = vmax.f32 %v6663_v50, 0.0 }
 0x9d3   :  { %v6921_v54 = vmax.f32 %v6665_v38, 0.0  ;;  %7359 = vmatmul.mubr.bf16.gmra.mrb[60].mxu1 %v13735_v57 }
 0x9d4   :  { %v6922_v39 = vmax.f32 %v6667_v6, 0.0  ;;  %7368 = vmatprep.mubr.bf16.mxu1 %v13751_v47 }
 0x9d5   :  { %v13797_v32 = vpack.c.bf16 %v6921_v54, %v6919_v11 }
 0x9d6   :  { %v13799_v43 = vpack.c.bf16 %v6922_v39, %v6920_v29  ;;  %v6670_v52 = vpop.f32.mrb[212].mxu1  ;;  %v10793_v39 = vld [vmem:[%s16052_s6 + $0xe8] sm:$0xff]  }
 0x9d7   :  { %v6671_v8 = vadd.f32 %v6670_v52, %v13654_v61  ;;  %v6672_v20 = vpop.f32.mrb[213].mxu1  ;;  %7978 = vmatpush1.bf16.msra.mxu0 %v10793_v39 }
 0x9d8   :  { %v6673_v35 = vadd.f32 %v6672_v20, %v13658_v49  ;;  %v6674_v33 = vpop.f32.mrb[214].mxu1  ;;  %7979 = vmatprep.subr.bf16.mxu0 %v16181_v15 }
 0x9d9   :  { %v6675_v19 = vadd.f32 %v6674_v33, %v13654_v61  ;;  %v6676_v24 = vpop.f32.mrb[215].mxu1  ;;  %v6923_v46 = vmax.f32 %v6671_v8, 0.0 }
 0x9da   :  { %v6677_v57 = vadd.f32 %v6676_v24, %v13658_v49  ;;  %v6924_v47 = vmax.f32 %v6673_v35, 0.0 }
 0x9db   :  { %v6925_v22 = vmax.f32 %v6675_v19, 0.0  ;;  %7369 = vmatmul.mubr.bf16.gmra.mrb[64].mxu1 %v13749_v34 }
 0x9dc   :  { %v6926_v27 = vmax.f32 %v6677_v57, 0.0  ;;  %7378 = vmatprep.mubr.bf16.mxu1 %v13761_v0 }
 0x9dd   :  { %v13807_v37 = vpack.c.bf16 %v6925_v22, %v6923_v46 }
 0x9de   :  { %v13809_v60 = vpack.c.bf16 %v6926_v27, %v6924_v47  ;;  %v6680_v4 = vpop.f32.mrb[216].mxu1 }
 0x9df   :  { %v6681_v25 = vadd.f32 %v6680_v4, %v13654_v61  ;;  %v6682_v21 = vpop.f32.mrb[217].mxu1 }
 0x9e0   :  { %v6683_v26 = vadd.f32 %v6682_v21, %v13658_v49  ;;  %v6684_v17 = vpop.f32.mrb[218].mxu1 }
 0x9e1   :  { %v6685_v34 = vadd.f32 %v6684_v17, %v13654_v61  ;;  %v6686_v45 = vpop.f32.mrb[219].mxu1  ;;  %v6927_v30 = vmax.f32 %v6681_v25, 0.0 }
 0x9e2   :  { %v6687_v0 = vadd.f32 %v6686_v45, %v13658_v49  ;;  %v6928_v62 = vmax.f32 %v6683_v26, 0.0 }
 0x9e3   :  { %v6929_v5 = vmax.f32 %v6685_v34, 0.0  ;;  %7379 = vmatmul.mubr.bf16.gmra.mrb[68].mxu1 %v13759_v31 }
 0x9e4   :  { %v6930_v42 = vmax.f32 %v6687_v0, 0.0  ;;  %7388 = vmatprep.mubr.bf16.mxu1 %v13775_v63 }
 0x9e5   :  { %v13821_v9 = vpack.c.bf16 %v6929_v5, %v6927_v30 }
 0x9e6   :  { %v13823_v53 = vpack.c.bf16 %v6930_v42, %v6928_v62  ;;  %v6690_v2 = vpop.f32.mrb[220].mxu1  ;;  %v10794_v62 = vld [vmem:[%s16052_s6 + $0xf0] sm:$0xff]  }
 0x9e7   :  { %v6691_v44 = vadd.f32 %v6690_v2, %v13654_v61  ;;  %v6692_v55 = vpop.f32.mrb[221].mxu1  ;;  %7980 = vmatpush1.bf16.msra.mxu0 %v10794_v62 }
 0x9e8   :  { %v6693_v12 = vadd.f32 %v6692_v55, %v13658_v49  ;;  %v6694_v56 = vpop.f32.mrb[222].mxu1 }
 0x9e9   :  { %v6695_v50 = vadd.f32 %v6694_v56, %v13654_v61  ;;  %v6696_v58 = vpop.f32.mrb[223].mxu1  ;;  %v6931_v38 = vmax.f32 %v6691_v44, 0.0 }
 0x9ea   :  { %v6697_v31 = vadd.f32 %v6696_v58, %v13658_v49  ;;  %v6932_v63 = vmax.f32 %v6693_v12, 0.0 }
 0x9eb   :  { %v6933_v16 = vmax.f32 %v6695_v50, 0.0  ;;  %7389 = vmatmul.mubr.bf16.gmra.mrb[72].mxu1 %v13773_v23 }
 0x9ec   :  { %v6934_v6 = vmax.f32 %v6697_v31, 0.0  ;;  %7398 = vmatprep.mubr.bf16.mxu1 %v13785_v36 }
 0x9ed   :  { %v13831_v11 = vpack.c.bf16 %v6933_v16, %v6931_v38 }
 0x9ee   :  { %v13833_v54 = vpack.c.bf16 %v6934_v6, %v6932_v63  ;;  %v6700_v29 = vpop.f32.mrb[224].mxu1 }
 0x9ef   :  { %v6701_v52 = vadd.f32 %v6700_v29, %v13654_v61  ;;  %v6702_v8 = vpop.f32.mrb[225].mxu1 }
 0x9f0   :  { %v6703_v20 = vadd.f32 %v6702_v8, %v13658_v49  ;;  %v6704_v35 = vpop.f32.mrb[226].mxu1 }
 0x9f1   :  { %v6705_v23 = vadd.f32 %v6704_v35, %v13654_v61  ;;  %v6706_v33 = vpop.f32.mrb[227].mxu1  ;;  %v6935_v19 = vmax.f32 %v6701_v52, 0.0 }
 0x9f2   :  { %v6707_v36 = vadd.f32 %v6706_v33, %v13658_v49  ;;  %v6936_v57 = vmax.f32 %v6703_v20, 0.0 }
 0x9f3   :  { %v6937_v24 = vmax.f32 %v6705_v23, 0.0  ;;  %7399 = vmatmul.mubr.bf16.gmra.mrb[76].mxu1 %v13783_v48 }
 0x9f4   :  { %v6938_v46 = vmax.f32 %v6707_v36, 0.0  ;;  %7408 = vmatprep.mubr.bf16.mxu1 %v13799_v43 }
 0x9f5   :  { %v13845_v22 = vpack.c.bf16 %v6937_v24, %v6935_v19 }
 0x9f6   :  { %v13847_v47 = vpack.c.bf16 %v6938_v46, %v6936_v57  ;;  %v6710_v27 = vpop.f32.mrb[228].mxu1 }
 0x9f7   :  { %v6711_v4 = vadd.f32 %v6710_v27, %v13654_v61  ;;  %v6712_v1 = vpop.f32.mrb[229].mxu1 }
 0x9f8   :  { %v6713_v15 = vadd.f32 %v6712_v1, %v13658_v49  ;;  %v6714_v25 = vpop.f32.mrb[230].mxu1 }
 0x9f9   :  { %v6715_v21 = vadd.f32 %v6714_v25, %v13654_v61  ;;  %v6716_v26 = vpop.f32.mrb[231].mxu1  ;;  %v6939_v17 = vmax.f32 %v6711_v4, 0.0 }
 0x9fa   :  { %v6717_v48 = vadd.f32 %v6716_v26, %v13658_v49  ;;  %v6940_v43 = vmax.f32 %v6713_v15, 0.0 }
 0x9fb   :  { %v6941_v34 = vmax.f32 %v6715_v21, 0.0  ;;  %7409 = vmatmul.mubr.bf16.gmra.mrb[80].mxu1 %v13797_v32 }
 0x9fc   :  { %v6942_v45 = vmax.f32 %v6717_v48, 0.0  ;;  %7418 = vmatprep.mubr.bf16.mxu1 %v13809_v60 }
 0x9fd   :  { %v13855_v0 = vpack.c.bf16 %v6941_v34, %v6939_v17 }
 0x9fe   :  { %v13857_v30 = vpack.c.bf16 %v6942_v45, %v6940_v43  ;;  %v6720_v5 = vpop.f32.mrb[232].mxu1 }
 0x9ff   :  { %v6721_v42 = vadd.f32 %v6720_v5, %v13654_v61  ;;  %v6722_v2 = vpop.f32.mrb[233].mxu1 }
 0xa00   :  { %v6723_v44 = vadd.f32 %v6722_v2, %v13658_v49  ;;  %v6724_v55 = vpop.f32.mrb[234].mxu1 }
 0xa01   :  { %v6725_v32 = vadd.f32 %v6724_v55, %v13654_v61  ;;  %v6726_v12 = vpop.f32.mrb[235].mxu1  ;;  %v6943_v56 = vmax.f32 %v6721_v42, 0.0 }
 0xa02   :  { %v6727_v60 = vadd.f32 %v6726_v12, %v13658_v49  ;;  %v6944_v58 = vmax.f32 %v6723_v44, 0.0 }
 0xa03   :  { %v6945_v50 = vmax.f32 %v6725_v32, 0.0  ;;  %7419 = vmatmul.mubr.bf16.gmra.mrb[84].mxu1 %v13807_v37 }
 0xa04   :  { %v6946_v31 = vmax.f32 %v6727_v60, 0.0  ;;  %7428 = vmatprep.mubr.bf16.mxu1 %v13823_v53 }
 0xa05   :  { %v13868_v38 = vpack.c.bf16 %v6945_v50, %v6943_v56 }
 0xa06   :  { %v7072_v16 = vpack.c.bf16 %v6946_v31, %v6944_v58  ;;  %v6730_v63 = vpop.f32.mrb[236].mxu1 }
 0xa07   :  { %v6731_v6 = vadd.f32 %v6730_v63, %v13654_v61  ;;  %v6732_v29 = vpop.f32.mrb[237].mxu1 }
 0xa08   :  { %v6733_v39 = vadd.f32 %v6732_v29, %v13658_v49  ;;  %v6734_v52 = vpop.f32.mrb[238].mxu1 }
 0xa09   :  { %v6735_v8 = vadd.f32 %v6734_v52, %v13654_v61  ;;  %v6736_v20 = vpop.f32.mrb[239].mxu1  ;;  %v6947_v37 = vmax.f32 %v6731_v6, 0.0 }
 0xa0a   :  { %v6737_v35 = vadd.f32 %v6736_v20, %v13658_v49  ;;  %v6948_v53 = vmax.f32 %v6733_v39, 0.0 }
 0xa0b   :  { %v6949_v23 = vmax.f32 %v6735_v8, 0.0  ;;  %7429 = vmatmul.mubr.bf16.gmra.mrb[88].mxu1 %v13821_v9 }
 0xa0c   :  { %v6950_v33 = vmax.f32 %v6737_v35, 0.0  ;;  %7438 = vmatprep.mubr.bf16.mxu1 %v13833_v54 }
 0xa0d   :  { %v13876_v36 = vpack.c.bf16 %v6949_v23, %v6947_v37 }
 0xa0e   :  { %v7074_v19 = vpack.c.bf16 %v6950_v33, %v6948_v53  ;;  %v6740_v24 = vpop.f32.mrb[240].mxu1 }
 0xa0f   :  { %v6741_v57 = vadd.f32 %v6740_v24, %v13654_v61  ;;  %v6742_v46 = vpop.f32.mrb[241].mxu1 }
 0xa10   :  { %v6743_v27 = vadd.f32 %v6742_v46, %v13658_v49  ;;  %v6744_v4 = vpop.f32.mrb[242].mxu1 }
 0xa11   :  { %v6745_v1 = vadd.f32 %v6744_v4, %v13654_v61  ;;  %v6746_v15 = vpop.f32.mrb[243].mxu1  ;;  %v6951_v9 = vmax.f32 %v6741_v57, 0.0 }
 0xa12   :  { %v6747_v25 = vadd.f32 %v6746_v15, %v13658_v49  ;;  %v6952_v54 = vmax.f32 %v6743_v27, 0.0 }
 0xa13   :  { %v6953_v21 = vmax.f32 %v6745_v1, 0.0  ;;  %7439 = vmatmul.mubr.bf16.gmra.mrb[92].mxu1 %v13831_v11 }
 0xa14   :  { %v6954_v26 = vmax.f32 %v6747_v25, 0.0  ;;  %7448 = vmatprep.mubr.bf16.mxu1 %v13847_v47 }
 0xa15   :  { %v13884_v48 = vpack.c.bf16 %v6953_v21, %v6951_v9 }
 0xa16   :  { %v7076_v17 = vpack.c.bf16 %v6954_v26, %v6952_v54  ;;  %v6750_v34 = vpop.f32.mrb[244].mxu1 }
 0xa17   :  { %v6751_v43 = vadd.f32 %v6750_v34, %v13654_v61  ;;  %v6752_v45 = vpop.f32.mrb[245].mxu1 }
 0xa18   :  { %v6753_v5 = vadd.f32 %v6752_v45, %v13658_v49  ;;  %v6754_v62 = vpop.f32.mrb[246].mxu1 }
 0xa19   :  { %v6755_v42 = vadd.f32 %v6754_v62, %v13654_v61  ;;  %v6756_v2 = vpop.f32.mrb[247].mxu1  ;;  %v6955_v11 = vmax.f32 %v6751_v43, 0.0 }
 0xa1a   :  { %v6757_v44 = vadd.f32 %v6756_v2, %v13658_v49  ;;  %v6956_v47 = vmax.f32 %v6753_v5, 0.0 }
 0xa1b   :  { %v6957_v55 = vmax.f32 %v6755_v42, 0.0  ;;  %7449 = vmatmul.mubr.bf16.gmra.mrb[96].mxu1 %v13845_v22 }
 0xa1c   :  { %v6958_v32 = vmax.f32 %v6757_v44, 0.0  ;;  %7458 = vmatprep.mubr.bf16.mxu1 %v13857_v30 }
 0xa1d   :  { %v13892_v12 = vpack.c.bf16 %v6957_v55, %v6955_v11 }
 0xa1e   :  { %v7078_v60 = vpack.c.bf16 %v6958_v32, %v6956_v47  ;;  %v6760_v56 = vpop.f32.mrb[248].mxu1 }
 0xa1f   :  { %v6761_v50 = vadd.f32 %v6760_v56, %v13654_v61  ;;  %v6762_v58 = vpop.f32.mrb[249].mxu1 }
 0xa20   :  { %v6763_v31 = vadd.f32 %v6762_v58, %v13658_v49  ;;  %v6764_v63 = vpop.f32.mrb[250].mxu1 }
 0xa21   :  { %v6765_v6 = vadd.f32 %v6764_v63, %v13654_v61  ;;  %v6766_v29 = vpop.f32.mrb[251].mxu1  ;;  %v6959_v22 = vmax.f32 %v6761_v50, 0.0 }
 0xa22   :  { %v6767_v39 = vadd.f32 %v6766_v29, %v13658_v49  ;;  %v6960_v30 = vmax.f32 %v6763_v31, 0.0 }
 0xa23   :  { %v6961_v52 = vmax.f32 %v6765_v6, 0.0  ;;  %7459 = vmatmul.mubr.bf16.gmra.mrb[100].mxu1 %v13855_v0 }
 0xa24   :  { %v6962_v8 = vmax.f32 %v6767_v39, 0.0  ;;  %7468 = vmatprep.mubr.bf16.mxu1 %v7072_v16 }
 0xa25   :  { %v13899_v20 = vpack.c.bf16 %v6961_v52, %v6959_v22 }
 0xa26   :  { %v7080_v35 = vpack.c.bf16 %v6962_v8, %v6960_v30  ;;  %v6770_v37 = vpop.f32.mrb[252].mxu1 }
 0xa27   :  { %v6771_v23 = vadd.f32 %v6770_v37, %v13654_v61  ;;  %v6772_v53 = vpop.f32.mrb[253].mxu1 }
 0xa28   :  { %v6773_v33 = vadd.f32 %v6772_v53, %v13658_v49  ;;  %v6774_v24 = vpop.f32.mrb[254].mxu1 }
 0xa29   :  { %v6775_v57 = vadd.f32 %v6774_v24, %v13654_v61  ;;  %v6776_v46 = vpop.f32.mrb[255].mxu1  ;;  %v6963_v4 = vmax.f32 %v6771_v23, 0.0 }
 0xa2a   :  { %v6777_v27 = vadd.f32 %v6776_v46, %v13658_v49  ;;  %v6964_v16 = vmax.f32 %v6773_v33, 0.0 }
 0xa2b   :  { %v6965_v0 = vmax.f32 %v6775_v57, 0.0  ;;  %7469 = vmatmul.mubr.bf16.gmra.mrb[104].mxu1 %v13868_v38 }
 0xa2c   :  { %v6966_v1 = vmax.f32 %v6777_v27, 0.0  ;;  %7478 = vmatprep.mubr.bf16.mxu1 %v7074_v19 }
 0xa2d   :  { %v13906_v15 = vpack.c.bf16 %v6965_v0, %v6963_v4 }
 0xa2e   :  { %v7082_v25 = vpack.c.bf16 %v6966_v1, %v6964_v16  ;;  %v6780_v9 = vpop.f32.mrb[0].mxu1 }
 0xa2f   :  { %v6781_v21 = vadd.f32 %v6780_v9, %v13654_v61  ;;  %v6782_v54 = vpop.f32.mrb[1].mxu1 }
 0xa30   :  { %v6783_v26 = vadd.f32 %v6782_v54, %v13658_v49  ;;  %v6784_v34 = vpop.f32.mrb[2].mxu1 }
 0xa31   :  { %v6785_v43 = vadd.f32 %v6784_v34, %v13654_v61  ;;  %v6786_v45 = vpop.f32.mrb[3].mxu1  ;;  %v6967_v62 = vmax.f32 %v6781_v21, 0.0 }
 0xa32   :  { %v6787_v5 = vadd.f32 %v6786_v45, %v13658_v49  ;;  %v6968_v19 = vmax.f32 %v6783_v26, 0.0 }
 0xa33   :  { %v6969_v38 = vmax.f32 %v6785_v43, 0.0  ;;  %7479 = vmatmul.mubr.bf16.gmra.mrb[108].mxu1 %v13876_v36 }
 0xa34   :  { %v6970_v42 = vmax.f32 %v6787_v5, 0.0  ;;  %7488 = vmatprep.mubr.bf16.mxu1 %v7076_v17 }
 0xa35   :  { %v13913_v2 = vpack.c.bf16 %v6969_v38, %v6967_v62 }
 0xa36   :  { %v7084_v44 = vpack.c.bf16 %v6970_v42, %v6968_v19  ;;  %v6790_v11 = vpop.f32.mrb[4].mxu1 }
 0xa37   :  { %v6791_v55 = vadd.f32 %v6790_v11, %v13654_v61  ;;  %v6792_v47 = vpop.f32.mrb[5].mxu1 }
 0xa38   :  { %v6793_v32 = vadd.f32 %v6792_v47, %v13658_v49  ;;  %v6794_v56 = vpop.f32.mrb[6].mxu1 }
 0xa39   :  { %v6795_v50 = vadd.f32 %v6794_v56, %v13654_v61  ;;  %v6796_v58 = vpop.f32.mrb[7].mxu1  ;;  %v6971_v63 = vmax.f32 %v6791_v55, 0.0 }
 0xa3a   :  { %v6797_v31 = vadd.f32 %v6796_v58, %v13658_v49  ;;  %v6972_v17 = vmax.f32 %v6793_v32, 0.0 }
 0xa3b   :  { %v6973_v36 = vmax.f32 %v6795_v50, 0.0  ;;  %7489 = vmatmul.mubr.bf16.gmra.mrb[112].mxu1 %v13884_v48 }
 0xa3c   :  { %v6974_v6 = vmax.f32 %v6797_v31, 0.0  ;;  %7498 = vmatprep.mubr.bf16.mxu1 %v7078_v60 }
 0xa3d   :  { %v13920_v29 = vpack.c.bf16 %v6973_v36, %v6971_v63 }
 0xa3e   :  { %v7086_v39 = vpack.c.bf16 %v6974_v6, %v6972_v17  ;;  %v6800_v22 = vpop.f32.mrb[8].mxu1 }
 0xa3f   :  { %v6801_v52 = vadd.f32 %v6800_v22, %v13654_v61  ;;  %v6802_v30 = vpop.f32.mrb[9].mxu1 }
 0xa40   :  { %v6803_v8 = vadd.f32 %v6802_v30, %v13658_v49  ;;  %v6804_v37 = vpop.f32.mrb[10].mxu1 }
 0xa41   :  { %v6805_v23 = vadd.f32 %v6804_v37, %v13654_v61  ;;  %v6806_v53 = vpop.f32.mrb[11].mxu1  ;;  %v6975_v24 = vmax.f32 %v6801_v52, 0.0 }
 0xa42   :  { %v6807_v33 = vadd.f32 %v6806_v53, %v13658_v49  ;;  %v6976_v60 = vmax.f32 %v6803_v8, 0.0 }
 0xa43   :  { %v6977_v48 = vmax.f32 %v6805_v23, 0.0  ;;  %7499 = vmatmul.mubr.bf16.gmra.mrb[116].mxu1 %v13892_v12 }
 0xa44   :  { %v6978_v57 = vmax.f32 %v6807_v33, 0.0  ;;  %7508 = vmatprep.mubr.bf16.mxu1 %v7080_v35 }
 0xa45   :  { %v13927_v46 = vpack.c.bf16 %v6977_v48, %v6975_v24 }
 0xa46   :  { %v7088_v27 = vpack.c.bf16 %v6978_v57, %v6976_v60  ;;  %v6810_v4 = vpop.f32.mrb[12].mxu1 }
 0xa47   :  { %v6811_v0 = vadd.f32 %v6810_v4, %v13654_v61  ;;  %v6812_v16 = vpop.f32.mrb[13].mxu1 }
 0xa48   :  { %v6813_v1 = vadd.f32 %v6812_v16, %v13658_v49  ;;  %v6814_v9 = vpop.f32.mrb[14].mxu1 }
 0xa49   :  { %v6815_v21 = vadd.f32 %v6814_v9, %v13654_v61  ;;  %v6816_v54 = vpop.f32.mrb[15].mxu1  ;;  %v6979_v34 = vmax.f32 %v6811_v0, 0.0 }
 0xa4a   :  { %v6817_v26 = vadd.f32 %v6816_v54, %v13658_v49  ;;  %v6980_v35 = vmax.f32 %v6813_v1, 0.0 }
 0xa4b   :  { %v6981_v12 = vmax.f32 %v6815_v21, 0.0  ;;  %7509 = vmatmul.mubr.bf16.gmra.mrb[120].mxu1 %v13899_v20 }
 0xa4c   :  { %v6982_v43 = vmax.f32 %v6817_v26, 0.0  ;;  %7518 = vmatprep.mubr.bf16.mxu1 %v7082_v25 }
 0xa4d   :  { %v13934_v45 = vpack.c.bf16 %v6981_v12, %v6979_v34 }
 0xa4e   :  { %v7090_v5 = vpack.c.bf16 %v6982_v43, %v6980_v35  ;;  %v6820_v62 = vpop.f32.mrb[16].mxu1 }
 0xa4f   :  { %v6821_v38 = vadd.f32 %v6820_v62, %v13654_v61  ;;  %v6822_v19 = vpop.f32.mrb[17].mxu1 }
 0xa50   :  { %v6823_v42 = vadd.f32 %v6822_v19, %v13658_v49  ;;  %v6824_v11 = vpop.f32.mrb[18].mxu1 }
 0xa51   :  { %v6825_v55 = vadd.f32 %v6824_v11, %v13654_v61  ;;  %v6826_v47 = vpop.f32.mrb[19].mxu1  ;;  %v6983_v56 = vmax.f32 %v6821_v38, 0.0 }
 0xa52   :  { %v6827_v32 = vadd.f32 %v6826_v47, %v13658_v49  ;;  %v6984_v25 = vmax.f32 %v6823_v42, 0.0 }
 0xa53   :  { %v6985_v20 = vmax.f32 %v6825_v55, 0.0  ;;  %7519 = vmatmul.mubr.bf16.gmra.mrb[124].mxu1 %v13906_v15 }
 0xa54   :  { %v6986_v50 = vmax.f32 %v6827_v32, 0.0  ;;  %7528 = vmatprep.mubr.bf16.mxu1 %v7084_v44 }
 0xa55   :  { %v13941_v58 = vpack.c.bf16 %v6985_v20, %v6983_v56 }
 0xa56   :  { %v7092_v31 = vpack.c.bf16 %v6986_v50, %v6984_v25  ;;  %v6830_v63 = vpop.f32.mrb[20].mxu1 }
 0xa57   :  { %v6831_v36 = vadd.f32 %v6830_v63, %v13654_v61  ;;  %v6832_v17 = vpop.f32.mrb[21].mxu1 }
 0xa58   :  { %v6833_v6 = vadd.f32 %v6832_v17, %v13658_v49  ;;  %v6834_v22 = vpop.f32.mrb[22].mxu1 }
 0xa59   :  { %v6835_v52 = vadd.f32 %v6834_v22, %v13654_v61  ;;  %v6836_v30 = vpop.f32.mrb[23].mxu1  ;;  %v6987_v37 = vmax.f32 %v6831_v36, 0.0 }
 0xa5a   :  { %v6837_v8 = vadd.f32 %v6836_v30, %v13658_v49  ;;  %v6988_v44 = vmax.f32 %v6833_v6, 0.0 }
 0xa5b   :  { %v6989_v15 = vmax.f32 %v6835_v52, 0.0  ;;  %7529 = vmatmul.mubr.bf16.gmra.mrb[128].mxu1 %v13913_v2 }
 0xa5c   :  { %v6990_v23 = vmax.f32 %v6837_v8, 0.0  ;;  %7538 = vmatprep.mubr.bf16.mxu1 %v7086_v39 }
 0xa5d   :  { %v13948_v53 = vpack.c.bf16 %v6989_v15, %v6987_v37 }
 0xa5e   :  { %v13950_v33 = vpack.c.bf16 %v6990_v23, %v6988_v44  ;;  %v6840_v24 = vpop.f32.mrb[24].mxu1 }
 0xa5f   :  { %v6841_v48 = vadd.f32 %v6840_v24, %v13654_v61  ;;  %v6842_v60 = vpop.f32.mrb[25].mxu1 }
 0xa60   :  { %v6843_v57 = vadd.f32 %v6842_v60, %v13658_v49  ;;  %v6844_v4 = vpop.f32.mrb[26].mxu1 }
 0xa61   :  { %v6845_v0 = vadd.f32 %v6844_v4, %v13654_v61  ;;  %v6846_v16 = vpop.f32.mrb[27].mxu1  ;;  %v6991_v2 = vmax.f32 %v6841_v48, 0.0  ;;  %v9870_v48 = vld [vmem:[%s16049_s3 + $0x10] ss:$8 sm:$0x3] }
 0xa62   :  { %v6847_v1 = vadd.f32 %v6846_v16, %v13658_v49  ;;  %v6992_v39 = vmax.f32 %v6843_v57, 0.0 }
 0xa63   :  { %v6993_v9 = vmax.f32 %v6845_v0, 0.0  ;;  %7539 = vmatmul.mubr.bf16.gmra.mrb[132].mxu1 %v13920_v29  ;;  %v13988_v0 = vrot.slane %v9870_v48, %v11241_v28 }
 0xa64   :  { %v6994_v21 = vmax.f32 %v6847_v1, 0.0  ;;  %7548 = vmatprep.mubr.bf16.mxu1 %v7088_v27 }
 0xa65   :  { %v13957_v54 = vpack.c.bf16 %v6993_v9, %v6991_v2  ;;  %v13992_v2 = vrot.slane %v9870_v48, %v11216_v7 }
 0xa66   :  { %v13959_v26 = vpack.c.bf16 %v6994_v21, %v6992_v39  ;;  %v6850_v34 = vpop.f32.mrb[28].mxu1 }
 0xa67   :  { %v6851_v12 = vadd.f32 %v6850_v34, %v13654_v61  ;;  %v6852_v35 = vpop.f32.mrb[29].mxu1 }
 0xa68   :  { %v6853_v43 = vadd.f32 %v6852_v35, %v13658_v49  ;;  %v6854_v62 = vpop.f32.mrb[30].mxu1 }
 0xa69   :  { %v6855_v38 = vadd.f32 %v6854_v62, %v13654_v61  ;;  %v6856_v19 = vpop.f32.mrb[31].mxu1  ;;  %v6995_v29 = vmax.f32 %v6851_v12, 0.0 }
 0xa6a   :  { %v6857_v42 = vadd.f32 %v6856_v19, %v13658_v49  ;;  %v6996_v27 = vmax.f32 %v6853_v43, 0.0 }
 0xa6b   :  { %v6997_v11 = vmax.f32 %v6855_v38, 0.0  ;;  %7549 = vmatmul.mubr.bf16.gmra.mrb[136].mxu1 %v13927_v46 }
 0xa6c   :  { %v6998_v55 = vmax.f32 %v6857_v42, 0.0  ;;  %7558 = vmatprep.mubr.bf16.mxu1 %v7090_v5 }
 0xa6d   :  { %v13966_v47 = vpack.c.bf16 %v6997_v11, %v6995_v29 }
 0xa6e   :  { %v13968_v32 = vpack.c.bf16 %v6998_v55, %v6996_v27  ;;  %v6860_v56 = vpop.f32.mrb[32].mxu1 }
 0xa6f   :  { %v6861_v20 = vadd.f32 %v6860_v56, %v13654_v61  ;;  %v6862_v25 = vpop.f32.mrb[33].mxu1 }
 0xa70   :  { %v6863_v50 = vadd.f32 %v6862_v25, %v13658_v49  ;;  %v6864_v63 = vpop.f32.mrb[34].mxu1 }
 0xa71   :  { %v6865_v36 = vadd.f32 %v6864_v63, %v13654_v61  ;;  %v6866_v17 = vpop.f32.mrb[35].mxu1  ;;  %v6999_v46 = vmax.f32 %v6861_v20, 0.0 }
 0xa72   :  { %v6867_v6 = vadd.f32 %v6866_v17, %v13658_v49  ;;  %v7000_v5 = vmax.f32 %v6863_v50, 0.0 }
 0xa73   :  { %v7001_v22 = vmax.f32 %v6865_v36, 0.0  ;;  %7559 = vmatmul.mubr.bf16.gmra.mrb[140].mxu1 %v13934_v45 }
 0xa74   :  { %v7002_v52 = vmax.f32 %v6867_v6, 0.0  ;;  %7568 = vmatprep.mubr.bf16.mxu1 %v7092_v31 }
 0xa75   :  { %v13975_v30 = vpack.c.bf16 %v7001_v22, %v6999_v46 }
 0xa76   :  { %v13977_v8 = vpack.c.bf16 %v7002_v52, %v7000_v5  ;;  %v6870_v37 = vpop.f32.mrb[36].mxu1 }
 0xa77   :  { %v6871_v15 = vadd.f32 %v6870_v37, %v13654_v61  ;;  %v6872_v44 = vpop.f32.mrb[37].mxu1 }
 0xa78   :  { %v6873_v23 = vadd.f32 %v6872_v44, %v13658_v49  ;;  %v6874_v24 = vpop.f32.mrb[38].mxu1 }
 0xa79   :  { %v6875_v45 = vadd.f32 %v6874_v24, %v13654_v61  ;;  %v6876_v60 = vpop.f32.mrb[39].mxu1  ;;  %v7003_v57 = vmax.f32 %v6871_v15, 0.0 }
 0xa7a   :  { %v6877_v31 = vadd.f32 %v6876_v60, %v13658_v49  ;;  %v7004_v16 = vmax.f32 %v6873_v23, 0.0 }
 0xa7b   :  { %v7005_v4 = vmax.f32 %v6875_v45, 0.0  ;;  %7569 = vmatmul.mubr.bf16.gmra.mrb[144].mxu1 %v13941_v58 }
 0xa7c   :  { %v7006_v1 = vmax.f32 %v6877_v31, 0.0  ;;  %7578 = vmatprep.mubr.bf16.mxu1 %v13950_v33 }
 0xa7d   :  { %v13994_v9 = vpack.c.bf16 %v7005_v4, %v7003_v57 }
 0xa7e   :  { %v13996_v61 = vpack.c.bf16 %v7006_v1, %v7004_v16  ;;  %v7310_v39 = vpop.f32.mrb[40].mxu1 }
 0xa7f   :  { %v7311_v49 = vadd.f32 %v7310_v39, %v13988_v0  ;;  %v7312_v21 = vpop.f32.mrb[41].mxu1 }
 0xa80   :  { %v7313_v58 = vadd.f32 %v7312_v21, %v13992_v2  ;;  %v7314_v34 = vpop.f32.mrb[42].mxu1 }
 0xa81   :  { %v7315_v28 = vadd.f32 %v7314_v34, %v13988_v0  ;;  %v7316_v12 = vpop.f32.mrb[43].mxu1  ;;  %v7629_v33 = vmax.f32 %v7311_v49, 0.0 }
 0xa82   :  { %v7317_v35 = vadd.f32 %v7316_v12, %v13992_v2  ;;  %v7630_v7 = vmax.f32 %v7313_v58, 0.0 }
 0xa83   :  { %v7631_v43 = vmax.f32 %v7315_v28, 0.0  ;;  %7579 = vmatmul.mubr.bf16.gmra.mrb[148].mxu1 %v13948_v53 }
 0xa84   :  { %v7632_v62 = vmax.f32 %v7317_v35, 0.0  ;;  %7588 = vmatprep.mubr.bf16.mxu1 %v13959_v26 }
 0xa85   :  { %v7789_v38 = vpack.c.bf16 %v7631_v43, %v7629_v33 }
 0xa86   :  { %v7790_v19 = vpack.c.bf16 %v7632_v62, %v7630_v7  ;;  %v7320_v42 = vpop.f32.mrb[44].mxu1 }
 0xa87   :  { %v7321_v29 = vadd.f32 %v7320_v42, %v13988_v0  ;;  %v7322_v11 = vpop.f32.mrb[45].mxu1 }
 0xa88   :  { %v7323_v27 = vadd.f32 %v7322_v11, %v13992_v2  ;;  %v7324_v55 = vpop.f32.mrb[46].mxu1  ;;  %7981 = vmatprep.mubr.bf16.mxu0 %v7790_v19 }
 0xa89   :  { %v7325_v56 = vadd.f32 %v7324_v55, %v13988_v0  ;;  %v7326_v20 = vpop.f32.mrb[47].mxu1  ;;  %7982 = vmatmul.mubr.bf16.vlgmr.msra.gmra.mrb[152].mxu0 %v7789_v38  ;;  %v7633_v25 = vmax.f32 %v7321_v29, 0.0 }
 0xa8a   :  { %v7327_v53 = vadd.f32 %v7326_v20, %v13992_v2  ;;  %v7634_v26 = vmax.f32 %v7323_v27, 0.0 }
 0xa8b   :  { %v7635_v50 = vmax.f32 %v7325_v56, 0.0  ;;  %7589 = vmatmul.mubr.bf16.gmra.mrb[152].mxu1 %v13957_v54 }
 0xa8c   :  { %v7636_v63 = vmax.f32 %v7327_v53, 0.0  ;;  %7598 = vmatprep.mubr.bf16.mxu1 %v13968_v32 }
 0xa8d   :  { %v7791_v36 = vpack.c.bf16 %v7635_v50, %v7633_v25 }
 0xa8e   :  { %v7792_v17 = vpack.c.bf16 %v7636_v63, %v7634_v26  ;;  %v7330_v6 = vpop.f32.mrb[48].mxu1 }
 0xa8f   :  { %v7331_v46 = vadd.f32 %v7330_v6, %v13988_v0  ;;  %v7332_v22 = vpop.f32.mrb[49].mxu1 }
 0xa90   :  { %v7333_v5 = vadd.f32 %v7332_v22, %v13992_v2  ;;  %v7334_v52 = vpop.f32.mrb[50].mxu1  ;;  %7989 = vmatprep.mubr.bf16.mxu0 %v7792_v17 }
 0xa91   :  { %v7335_v37 = vadd.f32 %v7334_v52, %v13988_v0  ;;  %v7336_v15 = vpop.f32.mrb[51].mxu1  ;;  %7990 = vmatmul.mubr.bf16.gmra.mrb[156].mxu0 %v7791_v36  ;;  %v7637_v44 = vmax.f32 %v7331_v46, 0.0 }
 0xa92   :  { %v7337_v54 = vadd.f32 %v7336_v15, %v13992_v2  ;;  %v7638_v32 = vmax.f32 %v7333_v5, 0.0 }
 0xa93   :  { %v7639_v23 = vmax.f32 %v7335_v37, 0.0  ;;  %7599 = vmatmul.mubr.bf16.gmra.mrb[156].mxu1 %v13966_v47 }
 0xa94   :  { %v7640_v24 = vmax.f32 %v7337_v54, 0.0  ;;  %7608 = vmatprep.mubr.bf16.mxu1 %v13977_v8 }
 0xa95   :  { %v7793_v48 = vpack.c.bf16 %v7639_v23, %v7637_v44 }
 0xa96   :  { %v7794_v45 = vpack.c.bf16 %v7640_v24, %v7638_v32  ;;  %v7340_v60 = vpop.f32.mrb[52].mxu1 }
 0xa97   :  { %v7341_v31 = vadd.f32 %v7340_v60, %v13988_v0  ;;  %v7342_v57 = vpop.f32.mrb[53].mxu1 }
 0xa98   :  { %v7343_v4 = vadd.f32 %v7342_v57, %v13992_v2  ;;  %v7344_v16 = vpop.f32.mrb[54].mxu1  ;;  %7997 = vmatprep.mubr.bf16.mxu0 %v7794_v45 }
 0xa99   :  { %v7345_v1 = vadd.f32 %v7344_v16, %v13988_v0  ;;  %v7346_v39 = vpop.f32.mrb[55].mxu1  ;;  %7998 = vmatmul.mubr.bf16.gmra.mrb[160].mxu0 %v7793_v48  ;;  %v7641_v49 = vmax.f32 %v7341_v31, 0.0 }
 0xa9a   :  { %v7347_v47 = vadd.f32 %v7346_v39, %v13992_v2  ;;  %v7642_v8 = vmax.f32 %v7343_v4, 0.0 }
 0xa9b   :  { %v7643_v21 = vmax.f32 %v7345_v1, 0.0  ;;  %7609 = vmatmul.mubr.bf16.gmra.mrb[160].mxu1 %v13975_v30 }
 0xa9c   :  { %v7644_v58 = vmax.f32 %v7347_v47, 0.0  ;;  %7618 = vmatprep.mubr.bf16.mxu1 %v13996_v61 }
 0xa9d   :  { %v7795_v34 = vpack.c.bf16 %v7643_v21, %v7641_v49 }
 0xa9e   :  { %v7796_v28 = vpack.c.bf16 %v7644_v58, %v7642_v8  ;;  %v7350_v12 = vpop.f32.mrb[56].mxu1 }
 0xa9f   :  { %v7351_v35 = vadd.f32 %v7350_v12, %v13988_v0  ;;  %v7352_v33 = vpop.f32.mrb[57].mxu1 }
 0xaa0   :  { %v7353_v43 = vadd.f32 %v7352_v33, %v13992_v2  ;;  %v7354_v7 = vpop.f32.mrb[58].mxu1  ;;  %8005 = vmatprep.mubr.bf16.mxu0 %v7796_v28 }
 0xaa1   :  { %v7355_v62 = vadd.f32 %v7354_v7, %v13988_v0  ;;  %v7356_v38 = vpop.f32.mrb[59].mxu1  ;;  %8006 = vmatmul.mubr.bf16.gmra.mrb[164].mxu0 %v7795_v34  ;;  %v7645_v19 = vmax.f32 %v7351_v35, 0.0 }
 0xaa2   :  { %v7357_v30 = vadd.f32 %v7356_v38, %v13992_v2  ;;  %v7646_v61 = vmax.f32 %v7353_v43, 0.0 }
 0xaa3   :  { %v7647_v42 = vmax.f32 %v7355_v62, 0.0  ;;  %7619 = vmatmul.mubr.bf16.gmra.mrb[164].mxu1 %v13994_v9 }
 0xaa4   :  { %v7648_v29 = vmax.f32 %v7357_v30, 0.0 }
 0xaa5   :  { %v7797_v11 = vpack.c.bf16 %v7647_v42, %v7645_v19 }
 0xaa6   :  { %v7798_v27 = vpack.c.bf16 %v7648_v29, %v7646_v61  ;;  %v7360_v55 = vpop.f32.mrb[60].mxu1 }
 0xaa7   :  { %v7361_v56 = vadd.f32 %v7360_v55, %v13988_v0  ;;  %v7362_v20 = vpop.f32.mrb[61].mxu1 }
 0xaa8   :  { %v7363_v53 = vadd.f32 %v7362_v20, %v13992_v2  ;;  %v7364_v25 = vpop.f32.mrb[62].mxu1  ;;  %8013 = vmatprep.mubr.bf16.mxu0 %v7798_v27 }
 0xaa9   :  { %v7365_v50 = vadd.f32 %v7364_v25, %v13988_v0  ;;  %v7366_v26 = vpop.f32.mrb[63].mxu1  ;;  %8014 = vmatmul.mubr.bf16.gmra.mrb[168].mxu0 %v7797_v11  ;;  %v7649_v36 = vmax.f32 %v7361_v56, 0.0 }
 0xaaa   :  { %v7367_v63 = vadd.f32 %v7366_v26, %v13992_v2  ;;  %v7650_v17 = vmax.f32 %v7363_v53, 0.0 }
 0xaab   :  { %v7651_v9 = vmax.f32 %v7365_v50, 0.0 }
 0xaac   :  { %v7652_v6 = vmax.f32 %v7367_v63, 0.0 }
 0xaad   :  { %v7799_v46 = vpack.c.bf16 %v7651_v9, %v7649_v36 }
 0xaae   :  { %v7800_v22 = vpack.c.bf16 %v7652_v6, %v7650_v17  ;;  %v7370_v5 = vpop.f32.mrb[64].mxu1 }
 0xaaf   :  { %v7371_v52 = vadd.f32 %v7370_v5, %v13988_v0  ;;  %v7372_v37 = vpop.f32.mrb[65].mxu1 }
 0xab0   :  { %v7373_v15 = vadd.f32 %v7372_v37, %v13992_v2  ;;  %v7374_v54 = vpop.f32.mrb[66].mxu1  ;;  %8021 = vmatprep.mubr.bf16.mxu0 %v7800_v22 }
 0xab1   :  { %v7375_v44 = vadd.f32 %v7374_v54, %v13988_v0  ;;  %v7376_v23 = vpop.f32.mrb[67].mxu1  ;;  %8022 = vmatmul.mubr.bf16.gmra.mrb[172].mxu0 %v7799_v46  ;;  %v7653_v24 = vmax.f32 %v7371_v52, 0.0 }
 0xab2   :  { %v7377_v32 = vadd.f32 %v7376_v23, %v13992_v2  ;;  %v7654_v45 = vmax.f32 %v7373_v15, 0.0 }
 0xab3   :  { %v7655_v48 = vmax.f32 %v7375_v44, 0.0 }
 0xab4   :  { %v7656_v60 = vmax.f32 %v7377_v32, 0.0 }
 0xab5   :  { %v7801_v31 = vpack.c.bf16 %v7655_v48, %v7653_v24 }
 0xab6   :  { %v7802_v57 = vpack.c.bf16 %v7656_v60, %v7654_v45  ;;  %v7380_v4 = vpop.f32.mrb[68].mxu1 }
 0xab7   :  { %v7381_v16 = vadd.f32 %v7380_v4, %v13988_v0  ;;  %v7382_v1 = vpop.f32.mrb[69].mxu1 }
 0xab8   :  { %v7383_v39 = vadd.f32 %v7382_v1, %v13992_v2  ;;  %v7384_v47 = vpop.f32.mrb[70].mxu1  ;;  %8029 = vmatprep.mubr.bf16.mxu0 %v7802_v57 }
 0xab9   :  { %v7385_v49 = vadd.f32 %v7384_v47, %v13988_v0  ;;  %v7386_v21 = vpop.f32.mrb[71].mxu1  ;;  %8030 = vmatmul.mubr.bf16.gmra.mrb[176].mxu0 %v7801_v31  ;;  %v7657_v58 = vmax.f32 %v7381_v16, 0.0 }
 0xaba   :  { %v7387_v8 = vadd.f32 %v7386_v21, %v13992_v2  ;;  %v7658_v28 = vmax.f32 %v7383_v39, 0.0 }
 0xabb   :  { %v7659_v34 = vmax.f32 %v7385_v49, 0.0 }
 0xabc   :  { %v7660_v12 = vmax.f32 %v7387_v8, 0.0 }
 0xabd   :  { %v7803_v35 = vpack.c.bf16 %v7659_v34, %v7657_v58 }
 0xabe   :  { %v7804_v33 = vpack.c.bf16 %v7660_v12, %v7658_v28  ;;  %v7390_v43 = vpop.f32.mrb[72].mxu1 }
 0xabf   :  { %v7391_v7 = vadd.f32 %v7390_v43, %v13988_v0  ;;  %v7392_v62 = vpop.f32.mrb[73].mxu1 }
 0xac0   :  { %v7393_v38 = vadd.f32 %v7392_v62, %v13992_v2  ;;  %v7394_v30 = vpop.f32.mrb[74].mxu1  ;;  %8037 = vmatprep.mubr.bf16.mxu0 %v7804_v33 }
 0xac1   :  { %v7395_v19 = vadd.f32 %v7394_v30, %v13988_v0  ;;  %v7396_v42 = vpop.f32.mrb[75].mxu1  ;;  %8038 = vmatmul.mubr.bf16.gmra.mrb[180].mxu0 %v7803_v35  ;;  %v7661_v29 = vmax.f32 %v7391_v7, 0.0 }
 0xac2   :  { %v7397_v61 = vadd.f32 %v7396_v42, %v13992_v2  ;;  %v7662_v27 = vmax.f32 %v7393_v38, 0.0 }
 0xac3   :  { %v7663_v11 = vmax.f32 %v7395_v19, 0.0 }
 0xac4   :  { %v7664_v55 = vmax.f32 %v7397_v61, 0.0 }
 0xac5   :  { %v7805_v56 = vpack.c.bf16 %v7663_v11, %v7661_v29 }
 0xac6   :  { %v7806_v20 = vpack.c.bf16 %v7664_v55, %v7662_v27  ;;  %v7400_v53 = vpop.f32.mrb[76].mxu1 }
 0xac7   :  { %v7401_v25 = vadd.f32 %v7400_v53, %v13988_v0  ;;  %v7402_v50 = vpop.f32.mrb[77].mxu1 }
 0xac8   :  { %v7403_v26 = vadd.f32 %v7402_v50, %v13992_v2  ;;  %v7404_v63 = vpop.f32.mrb[78].mxu1  ;;  %8045 = vmatprep.mubr.bf16.mxu0 %v7806_v20 }
 0xac9   :  { %v7405_v36 = vadd.f32 %v7404_v63, %v13988_v0  ;;  %v7406_v9 = vpop.f32.mrb[79].mxu1  ;;  %8046 = vmatmul.mubr.bf16.gmra.mrb[184].mxu0 %v7805_v56  ;;  %v7665_v6 = vmax.f32 %v7401_v25, 0.0 }
 0xaca   :  { %v7407_v17 = vadd.f32 %v7406_v9, %v13992_v2  ;;  %v7666_v22 = vmax.f32 %v7403_v26, 0.0 }
 0xacb   :  { %v7667_v46 = vmax.f32 %v7405_v36, 0.0 }
 0xacc   :  { %v7668_v5 = vmax.f32 %v7407_v17, 0.0 }
 0xacd   :  { %v7807_v52 = vpack.c.bf16 %v7667_v46, %v7665_v6 }
 0xace   :  { %v7808_v37 = vpack.c.bf16 %v7668_v5, %v7666_v22  ;;  %v7410_v15 = vpop.f32.mrb[80].mxu1 }
 0xacf   :  { %v7411_v54 = vadd.f32 %v7410_v15, %v13988_v0  ;;  %v7412_v44 = vpop.f32.mrb[81].mxu1 }
 0xad0   :  { %v7413_v23 = vadd.f32 %v7412_v44, %v13992_v2  ;;  %v7414_v32 = vpop.f32.mrb[82].mxu1  ;;  %8053 = vmatprep.mubr.bf16.mxu0 %v7808_v37 }
 0xad1   :  { %v7415_v24 = vadd.f32 %v7414_v32, %v13988_v0  ;;  %v7416_v48 = vpop.f32.mrb[83].mxu1  ;;  %8054 = vmatmul.mubr.bf16.gmra.mrb[188].mxu0 %v7807_v52  ;;  %v7669_v60 = vmax.f32 %v7411_v54, 0.0 }
 0xad2   :  { %v7417_v45 = vadd.f32 %v7416_v48, %v13992_v2  ;;  %v7670_v57 = vmax.f32 %v7413_v23, 0.0 }
 0xad3   :  { %v7671_v31 = vmax.f32 %v7415_v24, 0.0 }
 0xad4   :  { %v7672_v4 = vmax.f32 %v7417_v45, 0.0 }
 0xad5   :  { %v7809_v16 = vpack.c.bf16 %v7671_v31, %v7669_v60 }
 0xad6   :  { %v7810_v1 = vpack.c.bf16 %v7672_v4, %v7670_v57  ;;  %v7420_v39 = vpop.f32.mrb[84].mxu1 }
 0xad7   :  { %v7421_v47 = vadd.f32 %v7420_v39, %v13988_v0  ;;  %v7422_v49 = vpop.f32.mrb[85].mxu1 }
 0xad8   :  { %v7423_v21 = vadd.f32 %v7422_v49, %v13992_v2  ;;  %v7424_v8 = vpop.f32.mrb[86].mxu1  ;;  %8061 = vmatprep.mubr.bf16.mxu0 %v7810_v1 }
 0xad9   :  { %v7425_v58 = vadd.f32 %v7424_v8, %v13988_v0  ;;  %v7426_v34 = vpop.f32.mrb[87].mxu1  ;;  %8062 = vmatmul.mubr.bf16.gmra.mrb[192].mxu0 %v7809_v16  ;;  %v7673_v12 = vmax.f32 %v7421_v47, 0.0 }
 0xada   :  { %v7427_v28 = vadd.f32 %v7426_v34, %v13992_v2  ;;  %v7674_v33 = vmax.f32 %v7423_v21, 0.0 }
 0xadb   :  { %v7675_v35 = vmax.f32 %v7425_v58, 0.0 }
 0xadc   :  { %v7676_v43 = vmax.f32 %v7427_v28, 0.0 }
 0xadd   :  { %v7811_v7 = vpack.c.bf16 %v7675_v35, %v7673_v12 }
 0xade   :  { %v7812_v62 = vpack.c.bf16 %v7676_v43, %v7674_v33  ;;  %v7430_v38 = vpop.f32.mrb[88].mxu1 }
 0xadf   :  { %v7431_v30 = vadd.f32 %v7430_v38, %v13988_v0  ;;  %v7432_v19 = vpop.f32.mrb[89].mxu1 }
 0xae0   :  { %v7433_v42 = vadd.f32 %v7432_v19, %v13992_v2  ;;  %v7434_v61 = vpop.f32.mrb[90].mxu1  ;;  %8069 = vmatprep.mubr.bf16.mxu0 %v7812_v62 }
 0xae1   :  { %v7435_v29 = vadd.f32 %v7434_v61, %v13988_v0  ;;  %v7436_v11 = vpop.f32.mrb[91].mxu1  ;;  %8070 = vmatmul.mubr.bf16.gmra.mrb[196].mxu0 %v7811_v7  ;;  %v7677_v55 = vmax.f32 %v7431_v30, 0.0 }
 0xae2   :  { %v7437_v27 = vadd.f32 %v7436_v11, %v13992_v2  ;;  %v7678_v20 = vmax.f32 %v7433_v42, 0.0 }
 0xae3   :  { %v7679_v56 = vmax.f32 %v7435_v29, 0.0 }
 0xae4   :  { %v7680_v53 = vmax.f32 %v7437_v27, 0.0 }
 0xae5   :  { %v7813_v25 = vpack.c.bf16 %v7679_v56, %v7677_v55 }
 0xae6   :  { %v7814_v50 = vpack.c.bf16 %v7680_v53, %v7678_v20  ;;  %v7440_v26 = vpop.f32.mrb[92].mxu1 }
 0xae7   :  { %v7441_v63 = vadd.f32 %v7440_v26, %v13988_v0  ;;  %v7442_v36 = vpop.f32.mrb[93].mxu1 }
 0xae8   :  { %v7443_v9 = vadd.f32 %v7442_v36, %v13992_v2  ;;  %v7444_v17 = vpop.f32.mrb[94].mxu1  ;;  %8077 = vmatprep.mubr.bf16.mxu0 %v7814_v50 }
 0xae9   :  { %v7445_v6 = vadd.f32 %v7444_v17, %v13988_v0  ;;  %v7446_v46 = vpop.f32.mrb[95].mxu1  ;;  %8078 = vmatmul.mubr.bf16.gmra.mrb[200].mxu0 %v7813_v25  ;;  %v7681_v5 = vmax.f32 %v7441_v63, 0.0 }
 0xaea   :  { %v7447_v22 = vadd.f32 %v7446_v46, %v13992_v2  ;;  %v7682_v37 = vmax.f32 %v7443_v9, 0.0 }
 0xaeb   :  { %v7683_v52 = vmax.f32 %v7445_v6, 0.0 }
 0xaec   :  { %v7684_v15 = vmax.f32 %v7447_v22, 0.0 }
 0xaed   :  { %v7815_v54 = vpack.c.bf16 %v7683_v52, %v7681_v5 }
 0xaee   :  { %v7816_v44 = vpack.c.bf16 %v7684_v15, %v7682_v37  ;;  %v7450_v23 = vpop.f32.mrb[96].mxu1 }
 0xaef   :  { %v7451_v32 = vadd.f32 %v7450_v23, %v13988_v0  ;;  %v7452_v24 = vpop.f32.mrb[97].mxu1 }
 0xaf0   :  { %v7453_v48 = vadd.f32 %v7452_v24, %v13992_v2  ;;  %v7454_v45 = vpop.f32.mrb[98].mxu1  ;;  %8085 = vmatprep.mubr.bf16.mxu0 %v7816_v44 }
 0xaf1   :  { %v7455_v60 = vadd.f32 %v7454_v45, %v13988_v0  ;;  %v7456_v31 = vpop.f32.mrb[99].mxu1  ;;  %8086 = vmatmul.mubr.bf16.gmra.mrb[204].mxu0 %v7815_v54  ;;  %v7685_v4 = vmax.f32 %v7451_v32, 0.0 }
 0xaf2   :  { %v7457_v57 = vadd.f32 %v7456_v31, %v13992_v2  ;;  %v7686_v1 = vmax.f32 %v7453_v48, 0.0 }
 0xaf3   :  { %v7687_v16 = vmax.f32 %v7455_v60, 0.0 }
 0xaf4   :  { %v7688_v39 = vmax.f32 %v7457_v57, 0.0 }
 0xaf5   :  { %v7817_v47 = vpack.c.bf16 %v7687_v16, %v7685_v4 }
 0xaf6   :  { %v7818_v49 = vpack.c.bf16 %v7688_v39, %v7686_v1  ;;  %v7460_v21 = vpop.f32.mrb[100].mxu1 }
 0xaf7   :  { %v7461_v8 = vadd.f32 %v7460_v21, %v13988_v0  ;;  %v7462_v58 = vpop.f32.mrb[101].mxu1 }
 0xaf8   :  { %v7463_v34 = vadd.f32 %v7462_v58, %v13992_v2  ;;  %v7464_v28 = vpop.f32.mrb[102].mxu1  ;;  %8093 = vmatprep.mubr.bf16.mxu0 %v7818_v49 }
 0xaf9   :  { %v7465_v12 = vadd.f32 %v7464_v28, %v13988_v0  ;;  %v7466_v35 = vpop.f32.mrb[103].mxu1  ;;  %8094 = vmatmul.mubr.bf16.gmra.mrb[208].mxu0 %v7817_v47  ;;  %v7689_v43 = vmax.f32 %v7461_v8, 0.0 }
 0xafa   :  { %v7467_v33 = vadd.f32 %v7466_v35, %v13992_v2  ;;  %v7690_v62 = vmax.f32 %v7463_v34, 0.0 }
 0xafb   :  { %v7691_v7 = vmax.f32 %v7465_v12, 0.0 }
 0xafc   :  { %v7692_v38 = vmax.f32 %v7467_v33, 0.0 }
 0xafd   :  { %v7819_v30 = vpack.c.bf16 %v7691_v7, %v7689_v43 }
 0xafe   :  { %v7820_v19 = vpack.c.bf16 %v7692_v38, %v7690_v62  ;;  %v7470_v42 = vpop.f32.mrb[104].mxu1 }
 0xaff   :  { %v7471_v61 = vadd.f32 %v7470_v42, %v13988_v0  ;;  %v7472_v29 = vpop.f32.mrb[105].mxu1 }
 0xb00   :  { %v7473_v11 = vadd.f32 %v7472_v29, %v13992_v2  ;;  %v7474_v27 = vpop.f32.mrb[106].mxu1  ;;  %8101 = vmatprep.mubr.bf16.mxu0 %v7820_v19 }
 0xb01   :  { %v7475_v55 = vadd.f32 %v7474_v27, %v13988_v0  ;;  %v7476_v56 = vpop.f32.mrb[107].mxu1  ;;  %8102 = vmatmul.mubr.bf16.gmra.mrb[212].mxu0 %v7819_v30  ;;  %v7693_v53 = vmax.f32 %v7471_v61, 0.0 }
 0xb02   :  { %v7477_v20 = vadd.f32 %v7476_v56, %v13992_v2  ;;  %v7694_v50 = vmax.f32 %v7473_v11, 0.0 }
 0xb03   :  { %v7695_v25 = vmax.f32 %v7475_v55, 0.0 }
 0xb04   :  { %v7696_v26 = vmax.f32 %v7477_v20, 0.0 }
 0xb05   :  { %v7821_v63 = vpack.c.bf16 %v7695_v25, %v7693_v53 }
 0xb06   :  { %v7822_v36 = vpack.c.bf16 %v7696_v26, %v7694_v50  ;;  %v7480_v9 = vpop.f32.mrb[108].mxu1 }
 0xb07   :  { %v7481_v17 = vadd.f32 %v7480_v9, %v13988_v0  ;;  %v7482_v6 = vpop.f32.mrb[109].mxu1 }
 0xb08   :  { %v7483_v46 = vadd.f32 %v7482_v6, %v13992_v2  ;;  %v7484_v22 = vpop.f32.mrb[110].mxu1  ;;  %8109 = vmatprep.mubr.bf16.mxu0 %v7822_v36 }
 0xb09   :  { %v7485_v5 = vadd.f32 %v7484_v22, %v13988_v0  ;;  %v7486_v52 = vpop.f32.mrb[111].mxu1  ;;  %8110 = vmatmul.mubr.bf16.gmra.mrb[216].mxu0 %v7821_v63  ;;  %v7697_v15 = vmax.f32 %v7481_v17, 0.0 }
 0xb0a   :  { %v7487_v37 = vadd.f32 %v7486_v52, %v13992_v2  ;;  %v7698_v44 = vmax.f32 %v7483_v46, 0.0 }
 0xb0b   :  { %v7699_v54 = vmax.f32 %v7485_v5, 0.0 }
 0xb0c   :  { %v7700_v23 = vmax.f32 %v7487_v37, 0.0 }
 0xb0d   :  { %v7823_v32 = vpack.c.bf16 %v7699_v54, %v7697_v15 }
 0xb0e   :  { %v7824_v24 = vpack.c.bf16 %v7700_v23, %v7698_v44  ;;  %v7490_v48 = vpop.f32.mrb[112].mxu1 }
 0xb0f   :  { %v7491_v45 = vadd.f32 %v7490_v48, %v13988_v0  ;;  %v7492_v60 = vpop.f32.mrb[113].mxu1 }
 0xb10   :  { %v7493_v31 = vadd.f32 %v7492_v60, %v13992_v2  ;;  %v7494_v57 = vpop.f32.mrb[114].mxu1  ;;  %8117 = vmatprep.mubr.bf16.mxu0 %v7824_v24 }
 0xb11   :  { %v7495_v4 = vadd.f32 %v7494_v57, %v13988_v0  ;;  %v7496_v16 = vpop.f32.mrb[115].mxu1  ;;  %8118 = vmatmul.mubr.bf16.gmra.mrb[220].mxu0 %v7823_v32  ;;  %v7701_v39 = vmax.f32 %v7491_v45, 0.0 }
 0xb12   :  { %v7497_v1 = vadd.f32 %v7496_v16, %v13992_v2  ;;  %v7702_v49 = vmax.f32 %v7493_v31, 0.0 }
 0xb13   :  { %v7703_v47 = vmax.f32 %v7495_v4, 0.0 }
 0xb14   :  { %v7704_v21 = vmax.f32 %v7497_v1, 0.0 }
 0xb15   :  { %v7825_v8 = vpack.c.bf16 %v7703_v47, %v7701_v39 }
 0xb16   :  { %v7826_v58 = vpack.c.bf16 %v7704_v21, %v7702_v49  ;;  %v7500_v34 = vpop.f32.mrb[116].mxu1 }
 0xb17   :  { %v7501_v28 = vadd.f32 %v7500_v34, %v13988_v0  ;;  %v7502_v12 = vpop.f32.mrb[117].mxu1 }
 0xb18   :  { %v7503_v35 = vadd.f32 %v7502_v12, %v13992_v2  ;;  %v7504_v33 = vpop.f32.mrb[118].mxu1  ;;  %8125 = vmatprep.mubr.bf16.mxu0 %v7826_v58 }
 0xb19   :  { %v7505_v43 = vadd.f32 %v7504_v33, %v13988_v0  ;;  %v7506_v7 = vpop.f32.mrb[119].mxu1  ;;  %8126 = vmatmul.mubr.bf16.gmra.mrb[224].mxu0 %v7825_v8  ;;  %v7705_v38 = vmax.f32 %v7501_v28, 0.0 }
 0xb1a   :  { %v7507_v62 = vadd.f32 %v7506_v7, %v13992_v2  ;;  %v7706_v19 = vmax.f32 %v7503_v35, 0.0 }
 0xb1b   :  { %v7707_v30 = vmax.f32 %v7505_v43, 0.0 }
 0xb1c   :  { %v7708_v42 = vmax.f32 %v7507_v62, 0.0 }
 0xb1d   :  { %v7827_v61 = vpack.c.bf16 %v7707_v30, %v7705_v38 }
 0xb1e   :  { %v7828_v29 = vpack.c.bf16 %v7708_v42, %v7706_v19  ;;  %v7510_v11 = vpop.f32.mrb[120].mxu1 }
 0xb1f   :  { %v7511_v27 = vadd.f32 %v7510_v11, %v13988_v0  ;;  %v7512_v55 = vpop.f32.mrb[121].mxu1 }
 0xb20   :  { %v7513_v56 = vadd.f32 %v7512_v55, %v13992_v2  ;;  %v7514_v20 = vpop.f32.mrb[122].mxu1  ;;  %8133 = vmatprep.mubr.bf16.mxu0 %v7828_v29 }
 0xb21   :  { %v7515_v53 = vadd.f32 %v7514_v20, %v13988_v0  ;;  %v7516_v25 = vpop.f32.mrb[123].mxu1  ;;  %8134 = vmatmul.mubr.bf16.gmra.mrb[228].mxu0 %v7827_v61  ;;  %v7709_v26 = vmax.f32 %v7511_v27, 0.0 }
 0xb22   :  { %v7517_v50 = vadd.f32 %v7516_v25, %v13992_v2  ;;  %v7710_v36 = vmax.f32 %v7513_v56, 0.0 }
 0xb23   :  { %v7711_v63 = vmax.f32 %v7515_v53, 0.0 }
 0xb24   :  { %v7712_v9 = vmax.f32 %v7517_v50, 0.0 }
 0xb25   :  { %v7829_v17 = vpack.c.bf16 %v7711_v63, %v7709_v26 }
 0xb26   :  { %v7830_v6 = vpack.c.bf16 %v7712_v9, %v7710_v36  ;;  %v7520_v46 = vpop.f32.mrb[124].mxu1 }
 0xb27   :  { %v7521_v22 = vadd.f32 %v7520_v46, %v13988_v0  ;;  %v7522_v5 = vpop.f32.mrb[125].mxu1 }
 0xb28   :  { %v7523_v52 = vadd.f32 %v7522_v5, %v13992_v2  ;;  %v7524_v37 = vpop.f32.mrb[126].mxu1  ;;  %8141 = vmatprep.mubr.bf16.mxu0 %v7830_v6 }
 0xb29   :  { %v7525_v15 = vadd.f32 %v7524_v37, %v13988_v0  ;;  %v7526_v54 = vpop.f32.mrb[127].mxu1  ;;  %8142 = vmatmul.mubr.bf16.gmra.mrb[232].mxu0 %v7829_v17  ;;  %v7713_v23 = vmax.f32 %v7521_v22, 0.0 }
 0xb2a   :  { %v7527_v44 = vadd.f32 %v7526_v54, %v13992_v2  ;;  %v7714_v24 = vmax.f32 %v7523_v52, 0.0 }
 0xb2b   :  { %v7715_v32 = vmax.f32 %v7525_v15, 0.0 }
 0xb2c   :  { %v7716_v48 = vmax.f32 %v7527_v44, 0.0 }
 0xb2d   :  { %v7831_v45 = vpack.c.bf16 %v7715_v32, %v7713_v23 }
 0xb2e   :  { %v7832_v60 = vpack.c.bf16 %v7716_v48, %v7714_v24  ;;  %v7530_v31 = vpop.f32.mrb[128].mxu1 }
 0xb2f   :  { %v7531_v57 = vadd.f32 %v7530_v31, %v13988_v0  ;;  %v7532_v4 = vpop.f32.mrb[129].mxu1 }
 0xb30   :  { %v7533_v16 = vadd.f32 %v7532_v4, %v13992_v2  ;;  %v7534_v1 = vpop.f32.mrb[130].mxu1  ;;  %8149 = vmatprep.mubr.bf16.mxu0 %v7832_v60 }
 0xb31   :  { %v7535_v39 = vadd.f32 %v7534_v1, %v13988_v0  ;;  %v7536_v47 = vpop.f32.mrb[131].mxu1  ;;  %8150 = vmatmul.mubr.bf16.gmra.mrb[236].mxu0 %v7831_v45  ;;  %v7717_v21 = vmax.f32 %v7531_v57, 0.0 }
 0xb32   :  { %v7537_v49 = vadd.f32 %v7536_v47, %v13992_v2  ;;  %v7718_v58 = vmax.f32 %v7533_v16, 0.0 }
 0xb33   :  { %v7719_v8 = vmax.f32 %v7535_v39, 0.0 }
 0xb34   :  { %v7720_v34 = vmax.f32 %v7537_v49, 0.0 }
 0xb35   :  { %v7833_v28 = vpack.c.bf16 %v7719_v8, %v7717_v21 }
 0xb36   :  { %v7834_v12 = vpack.c.bf16 %v7720_v34, %v7718_v58  ;;  %v7540_v35 = vpop.f32.mrb[132].mxu1 }
 0xb37   :  { %v7541_v33 = vadd.f32 %v7540_v35, %v13988_v0  ;;  %v7542_v43 = vpop.f32.mrb[133].mxu1 }
 0xb38   :  { %v7543_v7 = vadd.f32 %v7542_v43, %v13992_v2  ;;  %v7544_v62 = vpop.f32.mrb[134].mxu1  ;;  %8157 = vmatprep.mubr.bf16.mxu0 %v7834_v12  ;;  %v9330_v43 = vld [vmem:[%s16048_s2] sm:$0xff] }
 0xb39   :  { %v7545_v38 = vadd.f32 %v7544_v62, %v13988_v0  ;;  %v7546_v30 = vpop.f32.mrb[135].mxu1  ;;  %8158 = vmatmul.mubr.bf16.gmra.mrb[240].mxu0 %v7833_v28  ;;  %v7721_v42 = vmax.f32 %v7541_v33, 0.0  ;;  %v9332_v33 = vld [vmem:[%s16048_s2 + $0x10] sm:$0xff]  ;;  %v9333_v62 = vld [vmem:[%s16048_s2 + $0x18] sm:$0xff] }
 0xb3a   :  { %v7547_v19 = vadd.f32 %v7546_v30, %v13992_v2  ;;  %v7722_v29 = vmax.f32 %v7543_v7, 0.0  ;;  %v9336_v30 = vld [vmem:[%s16048_s2 + $0x30] sm:$0xff] }
 0xb3b   :  { %v7723_v61 = vmax.f32 %v7545_v38, 0.0  ;;  %v9331_v38 = vld [vmem:[%s16048_s2 + $0x8] sm:$0xff] }
 0xb3c   :  { %v7724_v11 = vmax.f32 %v7547_v19, 0.0 }
 0xb3d   :  { %v7835_v27 = vpack.c.bf16 %v7723_v61, %v7721_v42  ;;  %v9334_v61 = vld [vmem:[%s16048_s2 + $0x20] sm:$0xff] }
 0xb3e   :  { %v7836_v55 = vpack.c.bf16 %v7724_v11, %v7722_v29  ;;  %v7550_v56 = vpop.f32.mrb[136].mxu1  ;;  %v9337_v29 = vld [vmem:[%s16048_s2 + $0x38] sm:$0xff]  ;;  %v9335_v11 = vld [vmem:[%s16048_s2 + $0x28] sm:$0xff] }
 0xb3f   :  { %v7551_v20 = vadd.f32 %v7550_v56, %v13988_v0  ;;  %v7552_v53 = vpop.f32.mrb[137].mxu1  ;;  %v14141_v56 = vmul.f32 %v9332_v33, %v12296_v40  ;;  %v16185_v40 = vld [vmem:[#allocation10_spill] sm:$0xff]  ;;  %v16194_v33 = vld [vmem:[#allocation19_spill] sm:$0xff] }
 0xb40   :  { %v7553_v25 = vadd.f32 %v7552_v53, %v13992_v2  ;;  %v7554_v50 = vpop.f32.mrb[138].mxu1  ;;  %8165 = vmatprep.mubr.bf16.mxu0 %v7836_v55  ;;  %v9340_v53 = vld [vmem:[%s16048_s2 + $0x50] sm:$0xff] }
 0xb41   :  { %v7555_v26 = vadd.f32 %v7554_v50, %v13988_v0  ;;  %v7556_v63 = vpop.f32.mrb[139].mxu1  ;;  %8166 = vmatmul.mubr.bf16.gmra.mrb[244].mxu0 %v7835_v27  ;;  %v7725_v9 = vmax.f32 %v7551_v20, 0.0  ;;  %v14144_v20 = vmul.f32 %v9330_v43, %v12302_v18  ;;  %v16186_v18 = vld [vmem:[#allocation11_spill] sm:$0xff] }
 0xb42   :  { %v7557_v36 = vadd.f32 %v7556_v63, %v13992_v2  ;;  %v7726_v6 = vmax.f32 %v7553_v25, 0.0  ;;  %v9338_v25 = vld [vmem:[%s16048_s2 + $0x40] sm:$0xff]  ;;  %v14154_v63 = vmul.f32 %v9333_v62, %v12299_v14  ;;  %v16187_v14 = vld [vmem:[#allocation13_spill] sm:$0xff] }
 0xb43   :  { %v7727_v17 = vmax.f32 %v7555_v26, 0.0 }
 0xb44   :  { %v7728_v46 = vmax.f32 %v7557_v36, 0.0  ;;  %v14157_v36 = vmul.f32 %v9331_v38, %v16185_v40  ;;  %v9347_v38 = vld [vmem:[%s16048_s2 + $0x88] sm:$0xff] }
 0xb45   :  { %v7837_v22 = vpack.c.bf16 %v7727_v17, %v7725_v9  ;;  %v14160_v9 = vmul.f32 %v9336_v30, %v16186_v18  ;;  %v9341_v17 = vld [vmem:[%s16048_s2 + $0x58] sm:$0xff]  ;;  %v9352_v30 = vld [vmem:[%s16048_s2 + $0xb0] sm:$0xff] }
 0xb46   :  { %v7838_v5 = vpack.c.bf16 %v7728_v46, %v7726_v6  ;;  %v7560_v52 = vpop.f32.mrb[140].mxu1  ;;  %v9339_v6 = vld [vmem:[%s16048_s2 + $0x48] sm:$0xff] }
 0xb47   :  { %v7561_v37 = vadd.f32 %v7560_v52, %v13988_v0  ;;  %v7562_v15 = vpop.f32.mrb[141].mxu1  ;;  %v16188_v52 = vld [vmem:[#allocation12_spill] sm:$0xff] }
 0xb48   :  { %v7563_v54 = vadd.f32 %v7562_v15, %v13992_v2  ;;  %v7564_v44 = vpop.f32.mrb[142].mxu1  ;;  %8173 = vmatprep.mubr.bf16.mxu0 %v7838_v5  ;;  %v14170_v5 = vmul.f32 %v9334_v61, %v16187_v14  ;;  %v16189_v15 = vld [vmem:[#allocation14_spill] sm:$0xff] }
 0xb49   :  { %v7565_v23 = vadd.f32 %v7564_v44, %v13988_v0  ;;  %v7566_v32 = vpop.f32.mrb[143].mxu1  ;;  %8174 = vmatmul.mubr.bf16.gmra.mrb[248].mxu0 %v7837_v22  ;;  %v7729_v48 = vmax.f32 %v7561_v37, 0.0  ;;  %v14173_v37 = vmul.f32 %v9337_v29, %v16188_v52  ;;  %v9344_v44 = vld [vmem:[%s16048_s2 + $0x70] sm:$0xff]  ;;  %v9351_v52 = vld [vmem:[%s16048_s2 + $0xa8] sm:$0xff] }
 0xb4a   :  { %v7567_v24 = vadd.f32 %v7566_v32, %v13992_v2  ;;  %v7730_v60 = vmax.f32 %v7563_v54, 0.0  ;;  %v14176_v54 = vmul.f32 %v9335_v11, %v16189_v15  ;;  %v14218_v43 = vmul.f32 %v9344_v44, %v16194_v33  ;;  %v16196_v29 = vld [vmem:[#allocation20_spill] sm:$0xff] }
 0xb4b   :  { %v7731_v45 = vmax.f32 %v7565_v23, 0.0  ;;  %v9342_v23 = vld [vmem:[%s16048_s2 + $0x60] sm:$0xff]  ;;  %v9356_v15 = vld [vmem:[%s16048_s2 + $0xd0] sm:$0xff] }
 0xb4c   :  { %v7732_v31 = vmax.f32 %v7567_v24, 0.0  ;;  %v14188_v24 = vld [vmem:[%s16049_s3 + $0x11] ss:$0 sm:$0xff] }
 0xb4d   :  { %v7839_v57 = vpack.c.bf16 %v7731_v45, %v7729_v48  ;;  %v16190_v48 = vld [vmem:[#allocation15_spill] sm:$0xff] }
 0xb4e   :  { %v7840_v4 = vpack.c.bf16 %v7732_v31, %v7730_v60  ;;  %v7570_v16 = vpop.f32.mrb[144].mxu1  ;;  %v14191_v45 = vmul.f32 %v9340_v53, %v16190_v48  ;;  %v16191_v60 = vld [vmem:[#allocation17_spill] sm:$0xff]  ;;  %v16198_v53 = vld [vmem:[#allocation23_spill] sm:$0xff] }
 0xb4f   :  { %v7571_v1 = vadd.f32 %v7570_v16, %v13988_v0  ;;  %v7572_v39 = vpop.f32.mrb[145].mxu1  ;;  %v14194_v31 = vmul.f32 %v9338_v25, %v16191_v60  ;;  %v9348_v16 = vld [vmem:[%s16048_s2 + $0x90] sm:$0xff]  ;;  %v16201_v60 = vld [vmem:[#allocation26_spill] sm:$0xff] }
 0xb50   :  { %v7573_v47 = vadd.f32 %v7572_v39, %v13992_v2  ;;  %v7574_v49 = vpop.f32.mrb[146].mxu1  ;;  %8181 = vmatprep.mubr.bf16.mxu0 %v7840_v4  ;;  %v9343_v4 = vld [vmem:[%s16048_s2 + $0x68] sm:$0xff]  ;;  %v14239_v25 = vmul.f32 %v9348_v16, %v16198_v53 }
 0xb51   :  { %v7575_v21 = vadd.f32 %v7574_v49, %v13988_v0  ;;  %v7576_v8 = vpop.f32.mrb[147].mxu1  ;;  %8182 = vmatmul.mubr.bf16.gmra.mrb[252].mxu0 %v7839_v57  ;;  %v7733_v34 = vmax.f32 %v7571_v1, 0.0  ;;  %v9345_v57 = vld [vmem:[%s16048_s2 + $0x78] sm:$0xff]  ;;  %v9355_v53 = vld [vmem:[%s16048_s2 + $0xc8] sm:$0xff] }
 0xb52   :  { %v7577_v58 = vadd.f32 %v7576_v8, %v13992_v2  ;;  %v7734_v12 = vmax.f32 %v7573_v47, 0.0  ;;  %v16192_v47 = vld [vmem:[#allocation16_spill] sm:$0xff]  ;;  %v14233_v11 = vmul.f32 %v9345_v57, %v16196_v29  ;;  %v14264_v57 = vmul.f32 %v9347_v38, %v16201_v60  ;;  %v16209_v29 = vld [vmem:[#allocation31_spill] sm:$0xff] }
 0xb53   :  { %v7735_v28 = vmax.f32 %v7575_v21, 0.0  ;;  %v14206_v49 = vmul.f32 %v9341_v17, %v16192_v47  ;;  %v16193_v21 = vld [vmem:[#allocation18_spill] sm:$0xff] }
 0xb54   :  { %v7736_v35 = vmax.f32 %v7577_v58, 0.0  ;;  %v14209_v8 = vmul.f32 %v9339_v6, %v16193_v21  ;;  %v9346_v58 = vld [vmem:[%s16048_s2 + $0x80] sm:$0xff]  ;;  %v16199_v6 = vld [vmem:[#allocation25_spill] sm:$0xff] }
 0xb55   :  { %v7841_v7 = vpack.c.bf16 %v7735_v28, %v7733_v34  ;;  %v9349_v34 = vld [vmem:[%s16048_s2 + $0x98] sm:$0xff] }
 0xb56   :  { %v7842_v19 = vpack.c.bf16 %v7736_v35, %v7734_v12  ;;  %v7580_v42 = vpop.f32.mrb[148].mxu1 }
 0xb57   :  { %v7581_v27 = vadd.f32 %v7580_v42, %v13988_v0  ;;  %v7582_v55 = vpop.f32.mrb[149].mxu1 }
 0xb58   :  { %v7583_v50 = vadd.f32 %v7582_v55, %v13992_v2  ;;  %v7584_v26 = vpop.f32.mrb[150].mxu1  ;;  %8189 = vmatprep.mubr.bf16.mxu0 %v7842_v19 }
 0xb59   :  { %v7585_v46 = vadd.f32 %v7584_v26, %v13988_v0  ;;  %v7586_v22 = vpop.f32.mrb[151].mxu1  ;;  %8190 = vmatmul.mubr.bf16.gmra.mrb[0].mxu0 %v7841_v7  ;;  %v7737_v1 = vmax.f32 %v7581_v27, 0.0  ;;  %v16195_v7 = vld [vmem:[#allocation21_spill] sm:$0xff]  ;;  %v16197_v27 = vld [vmem:[#allocation22_spill] sm:$0xff] }
 0xb5a   :  { %v7587_v32 = vadd.f32 %v7586_v22, %v13992_v2  ;;  %v7738_v28 = vmax.f32 %v7583_v50, 0.0  ;;  %v14221_v62 = vmul.f32 %v9342_v23, %v16195_v7  ;;  %v14236_v55 = vmul.f32 %v9343_v4, %v16197_v27  ;;  %v9350_v50 = vld [vmem:[%s16048_s2 + $0xa0] sm:$0xff]  ;;  %v9353_v26 = vld [vmem:[%s16048_s2 + $0xb8] sm:$0xff]  ;;  %v16200_v22 = vld [vmem:[#allocation24_spill] sm:$0xff] }
 0xb5b   :  { %v7739_v39 = vmax.f32 %v7585_v46, 0.0  ;;  %v14248_v46 = vmul.f32 %v9346_v58, %v16199_v6  ;;  %v14251_v14 = vmul.f32 %v9349_v34, %v16200_v22  ;;  %v16202_v4 = vld [vmem:[#allocation27_spill] sm:$0xff]  ;;  %v16204_v34 = vld [vmem:[#allocation29_spill] sm:$0xff]  ;;  %v14288_v27 = vmul.f32 %v9356_v15, %v16209_v29  ;;  %v9358_v22 = vld [vmem:[%s16048_s2 + $0xe0] sm:$0xff] }
 0xb5c   :  { %v7740_v12 = vmax.f32 %v7587_v32, 0.0  ;;  %v7983_v35 = vpop.f32.mrb[152].mxu0  ;;  %v14267_v16 = vmul.f32 %v9352_v30, %v16202_v4  ;;  %v16207_v30 = vld [vmem:[#allocation30_spill] sm:$0xff] }
 0xb5d   :  { %v7843_v19 = vpack.c.bf16 %v7739_v39, %v7737_v1  ;;  %v14230_v42 = vadd.f32 %v14188_v24, %v7983_v35  ;;  %v7985_v61 = vpop.f32.mrb[153].mxu0  ;;  %v9354_v1 = vld [vmem:[%s16048_s2 + $0xc0] sm:$0xff]  ;;  %v9357_v39 = vld [vmem:[%s16048_s2 + $0xd8] sm:$0xff]  ;;  %16210 = vst [vmem:[#allocation12_spill] sm:$0xff] %v14288_v27 }
 0xb5e   :  { %v7844_v40 = vpack.c.bf16 %v7740_v12, %v7738_v28  ;;  %v7590_v18 = vpop.f32.mrb[152].mxu1  ;;  %v7986_v17 = vpop.f32.mrb[154].mxu0  ;;  %16203 = vst [vmem:[#allocation10_spill] sm:$0xff] %v14267_v16  ;;  %v14278_v28 = vmul.f32 %v9350_v50, %v16204_v34  ;;  %v16205_v12 = vld [vmem:[#allocation28_spill] sm:$0xff]  ;;  %v14285_v61 = vmul.f32 %v9351_v52, %v16207_v30  ;;  %v9359_v34 = vld [vmem:[%s16048_s2 + $0xe8] sm:$0xff]  ;;  %v16219_v30 = vld [vmem:[#allocation37_spill] sm:$0xff] }
 0xb5f   :  { %v8367_v44 = vand.u32 2147483647, %v14230_v42  ;;  %v14261_v23 = vadd.f32 %v14188_v24, %v7986_v17  ;;  %v7592_v32 = vpop.f32.mrb[153].mxu1  ;;  %v7988_v48 = vpop.f32.mrb[155].mxu0  ;;  %v7591_v47 = vadd.f32 %v7590_v18, %v13988_v0  ;;  %v14281_v35 = vmul.f32 %v9353_v26, %v16205_v12  ;;  %v16213_v17 = vld [vmem:[#allocation32_spill] sm:$0xff] }
 0xb60   :  { %v7593_v21 = vadd.f32 %v7592_v32, %v13992_v2  ;;  %v7594_v58 = vpop.f32.mrb[154].mxu1  ;;  %8197 = vmatprep.mubr.bf16.mxu0 %v7844_v40  ;;  %16208 = vst [vmem:[#allocation13_spill] sm:$0xff] %v14285_v61  ;;  %v16211_v40 = vld [vmem:[#allocation33_spill] sm:$0xff]  ;;  %v14299_v6 = vmul.f32 %v9357_v39, %v16213_v17  ;;  %v16215_v39 = vld [vmem:[#allocation34_spill] sm:$0xff]  ;;  %v9364_v12 = vld [vmem:[%s16048_s2 + $0x110] sm:$0xff]  ;;  %v14326_v29 = vmul.f32 %v9358_v22, %v16219_v30 }
 0xb61   :  { %16206 = vst [vmem:[#allocation11_spill] sm:$0xff] %v14281_v35  ;;  %v8431_v33 = vsub.f32 0.0, %v8367_v44  ;;  %v8368_v7 = vand.u32 2147483647, %v14261_v23  ;;  %v7596_v38 = vpop.f32.mrb[155].mxu1  ;;  %8198 = vmatmul.mubr.bf16.gmra.mrb[4].mxu0 %v7843_v19  ;;  %v7595_v50 = vadd.f32 %v7594_v58, %v13988_v0  ;;  %v14296_v18 = vmul.f32 %v9354_v1, %v16211_v40  ;;  %v9360_v19 = vld [vmem:[%s16048_s2 + $0xf0] sm:$0xff] }
 0xb62   :  { %v7597_v26 = vadd.f32 %v7596_v38, %v13992_v2  ;;  %16214 = vst [vmem:[#allocation15_spill] sm:$0xff] %v14299_v6  ;;  %v9361_v44 = vld [vmem:[%s16048_s2 + $0xf8] sm:$0xff]  ;;  %v7741_v32 = vmax.f32 %v7591_v47, 0.0  ;;  %v7742_v48 = vmax.f32 %v7593_v21, 0.0  ;;  %v14311_v58 = vmul.f32 %v9355_v53, %v16215_v39  ;;  %v16217_v21 = vld [vmem:[#allocation35_spill] sm:$0xff]  ;;  %16220 = vst [vmem:[#allocation18_spill] sm:$0xff] %v14326_v29 }
 0xb63   :  { %16212 = vst [vmem:[#allocation14_spill] sm:$0xff] %v14296_v18  ;;  %v8495_v52 = vmul.f32 1.442695, %v8431_v33  ;;  %v8432_v15 = vsub.f32 0.0, %v8368_v7  ;;  %v7743_v60 = vmax.f32 %v7595_v50, 0.0  ;;  %v14323_v38 = vmul.f32 %v9360_v19, %v16217_v21  ;;  %v9362_v53 = vld [vmem:[%s16048_s2 + $0x100] sm:$0xff] }
 0xb64   :  { %v7744_v4 = vmax.f32 %v7597_v26, 0.0  ;;  %v7991_v1 = vpop.f32.mrb[156].mxu0  ;;  %16216 = vst [vmem:[#allocation17_spill] sm:$0xff] %v14311_v58  ;;  %v9365_v50 = vld [vmem:[%s16048_s2 + $0x118] sm:$0xff]  ;;  %v9363_v19 = vld [vmem:[%s16048_s2 + $0x108] sm:$0xff]  ;;  %v9368_v22 = vld [vmem:[%s16048_s2 + $0x130] sm:$0xff] }
 0xb65   :  { %10795 = vpow2.f32 %v8495_v52  ;;  %v8497_v33 = vmul.f32 1.442695, %v8432_v15  ;;  %v14320_v7 = vadd.f32 %v14188_v24, %v7991_v1  ;;  %v7993_v47 = vpop.f32.mrb[157].mxu0  ;;  %16218 = vst [vmem:[#allocation16_spill] sm:$0xff] %v14323_v38  ;;  %v7845_v26 = vpack.c.bf16 %v7743_v60, %v7741_v32  ;;  %v16221_v15 = vld [vmem:[#allocation36_spill] sm:$0xff]  ;;  %v16223_v60 = vld [vmem:[#allocation38_spill] sm:$0xff] }
 0xb66   :  { %v7846_v40 = vpack.c.bf16 %v7744_v4, %v7742_v48  ;;  %v7600_v17 = vpop.f32.mrb[156].mxu1  ;;  %v7994_v52 = vpop.f32.mrb[158].mxu0  ;;  %v14335_v1 = vmul.f32 %v9361_v44, %v16221_v15  ;;  %v14346_v4 = vmul.f32 %v9359_v34, %v16223_v60  ;;  %v16225_v44 = vld [vmem:[#allocation39_spill] sm:$0xff]  ;;  %v9366_v30 = vld [vmem:[%s16048_s2 + $0x120] sm:$0xff] }
 0xb67   :  { %10797 = vpow2.f32 %v8497_v33  ;;  %v8369_v39 = vand.u32 2147483647, %v14320_v7  ;;  %v7601_v47 = vadd.f32 %v7600_v17, %v13988_v0  ;;  %v7602_v32 = vpop.f32.mrb[157].mxu1  ;;  %v7996_v48 = vpop.f32.mrb[159].mxu0  ;;  %v14349_v21 = vmul.f32 %v9364_v12, %v16225_v44  ;;  %v16227_v17 = vld [vmem:[#allocation41_spill] sm:$0xff] }
 0xb68   :  { %16222 = vst [vmem:[#allocation19_spill] sm:$0xff] %v14335_v1  ;;  %16224 = vst [vmem:[#allocation21_spill] sm:$0xff] %v14346_v4  ;;  %v14355_v15 = vadd.f32 %v14188_v24, %v7994_v52  ;;  %v7603_v33 = vadd.f32 %v7602_v32, %v13992_v2  ;;  %v7604_v59 = vpop.f32.mrb[158].mxu1  ;;  %8205 = vmatprep.mubr.bf16.mxu0 %v7846_v40  ;;  %v14359_v3 = vmul.f32 %v9362_v53, %v16227_v17  ;;  %v16229_v48 = vld [vmem:[#allocation40_spill] sm:$0xff]  ;;  %v9369_v12 = vld [vmem:[%s16048_s2 + $0x138] sm:$0xff] }
 0xb69   :  { %16226 = vst [vmem:[#allocation20_spill] sm:$0xff] %v14349_v21  ;;  %v14362_v34 = vmul.f32 %v9365_v50, %v16229_v48  ;;  %v8433_v60 = vsub.f32 0.0, %v8369_v39  ;;  %v7605_v44 = vadd.f32 %v7604_v59, %v13988_v0  ;;  %v7606_v13 = vpop.f32.mrb[159].mxu1  ;;  %8206 = vmatmul.mubr.bf16.gmra.mrb[8].mxu0 %v7845_v26  ;;  %v16231_v52 = vld [vmem:[#allocation42_spill] sm:$0xff]  ;;  %v16233_v32 = vld [vmem:[#allocation43_spill] sm:$0xff]  ;;  %v16235_v48 = vld [vmem:[#allocation45_spill] sm:$0xff] }
 0xb6a   :  { %16228 = vst [vmem:[#allocation22_spill] sm:$0xff] %v14359_v3  ;;  %v14369_v41 = vmul.f32 %v9363_v19, %v16231_v52  ;;  %v14372_v40 = vmul.f32 %v9368_v22, %v16233_v32  ;;  %v9367_v53 = vld [vmem:[%s16048_s2 + $0x128] sm:$0xff]  ;;  %v8370_v50 = vand.u32 2147483647, %v14355_v15  ;;  %v7607_v17 = vadd.f32 %v7606_v13, %v13992_v2  ;;  %v9372_v59 = vld [vmem:[%s16048_s2 + $0x150] sm:$0xff]  ;;  %v9370_v26 = vld [vmem:[%s16048_s2 + $0x140] sm:$0xff] }
 0xb6b   :  { %16230 = vst [vmem:[#allocation23_spill] sm:$0xff] %v14362_v34  ;;  %v14380_v39 = vmul.f32 %v9366_v30, %v16235_v48  ;;  %v8499_v19 = vmul.f32 1.442695, %v8433_v60  ;;  %v7745_v22 = vmax.f32 %v7601_v47, 0.0  ;;  %v7747_v52 = vmax.f32 %v7605_v44, 0.0  ;;  %v16237_v32 = vld [vmem:[#allocation44_spill] sm:$0xff] }
 0xb6c   :  { %16232 = vst [vmem:[#allocation25_spill] sm:$0xff] %v14369_v41  ;;  %16234 = vst [vmem:[#allocation24_spill] sm:$0xff] %v14372_v40  ;;  %v14389_v51 = vmul.f32 %v9369_v12, %v16237_v32  ;;  %v9373_v13 = vld [vmem:[%s16048_s2 + $0x158] sm:$0xff]  ;;  %v9371_v30 = vld [vmem:[%s16048_s2 + $0x148] sm:$0xff]  ;;  %v8434_v48 = vsub.f32 0.0, %v8370_v50  ;;  %v7746_v10 = vmax.f32 %v7603_v33, 0.0 }
 0xb6d   :  { %16236 = vst [vmem:[#allocation26_spill] sm:$0xff] %v14380_v39  ;;  %v7748_v40 = vmax.f32 %v7607_v17, 0.0  ;;  %v7999_v39 = vpop.f32.mrb[160].mxu0  ;;  %v16239_v34 = vld [vmem:[#allocation46_spill] sm:$0xff]  ;;  %v9376_v47 = vld [vmem:[%s16048_s2 + $0x170] sm:$0xff]  ;;  %10799 = vpow2.f32 %v8499_v19  ;;  %v7847_v60 = vpack.c.bf16 %v7747_v52, %v7745_v22  ;;  %v16241_v33 = vld [vmem:[#allocation47_spill] sm:$0xff] }
 0xb6e   :  { %16238 = vst [vmem:[#allocation27_spill] sm:$0xff] %v14389_v51  ;;  %v14398_v21 = vmul.f32 %v9367_v53, %v16239_v34  ;;  %v9374_v12 = vld [vmem:[%s16048_s2 + $0x160] sm:$0xff]  ;;  %v14407_v44 = vadd.f32 %v14188_v24, %v7999_v39  ;;  %v8001_v50 = vpop.f32.mrb[161].mxu0  ;;  %v14410_v17 = vmul.f32 %v9372_v59, %v16241_v33  ;;  %v16243_v32 = vld [vmem:[#allocation49_spill] sm:$0xff]  ;;  %v9375_v51 = vld [vmem:[%s16048_s2 + $0x168] sm:$0xff]  ;;  %v7610_v52 = vpop.f32.mrb[160].mxu1 }
 0xb6f   :  { %v14413_v34 = vmul.f32 %v9370_v26, %v16243_v32  ;;  %v9377_v53 = vld [vmem:[%s16048_s2 + $0x178] sm:$0xff]  ;;  %v8501_v19 = vmul.f32 1.442695, %v8434_v48  ;;  %v7848_v22 = vpack.c.bf16 %v7748_v40, %v7746_v10  ;;  %v8002_v39 = vpop.f32.mrb[162].mxu0  ;;  %v16245_v50 = vld [vmem:[#allocation48_spill] sm:$0xff]  ;;  %v16247_v33 = vld [vmem:[#allocation50_spill] sm:$0xff] }
 0xb70   :  { %16240 = vst [vmem:[#allocation29_spill] sm:$0xff] %v14398_v21  ;;  %16242 = vst [vmem:[#allocation28_spill] sm:$0xff] %v14410_v17  ;;  %v14421_v21 = vpop.eup %10795  ;;  %v14424_v59 = vmul.f32 %v9373_v13, %v16245_v50  ;;  %v14427_v26 = vmul.f32 %v9371_v30, %v16247_v33  ;;  %v9380_v32 = vld [vmem:[%s16048_s2 + $0x190] sm:$0xff]  ;;  %v8371_v17 = vand.u32 2147483647, %v14407_v44  ;;  %v7612_v10 = vpop.f32.mrb[161].mxu1 }
 0xb71   :  { %16244 = vst [vmem:[#allocation30_spill] sm:$0xff] %v14413_v34  ;;  %v14434_v34 = vadd.f32 %v14188_v24, %v8002_v39  ;;  %v8004_v40 = vpop.f32.mrb[163].mxu0  ;;  %v16249_v48 = vld [vmem:[#allocation51_spill] sm:$0xff]  ;;  %v16251_v3 = vld [vmem:[#allocation53_spill] sm:$0xff]  ;;  %v9378_v30 = vld [vmem:[%s16048_s2 + $0x180] sm:$0xff]  ;;  %v8623_v50 = vadd.f32 1.0, %v14421_v21  ;;  %10801 = vpow2.f32 %v8501_v19  ;;  %8213 = vmatprep.mubr.bf16.mxu0 %v7848_v22  ;;  %v7611_v22 = vadd.f32 %v7610_v52, %v13988_v0 }
 0xb72   :  { %16246 = vst [vmem:[#allocation31_spill] sm:$0xff] %v14424_v59  ;;  %16248 = vst [vmem:[#allocation33_spill] sm:$0xff] %v14427_v26  ;;  %v14437_v41 = vmul.f32 %v9376_v47, %v16249_v48  ;;  %v14440_v13 = vmul.f32 %v9374_v12, %v16251_v3  ;;  %v7614_v33 = vpop.f32.mrb[162].mxu1  ;;  %v14446_v59 = vpop.eup %10797  ;;  %v16253_v39 = vld [vmem:[#allocation52_spill] sm:$0xff]  ;;  %v16255_v40 = vld [vmem:[#allocation54_spill] sm:$0xff]  ;;  %v8435_v48 = vsub.f32 0.0, %v8371_v17  ;;  %8214 = vmatmul.mubr.bf16.gmra.mrb[12].mxu0 %v7847_v60 }
 0xb73   :  { %v14449_v26 = vmul.f32 %v9377_v53, %v16253_v39  ;;  %v14452_v47 = vmul.f32 %v9375_v51, %v16255_v40  ;;  %v8372_v3 = vand.u32 2147483647, %v14434_v34  ;;  %v7616_v12 = vpop.f32.mrb[163].mxu1  ;;  %10803 = vlog2.f32 %v8623_v50  ;;  %v16259_v1 = vld [vmem:[#allocation57_spill] sm:$0xff] }
 0xb74   :  { %16250 = vst [vmem:[#allocation32_spill] sm:$0xff] %v14437_v41  ;;  %16252 = vst [vmem:[#allocation34_spill] sm:$0xff] %v14440_v13  ;;  %v16257_v41 = vld [vmem:[#allocation55_spill] sm:$0xff]  ;;  %v8632_v19 = vadd.f32 1.0, %v14446_v59  ;;  %v14461_v38 = vmul.f32 %v9378_v30, %v16259_v1  ;;  %v8626_v53 = vmul.f32 -0.5, %v14421_v21  ;;  %v16261_v40 = vlaneseq  ;;  %v8007_v60 = vpop.f32.mrb[164].mxu0 }
 0xb75   :  { %16254 = vst [vmem:[#allocation35_spill] sm:$0xff] %v14449_v26  ;;  %16256 = vst [vmem:[#allocation37_spill] sm:$0xff] %v14452_v47  ;;  %v14456_v13 = vmul.f32 %v9380_v32, %v16257_v41  ;;  %v8503_v51 = vmul.f32 1.442695, %v8435_v48  ;;  %v8436_v39 = vsub.f32 0.0, %v8372_v3  ;;  %v7615_v41 = vadd.f32 %v7614_v33, %v13988_v0  ;;  %v8009_v30 = vpop.f32.mrb[165].mxu0 }
 0xb76   :  { %16260 = vst [vmem:[#allocation38_spill] sm:$0xff] %v14461_v38  ;;  %v14466_v26 = vand.u32 127, %v16261_v40  ;;  %10805 = vlog2.f32 %v8632_v19  ;;  %v8635_v32 = vmul.f32 -0.5, %v14446_v59  ;;  %v7613_v1 = vadd.f32 %v7612_v10, %v13992_v2  ;;  %v7620_v40 = vpop.f32.mrb[164].mxu1  ;;  %v8010_v17 = vpop.f32.mrb[166].mxu0 }
 0xb77   :  { %16258 = vst [vmem:[#allocation36_spill] sm:$0xff] %v14456_v13  ;;  %10807 = vpow2.f32 %v8503_v51  ;;  %v8505_v52 = vmul.f32 1.442695, %v8436_v39  ;;  %v7749_v50 = vmax.f32 %v7611_v22, 0.0  ;;  %v7751_v13 = vmax.f32 %v7615_v41, 0.0  ;;  %v14475_v19 = vpop.eup %10799  ;;  %v7622_v39 = vpop.f32.mrb[165].mxu1 }
 0xb78   :  { %v7617_v48 = vadd.f32 %v7616_v12, %v13992_v2  ;;  %v14473_v3 = vadd.f32 %v14188_v24, %v8007_v60  ;;  %v8627_v33 = vadd.f32 1.0, %v8626_v53  ;;  %v8629_v38 = vand.u32 2147483647, %v14421_v21  ;;  %v8012_v10 = vpop.f32.mrb[167].mxu0  ;;  %v7624_v30 = vpop.f32.mrb[166].mxu1 }
 0xb79   :  { %v8304_v51 = vmax.f32 %v14261_v23, 0.0  ;;  %10809 = vpow2.f32 %v8505_v52  ;;  %v8638_v22 = vand.u32 2147483647, %v14446_v59  ;;  %v8641_v41 = vadd.f32 1.0, %v14475_v19  ;;  %v7626_v23 = vpop.f32.mrb[167].mxu1 }
 0xb7a   :  { %v7849_v12 = vpack.c.bf16 %v7751_v13, %v7749_v50  ;;  %v14482_v60 = vadd.f32 %v14188_v24, %v8010_v17  ;;  %vm9329_vm4 = vcmp.lt.s32.totalorder %v14466_v26, 8  ;;  %v8636_v47 = vadd.f32 1.0, %v8635_v32 }
 0xb7b   :  { %v7750_v53 = vmax.f32 %v7613_v1, 0.0  ;;  %v7752_v4 = vmax.f32 %v7617_v48, 0.0  ;;  %v8373_v29 = vand.u32 2147483647, %v14473_v3  ;;  %v14486_v52 = vpop.eup %10801  ;;  %10811 = vlog2.f32 %v8641_v41 }
 0xb7c   :  { %v7621_v13 = vadd.f32 %v7620_v40, %v13988_v0  ;;  %vm14491_vm5 = vcmp.lt.f32.partialorder %v8629_v38, 0.0004427343  ;;  %v8644_v32 = vmul.f32 -0.5, %v14475_v19  ;;  %v8650_v1 = vadd.f32 1.0, %v14486_v52  ;;  %v8015_v6 = vpop.f32.mrb[168].mxu0 }
 0xb7d   :  { %v7850_v50 = vpack.c.bf16 %v7752_v4, %v7750_v53  ;;  %v10804_v48 = vpop.eup %10803  ;;  %v8628_v27 = vmul.f32 %v14421_v21, %v8627_v33  ;;  %v8647_v58 = vand.u32 2147483647, %v14475_v19  ;;  %v8437_v10 = vsub.f32 0.0, %v8373_v29  ;;  %v8017_v35 = vpop.f32.mrb[169].mxu0 }
 0xb7e   :  { %v8374_v41 = vand.u32 2147483647, %v14482_v60  ;;  %v8625_v18 = vmul.f32 0.6931472, %v10804_v48  ;;  %v8637_v38 = vmul.f32 %v14446_v59, %v8636_v47  ;;  %vm14501_vm6 = vcmp.lt.f32.partialorder %v8638_v22, 0.0004427343 }
 0xb7f   :  { %10813 = vlog2.f32 %v8650_v1  ;;  %8221 = vmatprep.mubr.bf16.mxu0 %v7850_v50  ;;  %v8507_v53 = vmul.f32 1.442695, %v8437_v10  ;;  %v7753_v16 = vmax.f32 %v7621_v13, 0.0  ;;  %v7625_v33 = vadd.f32 %v7624_v30, %v13988_v0  ;;  %v8018_v29 = vpop.f32.mrb[170].mxu0 }
 0xb80   :  { %v10806_v4 = vpop.eup %10805  ;;  %v8438_v21 = vsub.f32 0.0, %v8374_v41  ;;  %8222 = vmatmul.mubr.bf16.gmra.mrb[16].mxu0 %v7849_v12  ;;  %v8631_v59 = vsel %vm14491_vm5, %v8628_v27, %v8625_v18  ;;  %v8645_v22 = vadd.f32 1.0, %v8644_v32  ;;  %v8653_v48 = vmul.f32 -0.5, %v14486_v52  ;;  %v8020_v1 = vpop.f32.mrb[171].mxu0 }
 0xb81   :  { %v14506_v61 = vpop.eup %10807  ;;  %v8634_v47 = vmul.f32 0.6931472, %v10806_v4  ;;  %v16266_v35 = vmax.f32 %v14230_v42, 0.0  ;;  %vm14513_vm7 = vcmp.lt.f32.partialorder %v8647_v58, 0.0004427343  ;;  %v7623_v12 = vadd.f32 %v7622_v39, %v13992_v2 }
 0xb82   :  { %v8659_v0 = vadd.f32 1.0, %v14506_v61  ;;  %10815 = vpow2.f32 %v8507_v53  ;;  %v8509_v18 = vmul.f32 1.442695, %v8438_v21  ;;  %v7627_v13 = vadd.f32 %v7626_v23, %v13992_v2 }
 0xb83   :  { %v9199_v50 = vadd.f32 %v8631_v59, %v16266_v35  ;;  %v14519_v30 = vpop.eup %10809  ;;  %v8640_v27 = vsel %vm14501_vm6, %v8637_v38, %v8634_v47  ;;  %v7755_v58 = vmax.f32 %v7625_v33, 0.0  ;;  %v8646_v32 = vmul.f32 %v14475_v19, %v8645_v22  ;;  %v9381_v35 = vld [vmem:[%s16048_s2 + $0x198] sm:$0xff] }
 0xb84   :  { %v9200_v42 = vadd.f32 %v8640_v27, %v8304_v51  ;;  %10817 = vlog2.f32 %v8659_v0  ;;  %v8654_v41 = vadd.f32 1.0, %v8653_v48  ;;  %v8656_v4 = vand.u32 2147483647, %v14486_v52  ;;  %v8023_v2 = vpop.f32.mrb[172].mxu0 }
 0xb85   :  { %v9263_v17 = vadd.f32 1e-05, %v9199_v50  ;;  %v8668_v39 = vadd.f32 1.0, %v14519_v30  ;;  %v10812_v59 = vpop.eup %10811  ;;  %10819 = vpow2.f32 %v8509_v18  ;;  %v7754_v53 = vmax.f32 %v7623_v12, 0.0  ;;  %v8025_v21 = vpop.f32.mrb[173].mxu0 }
 0xb86   :  { %v9264_v40 = vadd.f32 1e-05, %v9200_v42  ;;  %v8643_v19 = vmul.f32 0.6931472, %v10812_v59  ;;  %v8662_v51 = vmul.f32 -0.5, %v14506_v61  ;;  %v8671_v23 = vmul.f32 -0.5, %v14519_v30 }
 0xb87   :  { %v9458_v38 = vsel %vm9329_vm4, %v14144_v20, %v9263_v17  ;;  %10821 = vlog2.f32 %v8668_v39  ;;  %v7851_v33 = vpack.c.bf16 %v7755_v58, %v7753_v16  ;;  %v7756_v47 = vmax.f32 %v7627_v13, 0.0  ;;  %v8026_v48 = vpop.f32.mrb[174].mxu0 }
 0xb88   :  { %9522 = vst.msk [vmem:[%s16053_s7] sm:$0xff] %vm1899_vm0, %v9458_v38  ;;  %v9459_v20 = vsel %vm9329_vm4, %v14157_v36, %v9264_v40  ;;  %v14540_v22 = vadd.f32 %v14188_v24, %v8015_v6  ;;  %v8649_v50 = vsel %vm14513_vm7, %v8646_v32, %v8643_v19  ;;  %v8655_v36 = vmul.f32 %v14486_v52, %v8654_v41  ;;  %v8028_v0 = vpop.f32.mrb[175].mxu0  ;;  %v16272_v32 = vld [vmem:[#allocation56_spill] sm:$0xff] }
 0xb89   :  { %v10814_v1 = vpop.eup %10813  ;;  %9523 = vst.msk [vmem:[%s16053_s7 + $0x8] sm:$0xff] %vm1899_vm0, %v9459_v20  ;;  %vm14552_vm8 = vcmp.lt.f32.partialorder %v8656_v4, 0.0004427343  ;;  %v14557_v6 = vadd.f32 %v14188_v24, %v8018_v29  ;;  %v16271_v12 = vmax.f32 %v14320_v7, 0.0  ;;  %v8665_v13 = vand.u32 2147483647, %v14506_v61 }
 0xb8a   :  { %v8652_v18 = vmul.f32 0.6931472, %v10814_v1  ;;  %v7852_v17 = vpack.c.bf16 %v7756_v47, %v7754_v53  ;;  %v8663_v42 = vadd.f32 1.0, %v8662_v51  ;;  %v8375_v10 = vand.u32 2147483647, %v14540_v22 }
 0xb8b   :  { %v9201_v27 = vadd.f32 %v8649_v50, %v16271_v12  ;;  %v8376_v52 = vand.u32 2147483647, %v14557_v6  ;;  %v14565_v58 = vadd.f32 %v14188_v24, %v8023_v2  ;;  %v14568_v41 = vmul.f32 %v9381_v35, %v16272_v32  ;;  %v9379_v12 = vld [vmem:[%s16048_s2 + $0x188] sm:$0xff] }
 0xb8c   :  { %v8658_v7 = vsel %vm14552_vm8, %v8655_v36, %v8652_v18  ;;  %v8672_v4 = vadd.f32 1.0, %v8671_v23  ;;  %8229 = vmatprep.mubr.bf16.mxu0 %v7852_v17  ;;  %v14572_v39 = vpop.eup %10815  ;;  %v16273_v59 = vmax.f32 %v14355_v15, 0.0  ;;  %v8307_v40 = vmax.f32 %v14407_v44, 0.0  ;;  %v8031_v15 = vpop.f32.mrb[176].mxu0 }
 0xb8d   :  { %v9265_v29 = vadd.f32 1e-05, %v9201_v27  ;;  %v8439_v53 = vsub.f32 0.0, %v8375_v10  ;;  %v8440_v19 = vsub.f32 0.0, %v8376_v52  ;;  %8230 = vmatmul.mubr.bf16.gmra.mrb[20].mxu0 %v7851_v33  ;;  %vm14580_vm9 = vcmp.lt.f32.partialorder %v8665_v13, 0.0004427343 }
 0xb8e   :  { %v9202_v38 = vadd.f32 %v8658_v7, %v16273_v59  ;;  %v10818_v2 = vpop.eup %10817  ;;  %v8674_v23 = vand.u32 2147483647, %v14519_v30  ;;  %v8677_v20 = vadd.f32 1.0, %v14572_v39  ;;  %v8664_v47 = vmul.f32 %v14506_v61, %v8663_v42  ;;  %v8033_v16 = vpop.f32.mrb[177].mxu0 }
 0xb8f   :  { %v9460_v51 = vsel %vm9329_vm4, %v14141_v56, %v9265_v29  ;;  %v8661_v33 = vmul.f32 0.6931472, %v10818_v2  ;;  %v8377_v56 = vand.u32 2147483647, %v14565_v58  ;;  %v14592_v1 = vpop.eup %10819  ;;  %v8673_v35 = vmul.f32 %v14519_v30, %v8672_v4  ;;  %v8034_v13 = vpop.f32.mrb[178].mxu0  ;;  %v16276_v29 = vld [vmem:[#allocation58_spill] sm:$0xff] }
 0xb90   :  { %9524 = vst.msk [vmem:[%s16053_s7 + $0x10] sm:$0xff] %vm1899_vm0, %v9460_v51  ;;  %v9266_v44 = vadd.f32 1e-05, %v9202_v38  ;;  %10823 = vlog2.f32 %v8677_v20  ;;  %v8511_v50 = vmul.f32 1.442695, %v8439_v53  ;;  %v14596_v36 = vadd.f32 %v14188_v24, %v8026_v48 }
 0xb91   :  { %v10822_v0 = vpop.eup %10821  ;;  %v8667_v27 = vsel %vm14580_vm9, %v8664_v47, %v8661_v33  ;;  %v8686_v30 = vadd.f32 1.0, %v14592_v1  ;;  %v8513_v18 = vmul.f32 1.442695, %v8440_v19  ;;  %v8680_v42 = vmul.f32 -0.5, %v14572_v39 }
 0xb92   :  { %v9461_v61 = vsel %vm9329_vm4, %v14154_v63, %v9266_v44  ;;  %v9203_v48 = vadd.f32 %v8667_v27, %v8307_v40  ;;  %v8670_v17 = vmul.f32 0.6931472, %v10822_v0  ;;  %v14613_v10 = vadd.f32 %v14188_v24, %v8031_v15  ;;  %v8036_v63 = vpop.f32.mrb[179].mxu0 }
 0xb93   :  { %9525 = vst.msk [vmem:[%s16053_s7 + $0x18] sm:$0xff] %vm1899_vm0, %v9461_v61  ;;  %v8308_v52 = vmax.f32 %v14434_v34, 0.0  ;;  %vm8675_vm10 = vcmp.lt.f32.partialorder %v8674_v23, 0.0004427343  ;;  %10825 = vlog2.f32 %v8686_v30  ;;  %v8441_v32 = vsub.f32 0.0, %v8377_v56 }
 0xb94   :  { %v14617_v7 = vmul.f32 %v9379_v12, %v16276_v29  ;;  %v9267_v4 = vadd.f32 1e-05, %v9203_v48  ;;  %v8676_v59 = vsel %vm8675_vm10, %v8673_v35, %v8670_v17  ;;  %10827 = vpow2.f32 %v8511_v50  ;;  %v8039_v21 = vpop.f32.mrb[180].mxu0 }
 0xb95   :  { %v9204_v38 = vadd.f32 %v8676_v59, %v8308_v52  ;;  %v8689_v40 = vmul.f32 -0.5, %v14592_v1  ;;  %10829 = vpow2.f32 %v8513_v18  ;;  %v8515_v53 = vmul.f32 1.442695, %v8441_v32 }
 0xb96   :  { %v9462_v19 = vsel %vm9329_vm4, %v14170_v5, %v9267_v4  ;;  %v8681_v2 = vadd.f32 1.0, %v8680_v42  ;;  %v8378_v34 = vand.u32 2147483647, %v14596_v36  ;;  %v8379_v51 = vand.u32 2147483647, %v14613_v10  ;;  %v8041_v5 = vpop.f32.mrb[181].mxu0 }
 0xb97   :  { %9526 = vst.msk [vmem:[%s16053_s7 + $0x20] sm:$0xff] %vm1899_vm0, %v9462_v19  ;;  %v9268_v23 = vadd.f32 1e-05, %v9204_v38  ;;  %10831 = vpow2.f32 %v8515_v53  ;;  %v14630_v20 = vadd.f32 %v14188_v24, %v8034_v13  ;;  %v14633_v15 = vadd.f32 %v14188_v24, %v8039_v21  ;;  %v8042_v35 = vpop.f32.mrb[182].mxu0 }
 0xb98   :  { %v8309_v44 = vmax.f32 %v14473_v3, 0.0  ;;  %v8683_v33 = vand.u32 2147483647, %v14572_v39  ;;  %v8442_v47 = vsub.f32 0.0, %v8378_v34  ;;  %v8443_v56 = vsub.f32 0.0, %v8379_v51  ;;  %v8044_v61 = vpop.f32.mrb[183].mxu0 }
 0xb99   :  { %v9463_v50 = vsel %vm9329_vm4, %v14176_v54, %v9268_v23  ;;  %v8310_v16 = vmax.f32 %v14482_v60, 0.0  ;;  %v8690_v0 = vadd.f32 1.0, %v8689_v40  ;;  %v8380_v12 = vand.u32 2147483647, %v14630_v20 }
 0xb9a   :  { %v10824_v27 = vpop.eup %10823  ;;  %9527 = vst.msk [vmem:[%s16053_s7 + $0x28] sm:$0xff] %vm1899_vm0, %v9463_v50  ;;  %v8517_v3 = vmul.f32 1.442695, %v8442_v47  ;;  %v8519_v30 = vmul.f32 1.442695, %v8443_v56  ;;  %v14648_v13 = vadd.f32 %v14188_v24, %v8042_v35  ;;  %v8682_v60 = vmul.f32 %v14572_v39, %v8681_v2 }
 0xb9b   :  { %v8381_v18 = vand.u32 2147483647, %v14633_v15  ;;  %v8679_v54 = vmul.f32 0.6931472, %v10824_v27  ;;  %v8692_v48 = vand.u32 2147483647, %v14592_v1  ;;  %v8691_v53 = vmul.f32 %v14592_v1, %v8690_v0 }
 0xb9c   :  { %v8444_v17 = vsub.f32 0.0, %v8380_v12  ;;  %vm8684_vm11 = vcmp.lt.f32.partialorder %v8683_v33, 0.0004427343  ;;  %v8311_v42 = vmax.f32 %v14540_v22, 0.0  ;;  %10833 = vpow2.f32 %v8517_v3  ;;  %v8047_v19 = vpop.f32.mrb[184].mxu0  ;;  %v9384_v3 = vld [vmem:[%s16048_s2 + $0x1b0] sm:$0xff] }
 0xb9d   :  { %v8445_v63 = vsub.f32 0.0, %v8381_v18  ;;  %v10826_v52 = vpop.eup %10825  ;;  %v8685_v32 = vsel %vm8684_vm11, %v8682_v60, %v8679_v54  ;;  %10835 = vpow2.f32 %v8519_v30  ;;  %v8382_v4 = vand.u32 2147483647, %v14648_v13  ;;  %v8049_v21 = vpop.f32.mrb[185].mxu0 }
 0xb9e   :  { %v8521_v29 = vmul.f32 1.442695, %v8444_v17  ;;  %v10828_v59 = vpop.eup %10827  ;;  %v9205_v38 = vadd.f32 %v8685_v32, %v8309_v44  ;;  %v8688_v40 = vmul.f32 0.6931472, %v10826_v52  ;;  %v8312_v39 = vmax.f32 %v14557_v6, 0.0  ;;  %v8050_v56 = vpop.f32.mrb[186].mxu0 }
 0xb9f   :  { %v14656_v2 = vpop.eup %10829  ;;  %vm8693_vm12 = vcmp.lt.f32.partialorder %v8692_v48, 0.0004427343  ;;  %v8695_v34 = vadd.f32 1.0, %v10828_v59  ;;  %v8698_v51 = vmul.f32 -0.5, %v10828_v59  ;;  %v8523_v47 = vmul.f32 1.442695, %v8445_v63 }
 0xba0   :  { %10837 = vpow2.f32 %v8521_v29  ;;  %v9269_v23 = vadd.f32 1e-05, %v9205_v38  ;;  %v8694_v5 = vsel %vm8693_vm12, %v8691_v53, %v8688_v40  ;;  %v8704_v33 = vadd.f32 1.0, %v14656_v2  ;;  %v8052_v0 = vpop.f32.mrb[187].mxu0  ;;  %v16277_v29 = vld [vmem:[#allocation59_spill] sm:$0xff] }
 0xba1   :  { %v14659_v44 = vpop.eup %10831  ;;  %v9206_v35 = vadd.f32 %v8694_v5, %v8310_v16  ;;  %10839 = vlog2.f32 %v8695_v34  ;;  %v8313_v1 = vmax.f32 %v14565_v58, 0.0  ;;  %v8446_v50 = vsub.f32 0.0, %v8382_v4 }
 0xba2   :  { %v9464_v12 = vsel %vm9329_vm4, %v14160_v9, %v9269_v23  ;;  %v8701_v61 = vand.u32 2147483647, %v10828_v59  ;;  %10841 = vlog2.f32 %v8704_v33  ;;  %v8707_v27 = vmul.f32 -0.5, %v14656_v2 }
 0xba3   :  { %9528 = vst.msk [vmem:[%s16053_s7 + $0x30] sm:$0xff] %vm1899_vm0, %v9464_v12  ;;  %v9270_v16 = vadd.f32 1e-05, %v9206_v35  ;;  %v8699_v30 = vadd.f32 1.0, %v8698_v51  ;;  %v8713_v18 = vadd.f32 1.0, %v14659_v44  ;;  %10843 = vpow2.f32 %v8523_v47 }
 0xba4   :  { %v8716_v63 = vmul.f32 -0.5, %v14659_v44  ;;  %v8525_v52 = vmul.f32 1.442695, %v8446_v50  ;;  %v14683_v4 = vmul.f32 %v9384_v3, %v16277_v29  ;;  %vm14689_vm13 = vcmp.lt.f32.partialorder %v8701_v61, 0.0004427343  ;;  %v8055_v53 = vpop.f32.mrb[188].mxu0 }
 0xba5   :  { %v9465_v17 = vsel %vm9329_vm4, %v14173_v37, %v9270_v16  ;;  %10845 = vlog2.f32 %v8713_v18  ;;  %v8708_v40 = vadd.f32 1.0, %v8707_v27  ;;  %v8710_v37 = vand.u32 2147483647, %v14656_v2  ;;  %v8057_v33 = vpop.f32.mrb[189].mxu0 }
 0xba6   :  { %v10834_v32 = vpop.eup %10833  ;;  %9529 = vst.msk [vmem:[%s16053_s7 + $0x38] sm:$0xff] %vm1899_vm0, %v9465_v17  ;;  %v8700_v51 = vmul.f32 %v10828_v59, %v8699_v30  ;;  %v14695_v5 = vadd.f32 %v14188_v24, %v8047_v19  ;;  %v8719_v47 = vand.u32 2147483647, %v14659_v44  ;;  %10847 = vpow2.f32 %v8525_v52  ;;  %v8058_v0 = vpop.f32.mrb[190].mxu0 }
 0xba7   :  { %v10836_v34 = vpop.eup %10835  ;;  %v8722_v21 = vadd.f32 1.0, %v10834_v32  ;;  %v8725_v23 = vmul.f32 -0.5, %v10834_v32  ;;  %v8717_v61 = vadd.f32 1.0, %v8716_v63  ;;  %v8728_v27 = vand.u32 2147483647, %v10834_v32  ;;  %v8060_v59 = vpop.f32.mrb[191].mxu0 }
 0xba8   :  { %v8731_v35 = vadd.f32 1.0, %v10836_v34  ;;  %v8734_v50 = vmul.f32 -0.5, %v10836_v34  ;;  %v14701_v3 = vadd.f32 %v14188_v24, %v8050_v56  ;;  %v8737_v19 = vand.u32 2147483647, %v10836_v34 }
 0xba9   :  { %10849 = vlog2.f32 %v8722_v21  ;;  %v8726_v16 = vadd.f32 1.0, %v8725_v23  ;;  %v8709_v17 = vmul.f32 %v14656_v2, %v8708_v40  ;;  %vm14705_vm14 = vcmp.lt.f32.partialorder %v8710_v37, 0.0004427343 }
 0xbaa   :  { %v14698_v12 = vpop.eup %10837  ;;  %10851 = vlog2.f32 %v8731_v35  ;;  %v8735_v29 = vadd.f32 1.0, %v8734_v50  ;;  %v8383_v63 = vand.u32 2147483647, %v14695_v5  ;;  %vm14710_vm15 = vcmp.lt.f32.partialorder %v8719_v47, 0.0004427343 }
 0xbab   :  { %v8740_v30 = vadd.f32 1.0, %v14698_v12  ;;  %v10840_v18 = vpop.eup %10839  ;;  %v8743_v23 = vmul.f32 -0.5, %v14698_v12  ;;  %v8718_v59 = vmul.f32 %v14659_v44, %v8717_v61  ;;  %vm14716_vm1 = vcmp.lt.f32.partialorder %v8728_v27, 0.0004427343 }
 0xbac   :  { %v10842_v21 = vpop.eup %10841  ;;  %v8697_v33 = vmul.f32 0.6931472, %v10840_v18  ;;  %v8746_v40 = vand.u32 2147483647, %v14698_v12  ;;  %v8727_v47 = vmul.f32 %v10834_v32, %v8726_v16  ;;  %vm14723_vm2 = vcmp.lt.f32.partialorder %v8737_v19, 0.0004427343 }
 0xbad   :  { %10853 = vlog2.f32 %v8740_v30  ;;  %v8706_v35 = vmul.f32 0.6931472, %v10842_v21  ;;  %v10844_v37 = vpop.eup %10843  ;;  %v8447_v30 = vsub.f32 0.0, %v8383_v63  ;;  %v8384_v21 = vand.u32 2147483647, %v14701_v3  ;;  %v14728_v48 = vpop.f32.mrb[192].mxu0 }
 0xbae   :  { %v8703_v50 = vsel %vm14689_vm13, %v8700_v51, %v8697_v33  ;;  %v8736_v60 = vmul.f32 %v10836_v34, %v8735_v29  ;;  %v8749_v38 = vadd.f32 1.0, %v10844_v37  ;;  %v8065_v51 = vpop.f32.mrb[193].mxu0  ;;  %v8744_v19 = vadd.f32 1.0, %v8743_v23 }
 0xbaf   :  { %v10846_v44 = vpop.eup %10845  ;;  %v9207_v61 = vadd.f32 %v8703_v50, %v8311_v42  ;;  %v8712_v27 = vsel %vm14705_vm14, %v8709_v17, %v8706_v35  ;;  %v8752_v63 = vmul.f32 -0.5, %v10844_v37  ;;  %v8066_v33 = vpop.f32.mrb[194].mxu0  ;;  %vm14736_vm3 = vcmp.lt.f32.partialorder %v8746_v40, 0.0004427343 }
 0xbb0   :  { %v9208_v32 = vadd.f32 %v8712_v27, %v8312_v39  ;;  %v8715_v16 = vmul.f32 0.6931472, %v10846_v44  ;;  %10855 = vlog2.f32 %v8749_v38  ;;  %v14741_v22 = vadd.f32 %v14188_v24, %v8055_v53  ;;  %v8068_v42 = vpop.f32.mrb[195].mxu0  ;;  %v14743_v34 = vpop.eup %10847 }
 0xbb1   :  { %v9271_v9 = vadd.f32 1e-05, %v9207_v61  ;;  %v8527_v39 = vmul.f32 1.442695, %v8447_v30  ;;  %v8448_v52 = vsub.f32 0.0, %v8384_v21  ;;  %v8758_v53 = vadd.f32 1.0, %v14743_v34 }
 0xbb2   :  { %v9272_v17 = vadd.f32 1e-05, %v9208_v32  ;;  %v8721_v6 = vsel %vm14710_vm15, %v8718_v59, %v8715_v16  ;;  %v14754_v40 = vadd.f32 %v14188_v24, %v8058_v0  ;;  %v8745_v21 = vmul.f32 %v14698_v12, %v8744_v19 }
 0xbb3   :  { %v10850_v29 = vpop.eup %10849  ;;  %v9466_v23 = vsel %vm9329_vm4, %v14194_v31, %v9271_v9  ;;  %v9209_v35 = vadd.f32 %v8721_v6, %v8313_v1  ;;  %v8753_v31 = vadd.f32 1.0, %v8752_v63  ;;  %v8755_v9 = vand.u32 2147483647, %v10844_v37 }
 0xbb4   :  { %v10852_v50 = vpop.eup %10851  ;;  %9530 = vst.msk [vmem:[%s16053_s7 + $0x40] sm:$0xff] %vm1899_vm0, %v9466_v23  ;;  %v9467_v56 = vsel %vm9329_vm4, %v14209_v8, %v9272_v17  ;;  %v8724_v59 = vmul.f32 0.6931472, %v10850_v29  ;;  %10857 = vlog2.f32 %v8758_v53  ;;  %v8761_v1 = vmul.f32 -0.5, %v14743_v34  ;;  %v8071_v44 = vpop.f32.mrb[196].mxu0 }
 0xbb5   :  { %9531 = vst.msk [vmem:[%s16053_s7 + $0x48] sm:$0xff] %vm1899_vm0, %v9467_v56  ;;  %v9273_v24 = vadd.f32 1e-05, %v9209_v35  ;;  %v8733_v58 = vmul.f32 0.6931472, %v10852_v50  ;;  %10859 = vpow2.f32 %v8527_v39  ;;  %v16290_v27 = vmax.f32 %v14596_v36, 0.0 }
 0xbb6   :  { %v8730_v30 = vsel %vm14716_vm1, %v8727_v47, %v8724_v59  ;;  %v8529_v8 = vmul.f32 1.442695, %v8448_v52  ;;  %v8073_v16 = vpop.f32.mrb[197].mxu0  ;;  %v16291_v12 = vmax.f32 %v14613_v10, 0.0  ;;  %v8754_v47 = vmul.f32 %v10844_v37, %v8753_v31  ;;  %v9382_v10 = vld [vmem:[%s16048_s2 + $0x1a0] sm:$0xff] }
 0xbb7   :  { %v10854_v0 = vpop.eup %10853  ;;  %v9468_v61 = vsel %vm9329_vm4, %v14191_v45, %v9273_v24  ;;  %v9210_v38 = vadd.f32 %v8730_v30, %v16290_v27  ;;  %v8739_v51 = vsel %vm14723_vm2, %v8736_v60, %v8733_v58  ;;  %vm14784_vm5 = vcmp.lt.f32.partialorder %v8755_v9, 0.0004427343  ;;  %v14788_v45 = vpop.f32.mrb[198].mxu0  ;;  %v14802_v52 = vld [vmem:[%s16049_s3 + $0x11] ss:$0 sm:$0xff] }
 0xbb8   :  { %v8742_v32 = vmul.f32 0.6931472, %v10854_v0  ;;  %9532 = vst.msk [vmem:[%s16053_s7 + $0x50] sm:$0xff] %vm1899_vm0, %v9468_v61  ;;  %v9211_v2 = vadd.f32 %v8739_v51, %v16291_v12  ;;  %10861 = vpow2.f32 %v8529_v8  ;;  %v8762_v18 = vadd.f32 1.0, %v8761_v1  ;;  %v8076_v42 = vpop.f32.mrb[199].mxu0 }
 0xbb9   :  { %v9274_v36 = vadd.f32 1e-05, %v9210_v38  ;;  %v8385_v63 = vand.u32 2147483647, %v14741_v22  ;;  %v16294_v17 = vmax.f32 %v14630_v20, 0.0  ;;  %v14806_v54 = vadd.f32 %v14802_v52, %v14728_v48 }
 0xbba   :  { %v8748_v60 = vsel %vm14736_vm3, %v8745_v21, %v8742_v32  ;;  %v9275_v37 = vadd.f32 1e-05, %v9211_v2  ;;  %v8386_v39 = vand.u32 2147483647, %v14754_v40  ;;  %v10856_v29 = vpop.eup %10855  ;;  %v14812_v20 = vadd.f32 %v14802_v52, %v8066_v33 }
 0xbbb   :  { %v9212_v6 = vadd.f32 %v8748_v60, %v16294_v17  ;;  %v9469_v23 = vsel %vm9329_vm4, %v14206_v49, %v9274_v36  ;;  %v8449_v35 = vsub.f32 0.0, %v8385_v63  ;;  %v14815_v53 = vadd.f32 %v14802_v52, %v8071_v44  ;;  %v16295_v49 = vld [vmem:[#allocation61_spill] sm:$0xff] }
 0xbbc   :  { %9533 = vst.msk [vmem:[%s16053_s7 + $0x58] sm:$0xff] %vm1899_vm0, %v9469_v23  ;;  %v9470_v48 = vsel %vm9329_vm4, %v14221_v62, %v9275_v37  ;;  %v8751_v56 = vmul.f32 0.6931472, %v10856_v29  ;;  %v8450_v59 = vsub.f32 0.0, %v8386_v39  ;;  %v14825_v31 = vmul.f32 %v9382_v10, %v16295_v49  ;;  %v8079_v30 = vpop.f32.mrb[200].mxu0 }
 0xbbd   :  { %v9276_v50 = vadd.f32 1e-05, %v9212_v6  ;;  %9534 = vst.msk [vmem:[%s16053_s7 + $0x60] sm:$0xff] %vm1899_vm0, %v9470_v48  ;;  %v8764_v33 = vand.u32 2147483647, %v14743_v34  ;;  %v16296_v8 = vmax.f32 %v14633_v15, 0.0  ;;  %v8763_v61 = vmul.f32 %v14743_v34, %v8762_v18 }
 0xbbe   :  { %v8531_v9 = vmul.f32 1.442695, %v8449_v35  ;;  %v8387_v24 = vand.u32 2147483647, %v14806_v54  ;;  %v8757_v58 = vsel %vm14784_vm5, %v8754_v47, %v8751_v56  ;;  %v8533_v1 = vmul.f32 1.442695, %v8450_v59  ;;  %v10858_v21 = vpop.eup %10857 }
 0xbbf   :  { %v9471_v62 = vsel %vm9329_vm4, %v14236_v55, %v9276_v50  ;;  %v8388_v0 = vand.u32 2147483647, %v14812_v20  ;;  %v9213_v44 = vadd.f32 %v8757_v58, %v16296_v8  ;;  %v8081_v27 = vpop.f32.mrb[201].mxu0  ;;  %v10860_v38 = vpop.eup %10859  ;;  %v8760_v51 = vmul.f32 0.6931472, %v10858_v21 }
 0xbc0   :  { %9535 = vst.msk [vmem:[%s16053_s7 + $0x68] sm:$0xff] %vm1899_vm0, %v9471_v62  ;;  %10863 = vpow2.f32 %v8531_v9  ;;  %v8451_v55 = vsub.f32 0.0, %v8387_v24  ;;  %v8389_v16 = vand.u32 2147483647, %v14815_v53  ;;  %v8082_v12 = vpop.f32.mrb[202].mxu0  ;;  %v8318_v47 = vmax.f32 %v14648_v13, 0.0 }
 0xbc1   :  { %10865 = vpow2.f32 %v8533_v1  ;;  %v8452_v32 = vsub.f32 0.0, %v8388_v0  ;;  %v9277_v2 = vadd.f32 1e-05, %v9213_v44  ;;  %vm8765_vm6 = vcmp.lt.f32.partialorder %v8764_v33, 0.0004427343  ;;  %v8084_v63 = vpop.f32.mrb[203].mxu0 }
 0xbc2   :  { %v8767_v19 = vadd.f32 1.0, %v10860_v38  ;;  %v14848_v36 = vpop.eup %10861  ;;  %v8766_v15 = vsel %vm8765_vm6, %v8763_v61, %v8760_v51  ;;  %v8319_v34 = vmax.f32 %v14695_v5, 0.0  ;;  %v8535_v60 = vmul.f32 1.442695, %v8451_v55 }
 0xbc3   :  { %v8453_v18 = vsub.f32 0.0, %v8389_v16  ;;  %v9472_v42 = vsel %vm9329_vm4, %v14218_v43, %v9277_v2  ;;  %v9214_v10 = vadd.f32 %v8766_v15, %v8318_v47  ;;  %v8537_v37 = vmul.f32 1.442695, %v8452_v32 }
 0xbc4   :  { %10867 = vlog2.f32 %v8767_v19  ;;  %9536 = vst.msk [vmem:[%s16053_s7 + $0x70] sm:$0xff] %vm1899_vm0, %v9472_v42  ;;  %v8770_v13 = vmul.f32 -0.5, %v10860_v38  ;;  %v8320_v17 = vmax.f32 %v14701_v3, 0.0  ;;  %v8776_v6 = vadd.f32 1.0, %v14848_v36  ;;  %v14867_v56 = vpop.f32.mrb[204].mxu0 }
 0xbc5   :  { %v8321_v39 = vmax.f32 %v14741_v22, 0.0  ;;  %v9278_v29 = vadd.f32 1e-05, %v9214_v10  ;;  %v8773_v23 = vand.u32 2147483647, %v10860_v38  ;;  %10869 = vpow2.f32 %v8535_v60  ;;  %v8089_v9 = vpop.f32.mrb[205].mxu0 }
 0xbc6   :  { %v8539_v35 = vmul.f32 1.442695, %v8453_v18  ;;  %10871 = vlog2.f32 %v8776_v6  ;;  %v8779_v43 = vmul.f32 -0.5, %v14848_v36  ;;  %v8322_v48 = vmax.f32 %v14754_v40, 0.0 }
 0xbc7   :  { %v14865_v50 = vadd.f32 %v14802_v52, %v14788_v45  ;;  %v9473_v59 = vsel %vm9329_vm4, %v14233_v11, %v9278_v29  ;;  %10873 = vpow2.f32 %v8537_v37  ;;  %v14873_v49 = vadd.f32 %v14802_v52, %v8079_v30  ;;  %v14884_v11 = vpop.f32.mrb[206].mxu0 }
 0xbc8   :  { %v14876_v33 = vadd.f32 %v14802_v52, %v8082_v12  ;;  %9537 = vst.msk [vmem:[%s16053_s7 + $0x78] sm:$0xff] %vm1899_vm0, %v9473_v59  ;;  %v8771_v45 = vadd.f32 1.0, %v8770_v13  ;;  %v8323_v24 = vmax.f32 %v14806_v54, 0.0  ;;  %10875 = vpow2.f32 %v8539_v35  ;;  %v8092_v51 = vpop.f32.mrb[207].mxu0 }
 0xbc9   :  { %v8390_v62 = vand.u32 2147483647, %v14865_v50  ;;  %vm14886_vm7 = vcmp.lt.f32.partialorder %v8773_v23, 0.0004427343  ;;  %v8324_v0 = vmax.f32 %v14812_v20, 0.0  ;;  %v8325_v30 = vmax.f32 %v14815_v53, 0.0 }
 0xbca   :  { %v10864_v58 = vpop.eup %10863  ;;  %v8391_v21 = vand.u32 2147483647, %v14873_v49  ;;  %v8782_v44 = vand.u32 2147483647, %v14848_v36  ;;  %v8780_v32 = vadd.f32 1.0, %v8779_v43  ;;  %v8772_v47 = vmul.f32 %v10860_v38, %v8771_v45 }
 0xbcb   :  { %v10866_v8 = vpop.eup %10865  ;;  %v8785_v61 = vadd.f32 1.0, %v10864_v58  ;;  %v8788_v55 = vmul.f32 -0.5, %v10864_v58  ;;  %v8454_v27 = vsub.f32 0.0, %v8390_v62  ;;  %v8392_v2 = vand.u32 2147483647, %v14876_v33 }
 0xbcc   :  { %v8794_v16 = vadd.f32 1.0, %v10866_v8  ;;  %v8455_v12 = vsub.f32 0.0, %v8391_v21  ;;  %v8791_v19 = vand.u32 2147483647, %v10864_v58  ;;  %v8797_v18 = vmul.f32 -0.5, %v10866_v8  ;;  %v14899_v6 = vpop.f32.mrb[208].mxu0 }
 0xbcd   :  { %10877 = vlog2.f32 %v8785_v61  ;;  %v8541_v15 = vmul.f32 1.442695, %v8454_v27  ;;  %v8800_v63 = vand.u32 2147483647, %v10866_v8  ;;  %vm14895_vm8 = vcmp.lt.f32.partialorder %v8782_v44, 0.0004427343 }
 0xbce   :  { %v10868_v60 = vpop.eup %10867  ;;  %10879 = vlog2.f32 %v8794_v16  ;;  %v8543_v42 = vmul.f32 1.442695, %v8455_v12  ;;  %v8789_v13 = vadd.f32 1.0, %v8788_v55  ;;  %v8781_v38 = vmul.f32 %v14848_v36, %v8780_v32  ;;  %v8097_v43 = vpop.f32.mrb[209].mxu0 }
 0xbcf   :  { %v8769_v10 = vmul.f32 0.6931472, %v10868_v60  ;;  %10881 = vpow2.f32 %v8541_v15  ;;  %v14901_v29 = vpop.eup %10869  ;;  %v8326_v23 = vmax.f32 %v14865_v50, 0.0  ;;  %v8456_v35 = vsub.f32 0.0, %v8392_v2  ;;  %v14913_v44 = vpop.f32.mrb[210].mxu0 }
 0xbd0   :  { %10883 = vpow2.f32 %v8543_v42  ;;  %v10872_v59 = vpop.eup %10871  ;;  %vm14907_vm9 = vcmp.lt.f32.partialorder %v8791_v19, 0.0004427343  ;;  %v8803_v62 = vadd.f32 1.0, %v14901_v29  ;;  %v8327_v21 = vmax.f32 %v14873_v49, 0.0  ;;  %v8100_v51 = vpop.f32.mrb[211].mxu0 }
 0xbd1   :  { %v8775_v9 = vsel %vm14886_vm7, %v8772_v47, %v8769_v10  ;;  %v14915_v36 = vpop.eup %10873  ;;  %v8778_v55 = vmul.f32 0.6931472, %v10872_v59  ;;  %v8798_v27 = vadd.f32 1.0, %v8797_v18  ;;  %vm14919_vm10 = vcmp.lt.f32.partialorder %v8800_v63, 0.0004427343 }
 0xbd2   :  { %v9215_v61 = vadd.f32 %v8775_v9, %v8319_v34  ;;  %v14923_v32 = vpop.eup %10875  ;;  %v8790_v16 = vmul.f32 %v10864_v58, %v8789_v13  ;;  %10885 = vlog2.f32 %v8803_v62  ;;  %v8812_v12 = vadd.f32 1.0, %v14915_v36 }
 0xbd3   :  { %v14928_v2 = vadd.f32 %v14802_v52, %v14867_v56  ;;  %v8784_v5 = vsel %vm14895_vm8, %v8781_v38, %v8778_v55  ;;  %v8806_v34 = vmul.f32 -0.5, %v14901_v29  ;;  %v8545_v19 = vmul.f32 1.442695, %v8456_v35 }
 0xbd4   :  { %v9279_v47 = vadd.f32 1e-05, %v9215_v61  ;;  %v9216_v15 = vadd.f32 %v8784_v5, %v8320_v17  ;;  %10887 = vlog2.f32 %v8812_v12  ;;  %v8815_v58 = vmul.f32 -0.5, %v14915_v36 }
 0xbd5   :  { %v8821_v60 = vadd.f32 1.0, %v14923_v32  ;;  %v8799_v18 = vmul.f32 %v10866_v8, %v8798_v27  ;;  %v8824_v63 = vmul.f32 -0.5, %v14923_v32  ;;  %v14943_v42 = vadd.f32 %v14802_v52, %v14884_v11  ;;  %v14952_v11 = vpop.f32.mrb[212].mxu0 }
 0xbd6   :  { %v9474_v56 = vsel %vm9329_vm4, %v14248_v46, %v9279_v47  ;;  %v9280_v3 = vadd.f32 1e-05, %v9216_v15  ;;  %v8809_v17 = vand.u32 2147483647, %v14901_v29  ;;  %v8393_v37 = vand.u32 2147483647, %v14928_v2 }
 0xbd7   :  { %v10878_v10 = vpop.eup %10877  ;;  %9538 = vst.msk [vmem:[%s16053_s7 + $0x80] sm:$0xff] %vm1899_vm0, %v9474_v56  ;;  %10889 = vlog2.f32 %v8821_v60  ;;  %v8807_v13 = vadd.f32 1.0, %v8806_v34  ;;  %v8818_v38 = vand.u32 2147483647, %v14915_v36  ;;  %v8816_v9 = vadd.f32 1.0, %v8815_v58  ;;  %v8105_v61 = vpop.f32.mrb[213].mxu0 }
 0xbd8   :  { %v10880_v46 = vpop.eup %10879  ;;  %v8787_v8 = vmul.f32 0.6931472, %v10878_v10  ;;  %10891 = vpow2.f32 %v8545_v19  ;;  %v9475_v43 = vsel %vm9329_vm4, %v14264_v57, %v9280_v3  ;;  %v8827_v62 = vand.u32 2147483647, %v14923_v32  ;;  %v14966_v5 = vpop.f32.mrb[214].mxu0 }
 0xbd9   :  { %v10882_v35 = vpop.eup %10881  ;;  %v8796_v59 = vmul.f32 0.6931472, %v10880_v46  ;;  %9539 = vst.msk [vmem:[%s16053_s7 + $0x88] sm:$0xff] %vm1899_vm0, %v9475_v43  ;;  %v8825_v51 = vadd.f32 1.0, %v8824_v63  ;;  %v8457_v15 = vsub.f32 0.0, %v8393_v37  ;;  %v8108_v58 = vpop.f32.mrb[215].mxu0  ;;  %v8808_v45 = vmul.f32 %v14901_v29, %v8807_v13 }
 0xbda   :  { %v14958_v55 = vpop.eup %10883  ;;  %v8793_v27 = vsel %vm14907_vm9, %v8790_v16, %v8787_v8  ;;  %v8830_v12 = vadd.f32 1.0, %v10882_v35  ;;  %v8833_v47 = vmul.f32 -0.5, %v10882_v35  ;;  %vm14976_vm11 = vcmp.lt.f32.partialorder %v8809_v17, 0.0004427343 }
 0xbdb   :  { %v9217_v57 = vadd.f32 %v8793_v27, %v8321_v39  ;;  %v8802_v34 = vsel %vm14919_vm10, %v8799_v18, %v8796_v59  ;;  %v8839_v19 = vadd.f32 1.0, %v14958_v55  ;;  %vm14980_vm12 = vcmp.lt.f32.partialorder %v8818_v38, 0.0004427343 }
 0xbdc   :  { %v9218_v60 = vadd.f32 %v8802_v34, %v8322_v48  ;;  %10893 = vlog2.f32 %v8830_v12  ;;  %v10886_v56 = vpop.eup %10885  ;;  %v8836_v1 = vand.u32 2147483647, %v10882_v35  ;;  %v8817_v40 = vmul.f32 %v14915_v36, %v8816_v9  ;;  %v14993_v46 = vpop.f32.mrb[216].mxu0 }
 0xbdd   :  { %v9281_v22 = vadd.f32 1e-05, %v9217_v57  ;;  %10895 = vlog2.f32 %v8839_v19  ;;  %v8805_v63 = vmul.f32 0.6931472, %v10886_v56  ;;  %v8834_v48 = vadd.f32 1.0, %v8833_v47  ;;  %v8113_v13 = vpop.f32.mrb[217].mxu0 }
 0xbde   :  { %v9282_v18 = vadd.f32 1e-05, %v9218_v60  ;;  %v10888_v10 = vpop.eup %10887  ;;  %v8826_v3 = vmul.f32 %v14923_v32, %v8825_v51  ;;  %vm14989_vm13 = vcmp.lt.f32.partialorder %v8827_v62, 0.0004427343  ;;  %v8547_v37 = vmul.f32 1.442695, %v8457_v15 }
 0xbdf   :  { %v9476_v29 = vsel %vm9329_vm4, %v14239_v25, %v9281_v22  ;;  %v8811_v25 = vsel %vm14976_vm11, %v8808_v45, %v8805_v63  ;;  %v8814_v32 = vmul.f32 0.6931472, %v10888_v10  ;;  %v8842_v8 = vmul.f32 -0.5, %v14958_v55  ;;  %v15016_v9 = vpop.f32.mrb[218].mxu0 }
 0xbe0   :  { %9540 = vst.msk [vmem:[%s16053_s7 + $0x90] sm:$0xff] %vm1899_vm0, %v9476_v29  ;;  %v9477_v36 = vsel %vm9329_vm4, %v14251_v14, %v9282_v18  ;;  %v9219_v43 = vadd.f32 %v8811_v25, %v8323_v24  ;;  %vm15011_vm14 = vcmp.lt.f32.partialorder %v8836_v1, 0.0004427343  ;;  %10897 = vpow2.f32 %v8547_v37  ;;  %v8116_v54 = vpop.f32.mrb[219].mxu0 }
 0xbe1   :  { %v10890_v38 = vpop.eup %10889  ;;  %9541 = vst.msk [vmem:[%s16053_s7 + $0x98] sm:$0xff] %vm1899_vm0, %v9477_v36  ;;  %v8394_v14 = vand.u32 2147483647, %v14943_v42  ;;  %v8820_v61 = vsel %vm14980_vm12, %v8817_v40, %v8814_v32  ;;  %v8835_v51 = vmul.f32 %v10882_v35, %v8834_v48  ;;  %v8845_v12 = vand.u32 2147483647, %v14958_v55  ;;  %v16316_v48 = vld [vmem:[#allocation10_spill] sm:$0xff] }
 0xbe2   :  { %v15018_v62 = vpop.eup %10891  ;;  %v8823_v27 = vmul.f32 0.6931472, %v10890_v38  ;;  %v9283_v24 = vadd.f32 1e-05, %v9219_v43  ;;  %v9220_v47 = vadd.f32 %v8820_v61, %v8324_v0  ;;  %v15028_v34 = vadd.f32 %v14802_v52, %v14899_v6 }
 0xbe3   :  { %v8848_v57 = vadd.f32 1.0, %v15018_v62  ;;  %v8843_v15 = vadd.f32 1.0, %v8842_v8  ;;  %v8458_v58 = vsub.f32 0.0, %v8394_v14  ;;  %v15034_v35 = vadd.f32 %v14802_v52, %v14913_v44 }
 0xbe4   :  { %v8829_v19 = vsel %vm14989_vm13, %v8826_v3, %v8823_v27  ;;  %v9478_v20 = vsel %vm9329_vm4, %v14278_v28, %v9283_v24  ;;  %v9284_v0 = vadd.f32 1e-05, %v9220_v47  ;;  %vm15045_vm15 = vcmp.lt.f32.partialorder %v8845_v12, 0.0004427343  ;;  %v8119_v40 = vpop.f32.mrb[220].mxu0 }
 0xbe5   :  { %v9221_v60 = vadd.f32 %v8829_v19, %v8325_v30  ;;  %10899 = vlog2.f32 %v8848_v57  ;;  %9542 = vst.msk [vmem:[%s16053_s7 + $0xa0] sm:$0xff] %vm1899_vm0, %v9478_v20  ;;  %v8851_v44 = vmul.f32 -0.5, %v15018_v62  ;;  %v8549_v16 = vmul.f32 1.442695, %v8458_v58  ;;  %v16315_v30 = vld [vmem:[#allocation13_spill] sm:$0xff]  ;;  %v8121_v37 = vpop.f32.mrb[221].mxu0 }
 0xbe6   :  { %v10894_v6 = vpop.eup %10893  ;;  %v15052_v28 = vadd.f32 %v14802_v52, %v14952_v11  ;;  %v9479_v56 = vsel %vm9329_vm4, %v16315_v30, %v9284_v0  ;;  %v8395_v1 = vand.u32 2147483647, %v15028_v34  ;;  %v8844_v63 = vmul.f32 %v14958_v55, %v8843_v15  ;;  %v15079_v8 = vpop.f32.mrb[222].mxu0 }
 0xbe7   :  { %v10896_v53 = vpop.eup %10895  ;;  %v9285_v22 = vadd.f32 1e-05, %v9221_v60  ;;  %v8832_v39 = vmul.f32 0.6931472, %v10894_v6  ;;  %9543 = vst.msk [vmem:[%s16053_s7 + $0xa8] sm:$0xff] %vm1899_vm0, %v9479_v56  ;;  %10901 = vpow2.f32 %v8549_v16  ;;  %v8328_v43 = vmax.f32 %v14876_v33, 0.0 }
 0xbe8   :  { %v8841_v18 = vmul.f32 0.6931472, %v10896_v53  ;;  %v8396_v11 = vand.u32 2147483647, %v15034_v35  ;;  %v8854_v3 = vand.u32 2147483647, %v15018_v62  ;;  %v15117_v53 = vadd.f32 %v14802_v52, %v15016_v9 }
 0xbe9   :  { %v9480_v10 = vsel %vm9329_vm4, %v16316_v48, %v9285_v22  ;;  %v8838_v29 = vsel %vm15011_vm14, %v8835_v51, %v8832_v39  ;;  %v8459_v17 = vsub.f32 0.0, %v8395_v1  ;;  %v8397_v32 = vand.u32 2147483647, %v15052_v28  ;;  %v8124_v61 = vpop.f32.mrb[223].mxu0 }
 0xbea   :  { %9544 = vst.msk [vmem:[%s16053_s7 + $0xb0] sm:$0xff] %vm1899_vm0, %v9480_v10  ;;  %v9222_v55 = vadd.f32 %v8838_v29, %v8326_v23  ;;  %v8847_v36 = vsel %vm15045_vm15, %v8844_v63, %v8841_v18  ;;  %v8460_v25 = vsub.f32 0.0, %v8396_v11  ;;  %v10898_v13 = vpop.eup %10897  ;;  %v8852_v59 = vadd.f32 1.0, %v8851_v44 }
 0xbeb   :  { %v9223_v38 = vadd.f32 %v8847_v36, %v8327_v21  ;;  %v8551_v14 = vmul.f32 1.442695, %v8459_v17  ;;  %v8857_v50 = vadd.f32 1.0, %v10898_v13  ;;  %v15086_v23 = vadd.f32 %v14802_v52, %v14966_v5  ;;  %v16317_v21 = vld [vmem:[#allocation11_spill] sm:$0xff] }
 0xbec   :  { %v9286_v27 = vadd.f32 1e-05, %v9222_v55  ;;  %v15090_v51 = vadd.f32 %v14802_v52, %v14993_v46  ;;  %v8553_v54 = vmul.f32 1.442695, %v8460_v25  ;;  %v8461_v49 = vsub.f32 0.0, %v8397_v32  ;;  %v16320_v46 = vld [vmem:[#allocation14_spill] sm:$0xff] }
 0xbed   :  { %v9287_v12 = vadd.f32 1e-05, %v9223_v38  ;;  %10903 = vpow2.f32 %v8551_v14  ;;  %vm15095_vm1 = vcmp.lt.f32.partialorder %v8854_v3, 0.0004427343  ;;  %v8329_v47 = vmax.f32 %v14928_v2, 0.0  ;;  %v8127_v58 = vpop.f32.mrb[224].mxu0 }
 0xbee   :  { %v9481_v33 = vsel %vm9329_vm4, %v16317_v21, %v9286_v27  ;;  %10905 = vlog2.f32 %v8857_v50  ;;  %v8860_v19 = vmul.f32 -0.5, %v10898_v13  ;;  %v8555_v15 = vmul.f32 1.442695, %v8461_v49  ;;  %v8129_v45 = vpop.f32.mrb[225].mxu0 }
 0xbef   :  { %v10900_v5 = vpop.eup %10899  ;;  %9545 = vst.msk [vmem:[%s16053_s7 + $0xb8] sm:$0xff] %vm1899_vm0, %v9481_v33  ;;  %v9482_v57 = vsel %vm9329_vm4, %v16320_v46, %v9287_v12  ;;  %10907 = vpow2.f32 %v8553_v54  ;;  %v8853_v0 = vmul.f32 %v15018_v62, %v8852_v59  ;;  %v8330_v60 = vmax.f32 %v14943_v42, 0.0  ;;  %v15119_v30 = vpop.f32.mrb[226].mxu0 }
 0xbf0   :  { %9546 = vst.msk [vmem:[%s16053_s7 + $0xc0] sm:$0xff] %vm1899_vm0, %v9482_v57  ;;  %v8850_v20 = vmul.f32 0.6931472, %v10900_v5  ;;  %v8398_v6 = vand.u32 2147483647, %v15086_v23  ;;  %10909 = vpow2.f32 %v8555_v15  ;;  %v8331_v22 = vmax.f32 %v15028_v34, 0.0 }
 0xbf1   :  { %v8863_v44 = vand.u32 2147483647, %v10898_v13  ;;  %v8399_v16 = vand.u32 2147483647, %v15090_v51  ;;  %v15121_v56 = vpop.eup %10901  ;;  %v8332_v39 = vmax.f32 %v15034_v35, 0.0  ;;  %v8132_v18 = vpop.f32.mrb[227].mxu0  ;;  %v15129_v9 = vadd.f32 %v14802_v52, %v8119_v40 }
 0xbf2   :  { %v8856_v62 = vsel %vm15095_vm1, %v8853_v0, %v8850_v20  ;;  %v8462_v1 = vsub.f32 0.0, %v8398_v6  ;;  %v8861_v11 = vadd.f32 1.0, %v8860_v19  ;;  %v8866_v48 = vadd.f32 1.0, %v15121_v56 }
 0xbf3   :  { %v9224_v63 = vadd.f32 %v8856_v62, %v8328_v43  ;;  %v8333_v10 = vmax.f32 %v15052_v28, 0.0  ;;  %v8463_v3 = vsub.f32 0.0, %v8399_v16  ;;  %v8400_v17 = vand.u32 2147483647, %v15117_v53  ;;  %v16323_v43 = vld [vmem:[#allocation17_spill] sm:$0xff] }
 0xbf4   :  { %v8557_v29 = vmul.f32 1.442695, %v8462_v1  ;;  %vm15133_vm2 = vcmp.lt.f32.partialorder %v8863_v44, 0.0004427343  ;;  %10911 = vlog2.f32 %v8866_v48  ;;  %v8334_v36 = vmax.f32 %v15086_v23, 0.0  ;;  %v15146_v50 = vpop.f32.mrb[228].mxu0 }
 0xbf5   :  { %v9288_v37 = vadd.f32 1e-05, %v9224_v63  ;;  %v8869_v25 = vmul.f32 -0.5, %v15121_v56  ;;  %v8559_v32 = vmul.f32 1.442695, %v8463_v3  ;;  %v8464_v40 = vsub.f32 0.0, %v8400_v17 }
 0xbf6   :  { %10913 = vpow2.f32 %v8557_v29  ;;  %v8862_v14 = vmul.f32 %v10898_v13, %v8861_v11  ;;  %v8872_v61 = vand.u32 2147483647, %v15121_v56  ;;  %v8401_v27 = vand.u32 2147483647, %v15129_v9  ;;  %v8137_v21 = vpop.f32.mrb[229].mxu0 }
 0xbf7   :  { %v15139_v38 = vpop.eup %10903  ;;  %v9483_v59 = vsel %vm9329_vm4, %v16323_v43, %v9288_v37  ;;  %v8335_v49 = vmax.f32 %v15090_v51, 0.0  ;;  %10915 = vpow2.f32 %v8559_v32  ;;  %v15156_v13 = vadd.f32 %v14802_v52, %v15079_v8  ;;  %v15165_v0 = vpop.f32.mrb[230].mxu0  ;;  %v16326_v43 = vld [vmem:[#allocation12_spill] sm:$0xff] }
 0xbf8   :  { %v10906_v12 = vpop.eup %10905  ;;  %9547 = vst.msk [vmem:[%s16053_s7 + $0xc8] sm:$0xff] %vm1899_vm0, %v9483_v59  ;;  %v8875_v54 = vadd.f32 1.0, %v15139_v38  ;;  %v8336_v5 = vmax.f32 %v15117_v53, 0.0  ;;  %v8561_v46 = vmul.f32 1.442695, %v8464_v40  ;;  %v15162_v57 = vadd.f32 %v14802_v52, %v8127_v58  ;;  %v8140_v58 = vpop.f32.mrb[231].mxu0 }
 0xbf9   :  { %v15158_v33 = vpop.eup %10907  ;;  %v8859_v24 = vmul.f32 0.6931472, %v10906_v12  ;;  %v8870_v19 = vadd.f32 1.0, %v8869_v25  ;;  %v8465_v20 = vsub.f32 0.0, %v8401_v27  ;;  %vm15169_vm3 = vcmp.lt.f32.partialorder %v8872_v61, 0.0004427343 }
 0xbfa   :  { %10917 = vlog2.f32 %v8875_v54  ;;  %v8884_v15 = vadd.f32 1.0, %v15158_v33  ;;  %v10910_v6 = vpop.eup %10909  ;;  %v8878_v44 = vmul.f32 -0.5, %v15139_v38  ;;  %v8337_v1 = vmax.f32 %v15129_v9, 0.0 }
 0xbfb   :  { %v8865_v8 = vsel %vm15133_vm2, %v8862_v14, %v8859_v24  ;;  %10919 = vpow2.f32 %v8561_v46  ;;  %v8893_v62 = vadd.f32 1.0, %v10910_v6  ;;  %v8881_v18 = vand.u32 2147483647, %v15139_v38 }
 0xbfc   :  { %v9225_v16 = vadd.f32 %v8865_v8, %v8329_v47  ;;  %10921 = vlog2.f32 %v8884_v15  ;;  %v8887_v63 = vmul.f32 -0.5, %v15158_v33  ;;  %v8890_v11 = vand.u32 2147483647, %v15158_v33  ;;  %v15183_v32 = vpop.f32.mrb[232].mxu0 }
 0xbfd   :  { %v8896_v48 = vmul.f32 -0.5, %v10910_v6  ;;  %10923 = vlog2.f32 %v8893_v62  ;;  %v8563_v3 = vmul.f32 1.442695, %v8465_v20  ;;  %v8402_v17 = vand.u32 2147483647, %v15156_v13  ;;  %v8145_v27 = vpop.f32.mrb[233].mxu0 }
 0xbfe   :  { %v9289_v29 = vadd.f32 1e-05, %v9225_v16  ;;  %v10912_v37 = vpop.eup %10911  ;;  %v8871_v2 = vmul.f32 %v15121_v56, %v8870_v19  ;;  %v8879_v47 = vadd.f32 1.0, %v8878_v44  ;;  %v8899_v55 = vand.u32 2147483647, %v10910_v6  ;;  %v15196_v24 = vpop.f32.mrb[234].mxu0 }
 0xbff   :  { %v8403_v25 = vand.u32 2147483647, %v15162_v57  ;;  %v8868_v14 = vmul.f32 0.6931472, %v10912_v37  ;;  %10925 = vpow2.f32 %v8563_v3  ;;  %v8466_v61 = vsub.f32 0.0, %v8402_v17  ;;  %v8148_v44 = vpop.f32.mrb[235].mxu0 }
 0xc00   :  { %v10914_v40 = vpop.eup %10913  ;;  %v9484_v59 = vsel %vm9329_vm4, %v16326_v43, %v9289_v29  ;;  %vm15192_vm5 = vcmp.lt.f32.partialorder %v8881_v18, 0.0004427343  ;;  %v8888_v12 = vadd.f32 1.0, %v8887_v63  ;;  %v8897_v54 = vadd.f32 1.0, %v8896_v48 }
 0xc01   :  { %9548 = vst.msk [vmem:[%s16053_s7 + $0xd0] sm:$0xff] %vm1899_vm0, %v9484_v59  ;;  %v8902_v21 = vadd.f32 1.0, %v10914_v40  ;;  %v15198_v46 = vpop.eup %10915  ;;  %v8874_v19 = vsel %vm15169_vm3, %v8871_v2, %v8868_v14  ;;  %v8905_v15 = vmul.f32 -0.5, %v10914_v40  ;;  %v8565_v20 = vmul.f32 1.442695, %v8466_v61 }
 0xc02   :  { %v8467_v8 = vsub.f32 0.0, %v8403_v25  ;;  %v9226_v58 = vadd.f32 %v8874_v19, %v8330_v60  ;;  %v8880_v16 = vmul.f32 %v15139_v38, %v8879_v47  ;;  %vm15205_vm6 = vcmp.lt.f32.partialorder %v8890_v11, 0.0004427343  ;;  %v16333_v47 = vld [vmem:[#allocation15_spill] sm:$0xff] }
 0xc03   :  { %10927 = vlog2.f32 %v8902_v21  ;;  %vm15209_vm7 = vcmp.lt.f32.partialorder %v8899_v55, 0.0004427343  ;;  %v8908_v45 = vand.u32 2147483647, %v10914_v40  ;;  %v8911_v48 = vadd.f32 1.0, %v15198_v46 }
 0xc04   :  { %v10918_v18 = vpop.eup %10917  ;;  %10929 = vpow2.f32 %v8565_v20  ;;  %v9290_v42 = vadd.f32 1e-05, %v9226_v58  ;;  %v8889_v38 = vmul.f32 %v15158_v33, %v8888_v12  ;;  %v8567_v11 = vmul.f32 1.442695, %v8467_v8  ;;  %v15224_v14 = vpop.f32.mrb[236].mxu0 }
 0xc05   :  { %v15214_v29 = vpop.eup %10919  ;;  %v8877_v60 = vmul.f32 0.6931472, %v10918_v18  ;;  %v8898_v17 = vmul.f32 %v10910_v6, %v8897_v54  ;;  %v8906_v37 = vadd.f32 1.0, %v8905_v15  ;;  %10931 = vlog2.f32 %v8911_v48  ;;  %v8153_v56 = vpop.f32.mrb[237].mxu0  ;;  %v16336_v18 = vld [vmem:[#allocation18_spill] sm:$0xff] }
 0xc06   :  { %v10922_v3 = vpop.eup %10921  ;;  %v8920_v2 = vadd.f32 1.0, %v15214_v29  ;;  %v9485_v55 = vsel %vm9329_vm4, %v16333_v47, %v9290_v42  ;;  %v8914_v59 = vmul.f32 -0.5, %v15198_v46  ;;  %vm15232_vm8 = vcmp.lt.f32.partialorder %v8908_v45, 0.0004427343  ;;  %v15243_v19 = vpop.f32.mrb[238].mxu0 }
 0xc07   :  { %v8883_v25 = vsel %vm15192_vm5, %v8880_v16, %v8877_v60  ;;  %v8886_v43 = vmul.f32 0.6931472, %v10922_v3  ;;  %v10924_v33 = vpop.eup %10923  ;;  %9549 = vst.msk [vmem:[%s16053_s7 + $0xd8] sm:$0xff] %vm1899_vm0, %v9485_v55  ;;  %v15238_v27 = vadd.f32 %v14802_v52, %v15119_v30  ;;  %v8923_v21 = vmul.f32 -0.5, %v15214_v29  ;;  %v8156_v30 = vpop.f32.mrb[239].mxu0 }
 0xc08   :  { %v9227_v6 = vadd.f32 %v8883_v25, %v8331_v22  ;;  %10933 = vlog2.f32 %v8920_v2  ;;  %v8895_v54 = vmul.f32 0.6931472, %v10924_v33  ;;  %v8907_v20 = vmul.f32 %v10914_v40, %v8906_v37 }
 0xc09   :  { %v8892_v12 = vsel %vm15205_vm6, %v8889_v38, %v8886_v43  ;;  %10935 = vpow2.f32 %v8567_v11  ;;  %v10926_v34 = vpop.eup %10925  ;;  %v8917_v8 = vand.u32 2147483647, %v15198_v46  ;;  %v8915_v58 = vadd.f32 1.0, %v8914_v59  ;;  %v16337_v11 = vld [vmem:[#allocation21_spill] sm:$0xff]  ;;  %v16342_v43 = vld [vmem:[#allocation16_spill] sm:$0xff] }
 0xc0a   :  { %v9291_v22 = vadd.f32 1e-05, %v9227_v6  ;;  %v9228_v15 = vadd.f32 %v8892_v12, %v8332_v39  ;;  %v8901_v44 = vsel %vm15209_vm7, %v8898_v17, %v8895_v54  ;;  %v8926_v16 = vand.u32 2147483647, %v15214_v29 }
 0xc0b   :  { %v8929_v62 = vadd.f32 1.0, %v10926_v34  ;;  %v9229_v35 = vadd.f32 %v8901_v44, %v8333_v10  ;;  %v8932_v39 = vmul.f32 -0.5, %v10926_v34  ;;  %v8924_v63 = vadd.f32 1.0, %v8923_v21 }
 0xc0c   :  { %v9486_v45 = vsel %vm9329_vm4, %v16336_v18, %v9291_v22  ;;  %v9292_v48 = vadd.f32 1e-05, %v9228_v15  ;;  %v8935_v42 = vand.u32 2147483647, %v10926_v34  ;;  %v8404_v60 = vand.u32 2147483647, %v15238_v27 }
 0xc0d   :  { %v10928_v40 = vpop.eup %10927  ;;  %9550 = vst.msk [vmem:[%s16053_s7 + $0xe0] sm:$0xff] %vm1899_vm0, %v9486_v45  ;;  %10937 = vlog2.f32 %v8929_v62  ;;  %v9293_v28 = vadd.f32 1e-05, %v9229_v35  ;;  %v15268_v17 = vadd.f32 %v14802_v52, %v15146_v50  ;;  %v8916_v37 = vmul.f32 %v15198_v46, %v8915_v58  ;;  %v15284_v25 = vpop.f32.mrb[240].mxu0  ;;  %v16345_v35 = vld [vmem:[#allocation19_spill] sm:$0xff] }
 0xc0e   :  { %v15261_v38 = vpop.eup %10929  ;;  %v9487_v3 = vsel %vm9329_vm4, %v16337_v11, %v9292_v48  ;;  %v8904_v10 = vmul.f32 0.6931472, %v10928_v40  ;;  %vm15275_vm9 = vcmp.lt.f32.partialorder %v8917_v8, 0.0004427343  ;;  %vm15279_vm10 = vcmp.lt.f32.partialorder %v8926_v16, 0.0004427343 }
 0xc0f   :  { %9551 = vst.msk [vmem:[%s16053_s7 + $0xe8] sm:$0xff] %vm1899_vm0, %v9487_v3  ;;  %v8938_v55 = vadd.f32 1.0, %v15261_v38  ;;  %v10932_v50 = vpop.eup %10931  ;;  %v9488_v59 = vsel %vm9329_vm4, %v16342_v43, %v9293_v28  ;;  %v8933_v33 = vadd.f32 1.0, %v8932_v39  ;;  %v8468_v6 = vsub.f32 0.0, %v8404_v60  ;;  %v8161_v56 = vpop.f32.mrb[241].mxu0 }
 0xc10   :  { %v8910_v46 = vsel %vm15232_vm8, %v8907_v20, %v8904_v10  ;;  %9552 = vst.msk [vmem:[%s16053_s7 + $0xf0] sm:$0xff] %vm1899_vm0, %v9488_v59  ;;  %v8913_v54 = vmul.f32 0.6931472, %v10932_v50  ;;  %vm15297_vm11 = vcmp.lt.f32.partialorder %v8935_v42, 0.0004427343  ;;  %v8925_v15 = vmul.f32 %v15214_v29, %v8924_v63  ;;  %v16348_v10 = vld [vmem:[#allocation22_spill] sm:$0xff] }
 0xc11   :  { %v9230_v12 = vadd.f32 %v8910_v46, %v8334_v36  ;;  %10939 = vlog2.f32 %v8938_v55  ;;  %v15301_v22 = vpop.f32.mrb[242].mxu0  ;;  %v8944_v20 = vand.u32 2147483647, %v15261_v38  ;;  %v8569_v8 = vmul.f32 1.442695, %v8468_v6  ;;  %v9385_v59 = vld [vmem:[%s16048_s2 + $0x1b8] sm:$0xff] }
 0xc12   :  { %v10934_v61 = vpop.eup %10933  ;;  %v8405_v30 = vand.u32 2147483647, %v15268_v17  ;;  %v8919_v36 = vsel %vm15275_vm9, %v8916_v37, %v8913_v54  ;;  %v8941_v16 = vmul.f32 -0.5, %v15261_v38  ;;  %v8164_v62 = vpop.f32.mrb[243].mxu0  ;;  %v8934_v45 = vmul.f32 %v10926_v34, %v8933_v33  ;;  %v16349_v46 = vld [vmem:[#allocation25_spill] sm:$0xff] }
 0xc13   :  { %v15306_v44 = vpop.eup %10935  ;;  %v9294_v23 = vadd.f32 1e-05, %v9230_v12  ;;  %v8922_v58 = vmul.f32 0.6931472, %v10934_v61  ;;  %v9231_v18 = vadd.f32 %v8919_v36, %v8335_v49  ;;  %v15316_v48 = vadd.f32 %v14802_v52, %v15165_v0 }
 0xc14   :  { %v8947_v29 = vadd.f32 1.0, %v15306_v44  ;;  %10941 = vpow2.f32 %v8569_v8  ;;  %v8469_v63 = vsub.f32 0.0, %v8405_v30  ;;  %vm15329_vm12 = vcmp.lt.f32.partialorder %v8944_v20, 0.0004427343  ;;  %v15338_v28 = vpop.f32.mrb[244].mxu0 }
 0xc15   :  { %v9489_v39 = vsel %vm9329_vm4, %v16345_v35, %v9294_v23  ;;  %v8928_v40 = vsel %vm15279_vm10, %v8925_v15, %v8922_v58  ;;  %v9295_v51 = vadd.f32 1e-05, %v9231_v18  ;;  %v8942_v42 = vadd.f32 1.0, %v8941_v16  ;;  %v8169_v47 = vpop.f32.mrb[245].mxu0  ;;  %v16350_v23 = vld [vmem:[#allocation60_spill] sm:$0xff] }
 0xc16   :  { %9553 = vst.msk [vmem:[%s16053_s7 + $0xf8] sm:$0xff] %vm1899_vm0, %v9489_v39  ;;  %v9232_v49 = vadd.f32 %v8928_v40, %v8336_v5  ;;  %10943 = vlog2.f32 %v8947_v29  ;;  %v8953_v60 = vand.u32 2147483647, %v15306_v44  ;;  %v8571_v11 = vmul.f32 1.442695, %v8469_v63  ;;  %v16354_v47 = vld [vmem:[#allocation23_spill] sm:$0xff] }
 0xc17   :  { %v10938_v34 = vpop.eup %10937  ;;  %v15336_v3 = vadd.f32 %v14802_v52, %v15183_v32  ;;  %v9490_v53 = vsel %vm9329_vm4, %v16348_v10, %v9295_v51  ;;  %v8950_v2 = vmul.f32 -0.5, %v15306_v44  ;;  %v8338_v55 = vmax.f32 %v15156_v13, 0.0  ;;  %v15351_v43 = vpop.f32.mrb[246].mxu0  ;;  %v9383_v10 = vld [vmem:[%s16048_s2 + $0x1a8] sm:$0xff] }
 0xc18   :  { %v9296_v5 = vadd.f32 1e-05, %v9232_v49  ;;  %v8931_v37 = vmul.f32 0.6931472, %v10938_v34  ;;  %9554 = vst.msk [vmem:[%s16053_s7 + $0x100] sm:$0xff] %vm1899_vm0, %v9490_v53  ;;  %10945 = vpow2.f32 %v8571_v11  ;;  %v15363_v13 = vadd.f32 %v14802_v52, %v15196_v24 }
 0xc19   :  { %v8406_v32 = vand.u32 2147483647, %v15316_v48  ;;  %v8407_v50 = vand.u32 2147483647, %v15336_v3  ;;  %v15367_v56 = vadd.f32 %v14802_v52, %v15224_v14  ;;  %v8172_v12 = vpop.f32.mrb[247].mxu0  ;;  %v15377_v24 = vadd.f32 %v14802_v52, %v15243_v19 }
 0xc1a   :  { %v9491_v33 = vsel %vm9329_vm4, %v16349_v46, %v9296_v5  ;;  %v8937_v6 = vsel %vm15297_vm11, %v8934_v45, %v8931_v37  ;;  %v8943_v14 = vmul.f32 %v15261_v38, %v8942_v42  ;;  %v8951_v8 = vadd.f32 1.0, %v8950_v2  ;;  %v16351_v38 = vld [vmem:[#allocation20_spill] sm:$0xff]  ;;  %v16355_v12 = vld [vmem:[#allocation62_spill] sm:$0xff] }
 0xc1b   :  { %v10940_v54 = vpop.eup %10939  ;;  %9555 = vst.msk [vmem:[%s16053_s7 + $0x108] sm:$0xff] %vm1899_vm0, %v9491_v33  ;;  %v9233_v61 = vadd.f32 %v8937_v6, %v8337_v1  ;;  %v8470_v21 = vsub.f32 0.0, %v8406_v32  ;;  %v8471_v15 = vsub.f32 0.0, %v8407_v50  ;;  %v8408_v30 = vand.u32 2147483647, %v15363_v13 }
 0xc1c   :  { %v8940_v20 = vmul.f32 0.6931472, %v10940_v54  ;;  %v15382_v36 = vmul.f32 %v9385_v59, %v16350_v23  ;;  %v8339_v1 = vmax.f32 %v15162_v57, 0.0  ;;  %v8409_v52 = vand.u32 2147483647, %v15367_v56  ;;  %v15394_v39 = vpop.f32.mrb[248].mxu0 }
 0xc1d   :  { %v9297_v58 = vadd.f32 1e-05, %v9233_v61  ;;  %v8573_v16 = vmul.f32 1.442695, %v8470_v21  ;;  %v8575_v62 = vmul.f32 1.442695, %v8471_v15  ;;  %v8952_v42 = vmul.f32 %v15306_v44, %v8951_v8 }
 0xc1e   :  { %v8946_v9 = vsel %vm15329_vm12, %v8943_v14, %v8940_v20  ;;  %v8472_v18 = vsub.f32 0.0, %v8408_v30  ;;  %v15388_v19 = vpop.eup %10941  ;;  %v8410_v35 = vand.u32 2147483647, %v15377_v24  ;;  %vm15400_vm13 = vcmp.lt.f32.partialorder %v8953_v60, 0.0004427343  ;;  %v8177_v49 = vpop.f32.mrb[249].mxu0 }
 0xc1f   :  { %v9492_v45 = vsel %vm9329_vm4, %v16351_v38, %v9297_v58  ;;  %v9234_v29 = vadd.f32 %v8946_v9, %v8338_v55  ;;  %10947 = vpow2.f32 %v8573_v16  ;;  %v8340_v63 = vmax.f32 %v15238_v27, 0.0  ;;  %v15414_v5 = vld [vmem:[%s16049_s3 + $0x11] ss:$0 sm:$0xff]  ;;  %v15420_v2 = vpop.f32.mrb[250].mxu0  ;;  %v16356_v16 = vld [vmem:[#allocation26_spill] sm:$0xff] }
 0xc20   :  { %v10944_v40 = vpop.eup %10943  ;;  %9556 = vst.msk [vmem:[%s16053_s7 + $0x110] sm:$0xff] %vm1899_vm0, %v9492_v45  ;;  %v8956_v51 = vadd.f32 1.0, %v15388_v19  ;;  %10949 = vpow2.f32 %v8575_v62  ;;  %v8577_v11 = vmul.f32 1.442695, %v8472_v18  ;;  %v8959_v60 = vmul.f32 -0.5, %v15388_v19  ;;  %v8180_v59 = vpop.f32.mrb[251].mxu0 }
 0xc21   :  { %v9298_v0 = vadd.f32 1e-05, %v9234_v29  ;;  %v8949_v34 = vmul.f32 0.6931472, %v10944_v40  ;;  %v8473_v53 = vsub.f32 0.0, %v8409_v52  ;;  %v15418_v37 = vadd.f32 %v15414_v5, %v15284_v25 }
 0xc22   :  { %10951 = vlog2.f32 %v8956_v51  ;;  %v15422_v44 = vpop.eup %10945  ;;  %v8474_v50 = vsub.f32 0.0, %v8410_v35  ;;  %v8341_v46 = vmax.f32 %v15268_v17, 0.0  ;;  %v15437_v6 = vadd.f32 %v15414_v5, %v15301_v22 }
 0xc23   :  { %v9493_v55 = vsel %vm9329_vm4, %v16354_v47, %v9298_v0  ;;  %v8955_v32 = vsel %vm15400_vm13, %v8952_v42, %v8949_v34  ;;  %10953 = vpow2.f32 %v8577_v11  ;;  %v8965_v33 = vadd.f32 1.0, %v15422_v44 }
 0xc24   :  { %9557 = vst.msk [vmem:[%s16053_s7 + $0x118] sm:$0xff] %vm1899_vm0, %v9493_v55  ;;  %v9235_v25 = vadd.f32 %v8955_v32, %v8339_v1  ;;  %v15440_v54 = vmul.f32 %v9383_v10, %v16355_v12  ;;  %v8962_v61 = vand.u32 2147483647, %v15388_v19  ;;  %v8579_v21 = vmul.f32 1.442695, %v8473_v53 }
 0xc25   :  { %v8581_v15 = vmul.f32 1.442695, %v8474_v50  ;;  %10955 = vlog2.f32 %v8965_v33  ;;  %v8342_v14 = vmax.f32 %v15316_v48, 0.0  ;;  %v8343_v8 = vmax.f32 %v15336_v3, 0.0  ;;  %v15450_v58 = vpop.f32.mrb[252].mxu0 }
 0xc26   :  { %v9299_v20 = vadd.f32 1e-05, %v9235_v25  ;;  %v8960_v30 = vadd.f32 1.0, %v8959_v60  ;;  %10957 = vpow2.f32 %v8579_v21  ;;  %v8411_v23 = vand.u32 2147483647, %v15418_v37  ;;  %v8185_v18 = vpop.f32.mrb[253].mxu0 }
 0xc27   :  { %v15448_v22 = vadd.f32 %v15414_v5, %v15338_v28  ;;  %v8968_v9 = vmul.f32 -0.5, %v15422_v44  ;;  %10959 = vpow2.f32 %v8581_v15  ;;  %v8412_v1 = vand.u32 2147483647, %v15437_v6  ;;  %v15469_v35 = vpop.f32.mrb[254].mxu0 }
 0xc28   :  { %v9494_v62 = vsel %vm9329_vm4, %v16356_v16, %v9299_v20  ;;  %vm15463_vm14 = vcmp.lt.f32.partialorder %v8962_v61, 0.0004427343  ;;  %v8344_v38 = vmax.f32 %v15363_v13, 0.0  ;;  %v8345_v45 = vmax.f32 %v15367_v56, 0.0  ;;  %v8188_v34 = vpop.f32.mrb[255].mxu0 }
 0xc29   :  { %v15457_v52 = vpop.eup %10947  ;;  %9558 = vst.msk [vmem:[%s16053_s7 + $0x120] sm:$0xff] %vm1899_vm0, %v9494_v62  ;;  %v8475_v29 = vsub.f32 0.0, %v8411_v23  ;;  %v8971_v57 = vand.u32 2147483647, %v15422_v44  ;;  %v8346_v49 = vmax.f32 %v15377_v24, 0.0  ;;  %v8476_v0 = vsub.f32 0.0, %v8412_v1 }
 0xc2a   :  { %v15471_v40 = vpop.eup %10949  ;;  %v8974_v51 = vadd.f32 1.0, %v15457_v52  ;;  %v8961_v42 = vmul.f32 %v15388_v19, %v8960_v30  ;;  %v8413_v60 = vand.u32 2147483647, %v15448_v22  ;;  %v8969_v47 = vadd.f32 1.0, %v8968_v9  ;;  %v16376_v24 = vld [vmem:[#allocation28_spill] sm:$0xff] }
 0xc2b   :  { %v8983_v11 = vadd.f32 1.0, %v15471_v40  ;;  %v8583_v10 = vmul.f32 1.442695, %v8475_v29  ;;  %v8977_v55 = vmul.f32 -0.5, %v15457_v52  ;;  %v8347_v32 = vmax.f32 %v15418_v37, 0.0 }
 0xc2c   :  { %v10952_v53 = vpop.eup %10951  ;;  %10961 = vlog2.f32 %v8974_v51  ;;  %v8980_v25 = vand.u32 2147483647, %v15457_v52  ;;  %v8585_v33 = vmul.f32 1.442695, %v8476_v0  ;;  %vm15484_vm15 = vcmp.lt.f32.partialorder %v8971_v57, 0.0004427343 }
 0xc2d   :  { %v15481_v50 = vpop.eup %10953  ;;  %v8958_v59 = vmul.f32 0.6931472, %v10952_v53  ;;  %10963 = vlog2.f32 %v8983_v11  ;;  %v8986_v12 = vmul.f32 -0.5, %v15471_v40  ;;  %v8348_v21 = vmax.f32 %v15437_v6, 0.0  ;;  %v15494_v23 = vpop.f32.mrb[0].mxu0 }
 0xc2e   :  { %v8992_v61 = vadd.f32 1.0, %v15481_v50  ;;  %v8989_v20 = vand.u32 2147483647, %v15471_v40  ;;  %10965 = vpow2.f32 %v8583_v10  ;;  %v8477_v30 = vsub.f32 0.0, %v8413_v60  ;;  %v8193_v18 = vpop.f32.mrb[1].mxu0 }
 0xc2f   :  { %v8964_v15 = vsel %vm15463_vm14, %v8961_v42, %v8958_v59  ;;  %v10956_v16 = vpop.eup %10955  ;;  %v8970_v9 = vmul.f32 %v15422_v44, %v8969_v47  ;;  %v8978_v1 = vadd.f32 1.0, %v8977_v55  ;;  %vm15501_vm1 = vcmp.lt.f32.partialorder %v8980_v25, 0.0004427343  ;;  %v15506_v0 = vpop.f32.mrb[2].mxu0  ;;  %v16365_v55 = vld [vmem:[#allocation29_spill] sm:$0xff] }
 0xc30   :  { %v9236_v62 = vadd.f32 %v8964_v15, %v8340_v63  ;;  %10967 = vlog2.f32 %v8992_v61  ;;  %v15499_v29 = vpop.eup %10957  ;;  %v8967_v57 = vmul.f32 0.6931472, %v10956_v16  ;;  %v8995_v51 = vmul.f32 -0.5, %v15481_v50  ;;  %v8196_v11 = vpop.f32.mrb[3].mxu0 }
 0xc31   :  { %10969 = vpow2.f32 %v8585_v33  ;;  %v15508_v34 = vpop.eup %10959  ;;  %v9001_v63 = vadd.f32 1.0, %v15499_v29  ;;  %v8587_v44 = vmul.f32 1.442695, %v8477_v30  ;;  %v15513_v42 = vadd.f32 %v15414_v5, %v15351_v43 }
 0xc32   :  { %v9300_v27 = vadd.f32 1e-05, %v9236_v62  ;;  %v8973_v10 = vsel %vm15484_vm15, %v8970_v9, %v8967_v57  ;;  %v8987_v60 = vadd.f32 1.0, %v8986_v12  ;;  %vm15517_vm2 = vcmp.lt.f32.partialorder %v8989_v20, 0.0004427343  ;;  %v16366_v57 = vld [vmem:[#allocation24_spill] sm:$0xff] }
 0xc33   :  { %v9010_v47 = vadd.f32 1.0, %v15508_v34  ;;  %v9237_v25 = vadd.f32 %v8973_v10, %v8341_v46  ;;  %v8998_v43 = vand.u32 2147483647, %v15481_v50  ;;  %10971 = vlog2.f32 %v9001_v63 }
 0xc34   :  { %v9495_v59 = vsel %vm9329_vm4, %v16365_v55, %v9300_v27  ;;  %v8996_v33 = vadd.f32 1.0, %v8995_v51  ;;  %v9004_v19 = vmul.f32 -0.5, %v15499_v29  ;;  %v9013_v12 = vmul.f32 -0.5, %v15508_v34  ;;  %v15542_v18 = vpop.f32.mrb[4].mxu0 }
 0xc35   :  { %9559 = vst.msk [vmem:[%s16053_s7 + $0x128] sm:$0xff] %vm1899_vm0, %v9495_v59  ;;  %10973 = vlog2.f32 %v9010_v47  ;;  %v9301_v15 = vadd.f32 1e-05, %v9237_v25  ;;  %v9007_v20 = vand.u32 2147483647, %v15499_v29  ;;  %v8979_v16 = vmul.f32 %v15457_v52, %v8978_v1 }
 0xc36   :  { %v10962_v61 = vpop.eup %10961  ;;  %10975 = vpow2.f32 %v8587_v44  ;;  %v8414_v17 = vand.u32 2147483647, %v15513_v42  ;;  %v8988_v62 = vmul.f32 %v15471_v40, %v8987_v60  ;;  %v15540_v9 = vadd.f32 %v15414_v5, %v15394_v39  ;;  %v8201_v11 = vpop.f32.mrb[5].mxu0 }
 0xc37   :  { %v10964_v46 = vpop.eup %10963  ;;  %v8976_v30 = vmul.f32 0.6931472, %v10962_v61  ;;  %v9496_v51 = vsel %vm9329_vm4, %v16366_v57, %v9301_v15  ;;  %vm15547_vm3 = vcmp.lt.f32.partialorder %v8998_v43, 0.0004427343  ;;  %v8997_v40 = vmul.f32 %v15481_v50, %v8996_v33  ;;  %v15560_v60 = vpop.f32.mrb[6].mxu0 }
 0xc38   :  { %v8985_v27 = vmul.f32 0.6931472, %v10964_v46  ;;  %v8478_v44 = vsub.f32 0.0, %v8414_v17  ;;  %v15551_v52 = vpop.eup %10965  ;;  %9560 = vst.msk [vmem:[%s16053_s7 + $0x130] sm:$0xff] %vm1899_vm0, %v9496_v51  ;;  %v9005_v1 = vadd.f32 1.0, %v9004_v19  ;;  %v9014_v10 = vadd.f32 1.0, %v9013_v12 }
 0xc39   :  { %v8982_v39 = vsel %vm15501_vm1, %v8979_v16, %v8976_v30  ;;  %vm15566_vm5 = vcmp.lt.f32.partialorder %v9007_v20, 0.0004427343  ;;  %v9019_v28 = vadd.f32 1.0, %v15551_v52  ;;  %v8204_v43 = vpop.f32.mrb[7].mxu0  ;;  %v9016_v19 = vand.u32 2147483647, %v15508_v34 }
 0xc3a   :  { %v10968_v47 = vpop.eup %10967  ;;  %v9238_v55 = vadd.f32 %v8982_v39, %v8342_v14  ;;  %v8991_v59 = vsel %vm15517_vm2, %v8988_v62, %v8985_v27  ;;  %v8415_v48 = vand.u32 2147483647, %v15540_v9  ;;  %v8589_v12 = vmul.f32 1.442695, %v8478_v44 }
 0xc3b   :  { %v15571_v61 = vpop.eup %10969  ;;  %v9239_v50 = vadd.f32 %v8991_v59, %v8343_v8  ;;  %v8994_v33 = vmul.f32 0.6931472, %v10968_v47  ;;  %10977 = vlog2.f32 %v9019_v28  ;;  %v9006_v17 = vmul.f32 %v15499_v29, %v9005_v1  ;;  %v16371_v8 = vld [vmem:[#allocation27_spill] sm:$0xff]  ;;  %v16372_v29 = vld [vmem:[#allocation30_spill] sm:$0xff] }
 0xc3c   :  { %v9302_v14 = vadd.f32 1e-05, %v9238_v55  ;;  %v9028_v53 = vadd.f32 1.0, %v15571_v61  ;;  %v9015_v46 = vmul.f32 %v15508_v34, %v9014_v10  ;;  %v15589_v62 = vadd.f32 %v15414_v5, %v15420_v2  ;;  %v16373_v55 = vld [vmem:[#allocation33_spill] sm:$0xff] }
 0xc3d   :  { %v9303_v15 = vadd.f32 1e-05, %v9239_v50  ;;  %v9000_v20 = vsel %vm15547_vm3, %v8997_v40, %v8994_v33  ;;  %v10972_v3 = vpop.eup %10971  ;;  %v9022_v27 = vmul.f32 -0.5, %v15551_v52  ;;  %v9031_v13 = vmul.f32 -0.5, %v15571_v61 }
 0xc3e   :  { %v9497_v30 = vsel %vm9329_vm4, %v16371_v8, %v9302_v14  ;;  %v9240_v16 = vadd.f32 %v9000_v20, %v8344_v38  ;;  %10979 = vlog2.f32 %v9028_v53  ;;  %v9003_v51 = vmul.f32 0.6931472, %v10972_v3  ;;  %v15600_v38 = vpop.f32.mrb[8].mxu0  ;;  %v16377_v8 = vld [vmem:[#allocation31_spill] sm:$0xff] }
 0xc3f   :  { %v10974_v57 = vpop.eup %10973  ;;  %9561 = vst.msk [vmem:[%s16053_s7 + $0x138] sm:$0xff] %vm1899_vm0, %v9497_v30  ;;  %v9498_v34 = vsel %vm9329_vm4, %v16372_v29, %v9303_v15  ;;  %10981 = vpow2.f32 %v8589_v12  ;;  %v8479_v11 = vsub.f32 0.0, %v8415_v48  ;;  %v8209_v39 = vpop.f32.mrb[9].mxu0  ;;  %vm9017_vm6 = vcmp.lt.f32.partialorder %v9016_v19, 0.0004427343 }
 0xc40   :  { %v15602_v63 = vpop.eup %10975  ;;  %9562 = vst.msk [vmem:[%s16053_s7 + $0x140] sm:$0xff] %vm1899_vm0, %v9498_v34  ;;  %v9304_v2 = vadd.f32 1e-05, %v9240_v16  ;;  %v9012_v44 = vmul.f32 0.6931472, %v10974_v57  ;;  %v9009_v40 = vsel %vm15566_vm5, %v9006_v17, %v9003_v51  ;;  %v15621_v50 = vadd.f32 %v15414_v5, %v15450_v58 }
 0xc41   :  { %v9025_v1 = vand.u32 2147483647, %v15551_v52  ;;  %v9037_v10 = vadd.f32 1.0, %v15602_v63  ;;  %v15612_v47 = vpop.f32.mrb[10].mxu0  ;;  %v9241_v28 = vadd.f32 %v9009_v40, %v8345_v45  ;;  %v9023_v19 = vadd.f32 1.0, %v9022_v27 }
 0xc42   :  { %v9499_v59 = vsel %vm9329_vm4, %v16373_v55, %v9304_v2  ;;  %v9018_v43 = vsel %vm9017_vm6, %v9015_v46, %v9012_v44  ;;  %v8212_v25 = vpop.f32.mrb[11].mxu0  ;;  %v8591_v48 = vmul.f32 1.442695, %v8479_v11  ;;  %v9032_v56 = vadd.f32 1.0, %v9031_v13 }
 0xc43   :  { %9563 = vst.msk [vmem:[%s16053_s7 + $0x148] sm:$0xff] %vm1899_vm0, %v9499_v59  ;;  %v9242_v33 = vadd.f32 %v9018_v43, %v8346_v49  ;;  %10983 = vlog2.f32 %v9037_v10  ;;  %v9305_v14 = vadd.f32 1e-05, %v9241_v28  ;;  %v9040_v45 = vmul.f32 -0.5, %v15602_v63 }
 0xc44   :  { %v8416_v53 = vand.u32 2147483647, %v15589_v62  ;;  %vm15631_vm7 = vcmp.lt.f32.partialorder %v9025_v1, 0.0004427343  ;;  %v8349_v15 = vmax.f32 %v15448_v22, 0.0  ;;  %10985 = vpow2.f32 %v8591_v48 }
 0xc45   :  { %v9306_v58 = vadd.f32 1e-05, %v9242_v33  ;;  %v10978_v20 = vpop.eup %10977  ;;  %v9500_v49 = vsel %vm9329_vm4, %v16376_v24, %v9305_v14  ;;  %v9034_v17 = vand.u32 2147483647, %v15571_v61  ;;  %v8417_v3 = vand.u32 2147483647, %v15621_v50 }
 0xc46   :  { %v8480_v46 = vsub.f32 0.0, %v8416_v53  ;;  %9564 = vst.msk [vmem:[%s16053_s7 + $0x150] sm:$0xff] %vm1899_vm0, %v9500_v49  ;;  %v9021_v30 = vmul.f32 0.6931472, %v10978_v20  ;;  %v9024_v16 = vmul.f32 %v15551_v52, %v9023_v19  ;;  %v15651_v57 = vadd.f32 %v15414_v5, %v15469_v35  ;;  %v15653_v29 = vpop.f32.mrb[12].mxu0  ;;  %v16379_v20 = vld [vmem:[#allocation37_spill] sm:$0xff] }
 0xc47   :  { %v9501_v22 = vsel %vm9329_vm4, %v16377_v8, %v9306_v58  ;;  %v9033_v51 = vmul.f32 %v15571_v61, %v9032_v56  ;;  %v9041_v27 = vadd.f32 1.0, %v9040_v45  ;;  %v8481_v2 = vsub.f32 0.0, %v8417_v3  ;;  %v8217_v44 = vpop.f32.mrb[13].mxu0  ;;  %v16378_v56 = vld [vmem:[#allocation34_spill] sm:$0xff] }
 0xc48   :  { %v10980_v34 = vpop.eup %10979  ;;  %9565 = vst.msk [vmem:[%s16053_s7 + $0x158] sm:$0xff] %vm1899_vm0, %v9501_v22  ;;  %v8593_v13 = vmul.f32 1.442695, %v8480_v46  ;;  %v9027_v52 = vsel %vm15631_vm7, %v9024_v16, %v9021_v30  ;;  %v8418_v35 = vand.u32 2147483647, %v15651_v57  ;;  %v15665_v39 = vadd.f32 %v15414_v5, %v15494_v23 }
 0xc49   :  { %v9030_v11 = vmul.f32 0.6931472, %v10980_v34  ;;  %v15667_v40 = vpop.f32.mrb[14].mxu0  ;;  %v15669_v1 = vpop.eup %10981  ;;  %v9243_v61 = vadd.f32 %v9027_v52, %v8347_v32  ;;  %vm9035_vm8 = vcmp.lt.f32.partialorder %v9034_v17, 0.0004427343  ;;  %v15677_v23 = vadd.f32 %v15414_v5, %v15506_v0 }
 0xc4a   :  { %10987 = vpow2.f32 %v8593_v13  ;;  %v8595_v10 = vmul.f32 1.442695, %v8481_v2  ;;  %v8220_v55 = vpop.f32.mrb[15].mxu0  ;;  %v9043_v28 = vand.u32 2147483647, %v15602_v63  ;;  %v9046_v43 = vadd.f32 1.0, %v15669_v1 }
 0xc4b   :  { %v9036_v59 = vsel %vm9035_vm8, %v9033_v51, %v9030_v11  ;;  %v9307_v25 = vadd.f32 1e-05, %v9243_v61  ;;  %v8482_v37 = vsub.f32 0.0, %v8418_v35  ;;  %v9042_v19 = vmul.f32 %v15602_v63, %v9041_v27  ;;  %v16380_v35 = vld [vmem:[#allocation32_spill] sm:$0xff] }
 0xc4c   :  { %v9244_v33 = vadd.f32 %v9036_v59, %v8348_v21  ;;  %10989 = vpow2.f32 %v8595_v10  ;;  %v8350_v48 = vmax.f32 %v15513_v42, 0.0  ;;  %v8419_v14 = vand.u32 2147483647, %v15665_v39 }
 0xc4d   :  { %v10984_v32 = vpop.eup %10983  ;;  %10991 = vlog2.f32 %v9046_v43  ;;  %v9502_v45 = vsel %vm9329_vm4, %v16378_v56, %v9307_v25  ;;  %v8597_v58 = vmul.f32 1.442695, %v8482_v37  ;;  %vm9044_vm9 = vcmp.lt.f32.partialorder %v9043_v28, 0.0004427343 }
 0xc4e   :  { %v9308_v0 = vadd.f32 1e-05, %v9244_v33  ;;  %v9039_v53 = vmul.f32 0.6931472, %v10984_v32  ;;  %v15687_v12 = vpop.eup %10985  ;;  %9566 = vst.msk [vmem:[%s16053_s7 + $0x160] sm:$0xff] %vm1899_vm0, %v9502_v45  ;;  %v8483_v6 = vsub.f32 0.0, %v8419_v14  ;;  %v15696_v63 = vadd.f32 %v15414_v5, %v15542_v18 }
 0xc4f   :  { %v8420_v21 = vand.u32 2147483647, %v15677_v23  ;;  %v9049_v17 = vmul.f32 -0.5, %v15669_v1  ;;  %v9055_v46 = vadd.f32 1.0, %v15687_v12  ;;  %v8351_v8 = vmax.f32 %v15540_v9, 0.0 }
 0xc50   :  { %v9503_v24 = vsel %vm9329_vm4, %v16379_v20, %v9308_v0  ;;  %v9045_v49 = vsel %vm9044_vm9, %v9042_v19, %v9039_v53  ;;  %10993 = vpow2.f32 %v8597_v58  ;;  %v8599_v18 = vmul.f32 1.442695, %v8483_v6 }
 0xc51   :  { %9567 = vst.msk [vmem:[%s16053_s7 + $0x168] sm:$0xff] %vm1899_vm0, %v9503_v24  ;;  %v9245_v3 = vadd.f32 %v9045_v49, %v8349_v15  ;;  %v9052_v22 = vand.u32 2147483647, %v15669_v1  ;;  %10995 = vlog2.f32 %v9055_v46  ;;  %v8352_v30 = vmax.f32 %v15589_v62, 0.0 }
 0xc52   :  { %v8484_v16 = vsub.f32 0.0, %v8420_v21  ;;  %v8353_v51 = vmax.f32 %v15621_v50, 0.0  ;;  %10997 = vpow2.f32 %v8599_v18  ;;  %v8421_v27 = vand.u32 2147483647, %v15696_v63 }
 0xc53   :  { %v9309_v34 = vadd.f32 1e-05, %v9245_v3  ;;  %v9050_v2 = vadd.f32 1.0, %v9049_v17  ;;  %v9058_v15 = vmul.f32 -0.5, %v15687_v12  ;;  %v15715_v52 = vadd.f32 %v15414_v5, %v15560_v60  ;;  %v15717_v11 = vpop.f32.mrb[16].mxu0 }
 0xc54   :  { %v10988_v13 = vpop.eup %10987  ;;  %v8601_v44 = vmul.f32 1.442695, %v8484_v16  ;;  %v8354_v55 = vmax.f32 %v15651_v57, 0.0  ;;  %v8355_v59 = vmax.f32 %v15665_v39, 0.0  ;;  %v8225_v28 = vpop.f32.mrb[17].mxu0  ;;  %v8485_v25 = vsub.f32 0.0, %v8421_v27 }
 0xc55   :  { %v9504_v61 = vsel %vm9329_vm4, %v16380_v35, %v9309_v34  ;;  %v9064_v10 = vadd.f32 1.0, %v10988_v13  ;;  %vm15730_vm10 = vcmp.lt.f32.partialorder %v9052_v22, 0.0004427343  ;;  %v8422_v33 = vand.u32 2147483647, %v15715_v52  ;;  %v15735_v37 = vpop.f32.mrb[18].mxu0 }
 0xc56   :  { %v15724_v43 = vpop.eup %10989  ;;  %9568 = vst.msk [vmem:[%s16053_s7 + $0x170] sm:$0xff] %vm1899_vm0, %v9504_v61  ;;  %10999 = vpow2.f32 %v8601_v44  ;;  %v9067_v19 = vmul.f32 -0.5, %v10988_v13  ;;  %v15740_v56 = vadd.f32 %v15414_v5, %v15600_v38  ;;  %v8228_v45 = vpop.f32.mrb[19].mxu0  ;;  %v9051_v53 = vmul.f32 %v15669_v1, %v9050_v2  ;;  %v16385_v28 = vld [vmem:[#allocation35_spill] sm:$0xff] }
 0xc57   :  { %v10992_v32 = vpop.eup %10991  ;;  %11001 = vlog2.f32 %v9064_v10  ;;  %v9073_v14 = vadd.f32 1.0, %v15724_v43  ;;  %v9059_v58 = vadd.f32 1.0, %v9058_v15  ;;  %v8486_v6 = vsub.f32 0.0, %v8422_v33 }
 0xc58   :  { %v9048_v0 = vmul.f32 0.6931472, %v10992_v32  ;;  %v9061_v21 = vand.u32 2147483647, %v15687_v12  ;;  %v8356_v20 = vmax.f32 %v15677_v23, 0.0  ;;  %v8357_v46 = vmax.f32 %v15696_v63, 0.0 }
 0xc59   :  { %11003 = vlog2.f32 %v9073_v14  ;;  %v8603_v24 = vmul.f32 1.442695, %v8485_v25  ;;  %v9070_v17 = vand.u32 2147483647, %v10988_v13  ;;  %v8605_v38 = vmul.f32 1.442695, %v8486_v6 }
 0xc5a   :  { %v9054_v49 = vsel %vm15730_vm10, %v9051_v53, %v9048_v0  ;;  %v10994_v3 = vpop.eup %10993  ;;  %v9068_v1 = vadd.f32 1.0, %v9067_v19  ;;  %v8423_v22 = vand.u32 2147483647, %v15740_v56  ;;  %v9060_v34 = vmul.f32 %v15687_v12, %v9059_v58 }
 0xc5b   :  { %v9246_v18 = vadd.f32 %v9054_v49, %v8350_v48  ;;  %11005 = vpow2.f32 %v8603_v24  ;;  %v10996_v16 = vpop.eup %10995  ;;  %v9076_v27 = vmul.f32 -0.5, %v15724_v43  ;;  %v9082_v2 = vadd.f32 1.0, %v10994_v3 }
 0xc5c   :  { %v9085_v15 = vmul.f32 -0.5, %v10994_v3  ;;  %v15753_v44 = vpop.eup %10997  ;;  %v9057_v61 = vmul.f32 0.6931472, %v10996_v16  ;;  %11007 = vpow2.f32 %v8605_v38  ;;  %v8487_v10 = vsub.f32 0.0, %v8423_v22 }
 0xc5d   :  { %v9310_v35 = vadd.f32 1e-05, %v9246_v18  ;;  %vm9062_vm11 = vcmp.lt.f32.partialorder %v9061_v21, 0.0004427343  ;;  %vm15755_vm12 = vcmp.lt.f32.partialorder %v9070_v17, 0.0004427343  ;;  %11009 = vlog2.f32 %v9082_v2 }
 0xc5e   :  { %v9091_v48 = vadd.f32 1.0, %v15753_v44  ;;  %v9063_v60 = vsel %vm9062_vm11, %v9060_v34, %v9057_v61  ;;  %v9069_v25 = vmul.f32 %v10988_v13, %v9068_v1  ;;  %v9079_v33 = vand.u32 2147483647, %v15724_v43 }
 0xc5f   :  { %v9505_v12 = vsel %vm9329_vm4, %v16385_v28, %v9310_v35  ;;  %v9247_v19 = vadd.f32 %v9063_v60, %v8351_v8  ;;  %v9077_v14 = vadd.f32 1.0, %v9076_v27  ;;  %v8607_v45 = vmul.f32 1.442695, %v8487_v10 }
 0xc60   :  { %v15764_v32 = vpop.eup %10999  ;;  %9569 = vst.msk [vmem:[%s16053_s7 + $0x178] sm:$0xff] %vm1899_vm0, %v9505_v12  ;;  %11011 = vlog2.f32 %v9091_v48  ;;  %v9086_v53 = vadd.f32 1.0, %v9085_v15  ;;  %v9088_v58 = vand.u32 2147483647, %v10994_v3  ;;  %v15775_v6 = vadd.f32 %v15414_v5, %v15612_v47  ;;  %v15777_v21 = vpop.f32.mrb[20].mxu0  ;;  %v16388_v47 = vld [vmem:[#allocation38_spill] sm:$0xff] }
 0xc61   :  { %v11002_v0 = vpop.eup %11001  ;;  %v9100_v13 = vadd.f32 1.0, %v15764_v32  ;;  %v9311_v24 = vadd.f32 1e-05, %v9247_v19  ;;  %v9094_v17 = vmul.f32 -0.5, %v15753_v44  ;;  %11013 = vpow2.f32 %v8607_v45  ;;  %v8233_v1 = vpop.f32.mrb[21].mxu0 }
 0xc62   :  { %v9066_v49 = vmul.f32 0.6931472, %v11002_v0  ;;  %vm15780_vm13 = vcmp.lt.f32.partialorder %v9079_v33, 0.0004427343  ;;  %v9097_v38 = vand.u32 2147483647, %v15753_v44  ;;  %v9078_v27 = vmul.f32 %v15724_v43, %v9077_v14 }
 0xc63   :  { %v11004_v9 = vpop.eup %11003  ;;  %11015 = vlog2.f32 %v9100_v13  ;;  %v8358_v18 = vmax.f32 %v15715_v52, 0.0  ;;  %v9506_v22 = vsel %vm9329_vm4, %v16388_v47, %v9311_v24  ;;  %v15792_v2 = vpop.f32.mrb[22].mxu0  ;;  %vm15802_vm14 = vcmp.lt.f32.partialorder %v9088_v58, 0.0004427343 }
 0xc64   :  { %v9072_v16 = vsel %vm15755_vm12, %v9069_v25, %v9066_v49  ;;  %v9075_v34 = vmul.f32 0.6931472, %v11004_v9  ;;  %9570 = vst.msk [vmem:[%s16053_s7 + $0x180] sm:$0xff] %vm1899_vm0, %v9506_v22  ;;  %v9103_v10 = vmul.f32 -0.5, %v15764_v32  ;;  %v8424_v43 = vand.u32 2147483647, %v15775_v6 }
 0xc65   :  { %v15794_v15 = vpop.eup %11005  ;;  %v9248_v35 = vadd.f32 %v9072_v16, %v8352_v30  ;;  %v8236_v42 = vpop.f32.mrb[23].mxu0  ;;  %v9087_v28 = vmul.f32 %v10994_v3, %v9086_v53  ;;  %v9095_v12 = vadd.f32 1.0, %v9094_v17  ;;  %vm15815_vm15 = vcmp.lt.f32.partialorder %v9097_v38, 0.0004427343  ;;  %v16393_v17 = vld [vmem:[#allocation36_spill] sm:$0xff] }
 0xc66   :  { %v9081_v48 = vsel %vm15780_vm13, %v9078_v27, %v9075_v34  ;;  %v9109_v60 = vadd.f32 1.0, %v15794_v15  ;;  %v15811_v25 = vpop.eup %11007  ;;  %v8488_v19 = vsub.f32 0.0, %v8424_v43  ;;  %v9106_v45 = vand.u32 2147483647, %v15764_v32 }
 0xc67   :  { %v9312_v62 = vadd.f32 1e-05, %v9248_v35  ;;  %v9249_v30 = vadd.f32 %v9081_v48, %v8353_v51  ;;  %v11010_v14 = vpop.eup %11009  ;;  %v9118_v3 = vadd.f32 1.0, %v15811_v25  ;;  %v15823_v0 = vadd.f32 %v15414_v5, %v15653_v29 }
 0xc68   :  { %11017 = vlog2.f32 %v9109_v60  ;;  %v9084_v53 = vmul.f32 0.6931472, %v11010_v14  ;;  %v9104_v58 = vadd.f32 1.0, %v9103_v10  ;;  %v9096_v24 = vmul.f32 %v15753_v44, %v9095_v12 }
 0xc69   :  { %v9507_v50 = vsel %vm9329_vm4, %v14617_v7, %v9312_v62  ;;  %v9313_v51 = vadd.f32 1e-05, %v9249_v30  ;;  %v9112_v49 = vmul.f32 -0.5, %v15794_v15  ;;  %11019 = vlog2.f32 %v9118_v3 }
 0xc6a   :  { %v11012_v13 = vpop.eup %11011  ;;  %9571 = vst.msk [vmem:[%s16053_s7 + $0x188] sm:$0xff] %vm1899_vm0, %v9507_v50  ;;  %v8609_v29 = vmul.f32 1.442695, %v8488_v19  ;;  %v9090_v7 = vsel %vm15802_vm14, %v9087_v28, %v9084_v53  ;;  %v9121_v38 = vmul.f32 -0.5, %v15811_v25  ;;  %vm15848_vm1 = vcmp.lt.f32.partialorder %v9106_v45, 0.0004427343 }
 0xc6b   :  { %v9508_v9 = vsel %vm9329_vm4, %v16393_v17, %v9313_v51  ;;  %v9093_v8 = vmul.f32 0.6931472, %v11012_v13  ;;  %v15840_v1 = vpop.eup %11013  ;;  %v9250_v44 = vadd.f32 %v9090_v7, %v8354_v55  ;;  %v8425_v22 = vand.u32 2147483647, %v15823_v0 }
 0xc6c   :  { %9572 = vst.msk [vmem:[%s16053_s7 + $0x190] sm:$0xff] %vm1899_vm0, %v9508_v9  ;;  %11021 = vpow2.f32 %v8609_v29  ;;  %v9105_v27 = vmul.f32 %v15764_v32, %v9104_v58  ;;  %v9115_v35 = vand.u32 2147483647, %v15794_v15  ;;  %v9127_v61 = vadd.f32 1.0, %v15840_v1 }
 0xc6d   :  { %v11016_v16 = vpop.eup %11015  ;;  %v9099_v34 = vsel %vm15815_vm15, %v9096_v24, %v9093_v8  ;;  %v9314_v10 = vadd.f32 1e-05, %v9250_v44  ;;  %v9113_v43 = vadd.f32 1.0, %v9112_v49  ;;  %v9122_v42 = vadd.f32 1.0, %v9121_v38 }
 0xc6e   :  { %v9251_v57 = vadd.f32 %v9099_v34, %v8355_v59  ;;  %v9102_v55 = vmul.f32 0.6931472, %v11016_v16  ;;  %11023 = vlog2.f32 %v9127_v61  ;;  %v8489_v48 = vsub.f32 0.0, %v8425_v22 }
 0xc6f   :  { %v15862_v28 = vadd.f32 %v15414_v5, %v15667_v40  ;;  %v9509_v32 = vsel %vm9329_vm4, %v14568_v41, %v9314_v10  ;;  %v9130_v39 = vmul.f32 -0.5, %v15840_v1  ;;  %vm15876_vm2 = vcmp.lt.f32.partialorder %v9115_v35, 0.0004427343 }
 0xc70   :  { %v9315_v12 = vadd.f32 1e-05, %v9251_v57  ;;  %v9108_v60 = vsel %vm15848_vm1, %v9105_v27, %v9102_v55  ;;  %9573 = vst.msk [vmem:[%s16053_s7 + $0x198] sm:$0xff] %vm1899_vm0, %v9509_v32  ;;  %v9124_v41 = vand.u32 2147483647, %v15811_v25  ;;  %v15887_v14 = vadd.f32 %v15414_v5, %v15717_v11  ;;  %v16398_v55 = vld [vmem:[#allocation65_spill] sm:$0xff] }
 0xc71   :  { %v9252_v59 = vadd.f32 %v9108_v60, %v8356_v20  ;;  %v8611_v62 = vmul.f32 1.442695, %v8489_v48  ;;  %v8426_v19 = vand.u32 2147483647, %v15862_v28  ;;  %v15891_v23 = vadd.f32 %v15414_v5, %v15735_v37 }
 0xc72   :  { %v11018_v30 = vpop.eup %11017  ;;  %v9510_v33 = vsel %vm9329_vm4, %v14825_v31, %v9315_v12  ;;  %v9114_v3 = vmul.f32 %v15794_v15, %v9113_v43  ;;  %v9123_v50 = vmul.f32 %v15811_v25, %v9122_v42  ;;  %v9131_v51 = vadd.f32 1.0, %v9130_v39 }
 0xc73   :  { %9574 = vst.msk [vmem:[%s16053_s7 + $0x1a0] sm:$0xff] %vm1899_vm0, %v9510_v33  ;;  %v9316_v20 = vadd.f32 1e-05, %v9252_v59  ;;  %v9111_v45 = vmul.f32 0.6931472, %v11018_v30  ;;  %11025 = vpow2.f32 %v8611_v62  ;;  %v11020_v31 = vpop.eup %11019  ;;  %v8490_v11 = vsub.f32 0.0, %v8426_v19 }
 0xc74   :  { %v8427_v53 = vand.u32 2147483647, %v15887_v14  ;;  %v9120_v13 = vmul.f32 0.6931472, %v11020_v31  ;;  %v8428_v24 = vand.u32 2147483647, %v15891_v23  ;;  %v15915_v7 = vadd.f32 %v15414_v5, %v15777_v21 }
 0xc75   :  { %v9511_v37 = vsel %vm9329_vm4, %v15440_v54, %v9316_v20  ;;  %v9117_v58 = vsel %vm15876_vm2, %v9114_v3, %v9111_v45  ;;  %vm9125_vm3 = vcmp.lt.f32.partialorder %v9124_v41, 0.0004427343  ;;  %v8613_v25 = vmul.f32 1.442695, %v8490_v11  ;;  %v9387_v3 = vld [vmem:[%s16048_s2 + $0x1c8] sm:$0xff] }
 0xc76   :  { %v11022_v49 = vpop.eup %11021  ;;  %9575 = vst.msk [vmem:[%s16053_s7 + $0x1a8] sm:$0xff] %vm1899_vm0, %v9511_v37  ;;  %v9253_v15 = vadd.f32 %v9117_v58, %v8357_v46  ;;  %v8491_v29 = vsub.f32 0.0, %v8427_v53  ;;  %v9126_v17 = vsel %vm9125_vm3, %v9123_v50, %v9120_v13  ;;  %v9133_v54 = vand.u32 2147483647, %v15840_v1  ;;  %v16399_v13 = vld [vmem:[#allocation66_spill] sm:$0xff] }
 0xc77   :  { %v9136_v9 = vadd.f32 1.0, %v11022_v49  ;;  %v9254_v38 = vadd.f32 %v9126_v17, %v8358_v18  ;;  %11027 = vpow2.f32 %v8613_v25  ;;  %v8359_v63 = vmax.f32 %v15740_v56, 0.0 }
 0xc78   :  { %v9317_v8 = vadd.f32 1e-05, %v9253_v15  ;;  %v8615_v44 = vmul.f32 1.442695, %v8491_v29  ;;  %v11024_v47 = vpop.eup %11023  ;;  %v9132_v46 = vmul.f32 %v15840_v1, %v9131_v51  ;;  %v8492_v22 = vsub.f32 0.0, %v8428_v24 }
 0xc79   :  { %11029 = vlog2.f32 %v9136_v9  ;;  %v9318_v34 = vadd.f32 1e-05, %v9254_v38  ;;  %v9129_v21 = vmul.f32 0.6931472, %v11024_v47  ;;  %vm9134_vm5 = vcmp.lt.f32.partialorder %v9133_v54, 0.0004427343 }
 0xc7a   :  { %v9512_v16 = vsel %vm9329_vm4, %v14683_v4, %v9317_v8  ;;  %11031 = vpow2.f32 %v8615_v44  ;;  %v8617_v52 = vmul.f32 1.442695, %v8492_v22  ;;  %v8429_v56 = vand.u32 2147483647, %v15915_v7  ;;  %v9386_v4 = vld [vmem:[%s16048_s2 + $0x1c0] sm:$0xff]  ;;  %v9388_v8 = vld [vmem:[%s16048_s2 + $0x1d0] sm:$0xff] }
 0xc7b   :  { %9576 = vst.msk [vmem:[%s16053_s7 + $0x1b0] sm:$0xff] %vm1899_vm0, %v9512_v16  ;;  %v15931_v18 = vadd.f32 %v15414_v5, %v15792_v2  ;;  %v9513_v1 = vsel %vm9329_vm4, %v15382_v36, %v9318_v34  ;;  %v9135_v27 = vsel %vm9134_vm5, %v9132_v46, %v9129_v21  ;;  %v9139_v35 = vmul.f32 -0.5, %v11022_v49  ;;  %v16400_v21 = vld [vmem:[#allocation63_spill] sm:$0xff] }
 0xc7c   :  { %9577 = vst.msk [vmem:[%s16053_s7 + $0x1b8] sm:$0xff] %vm1899_vm0, %v9513_v1  ;;  %v9255_v10 = vadd.f32 %v9135_v27, %v8359_v63  ;;  %11033 = vpow2.f32 %v8617_v52  ;;  %v8493_v5 = vsub.f32 0.0, %v8429_v56  ;;  %v9450_v43 = vmul.f32 %v9386_v4, %v16398_v55 }
 0xc7d   :  { %v11026_v61 = vpop.eup %11025  ;;  %v8430_v57 = vand.u32 2147483647, %v15931_v18  ;;  %v9140_v32 = vadd.f32 1.0, %v9139_v35  ;;  %v9142_v60 = vand.u32 2147483647, %v11022_v49  ;;  %v8360_v20 = vmax.f32 %v15775_v6, 0.0 }
 0xc7e   :  { %v9145_v2 = vadd.f32 1.0, %v11026_v61  ;;  %v9319_v42 = vadd.f32 1e-05, %v9255_v10  ;;  %v8619_v48 = vmul.f32 1.442695, %v8493_v5  ;;  %v9148_v41 = vmul.f32 -0.5, %v11026_v61 }
 0xc7f   :  { %v8494_v36 = vsub.f32 0.0, %v8430_v57  ;;  %v9141_v19 = vmul.f32 %v11022_v49, %v9140_v32  ;;  %vm9143_vm6 = vcmp.lt.f32.partialorder %v9142_v60, 0.0004427343  ;;  %v9151_v53 = vand.u32 2147483647, %v11026_v61  ;;  %v16401_v60 = vld [vmem:[#allocation64_spill] sm:$0xff] }
 0xc80   :  { %11035 = vlog2.f32 %v9145_v2  ;;  %v9514_v12 = vsel %vm9329_vm4, %v9450_v43, %v9319_v42  ;;  %v9149_v11 = vadd.f32 1.0, %v9148_v41  ;;  %v9451_v24 = vmul.f32 %v9387_v3, %v16399_v13  ;;  %v9389_v2 = vld [vmem:[%s16048_s2 + $0x1d8] sm:$0xff] }
 0xc81   :  { %11037 = vpow2.f32 %v8619_v48  ;;  %v11028_v39 = vpop.eup %11027  ;;  %9578 = vst.msk [vmem:[%s16053_s7 + $0x1c0] sm:$0xff] %vm1899_vm0, %v9514_v12  ;;  %v8621_v59 = vmul.f32 1.442695, %v8494_v36  ;;  %v8361_v17 = vmax.f32 %v15823_v0, 0.0  ;;  %vm9152_vm7 = vcmp.lt.f32.partialorder %v9151_v53, 0.0004427343 }
 0xc82   :  { %v9154_v62 = vadd.f32 1.0, %v11028_v39  ;;  %v9157_v37 = vmul.f32 -0.5, %v11028_v39  ;;  %v9150_v9 = vmul.f32 %v11026_v61, %v9149_v11  ;;  %v9160_v46 = vand.u32 2147483647, %v11028_v39  ;;  %v16402_v3 = vld [vmem:[#allocation69_spill] sm:$0xff] }
 0xc83   :  { %v11030_v40 = vpop.eup %11029  ;;  %11039 = vpow2.f32 %v8621_v59  ;;  %v9452_v52 = vmul.f32 %v9388_v8, %v16400_v21  ;;  %v8362_v56 = vmax.f32 %v15862_v28, 0.0  ;;  %v8363_v36 = vmax.f32 %v15887_v14, 0.0  ;;  %v9390_v59 = vld [vmem:[%s16048_s2 + $0x1e0] sm:$0xff]  ;;  %v9392_v8 = vld [vmem:[%s16048_s2 + $0x1f0] sm:$0xff] }
 0xc84   :  { %v11032_v30 = vpop.eup %11031  ;;  %v9138_v33 = vmul.f32 0.6931472, %v11030_v40  ;;  %11041 = vlog2.f32 %v9154_v62  ;;  %v9158_v38 = vadd.f32 1.0, %v9157_v37  ;;  %vm9161_vm8 = vcmp.lt.f32.partialorder %v9160_v46, 0.0004427343  ;;  %v16404_v46 = vld [vmem:[#allocation67_spill] sm:$0xff] }
 0xc85   :  { %v9163_v45 = vadd.f32 1.0, %v11032_v30  ;;  %v9166_v15 = vmul.f32 -0.5, %v11032_v30  ;;  %v9169_v4 = vand.u32 2147483647, %v11032_v30 }
 0xc86   :  { %v9144_v31 = vsel %vm9143_vm6, %v9141_v19, %v9138_v33  ;;  %v15955_v50 = vpop.eup %11033  ;;  %v9159_v61 = vmul.f32 %v11028_v39, %v9158_v38  ;;  %v9453_v39 = vmul.f32 %v9389_v2, %v16401_v60 }
 0xc87   :  { %v9256_v51 = vadd.f32 %v9144_v31, %v8360_v20  ;;  %11043 = vlog2.f32 %v9163_v45  ;;  %v9172_v58 = vadd.f32 1.0, %v15955_v50  ;;  %v9175_v44 = vmul.f32 -0.5, %v15955_v50 }
 0xc88   :  { %v9167_v16 = vadd.f32 1.0, %v9166_v15  ;;  %v9178_v57 = vand.u32 2147483647, %v15955_v50  ;;  %vm9170_vm9 = vcmp.lt.f32.partialorder %v9169_v4, 0.0004427343  ;;  %v8364_v45 = vmax.f32 %v15891_v23, 0.0 }
 0xc89   :  { %v9320_v6 = vadd.f32 1e-05, %v9256_v51  ;;  %11045 = vlog2.f32 %v9172_v58  ;;  %v9176_v10 = vadd.f32 1.0, %v9175_v44  ;;  %v9454_v31 = vmul.f32 %v9390_v59, %v16402_v3  ;;  %v9391_v51 = vld [vmem:[%s16048_s2 + $0x1e8] sm:$0xff]  ;;  %v16403_v15 = vld [vmem:[#allocation70_spill] sm:$0xff] }
 0xc8a   :  { %v11036_v49 = vpop.eup %11035  ;;  %v9168_v48 = vmul.f32 %v11032_v30, %v9167_v16  ;;  %vm9179_vm10 = vcmp.lt.f32.partialorder %v9178_v57, 0.0004427343  ;;  %v9393_v16 = vld [vmem:[%s16048_s2 + $0x1f8] sm:$0xff] }
 0xc8b   :  { %v15959_v25 = vpop.eup %11037  ;;  %v9515_v29 = vsel %vm9329_vm4, %v9451_v24, %v9320_v6  ;;  %v9147_v54 = vmul.f32 0.6931472, %v11036_v49  ;;  %v9177_v41 = vmul.f32 %v15955_v50, %v9176_v10 }
 0xc8c   :  { %9579 = vst.msk [vmem:[%s16053_s7 + $0x1c8] sm:$0xff] %vm1899_vm0, %v9515_v29  ;;  %v9181_v47 = vadd.f32 1.0, %v15959_v25  ;;  %v9184_v55 = vmul.f32 -0.5, %v15959_v25  ;;  %v9187_v14 = vand.u32 2147483647, %v15959_v25  ;;  %v9455_v29 = vmul.f32 %v9391_v51, %v16403_v15 }
 0xc8d   :  { %v9153_v63 = vsel %vm9152_vm7, %v9150_v9, %v9147_v54  ;;  %v15973_v0 = vpop.eup %11039  ;;  %v8365_v54 = vmax.f32 %v15915_v7, 0.0  ;;  %v8366_v7 = vmax.f32 %v15931_v18, 0.0 }
 0xc8e   :  { %v9257_v22 = vadd.f32 %v9153_v63, %v8361_v17  ;;  %11047 = vlog2.f32 %v9181_v47  ;;  %v11042_v34 = vpop.eup %11041  ;;  %v9190_v1 = vadd.f32 1.0, %v15973_v0  ;;  %v9193_v62 = vmul.f32 -0.5, %v15973_v0 }
 0xc8f   :  { %v9156_v35 = vmul.f32 0.6931472, %v11042_v34  ;;  %v9185_v20 = vadd.f32 1.0, %v9184_v55  ;;  %v9196_v49 = vand.u32 2147483647, %v15973_v0 }
 0xc90   :  { %v9321_v27 = vadd.f32 1e-05, %v9257_v22  ;;  %11049 = vlog2.f32 %v9190_v1  ;;  %v9194_v58 = vadd.f32 1.0, %v9193_v62  ;;  %vm9188_vm11 = vcmp.lt.f32.partialorder %v9187_v14, 0.0004427343 }
 0xc91   :  { %v11044_v5 = vpop.eup %11043  ;;  %v9162_v43 = vsel %vm9161_vm8, %v9159_v61, %v9156_v35  ;;  %v9186_v6 = vmul.f32 %v15959_v25, %v9185_v20  ;;  %vm9197_vm12 = vcmp.lt.f32.partialorder %v9196_v49, 0.0004427343  ;;  %v9456_v22 = vmul.f32 %v9392_v8, %v16404_v46 }
 0xc92   :  { %v9516_v28 = vsel %vm9329_vm4, %v9452_v52, %v9321_v27  ;;  %v9165_v42 = vmul.f32 0.6931472, %v11044_v5  ;;  %v9258_v32 = vadd.f32 %v9162_v43, %v8362_v56  ;;  %v9195_v63 = vmul.f32 %v15973_v0, %v9194_v58  ;;  %v16405_v56 = vld [vmem:[#allocation68_spill] sm:$0xff] }
 0xc93   :  { %9580 = vst.msk [vmem:[%s16053_s7 + $0x1d0] sm:$0xff] %vm1899_vm0, %v9516_v28  ;;  %v11046_v12 = vpop.eup %11045  ;;  %v9457_v4 = vmul.f32 %v9393_v16, %v16405_v56 }
 0xc94   :  { %v9171_v40 = vsel %vm9170_vm9, %v9168_v48, %v9165_v42  ;;  %v9322_v30 = vadd.f32 1e-05, %v9258_v32  ;;  %v9174_v19 = vmul.f32 0.6931472, %v11046_v12 }
 0xc95   :  { %v9259_v33 = vadd.f32 %v9171_v40, %v8363_v36 }
 0xc96   :  { %v9517_v50 = vsel %vm9329_vm4, %v9453_v39, %v9322_v30  ;;  %v9180_v53 = vsel %vm9179_vm10, %v9177_v41, %v9174_v19 }
 0xc97   :  { %v9323_v11 = vadd.f32 1e-05, %v9259_v33  ;;  %9581 = vst.msk [vmem:[%s16053_s7 + $0x1d8] sm:$0xff] %vm1899_vm0, %v9517_v50  ;;  %v9260_v23 = vadd.f32 %v9180_v53, %v8364_v45 }
 0xc98   :  { %v11048_v37 = vpop.eup %11047 }
 0xc99   :  { %v9518_v13 = vsel %vm9329_vm4, %v9454_v31, %v9323_v11  ;;  %v9183_v24 = vmul.f32 0.6931472, %v11048_v37  ;;  %v9324_v17 = vadd.f32 1e-05, %v9260_v23 }
 0xc9a   :  { %9582 = vst.msk [vmem:[%s16053_s7 + $0x1e0] sm:$0xff] %vm1899_vm0, %v9518_v13  ;;  %v11050_v9 = vpop.eup %11049 }
 0xc9b   :  { %v9189_v38 = vsel %vm9188_vm11, %v9186_v6, %v9183_v24  ;;  %v9519_v25 = vsel %vm9329_vm4, %v9455_v29, %v9324_v17  ;;  %v9192_v47 = vmul.f32 0.6931472, %v11050_v9 }
 0xc9c   :  { %v9261_v44 = vadd.f32 %v9189_v38, %v8365_v54  ;;  %9583 = vst.msk [vmem:[%s16053_s7 + $0x1e8] sm:$0xff] %vm1899_vm0, %v9519_v25 }
 0xc9d   :  { %v9198_v21 = vsel %vm9197_vm12, %v9195_v63, %v9192_v47 }
 0xc9e   :  { %v9325_v34 = vadd.f32 1e-05, %v9261_v44  ;;  %v9262_v52 = vadd.f32 %v9198_v21, %v8366_v7 }
 0xca0   :  { %v9520_v0 = vsel %vm9329_vm4, %v9456_v22, %v9325_v34  ;;  %v9326_v18 = vadd.f32 1e-05, %v9262_v52 }
 0xca1   :  { %9584 = vst.msk [vmem:[%s16053_s7 + $0x1f0] sm:$0xff] %vm1899_vm0, %v9520_v0 }
 0xca2   :  { %v9521_v1 = vsel %vm9329_vm4, %v9457_v4, %v9326_v18 }
 0xca3   :  { %9585 = vst.msk [vmem:[%s16053_s7 + $0x1f8] sm:$0xff] %vm1899_vm0, %v9521_v1 }
 0xca4   :  { %9590 = vsyncpa [#allocation4], 1 }
 0xca5   :  { %9591 = vsyncpa [#allocation6], 1 }

</bundles_post_ra>
